<compile_context>
chip_gen: v7x
topology: tpu7x:2x2x1
jax: 0.10.0
libtpu: 0.0.40
codegen_flags: <defaults>
</compile_context>

<pallas_src>
import functools

import jax
import jax.numpy as jnp
from jax.experimental import pallas as pl
from jax.experimental.pallas import tpu as pltpu


# ----------------------------- in-kernel helpers ----------------------------

_SQRT1_2 = 0.7071067811865476


def _erf(z):
    # Abramowitz & Stegun 7.1.26 rational approximation (|err| <= 1.5e-7); uses only
    # exp/mul/div/select so it lowers cleanly in Mosaic. Effectively exact erf for f32.
    a1, a2, a3, a4, a5 = 0.254829592, -0.284496736, 1.421413741, -1.453152027, 1.061405429
    pc = 0.3275911
    sgn = jnp.where(z >= 0.0, 1.0, -1.0)
    za = jnp.abs(z)
    t = 1.0 / (1.0 + pc * za)
    poly = ((((a5 * t + a4) * t + a3) * t + a2) * t + a1) * t
    return sgn * (1.0 - poly * jnp.exp(-za * za))


def _gelu_exact(x):
    # nn.GELU(approximate='none'): 0.5 * x * (1 + erf(x / sqrt(2)))
    return 0.5 * x * (1.0 + _erf(x * _SQRT1_2))


def _layernorm(x, w, b, eps=1e-6):
    mu = jnp.mean(x, axis=-1, keepdims=True)
    xc = x - mu
    var = jnp.mean(xc * xc, axis=-1, keepdims=True)
    return xc * jax.lax.rsqrt(var + eps) * w + b


# --------------------------- fused tiled matmul ------------------------------

def fused_matmul(x, w, bias=None, *, residual=None, prologue_ln=None,
                 epilogue_ln=None, gelu=False, out_dtype=jnp.float32,
                 tm=None, tn=None, tk=None):
    """(M,K)@(K,N) on the MXU, bf16 operands / f32 accumulation.

    Optional fusions: LayerNorm prologue on the A tile (needs full-K tile), and
    bias -> GELU -> residual-add -> LayerNorm epilogue on the output tile.
    grid = (M/tm, N/tn, K/tk) with an f32 VMEM accumulator; bias/epilogue only on
    the last k step; dimension_semantics = (parallel, parallel, arbitrary).
    """
    M, K = x.shape
    K2, N = w.shape
    assert K == K2

    if prologue_ln is not None:
        tk = K                                   # LN stats need the full contraction dim
    if tk is None:
        tk = 512 if (K % 512 == 0 and K > 512) else K
    if epilogue_ln is not None:
        tn = N                                   # output LN needs the full output row
    if tn is None:
        tn = 256 if N % 256 == 0 else (128 if N % 128 == 0 else N)
    if tm is None:
        tm = 64 if M % 64 == 0 else M            # >=2 M-steps at demo size (megacore)
    assert M % tm == 0 and N % tn == 0 and K % tk == 0
    nk = K // tk

    have_bias = bias is not None
    have_res = residual is not None
    have_pln = prologue_ln is not None
    have_eln = epilogue_ln is not None

    def kernel(*refs):
        refs = list(refs)
        x_ref, w_ref = refs[0], refs[1]
        idx = 2
        b_ref = r_ref = plw_ref = plb_ref = elw_ref = elb_ref = None
        if have_bias:
            b_ref = refs[idx]; idx += 1
        if have_res:
            r_ref = refs[idx]; idx += 1
        if have_pln:
            plw_ref, plb_ref = refs[idx], refs[idx + 1]; idx += 2
        if have_eln:
            elw_ref, elb_ref = refs[idx], refs[idx + 1]; idx += 2
        o_ref, acc_ref = refs[idx], refs[idx + 1]

        kstep = pl.program_id(2)

        @pl.when(kstep == 0)
        def _init():
            acc_ref[...] = jnp.zeros_like(acc_ref)

        a = x_ref[...].astype(jnp.float32)
        if have_pln:                              # fused LayerNorm prologue (f32 stats)
            a = _layernorm(a, plw_ref[...], plb_ref[...])
        acc_ref[...] += jnp.dot(a.astype(jnp.bfloat16),
                                w_ref[...].astype(jnp.bfloat16),
                                preferred_element_type=jnp.float32)

        @pl.when(kstep == nk - 1)
        def _finalize():
            out = acc_ref[...]
            if have_bias:
                out = out + b_ref[...]
            if gelu:
                out = _gelu_exact(out)
            if have_res:
                out = out + r_ref[...].astype(jnp.float32)
            if have_eln:                          # fused LayerNorm2d epilogue (neck)
                out = _layernorm(out, elw_ref[...], elb_ref[...])
            o_ref[...] = out.astype(o_ref.dtype)

    operands = [x, w]
    in_specs = [pl.BlockSpec((tm, tk), lambda i, j, k: (i, k)),
                pl.BlockSpec((tk, tn), lambda i, j, k: (k, j))]
    if have_bias:
        operands.append(jnp.asarray(bias, jnp.float32).reshape(1, N))
        in_specs.append(pl.BlockSpec((1, tn), lambda i, j, k: (0, j)))
    if have_res:
        operands.append(residual)
        in_specs.append(pl.BlockSpec((tm, tn), lambda i, j, k: (i, j)))
    if have_pln:
        lw, lb = prologue_ln
        operands += [jnp.asarray(lw, jnp.float32).reshape(1, K),
                     jnp.asarray(lb, jnp.float32).reshape(1, K)]
        in_specs += [pl.BlockSpec((1, K), lambda i, j, k: (0, 0)),
                     pl.BlockSpec((1, K), lambda i, j, k: (0, 0))]
    if have_eln:
        lw, lb = epilogue_ln
        operands += [jnp.asarray(lw, jnp.float32).reshape(1, N),
                     jnp.asarray(lb, jnp.float32).reshape(1, N)]
        in_specs += [pl.BlockSpec((1, tn), lambda i, j, k: (0, 0)),
                     pl.BlockSpec((1, tn), lambda i, j, k: (0, 0))]

    return pl.pallas_call(
        kernel,
        grid=(M // tm, N // tn, nk),
        in_specs=in_specs,
        out_specs=pl.BlockSpec((tm, tn), lambda i, j, k: (i, j)),
        out_shape=jax.ShapeDtypeStruct((M, N), out_dtype),
        scratch_shapes=[pltpu.VMEM((tm, tn), jnp.float32)],
        compiler_params=pltpu.CompilerParams(
            dimension_semantics=("parallel", "parallel", "arbitrary"),
            vmem_limit_bytes=32 * 1024 * 1024),
    )(*operands)


# --------------------------- flash attention ---------------------------------

def _flash_attn_kernel(q_ref, k_ref, v_ref, o_ref, m_sc, l_sc, acc_sc):
    ki = pl.program_id(3)

    @pl.when(ki == 0)
    def _init():
        m_sc[...] = jnp.full_like(m_sc, -jnp.inf)
        l_sc[...] = jnp.zeros_like(l_sc)
        acc_sc[...] = jnp.zeros_like(acc_sc)

    q = q_ref[0].astype(jnp.bfloat16)            # (bq, d); 1/sqrt(d) baked into W_q
    k = k_ref[0].astype(jnp.bfloat16)            # (bk, d)
    v = v_ref[0].astype(jnp.bfloat16)            # (bk, d)
    s = jax.lax.dot_general(q, k, (((1,), (1,)), ((), ())),
                            preferred_element_type=jnp.float32)   # (bq, bk)

    m_prev = m_sc[...]
    m_new = jnp.maximum(m_prev, jnp.max(s, axis=-1, keepdims=True))
    alpha = jnp.exp(m_prev - m_new)
    p = jnp.exp(s - m_new)
    l_sc[...] = alpha * l_sc[...] + jnp.sum(p, axis=-1, keepdims=True)
    acc_sc[...] = alpha * acc_sc[...] + jnp.dot(p.astype(jnp.bfloat16), v,
                                                preferred_element_type=jnp.float32)
    m_sc[...] = m_new

    @pl.when(ki == pl.num_programs(3) - 1)
    def _finalize():
        inv_l = pl.reciprocal(l_sc[...], approx=True)   # EUP, not a VALU divide
        o_ref[0] = (acc_sc[...] * inv_l).astype(o_ref.dtype)


def flash_attention(qkv, num_heads, *, block_q=None, block_k=None,
                    out_dtype=jnp.bfloat16):
    """qkv: (B, N, 3C). q/k/v for head h are sliced by BlockSpec index maps
    (q at h*d, k at C+h*d, v at 2C+h*d) -- no physical transposes. Output (B, N, C)."""
    B, N, threeC = qkv.shape
    C = threeC // 3
    d = C // num_heads
    block_q = block_q or (128 if N % 128 == 0 else N)
    block_k = block_k or (128 if N % 128 == 0 else N)
    assert N % block_q == 0 and N % block_k == 0 and C % num_heads == 0
    nq, nk = N // block_q, N // block_k

    q_spec = pl.BlockSpec((1, block_q, d), lambda b, h, qi, ki: (b, qi, h))
    k_spec = pl.BlockSpec((1, block_k, d), lambda b, h, qi, ki: (b, ki, num_heads + h))
    v_spec = pl.BlockSpec((1, block_k, d), lambda b, h, qi, ki: (b, ki, 2 * num_heads + h))
    o_spec = pl.BlockSpec((1, block_q, d), lambda b, h, qi, ki: (b, qi, h))

    return pl.pallas_call(
        _flash_attn_kernel,
        grid=(B, num_heads, nq, nk),
        in_specs=[q_spec, k_spec, v_spec],
        out_specs=o_spec,
        out_shape=jax.ShapeDtypeStruct((B, N, C), out_dtype),
        scratch_shapes=[pltpu.VMEM((block_q, 1), jnp.float32),
                        pltpu.VMEM((block_q, 1), jnp.float32),
                        pltpu.VMEM((block_q, d), jnp.float32)],
        compiler_params=pltpu.CompilerParams(
            dimension_semantics=("parallel", "parallel", "parallel", "arbitrary"),
            vmem_limit_bytes=32 * 1024 * 1024),
    )(qkv, qkv, qkv)


# --------------------- neck conv3x3 (+LayerNorm2d) kernel ---------------------

def _neck_conv3x3_ln_kernel(x_ref, w_ref, lnw_ref, lnb_ref, o_ref, *, Hp, Wp):
    cin = x_ref.shape[-1]
    cout = o_ref.shape[-1]
    x = x_ref[0]                                  # (Hp+2, Wp+2, cin) padded NHWC tile
    acc = jnp.zeros((Hp * Wp, cout), jnp.float32)
    for kh in range(3):                           # 9 shifted MXU dots -- no im2col tensor
        for kw in range(3):
            slab = x[kh:kh + Hp, kw:kw + Wp, :].reshape(Hp * Wp, cin).astype(jnp.bfloat16)
            acc = acc + jnp.dot(slab, w_ref[kh, kw, :, :],
                                preferred_element_type=jnp.float32)
    y = _layernorm(acc, lnw_ref[...], lnb_ref[...])     # fused LayerNorm2d (over channels)
    o_ref[0] = y.reshape(Hp, Wp, cout).astype(o_ref.dtype)


def neck_conv3x3_ln(x_pad_nhwc, w, ln_w, ln_b):
    B, Hp2, Wp2, cin = x_pad_nhwc.shape
    Hp, Wp = Hp2 - 2, Wp2 - 2
    cout = w.shape[-1]
    kernel = functools.partial(_neck_conv3x3_ln_kernel, Hp=Hp, Wp=Wp)
    return pl.pallas_call(
        kernel,
        grid=(B,),
        in_specs=[pl.BlockSpec((1, Hp2, Wp2, cin), lambda b: (b, 0, 0, 0)),
                  pl.BlockSpec((3, 3, cin, cout), lambda b: (0, 0, 0, 0)),
                  pl.BlockSpec((1, cout), lambda b: (0, 0)),
                  pl.BlockSpec((1, cout), lambda b: (0, 0))],
        out_specs=pl.BlockSpec((1, Hp, Wp, cout), lambda b: (b, 0, 0, 0)),
        out_shape=jax.ShapeDtypeStruct((B, Hp, Wp, cout), jnp.float32),
        compiler_params=pltpu.CompilerParams(
            dimension_semantics=("parallel",),
            vmem_limit_bytes=32 * 1024 * 1024),
    )(x_pad_nhwc, w, ln_w.reshape(1, cout), ln_b.reshape(1, cout))


# ------------------------------ Parameter init -------------------------------

def init_sam_params(key, *, img_size=64, patch_size=8, embed_dim=256, depth=2,
                    num_heads=2, mlp_ratio=4, out_chans=256):
    """Deterministic synthetic SAM image-encoder weights, pre-packed for the kernels
    (bf16 matmul weights, normalization folded into patch embed, scale baked into W_q)."""
    Hp = Wp = img_size // patch_size
    keys = jax.random.split(key, 16 + 4 * depth)
    ki = iter(keys)

    def w(shape, scale=0.02):
        return scale * jax.random.normal(next(ki), shape, jnp.float32)

    pixel_mean = jnp.array([123.675, 116.28, 103.53], jnp.float32)
    pixel_std = jnp.array([58.395, 57.12, 57.375], jnp.float32)

    # PatchEmbed Conv2d(3, C, kernel=stride=patch): fold (x-mean)/std into weights+bias
    # so model.preprocess needs no separate elementwise pass over the image.
    pw = w((embed_dim, 3, patch_size, patch_size))        # torch layout (Cout, Cin, kh, kw)
    pb = w((embed_dim,))
    pw_norm = pw / pixel_std[None, :, None, None]
    pb_eff = pb - jnp.sum(pw_norm * pixel_mean[None, :, None, None], axis=(1, 2, 3))
    patch_w2d = pw_norm.reshape(embed_dim, -1).T.astype(jnp.bfloat16)   # (3*p*p, C), (c,ph,pw)

    d = embed_dim // num_heads
    scale = d ** -0.5
    hidden = embed_dim * mlp_ratio
    blocks = []
    for _ in range(depth):
        qkv_w = w((embed_dim, 3 * embed_dim))
        qkv_b = jnp.zeros((3 * embed_dim,), jnp.float32)
        # Bake the 1/sqrt(d) attention scale into the q projection columns/bias.
        qkv_w = qkv_w.at[:, :embed_dim].multiply(scale)
        qkv_b = qkv_b.at[:embed_dim].multiply(scale)
        blocks.append(dict(
            ln1_w=jnp.ones((embed_dim,), jnp.float32),
            ln1_b=jnp.zeros((embed_dim,), jnp.float32),
            qkv_w=qkv_w.astype(jnp.bfloat16), qkv_b=qkv_b,
            proj_w=w((embed_dim, embed_dim)).astype(jnp.bfloat16),
            proj_b=jnp.zeros((embed_dim,), jnp.float32),
            ln2_w=jnp.ones((embed_dim,), jnp.float32),
            ln2_b=jnp.zeros((embed_dim,), jnp.float32),
            fc1_w=w((embed_dim, hidden)).astype(jnp.bfloat16),
            fc1_b=jnp.zeros((hidden,), jnp.float32),
            fc2_w=w((hidden, embed_dim)).astype(jnp.bfloat16),
            fc2_b=jnp.zeros((embed_dim,), jnp.float32),
        ))

    pos_embed = w((1, Hp, Wp, embed_dim))
    nc1 = w((out_chans, embed_dim, 1, 1))
    nc2 = w((out_chans, out_chans, 3, 3))
    return dict(
        patch_size=patch_size, embed_dim=embed_dim, num_heads=num_heads,
        out_chans=out_chans,
        patch_w2d=patch_w2d, patch_b=pb_eff, pos_embed=pos_embed, blocks=blocks,
        neck_conv1_w=nc1.reshape(out_chans, embed_dim).T.astype(jnp.bfloat16),   # (C, out_c)
        neck_ln1_w=jnp.ones((out_chans,), jnp.float32),
        neck_ln1_b=jnp.zeros((out_chans,), jnp.float32),
        neck_conv2_w=jnp.transpose(nc2, (2, 3, 1, 0)).astype(jnp.bfloat16),      # (3,3,Ci,Co)
        neck_ln2_w=jnp.ones((out_chans,), jnp.float32),
        neck_ln2_b=jnp.zeros((out_chans,), jnp.float32),
    )


# ------------------------------ Forward (glue) --------------------------------

def sam_predictor_forward(params, images_nchw):
    """images_nchw: (B, 3, S, S) float32 in [0, 255] (already stacked, like set_images)."""
    # TODO(synk): transform.apply_image bilinear resize + square pad omitted; inputs are
    # assumed to already be at model resolution ((x-mean)/std is folded into patch weights).
    B, Cin, S, _ = images_nchw.shape
    p = params["patch_size"]
    C = params["embed_dim"]
    nH = params["num_heads"]
    out_c = params["out_chans"]
    Hp = Wp = S // p
    N = Hp * Wp
    M = B * N

    # Patch extraction (conv k=stride=p as one matmul); patch vector order (c, ph, pw)
    # matches the folded conv weight layout.
    xp = (images_nchw.reshape(B, Cin, Hp, p, Wp, p)
          .transpose(0, 2, 4, 1, 3, 5)
          .reshape(M, Cin * p * p)).astype(jnp.bfloat16)
    pos = jnp.broadcast_to(params["pos_embed"], (B, Hp, Wp, C)).reshape(M, C)
    x2 = fused_matmul(xp, params["patch_w2d"], params["patch_b"], residual=pos)  # (M, C) f32

    bq = 128 if N % 128 == 0 else N
    bk = 32 if N % 32 == 0 else N
    for blk in params["blocks"]:
        # x = x + proj(attn(norm1(x)))   -- LN fused into qkv, residual into proj epilogue
        qkv = fused_matmul(x2, blk["qkv_w"], blk["qkv_b"],
                           prologue_ln=(blk["ln1_w"], blk["ln1_b"]),
                           out_dtype=jnp.bfloat16)                     # (M, 3C) bf16
        # TODO(synk): SAM's decomposed relative positional bias / windowed attention omitted.
        attn = flash_attention(qkv.reshape(B, N, 3 * C), nH,
                               block_q=bq, block_k=bk)                  # (B, N, C) bf16
        x2 = fused_matmul(attn.reshape(M, C), blk["proj_w"], blk["proj_b"],
                          residual=x2)                                  # (M, C) f32

        # x = x + fc2(gelu(fc1(norm2(x))))   -- LN+GELU fused into fc1, residual into fc2
        h = fused_matmul(x2, blk["fc1_w"], blk["fc1_b"],
                         prologue_ln=(blk["ln2_w"], blk["ln2_b"]),
                         gelu=True, out_dtype=jnp.bfloat16)             # (M, 4C) bf16
        x2 = fused_matmul(h, blk["fc2_w"], blk["fc2_b"], residual=x2)   # (M, C) f32

    # Neck: Conv1x1(no bias)+LayerNorm2d fused, then Conv3x3(no bias)+LayerNorm2d fused.
    y = fused_matmul(x2, params["neck_conv1_w"],
                     epilogue_ln=(params["neck_ln1_w"], params["neck_ln1_b"]))  # (M, out_c)
    y_pad = jnp.pad(y.reshape(B, Hp, Wp, out_c), ((0, 0), (1, 1), (1, 1), (0, 0)))
    out_nhwc = neck_conv3x3_ln(y_pad, params["neck_conv2_w"],
                               params["neck_ln2_w"], params["neck_ln2_b"])
    # Single layout change at the very end: NHWC -> NCHW (SAM image_encoder output).
    return out_nhwc.transpose(0, 3, 1, 2)


# ----------------------------------- main -------------------------------------

if __name__ == "__main__":
    key = jax.random.PRNGKey(0)
    pkey, dkey = jax.random.split(key)

    B, S = 2, 64
    params = init_sam_params(pkey, img_size=S, patch_size=8, embed_dim=256,
                             depth=2, num_heads=2, mlp_ratio=4, out_chans=256)

    # Synthetic "list of HWC images" in [0, 255], already at model resolution.
    raw = jax.random.uniform(dkey, (B, S, S, 3), jnp.float32, 0.0, 255.0)
    images = [raw[i] for i in range(B)]
    # Mimic SamPredictor.set_images: permute(2, 0, 1) + stack -> NCHW batch.
    x = jnp.stack([img.transpose(2, 0, 1) for img in images])

    fwd = jax.jit(functools.partial(sam_predictor_forward, params))
    out = jax.block_until_ready(fwd(x))

    Hp = S // params["patch_size"]
    assert out.shape == (B, params["out_chans"], Hp, Hp), out.shape
    assert out.dtype == jnp.float32
    print("KERNEL_OK")
</pallas_src>

<mosaic_0001>
module attributes {stable_mosaic.version = 11 : i64} {
  func.func @kernel(%arg0: i32, %arg1: i32, %arg2: i32, %arg3: memref<64x192xbf16, #tpu.memory_space<vmem>>, %arg4: memref<192x256xbf16, #tpu.memory_space<vmem>>, %arg5: memref<1x256xf32, #tpu.memory_space<vmem>>, %arg6: memref<64x256xf32, #tpu.memory_space<vmem>>, %arg7: memref<64x256xf32, #tpu.memory_space<vmem>>, %arg8: memref<64x256xf32, #tpu.memory_space<vmem>>) attributes {dimension_semantics = [#tpu.dimension_semantics<parallel>, #tpu.dimension_semantics<parallel>, #tpu.dimension_semantics<arbitrary>], iteration_bounds = array<i64: 2, 1, 1>, scalar_prefetch = 0 : i64, scratch_operands = 1 : i64, tpu.core_type = #tpu.core_type<tc>, window_params = [{transform_indices = @transform_0, window_bounds = array<i64: 64, 192>}, {transform_indices = @transform_1, window_bounds = array<i64: 192, 256>}, {transform_indices = @transform_2, window_bounds = array<i64: 1, 256>}, {transform_indices = @transform_3, window_bounds = array<i64: 64, 256>}, {transform_indices = @transform_4, window_bounds = array<i64: 64, 256>}]} {
    %c0_i32 = arith.constant 0 : i32
    %0 = arith.cmpi eq, %arg2, %c0_i32 : i32
    %1 = arith.extui %0 : i1 to i32
    %c0_i32_0 = arith.constant 0 : i32
    %2 = arith.cmpi ne, %1, %c0_i32_0 : i32
    scf.if %2 {
      %cst_10 = arith.constant 0.000000e+00 : f32
      %14 = vector.broadcast %cst_10 : f32 to vector<64x256xf32>
      %c0_11 = arith.constant 0 : index
      %c0_12 = arith.constant 0 : index
      %15 = vector.load %arg8[%c0_11, %c0_12] : memref<64x256xf32, #tpu.memory_space<vmem>>, vector<64x256xf32>
      tpu.vector_store %arg8[%c0_11, %c0_12], %14 {strides = array<i32>} : memref<64x256xf32, #tpu.memory_space<vmem>>, vector<64x256xf32>,
    } else {
    }
    %c0 = arith.constant 0 : index
    %c0_1 = arith.constant 0 : index
    %3 = vector.load %arg3[%c0, %c0_1] : memref<64x192xbf16, #tpu.memory_space<vmem>>, vector<64x192xbf16>
    %4 = arith.extf %3 : vector<64x192xbf16> to vector<64x192xf32>
    %c0_2 = arith.constant 0 : index
    %c0_3 = arith.constant 0 : index
    %5 = vector.load %arg8[%c0_2, %c0_3] : memref<64x256xf32, #tpu.memory_space<vmem>>, vector<64x256xf32>
    %6 = arith.truncf %4 : vector<64x192xf32> to vector<64x192xbf16>
    %c0_4 = arith.constant 0 : index
    %c0_5 = arith.constant 0 : index
    %7 = vector.load %arg4[%c0_4, %c0_5] : memref<192x256xbf16, #tpu.memory_space<vmem>>, vector<192x256xbf16>
    %cst = arith.constant dense<0.000000e+00> : vector<64x256xf32>
    %8 = tpu.matmul %6, %7, %cst {dimension_numbers = #tpu.dot_dimension_numbers<[1], [0], [0], [1], [0, 0, 1, 1], [], []>} : vector<64x192xbf16>, vector<192x256xbf16>, vector<64x256xf32> -> vector<64x256xf32>
    %9 = arith.addf %5, %8 : vector<64x256xf32>
    %c0_6 = arith.constant 0 : index
    %c0_7 = arith.constant 0 : index
    %10 = vector.load %arg8[%c0_6, %c0_7] : memref<64x256xf32, #tpu.memory_space<vmem>>, vector<64x256xf32>
    tpu.vector_store %arg8[%c0_6, %c0_7], %9 {strides = array<i32>} : memref<64x256xf32, #tpu.memory_space<vmem>>, vector<64x256xf32>,
    %c0_i32_8 = arith.constant 0 : i32
    %11 = arith.cmpi eq, %arg2, %c0_i32_8 : i32
    %12 = arith.extui %11 : i1 to i32
    %c0_i32_9 = arith.constant 0 : i32
    %13 = arith.cmpi ne, %12, %c0_i32_9 : i32
    scf.if %13 {
      %c0_10 = arith.constant 0 : index
      %c0_11 = arith.constant 0 : index
      %14 = vector.load %arg8[%c0_10, %c0_11] : memref<64x256xf32, #tpu.memory_space<vmem>>, vector<64x256xf32>
      %c0_12 = arith.constant 0 : index
      %c0_13 = arith.constant 0 : index
      %15 = vector.load %arg5[%c0_12, %c0_13] : memref<1x256xf32, #tpu.memory_space<vmem>>, vector<1x256xf32>
      %16 = vector.broadcast %15 : vector<1x256xf32> to vector<64x256xf32>
      %17 = arith.addf %14, %16 : vector<64x256xf32>
      %c0_14 = arith.constant 0 : index
      %c0_15 = arith.constant 0 : index
      %18 = vector.load %arg6[%c0_14, %c0_15] : memref<64x256xf32, #tpu.memory_space<vmem>>, vector<64x256xf32>
      %19 = arith.addf %17, %18 : vector<64x256xf32>
      %c0_16 = arith.constant 0 : index
      %c0_17 = arith.constant 0 : index
      %20 = vector.load %arg7[%c0_16, %c0_17] : memref<64x256xf32, #tpu.memory_space<vmem>>, vector<64x256xf32>
      tpu.vector_store %arg7[%c0_16, %c0_17], %19 {strides = array<i32>} : memref<64x256xf32, #tpu.memory_space<vmem>>, vector<64x256xf32>,
    } else {
    }
    return
  }
  func.func @transform_0(%arg0: i32, %arg1: i32, %arg2: i32) -> (i32, i32) {
    %c0_i32 = arith.constant 0 : i32
    return %arg0, %arg2 : i32, i32
  }
  func.func @transform_1(%arg0: i32, %arg1: i32, %arg2: i32) -> (i32, i32) {
    %c0_i32 = arith.constant 0 : i32
    return %arg2, %arg1 : i32, i32
  }
  func.func @transform_2(%arg0: i32, %arg1: i32, %arg2: i32) -> (i32, i32) {
    %c0_i32 = arith.constant 0 : i32
    %c0_i32_0 = arith.constant 0 : i32
    return %c0_i32, %arg1 : i32, i32
  }
  func.func @transform_3(%arg0: i32, %arg1: i32, %arg2: i32) -> (i32, i32) {
    %c0_i32 = arith.constant 0 : i32
    return %arg0, %arg1 : i32, i32
  }
  func.func @transform_4(%arg0: i32, %arg1: i32, %arg2: i32) -> (i32, i32) {
    %c0_i32 = arith.constant 0 : i32
    return %arg0, %arg1 : i32, i32
  }
}

module attributes {stable_mosaic.version = 11 : i64} {
  func.func @_flash_attn_kernel(%arg0: i32, %arg1: i32, %arg2: i32, %arg3: i32, %arg4: memref<1x64x128xbf16, #tpu.memory_space<vmem>>, %arg5: memref<1x32x128xbf16, #tpu.memory_space<vmem>>, %arg6: memref<1x32x128xbf16, #tpu.memory_space<vmem>>, %arg7: memref<1x64x128xbf16, #tpu.memory_space<vmem>>, %arg8: memref<64x1xf32, #tpu.memory_space<vmem>>, %arg9: memref<64x1xf32, #tpu.memory_space<vmem>>, %arg10: memref<64x128xf32, #tpu.memory_space<vmem>>) attributes {dimension_semantics = [#tpu.dimension_semantics<parallel>, #tpu.dimension_semantics<parallel>, #tpu.dimension_semantics<parallel>, #tpu.dimension_semantics<arbitrary>], iteration_bounds = array<i64: 2, 2, 1, 2>, scalar_prefetch = 0 : i64, scratch_operands = 3 : i64, tpu.core_type = #tpu.core_type<tc>, window_params = [{transform_indices = @transform_0, window_bounds = array<i64: 1, 64, 128>}, {transform_indices = @transform_1, window_bounds = array<i64: 1, 32, 128>}, {transform_indices = @transform_2, window_bounds = array<i64: 1, 32, 128>}, {transform_indices = @transform_3, window_bounds = array<i64: 1, 64, 128>}]} {
    %c0_i32 = arith.constant 0 : i32
    %0 = arith.cmpi eq, %arg3, %c0_i32 : i32
    %1 = arith.extui %0 : i1 to i32
    %c0_i32_0 = arith.constant 0 : i32
    %2 = arith.cmpi ne, %1, %c0_i32_0 : i32
    scf.if %2 {
      %cst_25 = arith.constant 0xFF800000 : f32
      %36 = vector.broadcast %cst_25 : f32 to vector<64x1xf32>
      %c0_26 = arith.constant 0 : index
      %c0_27 = arith.constant 0 : index
      %37 = vector.load %arg8[%c0_26, %c0_27] : memref<64x1xf32, #tpu.memory_space<vmem>>, vector<64x1xf32>
      tpu.vector_store %arg8[%c0_26, %c0_27], %36 {strides = array<i32>} : memref<64x1xf32, #tpu.memory_space<vmem>>, vector<64x1xf32>,
      %cst_28 = arith.constant 0.000000e+00 : f32
      %38 = vector.broadcast %cst_28 : f32 to vector<64x1xf32>
      %c0_29 = arith.constant 0 : index
      %c0_30 = arith.constant 0 : index
      %39 = vector.load %arg9[%c0_29, %c0_30] : memref<64x1xf32, #tpu.memory_space<vmem>>, vector<64x1xf32>
      tpu.vector_store %arg9[%c0_29, %c0_30], %38 {strides = array<i32>} : memref<64x1xf32, #tpu.memory_space<vmem>>, vector<64x1xf32>,
      %cst_31 = arith.constant 0.000000e+00 : f32
      %40 = vector.broadcast %cst_31 : f32 to vector<64x128xf32>
      %c0_32 = arith.constant 0 : index
      %c0_33 = arith.constant 0 : index
      %41 = vector.load %arg10[%c0_32, %c0_33] : memref<64x128xf32, #tpu.memory_space<vmem>>, vector<64x128xf32>
      tpu.vector_store %arg10[%c0_32, %c0_33], %40 {strides = array<i32>} : memref<64x128xf32, #tpu.memory_space<vmem>>, vector<64x128xf32>,
    } else {
    }
    %c0 = arith.constant 0 : index
    %c0_1 = arith.constant 0 : index
    %c0_2 = arith.constant 0 : index
    %3 = vector.load %arg4[%c0, %c0_1, %c0_2] : memref<1x64x128xbf16, #tpu.memory_space<vmem>>, vector<1x64x128xbf16>
    %4 = vector.shape_cast %3 : vector<1x64x128xbf16> to vector<64x128xbf16>
    %c0_3 = arith.constant 0 : index
    %c0_4 = arith.constant 0 : index
    %c0_5 = arith.constant 0 : index
    %5 = vector.load %arg5[%c0_3, %c0_4, %c0_5] : memref<1x32x128xbf16, #tpu.memory_space<vmem>>, vector<1x32x128xbf16>
    %6 = vector.shape_cast %5 : vector<1x32x128xbf16> to vector<32x128xbf16>
    %c0_6 = arith.constant 0 : index
    %c0_7 = arith.constant 0 : index
    %c0_8 = arith.constant 0 : index
    %7 = vector.load %arg6[%c0_6, %c0_7, %c0_8] : memref<1x32x128xbf16, #tpu.memory_space<vmem>>, vector<1x32x128xbf16>
    %8 = vector.shape_cast %7 : vector<1x32x128xbf16> to vector<32x128xbf16>
    %cst = arith.constant dense<0.000000e+00> : vector<64x32xf32>
    %9 = tpu.matmul %4, %6, %cst {dimension_numbers = #tpu.dot_dimension_numbers<[1], [1], [0], [0], [0, 0, 1, 0], [], []>} : vector<64x128xbf16>, vector<32x128xbf16>, vector<64x32xf32> -> vector<64x32xf32>
    %c0_9 = arith.constant 0 : index
    %c0_10 = arith.constant 0 : index
    %10 = vector.load %arg8[%c0_9, %c0_10] : memref<64x1xf32, #tpu.memory_space<vmem>>, vector<64x1xf32>
    %cst_11 = arith.constant dense<0xFF800000> : vector<64xf32>
    %11 = vector.multi_reduction <maximumf>, %9, %cst_11 [1] : vector<64x32xf32> to vector<64xf32>
    %12 = vector.shape_cast %11 : vector<64xf32> to vector<64x1xf32>
    %13 = arith.maximumf %10, %12 : vector<64x1xf32>
    %14 = arith.subf %10, %13 : vector<64x1xf32>
    %15 = math.exp %14 : vector<64x1xf32>
    %16 = vector.broadcast %13 : vector<64x1xf32> to vector<64x32xf32>
    %17 = arith.subf %9, %16 : vector<64x32xf32>
    %18 = math.exp %17 : vector<64x32xf32>
    %c0_12 = arith.constant 0 : index
    %c0_13 = arith.constant 0 : index
    %19 = vector.load %arg9[%c0_12, %c0_13] : memref<64x1xf32, #tpu.memory_space<vmem>>, vector<64x1xf32>
    %20 = arith.mulf %15, %19 : vector<64x1xf32>
    %cst_14 = arith.constant dense<0.000000e+00> : vector<64xf32>
    %21 = vector.multi_reduction <add>, %18, %cst_14 [1] : vector<64x32xf32> to vector<64xf32>
    %22 = vector.shape_cast %21 : vector<64xf32> to vector<64x1xf32>
    %23 = arith.addf %20, %22 : vector<64x1xf32>
    %c0_15 = arith.constant 0 : index
    %c0_16 = arith.constant 0 : index
    %24 = vector.load %arg9[%c0_15, %c0_16] : memref<64x1xf32, #tpu.memory_space<vmem>>, vector<64x1xf32>
    tpu.vector_store %arg9[%c0_15, %c0_16], %23 {strides = array<i32>} : memref<64x1xf32, #tpu.memory_space<vmem>>, vector<64x1xf32>,
    %c0_17 = arith.constant 0 : index
    %c0_18 = arith.constant 0 : index
    %25 = vector.load %arg10[%c0_17, %c0_18] : memref<64x128xf32, #tpu.memory_space<vmem>>, vector<64x128xf32>
    %26 = vector.broadcast %15 : vector<64x1xf32> to vector<64x128xf32>
    %27 = arith.mulf %26, %25 : vector<64x128xf32>
    %28 = arith.truncf %18 : vector<64x32xf32> to vector<64x32xbf16>
    %cst_19 = arith.constant dense<0.000000e+00> : vector<64x128xf32>
    %29 = tpu.matmul %28, %8, %cst_19 {dimension_numbers = #tpu.dot_dimension_numbers<[1], [0], [0], [1], [0, 0, 1, 1], [], []>} : vector<64x32xbf16>, vector<32x128xbf16>, vector<64x128xf32> -> vector<64x128xf32>
    %30 = arith.addf %27, %29 : vector<64x128xf32>
    %c0_20 = arith.constant 0 : index
    %c0_21 = arith.constant 0 : index
    %31 = vector.load %arg10[%c0_20, %c0_21] : memref<64x128xf32, #tpu.memory_space<vmem>>, vector<64x128xf32>
    tpu.vector_store %arg10[%c0_20, %c0_21], %30 {strides = array<i32>} : memref<64x128xf32, #tpu.memory_space<vmem>>, vector<64x128xf32>,
    %c0_22 = arith.constant 0 : index
    %c0_23 = arith.constant 0 : index
    %32 = vector.load %arg8[%c0_22, %c0_23] : memref<64x1xf32, #tpu.memory_space<vmem>>, vector<64x1xf32>
    tpu.vector_store %arg8[%c0_22, %c0_23], %13 {strides = array<i32>} : memref<64x1xf32, #tpu.memory_space<vmem>>, vector<64x1xf32>,
    %c1_i32 = arith.constant 1 : i32
    %33 = arith.cmpi eq, %arg3, %c1_i32 : i32
    %34 = arith.extui %33 : i1 to i32
    %c0_i32_24 = arith.constant 0 : i32
    %35 = arith.cmpi ne, %34, %c0_i32_24 : i32
    scf.if %35 {
      %c0_25 = arith.constant 0 : index
      %c0_26 = arith.constant 0 : index
      %36 = vector.load %arg9[%c0_25, %c0_26] : memref<64x1xf32, #tpu.memory_space<vmem>>, vector<64x1xf32>
      %37 = tpu.reciprocal %36 {approx = true} : vector<64x1xf32> -> vector<64x1xf32>
      %c0_27 = arith.constant 0 : index
      %c0_28 = arith.constant 0 : index
      %38 = vector.load %arg10[%c0_27, %c0_28] : memref<64x128xf32, #tpu.memory_space<vmem>>, vector<64x128xf32>
      %39 = vector.broadcast %37 : vector<64x1xf32> to vector<64x128xf32>
      %40 = arith.mulf %38, %39 : vector<64x128xf32>
      %41 = arith.truncf %40 : vector<64x128xf32> to vector<64x128xbf16>
      %c0_29 = arith.constant 0 : index
      %c0_30 = arith.constant 0 : index
      %c0_31 = arith.constant 0 : index
      %42 = vector.load %arg7[%c0_29, %c0_30, %c0_31] : memref<1x64x128xbf16, #tpu.memory_space<vmem>>, vector<1x64x128xbf16>
      %43 = vector.shape_cast %42 : vector<1x64x128xbf16> to vector<64x128xbf16>
      %44 = vector.shape_cast %41 : vector<64x128xbf16> to vector<1x64x128xbf16>
      tpu.vector_store %arg7[%c0_29, %c0_30, %c0_31], %44 {strides = array<i32>} : memref<1x64x128xbf16, #tpu.memory_space<vmem>>, vector<1x64x128xbf16>,
    } else {
    }
    return
  }
  func.func @transform_0(%arg0: i32, %arg1: i32, %arg2: i32, %arg3: i32) -> (i32, i32, i32) {
    %c0_i32 = arith.constant 0 : i32
    return %arg0, %arg2, %arg1 : i32, i32, i32
  }
  func.func @transform_1(%arg0: i32, %arg1: i32, %arg2: i32, %arg3: i32) -> (i32, i32, i32) {
    %c2_i32 = arith.constant 2 : i32
    %0 = arith.addi %c2_i32, %arg1 : i32
    %c0_i32 = arith.constant 0 : i32
    return %arg0, %arg3, %0 : i32, i32, i32
  }
  func.func @transform_2(%arg0: i32, %arg1: i32, %arg2: i32, %arg3: i32) -> (i32, i32, i32) {
    %c4_i32 = arith.constant 4 : i32
    %0 = arith.addi %c4_i32, %arg1 : i32
    %c0_i32 = arith.constant 0 : i32
    return %arg0, %arg3, %0 : i32, i32, i32
  }
  func.func @transform_3(%arg0: i32, %arg1: i32, %arg2: i32, %arg3: i32) -> (i32, i32, i32) {
    %c0_i32 = arith.constant 0 : i32
    return %arg0, %arg2, %arg1 : i32, i32, i32
  }
}

module attributes {stable_mosaic.version = 11 : i64} {
  func.func @kernel(%arg0: i32, %arg1: i32, %arg2: i32, %arg3: memref<64x256xf32, #tpu.memory_space<vmem>>, %arg4: memref<256x256xbf16, #tpu.memory_space<vmem>>, %arg5: memref<1x256xf32, #tpu.memory_space<vmem>>, %arg6: memref<1x256xf32, #tpu.memory_space<vmem>>, %arg7: memref<1x256xf32, #tpu.memory_space<vmem>>, %arg8: memref<64x256xbf16, #tpu.memory_space<vmem>>, %arg9: memref<64x256xf32, #tpu.memory_space<vmem>>) attributes {dimension_semantics = [#tpu.dimension_semantics<parallel>, #tpu.dimension_semantics<parallel>, #tpu.dimension_semantics<arbitrary>], iteration_bounds = array<i64: 2, 3, 1>, scalar_prefetch = 0 : i64, scratch_operands = 1 : i64, tpu.core_type = #tpu.core_type<tc>, window_params = [{transform_indices = @transform_0, window_bounds = array<i64: 64, 256>}, {transform_indices = @transform_1, window_bounds = array<i64: 256, 256>}, {transform_indices = @transform_2, window_bounds = array<i64: 1, 256>}, {pipeline_mode = #tpu.pipeline_mode<synchronous>, transform_indices = @transform_3, window_bounds = array<i64: 1, 256>}, {pipeline_mode = #tpu.pipeline_mode<synchronous>, transform_indices = @transform_4, window_bounds = array<i64: 1, 256>}, {transform_indices = @transform_5, window_bounds = array<i64: 64, 256>}]} {
    %c0_i32 = arith.constant 0 : i32
    %0 = arith.cmpi eq, %arg2, %c0_i32 : i32
    %1 = arith.extui %0 : i1 to i32
    %c0_i32_0 = arith.constant 0 : i32
    %2 = arith.cmpi ne, %1, %c0_i32_0 : i32
    scf.if %2 {
      %cst_19 = arith.constant 0.000000e+00 : f32
      %35 = vector.broadcast %cst_19 : f32 to vector<64x256xf32>
      %c0_20 = arith.constant 0 : index
      %c0_21 = arith.constant 0 : index
      %36 = vector.load %arg9[%c0_20, %c0_21] : memref<64x256xf32, #tpu.memory_space<vmem>>, vector<64x256xf32>
      tpu.vector_store %arg9[%c0_20, %c0_21], %35 {strides = array<i32>} : memref<64x256xf32, #tpu.memory_space<vmem>>, vector<64x256xf32>,
    } else {
    }
    %c0 = arith.constant 0 : index
    %c0_1 = arith.constant 0 : index
    %3 = vector.load %arg3[%c0, %c0_1] : memref<64x256xf32, #tpu.memory_space<vmem>>, vector<64x256xf32>
    %c0_2 = arith.constant 0 : index
    %c0_3 = arith.constant 0 : index
    %4 = vector.load %arg6[%c0_2, %c0_3] : memref<1x256xf32, #tpu.memory_space<vmem>>, vector<1x256xf32>
    %c0_4 = arith.constant 0 : index
    %c0_5 = arith.constant 0 : index
    %5 = vector.load %arg7[%c0_4, %c0_5] : memref<1x256xf32, #tpu.memory_space<vmem>>, vector<1x256xf32>
    %cst = arith.constant dense<0.000000e+00> : vector<64xf32>
    %6 = vector.multi_reduction <add>, %3, %cst [1] : vector<64x256xf32> to vector<64xf32>
    %7 = vector.shape_cast %6 : vector<64xf32> to vector<64x1xf32>
    %cst_6 = arith.constant 2.560000e+02 : f32
    %8 = vector.broadcast %cst_6 : f32 to vector<64x1xf32>
    %9 = arith.divf %7, %8 : vector<64x1xf32>
    %10 = vector.broadcast %9 : vector<64x1xf32> to vector<64x256xf32>
    %11 = arith.subf %3, %10 : vector<64x256xf32>
    %12 = arith.mulf %11, %11 : vector<64x256xf32>
    %cst_7 = arith.constant dense<0.000000e+00> : vector<64xf32>
    %13 = vector.multi_reduction <add>, %12, %cst_7 [1] : vector<64x256xf32> to vector<64xf32>
    %14 = vector.shape_cast %13 : vector<64xf32> to vector<64x1xf32>
    %cst_8 = arith.constant 2.560000e+02 : f32
    %15 = vector.broadcast %cst_8 : f32 to vector<64x1xf32>
    %16 = arith.divf %14, %15 : vector<64x1xf32>
    %cst_9 = arith.constant 9.99999997E-7 : f32
    %17 = vector.broadcast %cst_9 : f32 to vector<64x1xf32>
    %18 = arith.addf %16, %17 : vector<64x1xf32>
    %19 = math.rsqrt %18 : vector<64x1xf32>
    %20 = vector.broadcast %19 : vector<64x1xf32> to vector<64x256xf32>
    %21 = arith.mulf %11, %20 : vector<64x256xf32>
    %22 = vector.broadcast %4 : vector<1x256xf32> to vector<64x256xf32>
    %23 = arith.mulf %21, %22 : vector<64x256xf32>
    %24 = vector.broadcast %5 : vector<1x256xf32> to vector<64x256xf32>
    %25 = arith.addf %23, %24 : vector<64x256xf32>
    %c0_10 = arith.constant 0 : index
    %c0_11 = arith.constant 0 : index
    %26 = vector.load %arg9[%c0_10, %c0_11] : memref<64x256xf32, #tpu.memory_space<vmem>>, vector<64x256xf32>
    %27 = arith.truncf %25 : vector<64x256xf32> to vector<64x256xbf16>
    %c0_12 = arith.constant 0 : index
    %c0_13 = arith.constant 0 : index
    %28 = vector.load %arg4[%c0_12, %c0_13] : memref<256x256xbf16, #tpu.memory_space<vmem>>, vector<256x256xbf16>
    %cst_14 = arith.constant dense<0.000000e+00> : vector<64x256xf32>
    %29 = tpu.matmul %27, %28, %cst_14 {dimension_numbers = #tpu.dot_dimension_numbers<[1], [0], [0], [1], [0, 0, 1, 1], [], []>} : vector<64x256xbf16>, vector<256x256xbf16>, vector<64x256xf32> -> vector<64x256xf32>
    %30 = arith.addf %26, %29 : vector<64x256xf32>
    %c0_15 = arith.constant 0 : index
    %c0_16 = arith.constant 0 : index
    %31 = vector.load %arg9[%c0_15, %c0_16] : memref<64x256xf32, #tpu.memory_space<vmem>>, vector<64x256xf32>
    tpu.vector_store %arg9[%c0_15, %c0_16], %30 {strides = array<i32>} : memref<64x256xf32, #tpu.memory_space<vmem>>, vector<64x256xf32>,
    %c0_i32_17 = arith.constant 0 : i32
    %32 = arith.cmpi eq, %arg2, %c0_i32_17 : i32
    %33 = arith.extui %32 : i1 to i32
    %c0_i32_18 = arith.constant 0 : i32
    %34 = arith.cmpi ne, %33, %c0_i32_18 : i32
    scf.if %34 {
      %c0_19 = arith.constant 0 : index
      %c0_20 = arith.constant 0 : index
      %35 = vector.load %arg9[%c0_19, %c0_20] : memref<64x256xf32, #tpu.memory_space<vmem>>, vector<64x256xf32>
      %c0_21 = arith.constant 0 : index
      %c0_22 = arith.constant 0 : index
      %36 = vector.load %arg5[%c0_21, %c0_22] : memref<1x256xf32, #tpu.memory_space<vmem>>, vector<1x256xf32>
      %37 = vector.broadcast %36 : vector<1x256xf32> to vector<64x256xf32>
      %38 = arith.addf %35, %37 : vector<64x256xf32>
      %39 = arith.truncf %38 : vector<64x256xf32> to vector<64x256xbf16>
      %c0_23 = arith.constant 0 : index
      %c0_24 = arith.constant 0 : index
      %40 = vector.load %arg8[%c0_23, %c0_24] : memref<64x256xbf16, #tpu.memory_space<vmem>>, vector<64x256xbf16>
      tpu.vector_store %arg8[%c0_23, %c0_24], %39 {strides = array<i32>} : memref<64x256xbf16, #tpu.memory_space<vmem>>, vector<64x256xbf16>,
    } else {
    }
    return
  }
  func.func @transform_0(%arg0: i32, %arg1: i32, %arg2: i32) -> (i32, i32) {
    %c0_i32 = arith.constant 0 : i32
    return %arg0, %arg2 : i32, i32
  }
  func.func @transform_1(%arg0: i32, %arg1: i32, %arg2: i32) -> (i32, i32) {
    %c0_i32 = arith.constant 0 : i32
    return %arg2, %arg1 : i32, i32
  }
  func.func @transform_2(%arg0: i32, %arg1: i32, %arg2: i32) -> (i32, i32) {
    %c0_i32 = arith.constant 0 : i32
    %c0_i32_0 = arith.constant 0 : i32
    return %c0_i32, %arg1 : i32, i32
  }
  func.func @transform_3(%arg0: i32, %arg1: i32, %arg2: i32) -> (i32, i32) {
    %c0_i32 = arith.constant 0 : i32
    %c0_i32_0 = arith.constant 0 : i32
    %c0_i32_1 = arith.constant 0 : i32
    return %c0_i32, %c0_i32_0 : i32, i32
  }
  func.func @transform_4(%arg0: i32, %arg1: i32, %arg2: i32) -> (i32, i32) {
    %c0_i32 = arith.constant 0 : i32
    %c0_i32_0 = arith.constant 0 : i32
    %c0_i32_1 = arith.constant 0 : i32
    return %c0_i32, %c0_i32_0 : i32, i32
  }
  func.func @transform_5(%arg0: i32, %arg1: i32, %arg2: i32) -> (i32, i32) {
    %c0_i32 = arith.constant 0 : i32
    return %arg0, %arg1 : i32, i32
  }
}

module attributes {stable_mosaic.version = 11 : i64} {
  func.func @kernel(%arg0: i32, %arg1: i32, %arg2: i32, %arg3: memref<64x256xbf16, #tpu.memory_space<vmem>>, %arg4: memref<256x256xbf16, #tpu.memory_space<vmem>>, %arg5: memref<1x256xf32, #tpu.memory_space<vmem>>, %arg6: memref<64x256xf32, #tpu.memory_space<vmem>>, %arg7: memref<64x256xf32, #tpu.memory_space<vmem>>, %arg8: memref<64x256xf32, #tpu.memory_space<vmem>>) attributes {dimension_semantics = [#tpu.dimension_semantics<parallel>, #tpu.dimension_semantics<parallel>, #tpu.dimension_semantics<arbitrary>], iteration_bounds = array<i64: 2, 1, 1>, scalar_prefetch = 0 : i64, scratch_operands = 1 : i64, tpu.core_type = #tpu.core_type<tc>, window_params = [{transform_indices = @transform_0, window_bounds = array<i64: 64, 256>}, {transform_indices = @transform_1, window_bounds = array<i64: 256, 256>}, {transform_indices = @transform_2, window_bounds = array<i64: 1, 256>}, {transform_indices = @transform_3, window_bounds = array<i64: 64, 256>}, {transform_indices = @transform_4, window_bounds = array<i64: 64, 256>}]} {
    %c0_i32 = arith.constant 0 : i32
    %0 = arith.cmpi eq, %arg2, %c0_i32 : i32
    %1 = arith.extui %0 : i1 to i32
    %c0_i32_0 = arith.constant 0 : i32
    %2 = arith.cmpi ne, %1, %c0_i32_0 : i32
    scf.if %2 {
      %cst_10 = arith.constant 0.000000e+00 : f32
      %14 = vector.broadcast %cst_10 : f32 to vector<64x256xf32>
      %c0_11 = arith.constant 0 : index
      %c0_12 = arith.constant 0 : index
      %15 = vector.load %arg8[%c0_11, %c0_12] : memref<64x256xf32, #tpu.memory_space<vmem>>, vector<64x256xf32>
      tpu.vector_store %arg8[%c0_11, %c0_12], %14 {strides = array<i32>} : memref<64x256xf32, #tpu.memory_space<vmem>>, vector<64x256xf32>,
    } else {
    }
    %c0 = arith.constant 0 : index
    %c0_1 = arith.constant 0 : index
    %3 = vector.load %arg3[%c0, %c0_1] : memref<64x256xbf16, #tpu.memory_space<vmem>>, vector<64x256xbf16>
    %4 = arith.extf %3 : vector<64x256xbf16> to vector<64x256xf32>
    %c0_2 = arith.constant 0 : index
    %c0_3 = arith.constant 0 : index
    %5 = vector.load %arg8[%c0_2, %c0_3] : memref<64x256xf32, #tpu.memory_space<vmem>>, vector<64x256xf32>
    %6 = arith.truncf %4 : vector<64x256xf32> to vector<64x256xbf16>
    %c0_4 = arith.constant 0 : index
    %c0_5 = arith.constant 0 : index
    %7 = vector.load %arg4[%c0_4, %c0_5] : memref<256x256xbf16, #tpu.memory_space<vmem>>, vector<256x256xbf16>
    %cst = arith.constant dense<0.000000e+00> : vector<64x256xf32>
    %8 = tpu.matmul %6, %7, %cst {dimension_numbers = #tpu.dot_dimension_numbers<[1], [0], [0], [1], [0, 0, 1, 1], [], []>} : vector<64x256xbf16>, vector<256x256xbf16>, vector<64x256xf32> -> vector<64x256xf32>
    %9 = arith.addf %5, %8 : vector<64x256xf32>
    %c0_6 = arith.constant 0 : index
    %c0_7 = arith.constant 0 : index
    %10 = vector.load %arg8[%c0_6, %c0_7] : memref<64x256xf32, #tpu.memory_space<vmem>>, vector<64x256xf32>
    tpu.vector_store %arg8[%c0_6, %c0_7], %9 {strides = array<i32>} : memref<64x256xf32, #tpu.memory_space<vmem>>, vector<64x256xf32>,
    %c0_i32_8 = arith.constant 0 : i32
    %11 = arith.cmpi eq, %arg2, %c0_i32_8 : i32
    %12 = arith.extui %11 : i1 to i32
    %c0_i32_9 = arith.constant 0 : i32
    %13 = arith.cmpi ne, %12, %c0_i32_9 : i32
    scf.if %13 {
      %c0_10 = arith.constant 0 : index
      %c0_11 = arith.constant 0 : index
      %14 = vector.load %arg8[%c0_10, %c0_11] : memref<64x256xf32, #tpu.memory_space<vmem>>, vector<64x256xf32>
      %c0_12 = arith.constant 0 : index
      %c0_13 = arith.constant 0 : index
      %15 = vector.load %arg5[%c0_12, %c0_13] : memref<1x256xf32, #tpu.memory_space<vmem>>, vector<1x256xf32>
      %16 = vector.broadcast %15 : vector<1x256xf32> to vector<64x256xf32>
      %17 = arith.addf %14, %16 : vector<64x256xf32>
      %c0_14 = arith.constant 0 : index
      %c0_15 = arith.constant 0 : index
      %18 = vector.load %arg6[%c0_14, %c0_15] : memref<64x256xf32, #tpu.memory_space<vmem>>, vector<64x256xf32>
      %19 = arith.addf %17, %18 : vector<64x256xf32>
      %c0_16 = arith.constant 0 : index
      %c0_17 = arith.constant 0 : index
      %20 = vector.load %arg7[%c0_16, %c0_17] : memref<64x256xf32, #tpu.memory_space<vmem>>, vector<64x256xf32>
      tpu.vector_store %arg7[%c0_16, %c0_17], %19 {strides = array<i32>} : memref<64x256xf32, #tpu.memory_space<vmem>>, vector<64x256xf32>,
    } else {
    }
    return
  }
  func.func @transform_0(%arg0: i32, %arg1: i32, %arg2: i32) -> (i32, i32) {
    %c0_i32 = arith.constant 0 : i32
    return %arg0, %arg2 : i32, i32
  }
  func.func @transform_1(%arg0: i32, %arg1: i32, %arg2: i32) -> (i32, i32) {
    %c0_i32 = arith.constant 0 : i32
    return %arg2, %arg1 : i32, i32
  }
  func.func @transform_2(%arg0: i32, %arg1: i32, %arg2: i32) -> (i32, i32) {
    %c0_i32 = arith.constant 0 : i32
    %c0_i32_0 = arith.constant 0 : i32
    return %c0_i32, %arg1 : i32, i32
  }
  func.func @transform_3(%arg0: i32, %arg1: i32, %arg2: i32) -> (i32, i32) {
    %c0_i32 = arith.constant 0 : i32
    return %arg0, %arg1 : i32, i32
  }
  func.func @transform_4(%arg0: i32, %arg1: i32, %arg2: i32) -> (i32, i32) {
    %c0_i32 = arith.constant 0 : i32
    return %arg0, %arg1 : i32, i32
  }
}

module attributes {stable_mosaic.version = 11 : i64} {
  func.func @kernel(%arg0: i32, %arg1: i32, %arg2: i32, %arg3: memref<64x256xf32, #tpu.memory_space<vmem>>, %arg4: memref<256x256xbf16, #tpu.memory_space<vmem>>, %arg5: memref<1x256xf32, #tpu.memory_space<vmem>>, %arg6: memref<1x256xf32, #tpu.memory_space<vmem>>, %arg7: memref<1x256xf32, #tpu.memory_space<vmem>>, %arg8: memref<64x256xbf16, #tpu.memory_space<vmem>>, %arg9: memref<64x256xf32, #tpu.memory_space<vmem>>) attributes {dimension_semantics = [#tpu.dimension_semantics<parallel>, #tpu.dimension_semantics<parallel>, #tpu.dimension_semantics<arbitrary>], iteration_bounds = array<i64: 2, 4, 1>, scalar_prefetch = 0 : i64, scratch_operands = 1 : i64, tpu.core_type = #tpu.core_type<tc>, window_params = [{transform_indices = @transform_0, window_bounds = array<i64: 64, 256>}, {transform_indices = @transform_1, window_bounds = array<i64: 256, 256>}, {transform_indices = @transform_2, window_bounds = array<i64: 1, 256>}, {pipeline_mode = #tpu.pipeline_mode<synchronous>, transform_indices = @transform_3, window_bounds = array<i64: 1, 256>}, {pipeline_mode = #tpu.pipeline_mode<synchronous>, transform_indices = @transform_4, window_bounds = array<i64: 1, 256>}, {transform_indices = @transform_5, window_bounds = array<i64: 64, 256>}]} {
    %c0_i32 = arith.constant 0 : i32
    %0 = arith.cmpi eq, %arg2, %c0_i32 : i32
    %1 = arith.extui %0 : i1 to i32
    %c0_i32_0 = arith.constant 0 : i32
    %2 = arith.cmpi ne, %1, %c0_i32_0 : i32
    scf.if %2 {
      %cst_19 = arith.constant 0.000000e+00 : f32
      %35 = vector.broadcast %cst_19 : f32 to vector<64x256xf32>
      %c0_20 = arith.constant 0 : index
      %c0_21 = arith.constant 0 : index
      %36 = vector.load %arg9[%c0_20, %c0_21] : memref<64x256xf32, #tpu.memory_space<vmem>>, vector<64x256xf32>
      tpu.vector_store %arg9[%c0_20, %c0_21], %35 {strides = array<i32>} : memref<64x256xf32, #tpu.memory_space<vmem>>, vector<64x256xf32>,
    } else {
    }
    %c0 = arith.constant 0 : index
    %c0_1 = arith.constant 0 : index
    %3 = vector.load %arg3[%c0, %c0_1] : memref<64x256xf32, #tpu.memory_space<vmem>>, vector<64x256xf32>
    %c0_2 = arith.constant 0 : index
    %c0_3 = arith.constant 0 : index
    %4 = vector.load %arg6[%c0_2, %c0_3] : memref<1x256xf32, #tpu.memory_space<vmem>>, vector<1x256xf32>
    %c0_4 = arith.constant 0 : index
    %c0_5 = arith.constant 0 : index
    %5 = vector.load %arg7[%c0_4, %c0_5] : memref<1x256xf32, #tpu.memory_space<vmem>>, vector<1x256xf32>
    %cst = arith.constant dense<0.000000e+00> : vector<64xf32>
    %6 = vector.multi_reduction <add>, %3, %cst [1] : vector<64x256xf32> to vector<64xf32>
    %7 = vector.shape_cast %6 : vector<64xf32> to vector<64x1xf32>
    %cst_6 = arith.constant 2.560000e+02 : f32
    %8 = vector.broadcast %cst_6 : f32 to vector<64x1xf32>
    %9 = arith.divf %7, %8 : vector<64x1xf32>
    %10 = vector.broadcast %9 : vector<64x1xf32> to vector<64x256xf32>
    %11 = arith.subf %3, %10 : vector<64x256xf32>
    %12 = arith.mulf %11, %11 : vector<64x256xf32>
    %cst_7 = arith.constant dense<0.000000e+00> : vector<64xf32>
    %13 = vector.multi_reduction <add>, %12, %cst_7 [1] : vector<64x256xf32> to vector<64xf32>
    %14 = vector.shape_cast %13 : vector<64xf32> to vector<64x1xf32>
    %cst_8 = arith.constant 2.560000e+02 : f32
    %15 = vector.broadcast %cst_8 : f32 to vector<64x1xf32>
    %16 = arith.divf %14, %15 : vector<64x1xf32>
    %cst_9 = arith.constant 9.99999997E-7 : f32
    %17 = vector.broadcast %cst_9 : f32 to vector<64x1xf32>
    %18 = arith.addf %16, %17 : vector<64x1xf32>
    %19 = math.rsqrt %18 : vector<64x1xf32>
    %20 = vector.broadcast %19 : vector<64x1xf32> to vector<64x256xf32>
    %21 = arith.mulf %11, %20 : vector<64x256xf32>
    %22 = vector.broadcast %4 : vector<1x256xf32> to vector<64x256xf32>
    %23 = arith.mulf %21, %22 : vector<64x256xf32>
    %24 = vector.broadcast %5 : vector<1x256xf32> to vector<64x256xf32>
    %25 = arith.addf %23, %24 : vector<64x256xf32>
    %c0_10 = arith.constant 0 : index
    %c0_11 = arith.constant 0 : index
    %26 = vector.load %arg9[%c0_10, %c0_11] : memref<64x256xf32, #tpu.memory_space<vmem>>, vector<64x256xf32>
    %27 = arith.truncf %25 : vector<64x256xf32> to vector<64x256xbf16>
    %c0_12 = arith.constant 0 : index
    %c0_13 = arith.constant 0 : index
    %28 = vector.load %arg4[%c0_12, %c0_13] : memref<256x256xbf16, #tpu.memory_space<vmem>>, vector<256x256xbf16>
    %cst_14 = arith.constant dense<0.000000e+00> : vector<64x256xf32>
    %29 = tpu.matmul %27, %28, %cst_14 {dimension_numbers = #tpu.dot_dimension_numbers<[1], [0], [0], [1], [0, 0, 1, 1], [], []>} : vector<64x256xbf16>, vector<256x256xbf16>, vector<64x256xf32> -> vector<64x256xf32>
    %30 = arith.addf %26, %29 : vector<64x256xf32>
    %c0_15 = arith.constant 0 : index
    %c0_16 = arith.constant 0 : index
    %31 = vector.load %arg9[%c0_15, %c0_16] : memref<64x256xf32, #tpu.memory_space<vmem>>, vector<64x256xf32>
    tpu.vector_store %arg9[%c0_15, %c0_16], %30 {strides = array<i32>} : memref<64x256xf32, #tpu.memory_space<vmem>>, vector<64x256xf32>,
    %c0_i32_17 = arith.constant 0 : i32
    %32 = arith.cmpi eq, %arg2, %c0_i32_17 : i32
    %33 = arith.extui %32 : i1 to i32
    %c0_i32_18 = arith.constant 0 : i32
    %34 = arith.cmpi ne, %33, %c0_i32_18 : i32
    scf.if %34 {
      %c0_19 = arith.constant 0 : index
      %c0_20 = arith.constant 0 : index
      %35 = vector.load %arg9[%c0_19, %c0_20] : memref<64x256xf32, #tpu.memory_space<vmem>>, vector<64x256xf32>
      %c0_21 = arith.constant 0 : index
      %c0_22 = arith.constant 0 : index
      %36 = vector.load %arg5[%c0_21, %c0_22] : memref<1x256xf32, #tpu.memory_space<vmem>>, vector<1x256xf32>
      %37 = vector.broadcast %36 : vector<1x256xf32> to vector<64x256xf32>
      %38 = arith.addf %35, %37 : vector<64x256xf32>
      %cst_23 = arith.constant 5.000000e-01 : f32
      %39 = vector.broadcast %cst_23 : f32 to vector<64x256xf32>
      %40 = arith.mulf %39, %38 : vector<64x256xf32>
      %cst_24 = arith.constant 0.707106769 : f32
      %41 = vector.broadcast %cst_24 : f32 to vector<64x256xf32>
      %42 = arith.mulf %38, %41 : vector<64x256xf32>
      %cst_25 = arith.constant 0.000000e+00 : f32
      %43 = vector.broadcast %cst_25 : f32 to vector<64x256xf32>
      %44 = arith.cmpf oge, %42, %43 : vector<64x256xf32>
      %cst_26 = arith.constant 1.000000e+00 : f32
      %cst_27 = arith.constant -1.000000e+00 : f32
      %45 = vector.broadcast %cst_26 : f32 to vector<64x256xf32>
      %46 = vector.broadcast %cst_27 : f32 to vector<64x256xf32>
      %47 = arith.select %44, %45, %46 : vector<64x256xi1>, vector<64x256xf32>
      %48 = math.absf %42 : vector<64x256xf32>
      %cst_28 = arith.constant 0.327591091 : f32
      %49 = vector.broadcast %cst_28 : f32 to vector<64x256xf32>
      %50 = arith.mulf %49, %48 : vector<64x256xf32>
      %cst_29 = arith.constant 1.000000e+00 : f32
      %51 = vector.broadcast %cst_29 : f32 to vector<64x256xf32>
      %52 = arith.addf %51, %50 : vector<64x256xf32>
      %cst_30 = arith.constant 1.000000e+00 : f32
      %53 = vector.broadcast %cst_30 : f32 to vector<64x256xf32>
      %54 = arith.divf %53, %52 : vector<64x256xf32>
      %cst_31 = arith.constant 1.06140542 : f32
      %55 = vector.broadcast %cst_31 : f32 to vector<64x256xf32>
      %56 = arith.mulf %55, %54 : vector<64x256xf32>
      %cst_32 = arith.constant -1.45315206 : f32
      %57 = vector.broadcast %cst_32 : f32 to vector<64x256xf32>
      %58 = arith.addf %56, %57 : vector<64x256xf32>
      %59 = arith.mulf %58, %54 : vector<64x256xf32>
      %cst_33 = arith.constant 1.42141378 : f32
      %60 = vector.broadcast %cst_33 : f32 to vector<64x256xf32>
      %61 = arith.addf %59, %60 : vector<64x256xf32>
      %62 = arith.mulf %61, %54 : vector<64x256xf32>
      %cst_34 = arith.constant -0.284496725 : f32
      %63 = vector.broadcast %cst_34 : f32 to vector<64x256xf32>
      %64 = arith.addf %62, %63 : vector<64x256xf32>
      %65 = arith.mulf %64, %54 : vector<64x256xf32>
      %cst_35 = arith.constant 0.254829586 : f32
      %66 = vector.broadcast %cst_35 : f32 to vector<64x256xf32>
      %67 = arith.addf %65, %66 : vector<64x256xf32>
      %68 = arith.mulf %67, %54 : vector<64x256xf32>
      %cst_36 = arith.constant 0.000000e+00 : f32
      %69 = vector.broadcast %cst_36 : f32 to vector<64x256xf32>
      %70 = arith.subf %69, %48 : vector<64x256xf32>
      %71 = arith.mulf %70, %48 : vector<64x256xf32>
      %72 = math.exp %71 : vector<64x256xf32>
      %73 = arith.mulf %68, %72 : vector<64x256xf32>
      %cst_37 = arith.constant 1.000000e+00 : f32
      %74 = vector.broadcast %cst_37 : f32 to vector<64x256xf32>
      %75 = arith.subf %74, %73 : vector<64x256xf32>
      %76 = arith.mulf %47, %75 : vector<64x256xf32>
      %cst_38 = arith.constant 1.000000e+00 : f32
      %77 = vector.broadcast %cst_38 : f32 to vector<64x256xf32>
      %78 = arith.addf %77, %76 : vector<64x256xf32>
      %79 = arith.mulf %40, %78 : vector<64x256xf32>
      %80 = arith.truncf %79 : vector<64x256xf32> to vector<64x256xbf16>
      %c0_39 = arith.constant 0 : index
      %c0_40 = arith.constant 0 : index
      %81 = vector.load %arg8[%c0_39, %c0_40] : memref<64x256xbf16, #tpu.memory_space<vmem>>, vector<64x256xbf16>
      tpu.vector_store %arg8[%c0_39, %c0_40], %80 {strides = array<i32>} : memref<64x256xbf16, #tpu.memory_space<vmem>>, vector<64x256xbf16>,
    } else {
    }
    return
  }
  func.func @transform_0(%arg0: i32, %arg1: i32, %arg2: i32) -> (i32, i32) {
    %c0_i32 = arith.constant 0 : i32
    return %arg0, %arg2 : i32, i32
  }
  func.func @transform_1(%arg0: i32, %arg1: i32, %arg2: i32) -> (i32, i32) {
    %c0_i32 = arith.constant 0 : i32
    return %arg2, %arg1 : i32, i32
  }
  func.func @transform_2(%arg0: i32, %arg1: i32, %arg2: i32) -> (i32, i32) {
    %c0_i32 = arith.constant 0 : i32
    %c0_i32_0 = arith.constant 0 : i32
    return %c0_i32, %arg1 : i32, i32
  }
  func.func @transform_3(%arg0: i32, %arg1: i32, %arg2: i32) -> (i32, i32) {
    %c0_i32 = arith.constant 0 : i32
    %c0_i32_0 = arith.constant 0 : i32
    %c0_i32_1 = arith.constant 0 : i32
    return %c0_i32, %c0_i32_0 : i32, i32
  }
  func.func @transform_4(%arg0: i32, %arg1: i32, %arg2: i32) -> (i32, i32) {
    %c0_i32 = arith.constant 0 : i32
    %c0_i32_0 = arith.constant 0 : i32
    %c0_i32_1 = arith.constant 0 : i32
    return %c0_i32, %c0_i32_0 : i32, i32
  }
  func.func @transform_5(%arg0: i32, %arg1: i32, %arg2: i32) -> (i32, i32) {
    %c0_i32 = arith.constant 0 : i32
    return %arg0, %arg1 : i32, i32
  }
}

module attributes {stable_mosaic.version = 11 : i64} {
  func.func @kernel(%arg0: i32, %arg1: i32, %arg2: i32, %arg3: memref<64x512xbf16, #tpu.memory_space<vmem>>, %arg4: memref<512x256xbf16, #tpu.memory_space<vmem>>, %arg5: memref<1x256xf32, #tpu.memory_space<vmem>>, %arg6: memref<64x256xf32, #tpu.memory_space<vmem>>, %arg7: memref<64x256xf32, #tpu.memory_space<vmem>>, %arg8: memref<64x256xf32, #tpu.memory_space<vmem>>) attributes {dimension_semantics = [#tpu.dimension_semantics<parallel>, #tpu.dimension_semantics<parallel>, #tpu.dimension_semantics<arbitrary>], iteration_bounds = array<i64: 2, 1, 2>, scalar_prefetch = 0 : i64, scratch_operands = 1 : i64, tpu.core_type = #tpu.core_type<tc>, window_params = [{transform_indices = @transform_0, window_bounds = array<i64: 64, 512>}, {transform_indices = @transform_1, window_bounds = array<i64: 512, 256>}, {transform_indices = @transform_2, window_bounds = array<i64: 1, 256>}, {transform_indices = @transform_3, window_bounds = array<i64: 64, 256>}, {transform_indices = @transform_4, window_bounds = array<i64: 64, 256>}]} {
    %c0_i32 = arith.constant 0 : i32
    %0 = arith.cmpi eq, %arg2, %c0_i32 : i32
    %1 = arith.extui %0 : i1 to i32
    %c0_i32_0 = arith.constant 0 : i32
    %2 = arith.cmpi ne, %1, %c0_i32_0 : i32
    scf.if %2 {
      %cst_9 = arith.constant 0.000000e+00 : f32
      %14 = vector.broadcast %cst_9 : f32 to vector<64x256xf32>
      %c0_10 = arith.constant 0 : index
      %c0_11 = arith.constant 0 : index
      %15 = vector.load %arg8[%c0_10, %c0_11] : memref<64x256xf32, #tpu.memory_space<vmem>>, vector<64x256xf32>
      tpu.vector_store %arg8[%c0_10, %c0_11], %14 {strides = array<i32>} : memref<64x256xf32, #tpu.memory_space<vmem>>, vector<64x256xf32>,
    } else {
    }
    %c0 = arith.constant 0 : index
    %c0_1 = arith.constant 0 : index
    %3 = vector.load %arg3[%c0, %c0_1] : memref<64x512xbf16, #tpu.memory_space<vmem>>, vector<64x512xbf16>
    %4 = arith.extf %3 : vector<64x512xbf16> to vector<64x512xf32>
    %c0_2 = arith.constant 0 : index
    %c0_3 = arith.constant 0 : index
    %5 = vector.load %arg8[%c0_2, %c0_3] : memref<64x256xf32, #tpu.memory_space<vmem>>, vector<64x256xf32>
    %6 = arith.truncf %4 : vector<64x512xf32> to vector<64x512xbf16>
    %c0_4 = arith.constant 0 : index
    %c0_5 = arith.constant 0 : index
    %7 = vector.load %arg4[%c0_4, %c0_5] : memref<512x256xbf16, #tpu.memory_space<vmem>>, vector<512x256xbf16>
    %cst = arith.constant dense<0.000000e+00> : vector<64x256xf32>
    %8 = tpu.matmul %6, %7, %cst {dimension_numbers = #tpu.dot_dimension_numbers<[1], [0], [0], [1], [0, 0, 1, 1], [], []>} : vector<64x512xbf16>, vector<512x256xbf16>, vector<64x256xf32> -> vector<64x256xf32>
    %9 = arith.addf %5, %8 : vector<64x256xf32>
    %c0_6 = arith.constant 0 : index
    %c0_7 = arith.constant 0 : index
    %10 = vector.load %arg8[%c0_6, %c0_7] : memref<64x256xf32, #tpu.memory_space<vmem>>, vector<64x256xf32>
    tpu.vector_store %arg8[%c0_6, %c0_7], %9 {strides = array<i32>} : memref<64x256xf32, #tpu.memory_space<vmem>>, vector<64x256xf32>,
    %c1_i32 = arith.constant 1 : i32
    %11 = arith.cmpi eq, %arg2, %c1_i32 : i32
    %12 = arith.extui %11 : i1 to i32
    %c0_i32_8 = arith.constant 0 : i32
    %13 = arith.cmpi ne, %12, %c0_i32_8 : i32
    scf.if %13 {
      %c0_9 = arith.constant 0 : index
      %c0_10 = arith.constant 0 : index
      %14 = vector.load %arg8[%c0_9, %c0_10] : memref<64x256xf32, #tpu.memory_space<vmem>>, vector<64x256xf32>
      %c0_11 = arith.constant 0 : index
      %c0_12 = arith.constant 0 : index
      %15 = vector.load %arg5[%c0_11, %c0_12] : memref<1x256xf32, #tpu.memory_space<vmem>>, vector<1x256xf32>
      %16 = vector.broadcast %15 : vector<1x256xf32> to vector<64x256xf32>
      %17 = arith.addf %14, %16 : vector<64x256xf32>
      %c0_13 = arith.constant 0 : index
      %c0_14 = arith.constant 0 : index
      %18 = vector.load %arg6[%c0_13, %c0_14] : memref<64x256xf32, #tpu.memory_space<vmem>>, vector<64x256xf32>
      %19 = arith.addf %17, %18 : vector<64x256xf32>
      %c0_15 = arith.constant 0 : index
      %c0_16 = arith.constant 0 : index
      %20 = vector.load %arg7[%c0_15, %c0_16] : memref<64x256xf32, #tpu.memory_space<vmem>>, vector<64x256xf32>
      tpu.vector_store %arg7[%c0_15, %c0_16], %19 {strides = array<i32>} : memref<64x256xf32, #tpu.memory_space<vmem>>, vector<64x256xf32>,
    } else {
    }
    return
  }
  func.func @transform_0(%arg0: i32, %arg1: i32, %arg2: i32) -> (i32, i32) {
    %c0_i32 = arith.constant 0 : i32
    return %arg0, %arg2 : i32, i32
  }
  func.func @transform_1(%arg0: i32, %arg1: i32, %arg2: i32) -> (i32, i32) {
    %c0_i32 = arith.constant 0 : i32
    return %arg2, %arg1 : i32, i32
  }
  func.func @transform_2(%arg0: i32, %arg1: i32, %arg2: i32) -> (i32, i32) {
    %c0_i32 = arith.constant 0 : i32
    %c0_i32_0 = arith.constant 0 : i32
    return %c0_i32, %arg1 : i32, i32
  }
  func.func @transform_3(%arg0: i32, %arg1: i32, %arg2: i32) -> (i32, i32) {
    %c0_i32 = arith.constant 0 : i32
    return %arg0, %arg1 : i32, i32
  }
  func.func @transform_4(%arg0: i32, %arg1: i32, %arg2: i32) -> (i32, i32) {
    %c0_i32 = arith.constant 0 : i32
    return %arg0, %arg1 : i32, i32
  }
}

module attributes {stable_mosaic.version = 11 : i64} {
  func.func @kernel(%arg0: i32, %arg1: i32, %arg2: i32, %arg3: memref<64x256xf32, #tpu.memory_space<vmem>>, %arg4: memref<256x256xbf16, #tpu.memory_space<vmem>>, %arg5: memref<1x256xf32, #tpu.memory_space<vmem>>, %arg6: memref<1x256xf32, #tpu.memory_space<vmem>>, %arg7: memref<64x256xf32, #tpu.memory_space<vmem>>, %arg8: memref<64x256xf32, #tpu.memory_space<vmem>>) attributes {dimension_semantics = [#tpu.dimension_semantics<parallel>, #tpu.dimension_semantics<parallel>, #tpu.dimension_semantics<arbitrary>], iteration_bounds = array<i64: 2, 1, 1>, scalar_prefetch = 0 : i64, scratch_operands = 1 : i64, tpu.core_type = #tpu.core_type<tc>, window_params = [{transform_indices = @transform_0, window_bounds = array<i64: 64, 256>}, {transform_indices = @transform_1, window_bounds = array<i64: 256, 256>}, {pipeline_mode = #tpu.pipeline_mode<synchronous>, transform_indices = @transform_2, window_bounds = array<i64: 1, 256>}, {pipeline_mode = #tpu.pipeline_mode<synchronous>, transform_indices = @transform_3, window_bounds = array<i64: 1, 256>}, {transform_indices = @transform_4, window_bounds = array<i64: 64, 256>}]} {
    %c0_i32 = arith.constant 0 : i32
    %0 = arith.cmpi eq, %arg2, %c0_i32 : i32
    %1 = arith.extui %0 : i1 to i32
    %c0_i32_0 = arith.constant 0 : i32
    %2 = arith.cmpi ne, %1, %c0_i32_0 : i32
    scf.if %2 {
      %cst_10 = arith.constant 0.000000e+00 : f32
      %13 = vector.broadcast %cst_10 : f32 to vector<64x256xf32>
      %c0_11 = arith.constant 0 : index
      %c0_12 = arith.constant 0 : index
      %14 = vector.load %arg8[%c0_11, %c0_12] : memref<64x256xf32, #tpu.memory_space<vmem>>, vector<64x256xf32>
      tpu.vector_store %arg8[%c0_11, %c0_12], %13 {strides = array<i32>} : memref<64x256xf32, #tpu.memory_space<vmem>>, vector<64x256xf32>,
    } else {
    }
    %c0 = arith.constant 0 : index
    %c0_1 = arith.constant 0 : index
    %3 = vector.load %arg3[%c0, %c0_1] : memref<64x256xf32, #tpu.memory_space<vmem>>, vector<64x256xf32>
    %c0_2 = arith.constant 0 : index
    %c0_3 = arith.constant 0 : index
    %4 = vector.load %arg8[%c0_2, %c0_3] : memref<64x256xf32, #tpu.memory_space<vmem>>, vector<64x256xf32>
    %5 = arith.truncf %3 : vector<64x256xf32> to vector<64x256xbf16>
    %c0_4 = arith.constant 0 : index
    %c0_5 = arith.constant 0 : index
    %6 = vector.load %arg4[%c0_4, %c0_5] : memref<256x256xbf16, #tpu.memory_space<vmem>>, vector<256x256xbf16>
    %cst = arith.constant dense<0.000000e+00> : vector<64x256xf32>
    %7 = tpu.matmul %5, %6, %cst {dimension_numbers = #tpu.dot_dimension_numbers<[1], [0], [0], [1], [0, 0, 1, 1], [], []>} : vector<64x256xbf16>, vector<256x256xbf16>, vector<64x256xf32> -> vector<64x256xf32>
    %8 = arith.addf %4, %7 : vector<64x256xf32>
    %c0_6 = arith.constant 0 : index
    %c0_7 = arith.constant 0 : index
    %9 = vector.load %arg8[%c0_6, %c0_7] : memref<64x256xf32, #tpu.memory_space<vmem>>, vector<64x256xf32>
    tpu.vector_store %arg8[%c0_6, %c0_7], %8 {strides = array<i32>} : memref<64x256xf32, #tpu.memory_space<vmem>>, vector<64x256xf32>,
    %c0_i32_8 = arith.constant 0 : i32
    %10 = arith.cmpi eq, %arg2, %c0_i32_8 : i32
    %11 = arith.extui %10 : i1 to i32
    %c0_i32_9 = arith.constant 0 : i32
    %12 = arith.cmpi ne, %11, %c0_i32_9 : i32
    scf.if %12 {
      %c0_10 = arith.constant 0 : index
      %c0_11 = arith.constant 0 : index
      %13 = vector.load %arg8[%c0_10, %c0_11] : memref<64x256xf32, #tpu.memory_space<vmem>>, vector<64x256xf32>
      %c0_12 = arith.constant 0 : index
      %c0_13 = arith.constant 0 : index
      %14 = vector.load %arg5[%c0_12, %c0_13] : memref<1x256xf32, #tpu.memory_space<vmem>>, vector<1x256xf32>
      %c0_14 = arith.constant 0 : index
      %c0_15 = arith.constant 0 : index
      %15 = vector.load %arg6[%c0_14, %c0_15] : memref<1x256xf32, #tpu.memory_space<vmem>>, vector<1x256xf32>
      %cst_16 = arith.constant dense<0.000000e+00> : vector<64xf32>
      %16 = vector.multi_reduction <add>, %13, %cst_16 [1] : vector<64x256xf32> to vector<64xf32>
      %17 = vector.shape_cast %16 : vector<64xf32> to vector<64x1xf32>
      %cst_17 = arith.constant 2.560000e+02 : f32
      %18 = vector.broadcast %cst_17 : f32 to vector<64x1xf32>
      %19 = arith.divf %17, %18 : vector<64x1xf32>
      %20 = vector.broadcast %19 : vector<64x1xf32> to vector<64x256xf32>
      %21 = arith.subf %13, %20 : vector<64x256xf32>
      %22 = arith.mulf %21, %21 : vector<64x256xf32>
      %cst_18 = arith.constant dense<0.000000e+00> : vector<64xf32>
      %23 = vector.multi_reduction <add>, %22, %cst_18 [1] : vector<64x256xf32> to vector<64xf32>
      %24 = vector.shape_cast %23 : vector<64xf32> to vector<64x1xf32>
      %cst_19 = arith.constant 2.560000e+02 : f32
      %25 = vector.broadcast %cst_19 : f32 to vector<64x1xf32>
      %26 = arith.divf %24, %25 : vector<64x1xf32>
      %cst_20 = arith.constant 9.99999997E-7 : f32
      %27 = vector.broadcast %cst_20 : f32 to vector<64x1xf32>
      %28 = arith.addf %26, %27 : vector<64x1xf32>
      %29 = math.rsqrt %28 : vector<64x1xf32>
      %30 = vector.broadcast %29 : vector<64x1xf32> to vector<64x256xf32>
      %31 = arith.mulf %21, %30 : vector<64x256xf32>
      %32 = vector.broadcast %14 : vector<1x256xf32> to vector<64x256xf32>
      %33 = arith.mulf %31, %32 : vector<64x256xf32>
      %34 = vector.broadcast %15 : vector<1x256xf32> to vector<64x256xf32>
      %35 = arith.addf %33, %34 : vector<64x256xf32>
      %c0_21 = arith.constant 0 : index
      %c0_22 = arith.constant 0 : index
      %36 = vector.load %arg7[%c0_21, %c0_22] : memref<64x256xf32, #tpu.memory_space<vmem>>, vector<64x256xf32>
      tpu.vector_store %arg7[%c0_21, %c0_22], %35 {strides = array<i32>} : memref<64x256xf32, #tpu.memory_space<vmem>>, vector<64x256xf32>,
    } else {
    }
    return
  }
  func.func @transform_0(%arg0: i32, %arg1: i32, %arg2: i32) -> (i32, i32) {
    %c0_i32 = arith.constant 0 : i32
    return %arg0, %arg2 : i32, i32
  }
  func.func @transform_1(%arg0: i32, %arg1: i32, %arg2: i32) -> (i32, i32) {
    %c0_i32 = arith.constant 0 : i32
    return %arg2, %arg1 : i32, i32
  }
  func.func @transform_2(%arg0: i32, %arg1: i32, %arg2: i32) -> (i32, i32) {
    %c0_i32 = arith.constant 0 : i32
    %c0_i32_0 = arith.constant 0 : i32
    %c0_i32_1 = arith.constant 0 : i32
    return %c0_i32, %c0_i32_0 : i32, i32
  }
  func.func @transform_3(%arg0: i32, %arg1: i32, %arg2: i32) -> (i32, i32) {
    %c0_i32 = arith.constant 0 : i32
    %c0_i32_0 = arith.constant 0 : i32
    %c0_i32_1 = arith.constant 0 : i32
    return %c0_i32, %c0_i32_0 : i32, i32
  }
  func.func @transform_4(%arg0: i32, %arg1: i32, %arg2: i32) -> (i32, i32) {
    %c0_i32 = arith.constant 0 : i32
    return %arg0, %arg1 : i32, i32
  }
}

module attributes {stable_mosaic.version = 11 : i64} {
  func.func @_neck_conv3x3_ln_kernel(%arg0: i32, %arg1: memref<1x10x10x256xf32, #tpu.memory_space<vmem>>, %arg2: memref<3x3x256x256xbf16, #tpu.memory_space<vmem>>, %arg3: memref<1x256xf32, #tpu.memory_space<vmem>>, %arg4: memref<1x256xf32, #tpu.memory_space<vmem>>, %arg5: memref<1x8x8x256xf32, #tpu.memory_space<vmem>>) attributes {dimension_semantics = [#tpu.dimension_semantics<parallel>], iteration_bounds = array<i64: 2>, scalar_prefetch = 0 : i64, scratch_operands = 0 : i64, tpu.core_type = #tpu.core_type<tc>, window_params = [{transform_indices = @transform_0, window_bounds = array<i64: 1, 10, 10, 256>}, {pipeline_mode = #tpu.pipeline_mode<synchronous>, transform_indices = @transform_1, window_bounds = array<i64: 3, 3, 256, 256>}, {pipeline_mode = #tpu.pipeline_mode<synchronous>, transform_indices = @transform_2, window_bounds = array<i64: 1, 256>}, {pipeline_mode = #tpu.pipeline_mode<synchronous>, transform_indices = @transform_3, window_bounds = array<i64: 1, 256>}, {transform_indices = @transform_4, window_bounds = array<i64: 1, 8, 8, 256>}]} {
    %c0 = arith.constant 0 : index
    %c0_0 = arith.constant 0 : index
    %c0_1 = arith.constant 0 : index
    %c0_2 = arith.constant 0 : index
    %0 = vector.load %arg1[%c0, %c0_0, %c0_1, %c0_2] : memref<1x10x10x256xf32, #tpu.memory_space<vmem>>, vector<1x10x10x256xf32>
    %1 = vector.shape_cast %0 : vector<1x10x10x256xf32> to vector<10x10x256xf32>
    %cst = arith.constant 0.000000e+00 : f32
    %2 = vector.broadcast %cst : f32 to vector<64x256xf32>
    %3 = vector.extract_strided_slice %1 {offsets = [0, 0, 0], sizes = [8, 8, 256], strides = [1, 1, 1]} : vector<10x10x256xf32> to vector<8x8x256xf32>
    %4 = vector.shape_cast %3 : vector<8x8x256xf32> to vector<64x256xf32>
    %5 = arith.truncf %4 : vector<64x256xf32> to vector<64x256xbf16>
    %c0_3 = arith.constant 0 : index
    %c0_4 = arith.constant 0 : index
    %c0_5 = arith.constant 0 : index
    %c0_6 = arith.constant 0 : index
    %6 = vector.load %arg2[%c0_3, %c0_4, %c0_5, %c0_6] : memref<3x3x256x256xbf16, #tpu.memory_space<vmem>>, vector<1x1x256x256xbf16>
    %7 = vector.shape_cast %6 : vector<1x1x256x256xbf16> to vector<256x256xbf16>
    %cst_7 = arith.constant dense<0.000000e+00> : vector<64x256xf32>
    %8 = tpu.matmul %5, %7, %cst_7 {dimension_numbers = #tpu.dot_dimension_numbers<[1], [0], [0], [1], [0, 0, 1, 1], [], []>} : vector<64x256xbf16>, vector<256x256xbf16>, vector<64x256xf32> -> vector<64x256xf32>
    %9 = arith.addf %2, %8 : vector<64x256xf32>
    %10 = vector.extract_strided_slice %1 {offsets = [0, 1, 0], sizes = [8, 8, 256], strides = [1, 1, 1]} : vector<10x10x256xf32> to vector<8x8x256xf32>
    %11 = vector.shape_cast %10 : vector<8x8x256xf32> to vector<64x256xf32>
    %12 = arith.truncf %11 : vector<64x256xf32> to vector<64x256xbf16>
    %c0_8 = arith.constant 0 : index
    %c1 = arith.constant 1 : index
    %c0_9 = arith.constant 0 : index
    %c0_10 = arith.constant 0 : index
    %13 = vector.load %arg2[%c0_8, %c1, %c0_9, %c0_10] : memref<3x3x256x256xbf16, #tpu.memory_space<vmem>>, vector<1x1x256x256xbf16>
    %14 = vector.shape_cast %13 : vector<1x1x256x256xbf16> to vector<256x256xbf16>
    %cst_11 = arith.constant dense<0.000000e+00> : vector<64x256xf32>
    %15 = tpu.matmul %12, %14, %cst_11 {dimension_numbers = #tpu.dot_dimension_numbers<[1], [0], [0], [1], [0, 0, 1, 1], [], []>} : vector<64x256xbf16>, vector<256x256xbf16>, vector<64x256xf32> -> vector<64x256xf32>
    %16 = arith.addf %9, %15 : vector<64x256xf32>
    %17 = vector.extract_strided_slice %1 {offsets = [0, 2, 0], sizes = [8, 8, 256], strides = [1, 1, 1]} : vector<10x10x256xf32> to vector<8x8x256xf32>
    %18 = vector.shape_cast %17 : vector<8x8x256xf32> to vector<64x256xf32>
    %19 = arith.truncf %18 : vector<64x256xf32> to vector<64x256xbf16>
    %c0_12 = arith.constant 0 : index
    %c2 = arith.constant 2 : index
    %c0_13 = arith.constant 0 : index
    %c0_14 = arith.constant 0 : index
    %20 = vector.load %arg2[%c0_12, %c2, %c0_13, %c0_14] : memref<3x3x256x256xbf16, #tpu.memory_space<vmem>>, vector<1x1x256x256xbf16>
    %21 = vector.shape_cast %20 : vector<1x1x256x256xbf16> to vector<256x256xbf16>
    %cst_15 = arith.constant dense<0.000000e+00> : vector<64x256xf32>
    %22 = tpu.matmul %19, %21, %cst_15 {dimension_numbers = #tpu.dot_dimension_numbers<[1], [0], [0], [1], [0, 0, 1, 1], [], []>} : vector<64x256xbf16>, vector<256x256xbf16>, vector<64x256xf32> -> vector<64x256xf32>
    %23 = arith.addf %16, %22 : vector<64x256xf32>
    %24 = vector.extract_strided_slice %1 {offsets = [1, 0, 0], sizes = [8, 8, 256], strides = [1, 1, 1]} : vector<10x10x256xf32> to vector<8x8x256xf32>
    %25 = vector.shape_cast %24 : vector<8x8x256xf32> to vector<64x256xf32>
    %26 = arith.truncf %25 : vector<64x256xf32> to vector<64x256xbf16>
    %c1_16 = arith.constant 1 : index
    %c0_17 = arith.constant 0 : index
    %c0_18 = arith.constant 0 : index
    %c0_19 = arith.constant 0 : index
    %27 = vector.load %arg2[%c1_16, %c0_17, %c0_18, %c0_19] : memref<3x3x256x256xbf16, #tpu.memory_space<vmem>>, vector<1x1x256x256xbf16>
    %28 = vector.shape_cast %27 : vector<1x1x256x256xbf16> to vector<256x256xbf16>
    %cst_20 = arith.constant dense<0.000000e+00> : vector<64x256xf32>
    %29 = tpu.matmul %26, %28, %cst_20 {dimension_numbers = #tpu.dot_dimension_numbers<[1], [0], [0], [1], [0, 0, 1, 1], [], []>} : vector<64x256xbf16>, vector<256x256xbf16>, vector<64x256xf32> -> vector<64x256xf32>
    %30 = arith.addf %23, %29 : vector<64x256xf32>
    %31 = vector.extract_strided_slice %1 {offsets = [1, 1, 0], sizes = [8, 8, 256], strides = [1, 1, 1]} : vector<10x10x256xf32> to vector<8x8x256xf32>
    %32 = vector.shape_cast %31 : vector<8x8x256xf32> to vector<64x256xf32>
    %33 = arith.truncf %32 : vector<64x256xf32> to vector<64x256xbf16>
    %c1_21 = arith.constant 1 : index
    %c1_22 = arith.constant 1 : index
    %c0_23 = arith.constant 0 : index
    %c0_24 = arith.constant 0 : index
    %34 = vector.load %arg2[%c1_21, %c1_22, %c0_23, %c0_24] : memref<3x3x256x256xbf16, #tpu.memory_space<vmem>>, vector<1x1x256x256xbf16>
    %35 = vector.shape_cast %34 : vector<1x1x256x256xbf16> to vector<256x256xbf16>
    %cst_25 = arith.constant dense<0.000000e+00> : vector<64x256xf32>
    %36 = tpu.matmul %33, %35, %cst_25 {dimension_numbers = #tpu.dot_dimension_numbers<[1], [0], [0], [1], [0, 0, 1, 1], [], []>} : vector<64x256xbf16>, vector<256x256xbf16>, vector<64x256xf32> -> vector<64x256xf32>
    %37 = arith.addf %30, %36 : vector<64x256xf32>
    %38 = vector.extract_strided_slice %1 {offsets = [1, 2, 0], sizes = [8, 8, 256], strides = [1, 1, 1]} : vector<10x10x256xf32> to vector<8x8x256xf32>
    %39 = vector.shape_cast %38 : vector<8x8x256xf32> to vector<64x256xf32>
    %40 = arith.truncf %39 : vector<64x256xf32> to vector<64x256xbf16>
    %c1_26 = arith.constant 1 : index
    %c2_27 = arith.constant 2 : index
    %c0_28 = arith.constant 0 : index
    %c0_29 = arith.constant 0 : index
    %41 = vector.load %arg2[%c1_26, %c2_27, %c0_28, %c0_29] : memref<3x3x256x256xbf16, #tpu.memory_space<vmem>>, vector<1x1x256x256xbf16>
    %42 = vector.shape_cast %41 : vector<1x1x256x256xbf16> to vector<256x256xbf16>
    %cst_30 = arith.constant dense<0.000000e+00> : vector<64x256xf32>
    %43 = tpu.matmul %40, %42, %cst_30 {dimension_numbers = #tpu.dot_dimension_numbers<[1], [0], [0], [1], [0, 0, 1, 1], [], []>} : vector<64x256xbf16>, vector<256x256xbf16>, vector<64x256xf32> -> vector<64x256xf32>
    %44 = arith.addf %37, %43 : vector<64x256xf32>
    %45 = vector.extract_strided_slice %1 {offsets = [2, 0, 0], sizes = [8, 8, 256], strides = [1, 1, 1]} : vector<10x10x256xf32> to vector<8x8x256xf32>
    %46 = vector.shape_cast %45 : vector<8x8x256xf32> to vector<64x256xf32>
    %47 = arith.truncf %46 : vector<64x256xf32> to vector<64x256xbf16>
    %c2_31 = arith.constant 2 : index
    %c0_32 = arith.constant 0 : index
    %c0_33 = arith.constant 0 : index
    %c0_34 = arith.constant 0 : index
    %48 = vector.load %arg2[%c2_31, %c0_32, %c0_33, %c0_34] : memref<3x3x256x256xbf16, #tpu.memory_space<vmem>>, vector<1x1x256x256xbf16>
    %49 = vector.shape_cast %48 : vector<1x1x256x256xbf16> to vector<256x256xbf16>
    %cst_35 = arith.constant dense<0.000000e+00> : vector<64x256xf32>
    %50 = tpu.matmul %47, %49, %cst_35 {dimension_numbers = #tpu.dot_dimension_numbers<[1], [0], [0], [1], [0, 0, 1, 1], [], []>} : vector<64x256xbf16>, vector<256x256xbf16>, vector<64x256xf32> -> vector<64x256xf32>
    %51 = arith.addf %44, %50 : vector<64x256xf32>
    %52 = vector.extract_strided_slice %1 {offsets = [2, 1, 0], sizes = [8, 8, 256], strides = [1, 1, 1]} : vector<10x10x256xf32> to vector<8x8x256xf32>
    %53 = vector.shape_cast %52 : vector<8x8x256xf32> to vector<64x256xf32>
    %54 = arith.truncf %53 : vector<64x256xf32> to vector<64x256xbf16>
    %c2_36 = arith.constant 2 : index
    %c1_37 = arith.constant 1 : index
    %c0_38 = arith.constant 0 : index
    %c0_39 = arith.constant 0 : index
    %55 = vector.load %arg2[%c2_36, %c1_37, %c0_38, %c0_39] : memref<3x3x256x256xbf16, #tpu.memory_space<vmem>>, vector<1x1x256x256xbf16>
    %56 = vector.shape_cast %55 : vector<1x1x256x256xbf16> to vector<256x256xbf16>
    %cst_40 = arith.constant dense<0.000000e+00> : vector<64x256xf32>
    %57 = tpu.matmul %54, %56, %cst_40 {dimension_numbers = #tpu.dot_dimension_numbers<[1], [0], [0], [1], [0, 0, 1, 1], [], []>} : vector<64x256xbf16>, vector<256x256xbf16>, vector<64x256xf32> -> vector<64x256xf32>
    %58 = arith.addf %51, %57 : vector<64x256xf32>
    %59 = vector.extract_strided_slice %1 {offsets = [2, 2, 0], sizes = [8, 8, 256], strides = [1, 1, 1]} : vector<10x10x256xf32> to vector<8x8x256xf32>
    %60 = vector.shape_cast %59 : vector<8x8x256xf32> to vector<64x256xf32>
    %61 = arith.truncf %60 : vector<64x256xf32> to vector<64x256xbf16>
    %c2_41 = arith.constant 2 : index
    %c2_42 = arith.constant 2 : index
    %c0_43 = arith.constant 0 : index
    %c0_44 = arith.constant 0 : index
    %62 = vector.load %arg2[%c2_41, %c2_42, %c0_43, %c0_44] : memref<3x3x256x256xbf16, #tpu.memory_space<vmem>>, vector<1x1x256x256xbf16>
    %63 = vector.shape_cast %62 : vector<1x1x256x256xbf16> to vector<256x256xbf16>
    %cst_45 = arith.constant dense<0.000000e+00> : vector<64x256xf32>
    %64 = tpu.matmul %61, %63, %cst_45 {dimension_numbers = #tpu.dot_dimension_numbers<[1], [0], [0], [1], [0, 0, 1, 1], [], []>} : vector<64x256xbf16>, vector<256x256xbf16>, vector<64x256xf32> -> vector<64x256xf32>
    %65 = arith.addf %58, %64 : vector<64x256xf32>
    %c0_46 = arith.constant 0 : index
    %c0_47 = arith.constant 0 : index
    %66 = vector.load %arg3[%c0_46, %c0_47] : memref<1x256xf32, #tpu.memory_space<vmem>>, vector<1x256xf32>
    %c0_48 = arith.constant 0 : index
    %c0_49 = arith.constant 0 : index
    %67 = vector.load %arg4[%c0_48, %c0_49] : memref<1x256xf32, #tpu.memory_space<vmem>>, vector<1x256xf32>
    %cst_50 = arith.constant dense<0.000000e+00> : vector<64xf32>
    %68 = vector.multi_reduction <add>, %65, %cst_50 [1] : vector<64x256xf32> to vector<64xf32>
    %69 = vector.shape_cast %68 : vector<64xf32> to vector<64x1xf32>
    %cst_51 = arith.constant 2.560000e+02 : f32
    %70 = vector.broadcast %cst_51 : f32 to vector<64x1xf32>
    %71 = arith.divf %69, %70 : vector<64x1xf32>
    %72 = vector.broadcast %71 : vector<64x1xf32> to vector<64x256xf32>
    %73 = arith.subf %65, %72 : vector<64x256xf32>
    %74 = arith.mulf %73, %73 : vector<64x256xf32>
    %cst_52 = arith.constant dense<0.000000e+00> : vector<64xf32>
    %75 = vector.multi_reduction <add>, %74, %cst_52 [1] : vector<64x256xf32> to vector<64xf32>
    %76 = vector.shape_cast %75 : vector<64xf32> to vector<64x1xf32>
    %cst_53 = arith.constant 2.560000e+02 : f32
    %77 = vector.broadcast %cst_53 : f32 to vector<64x1xf32>
    %78 = arith.divf %76, %77 : vector<64x1xf32>
    %cst_54 = arith.constant 9.99999997E-7 : f32
    %79 = vector.broadcast %cst_54 : f32 to vector<64x1xf32>
    %80 = arith.addf %78, %79 : vector<64x1xf32>
    %81 = math.rsqrt %80 : vector<64x1xf32>
    %82 = vector.broadcast %81 : vector<64x1xf32> to vector<64x256xf32>
    %83 = arith.mulf %73, %82 : vector<64x256xf32>
    %84 = vector.broadcast %66 : vector<1x256xf32> to vector<64x256xf32>
    %85 = arith.mulf %83, %84 : vector<64x256xf32>
    %86 = vector.broadcast %67 : vector<1x256xf32> to vector<64x256xf32>
    %87 = arith.addf %85, %86 : vector<64x256xf32>
    %88 = vector.shape_cast %87 : vector<64x256xf32> to vector<8x8x256xf32>
    %c0_55 = arith.constant 0 : index
    %c0_56 = arith.constant 0 : index
    %c0_57 = arith.constant 0 : index
    %c0_58 = arith.constant 0 : index
    %89 = vector.load %arg5[%c0_55, %c0_56, %c0_57, %c0_58] : memref<1x8x8x256xf32, #tpu.memory_space<vmem>>, vector<1x8x8x256xf32>
    %90 = vector.shape_cast %89 : vector<1x8x8x256xf32> to vector<8x8x256xf32>
    %91 = vector.shape_cast %88 : vector<8x8x256xf32> to vector<1x8x8x256xf32>
    tpu.vector_store %arg5[%c0_55, %c0_56, %c0_57, %c0_58], %91 {strides = array<i32>} : memref<1x8x8x256xf32, #tpu.memory_space<vmem>>, vector<1x8x8x256xf32>,
    return
  }
  func.func @transform_0(%arg0: i32) -> (i32, i32, i32, i32) {
    %c0_i32 = arith.constant 0 : i32
    %c0_i32_0 = arith.constant 0 : i32
    %c0_i32_1 = arith.constant 0 : i32
    %c0_i32_2 = arith.constant 0 : i32
    return %arg0, %c0_i32, %c0_i32_0, %c0_i32_1 : i32, i32, i32, i32
  }
  func.func @transform_1(%arg0: i32) -> (i32, i32, i32, i32) {
    %c0_i32 = arith.constant 0 : i32
    %c0_i32_0 = arith.constant 0 : i32
    %c0_i32_1 = arith.constant 0 : i32
    %c0_i32_2 = arith.constant 0 : i32
    %c0_i32_3 = arith.constant 0 : i32
    return %c0_i32, %c0_i32_0, %c0_i32_1, %c0_i32_2 : i32, i32, i32, i32
  }
  func.func @transform_2(%arg0: i32) -> (i32, i32) {
    %c0_i32 = arith.constant 0 : i32
    %c0_i32_0 = arith.constant 0 : i32
    %c0_i32_1 = arith.constant 0 : i32
    return %c0_i32, %c0_i32_0 : i32, i32
  }
  func.func @transform_3(%arg0: i32) -> (i32, i32) {
    %c0_i32 = arith.constant 0 : i32
    %c0_i32_0 = arith.constant 0 : i32
    %c0_i32_1 = arith.constant 0 : i32
    return %c0_i32, %c0_i32_0 : i32, i32
  }
  func.func @transform_4(%arg0: i32) -> (i32, i32, i32, i32) {
    %c0_i32 = arith.constant 0 : i32
    %c0_i32_0 = arith.constant 0 : i32
    %c0_i32_1 = arith.constant 0 : i32
    %c0_i32_2 = arith.constant 0 : i32
    return %arg0, %c0_i32, %c0_i32_0, %c0_i32_1 : i32, i32, i32, i32
  }
}

</mosaic_0001>

<bundles_post_ra>
// kernel: sam_predictor_forward.13
= control target key start
LH: loop header
LB: loop body
LE: loop exit
PB: predicated region body
PF: predicated region fallthrough
CT: control target
= control target key end

     0   :  { %s1137_s15 = smov 0   ;;  %s1139_s16 = smov 0   ;;  %s1312_s0 = inlined_call_operand.vmem [shape: bf16[128,192], index: 0, kind: input, shape index: {}]   ;;  %s1313_s1 = inlined_call_operand.vmem [shape: bf16[192,256], index: 1, kind: input, shape index: {}]   ;;  %s1314_s2 = inlined_call_operand.vmem [shape: f32[1,256], index: 2, kind: input, shape index: {}]   ;;  %s1315_s3 = inlined_call_operand.vmem [shape: f32[128,256], index: 3, kind: input, shape index: {}]   ;;  %s1316_s4 = inlined_call_operand.vmem [shape: f32[128,256], index: 4, kind: output, shape index: {}]  }
   0x1   :  { %s1141_s17 = smov 0  }
   0x2 LB: > { %s33_s18 = sadd.s32 1, %s1106_s16  ;;  %p941_p0 = scmp.ge.s32.totalorder %s1110_s17, 1  ;;  %s1110_s17 = sphi %s1141_s17, %s14_s17   ;;  %s1106_s16 = sphi %s1139_s16, %s1318_s16   ;;  %s1102_s15 = sphi %s1137_s15, %s1317_s15  }
   0x3   : > { %p35_p1 = scmp.ge.s32.totalorder %s33_s18, 2  ;;  %p240_p2 = scmp.lt.s32.totalorder %s1110_s17, 3 }
   0x5   : > { %s1320_s18 = smov (%p35_p1, %s33_s18), 0  ;;  %p241_p3 = pnand %p941_p0, %p240_p2 }
   0x6   : > { %v1040_v0 = vld [vmem:[%s1313_s1 + $0x4] ss:$8 sps:$4 sm:$0xff] (!%p241_p3)   ;;  %s942_s21 = sshll.u32 (!%p241_p3), %s1102_s15, 3  ;;  %v1042_v1 = vld [vmem:[%s1313_s1] ss:$8 sps:$4 sm:$0xff] (!%p241_p3)   ;;  %vm578_vm0 = vcmask (!%p241_p3), 523264   ;;  %v717_v32 = vlaneseq (!%p241_p3) }
   0x7   : > { %244 = sbr.rel (%p241_p3) target bundleno = 283 (0x11b), region = 36  ;;  %591 = vmatprep.subr.bf16.mxu0 (!%p241_p3), %v1040_v0  ;;  %992 = vmatprep.subr.bf16.mxu1 (!%p241_p3), %v1040_v0  ;;  %v1043_v2 = vld [vmem:[%s1313_s1 + $0x14] ss:$8 sps:$4 sm:$0xff] (!%p241_p3)   ;;  %v1045_v3 = vld [vmem:[%s1313_s1 + $0x10] ss:$8 sps:$4 sm:$0xff] (!%p241_p3)   ;;  %p302_p4 = scmp.lt.s32.totalorder (!%p241_p3), %s942_s21, 15 }
   0x8   : > { %592 = vmatpush1.bf16.msra.mxu0 (!%p241_p3), %v1042_v1  ;;  %1004 = vmatpush1.bf16.msra.mxu1 (!%p241_p3), %v1042_v1  ;;  %v1046_v4 = vld [vmem:[%s1313_s1 + $0x24] ss:$8 sps:$4 sm:$0xff] (!%p241_p3)   ;;  %v1048_v5 = vld [vmem:[%s1313_s1 + $0x20] ss:$8 sps:$4 sm:$0xff] (!%p241_p3)   ;;  %v1049_v6 = vld [vmem:[%s1313_s1 + $0x34] ss:$8 sps:$4 sm:$0xff] (!%p241_p3)  }
   0x9   : > { %593 = vmatprep.subr.bf16.mxu0 (!%p241_p3), %v1043_v2  ;;  %993 = vmatprep.subr.bf16.mxu1 (!%p241_p3), %v1043_v2  ;;  %v1051_v7 = vld [vmem:[%s1313_s1 + $0x30] ss:$8 sps:$4 sm:$0xff] (!%p241_p3)   ;;  %v1052_v8 = vld [vmem:[%s1313_s1 + $0x44] ss:$8 sps:$4 sm:$0xff] (!%p241_p3)   ;;  %v1054_v9 = vld [vmem:[%s1313_s1 + $0x40] ss:$8 sps:$4 sm:$0xff] (!%p241_p3)  }
   0xa   : > { %v1055_v10 = vld [vmem:[%s1313_s1 + $0x54] ss:$8 sps:$4 sm:$0xff] (!%p241_p3)   ;;  %v1057_v13 = vld [vmem:[%s1313_s1 + $0x50] ss:$8 sps:$4 sm:$0xff] (!%p241_p3)   ;;  %v1058_v14 = vld [vmem:[%s1313_s1 + $0x64] ss:$8 sps:$4 sm:$0xff] (!%p241_p3)  }
   0xb   : > { %v1060_v15 = vld [vmem:[%s1313_s1 + $0x60] ss:$8 sps:$4 sm:$0xff] (!%p241_p3)   ;;  %v1061_v16 = vld [vmem:[%s1313_s1 + $0x74] ss:$8 sps:$4 sm:$0xff] (!%p241_p3)   ;;  %v1063_v17 = vld [vmem:[%s1313_s1 + $0x70] ss:$8 sps:$4 sm:$0xff] (!%p241_p3)  }
   0xc   : > { %594 = vmatpush1.bf16.msra.mxu0 (!%p241_p3), %v1045_v3  ;;  %1005 = vmatpush1.bf16.msra.mxu1 (!%p241_p3), %v1045_v3  ;;  %v1064_v18 = vld [vmem:[%s1313_s1 + $0x84] ss:$8 sps:$4 sm:$0xff] (!%p241_p3)   ;;  %v1066_v19 = vld [vmem:[%s1313_s1 + $0x80] ss:$8 sps:$4 sm:$0xff] (!%p241_p3)   ;;  %v1067_v20 = vld [vmem:[%s1313_s1 + $0x94] ss:$8 sps:$4 sm:$0xff] (!%p241_p3)  }
   0xd   : > { %595 = vmatprep.subr.bf16.mxu0 (!%p241_p3), %v1046_v4  ;;  %994 = vmatprep.subr.bf16.mxu1 (!%p241_p3), %v1046_v4  ;;  %v1069_v21 = vld [vmem:[%s1313_s1 + $0x90] ss:$8 sps:$4 sm:$0xff] (!%p241_p3)   ;;  %v1070_v22 = vld [vmem:[%s1313_s1 + $0xa4] ss:$8 sps:$4 sm:$0xff] (!%p241_p3)   ;;  %v1072_v23 = vld [vmem:[%s1313_s1 + $0xa0] ss:$8 sps:$4 sm:$0xff] (!%p241_p3)  }
   0xe   : > { %s1322_s21 = smov (!%p302_p4, %s942_s21), 15  ;;  %v1073_v24 = vld [vmem:[%s1313_s1 + $0xb4] ss:$8 sps:$4 sm:$0xff]   ;;  %v1075_v25 = vld [vmem:[%s1313_s1 + $0xb0] ss:$8 sps:$4 sm:$0xff]   ;;  %v718_v33 = vshrl.u32 %v717_v32, 7 }
   0xf   : > { %s989_s10 = sshll.u32 %s1322_s21, 3  ;;  %s990_s29 = sshll.u32 %s1322_s21, 4  ;;  %v715_v35 = vld [vmem:[%s1314_s2] sm:$0x3] }
  0x10   : > { %596 = vmatpush1.bf16.msra.mxu0 %v1048_v5  ;;  %1006 = vmatpush1.bf16.msra.mxu1 %v1048_v5  ;;  %s1188_s15 = scalar_lea.vmem %s1312_s0, %s989_s10  ;;  %v719_v34 = vsub.s32 0, %v718_v33  ;;  %v723_v36 = vsub.s32 1, %v718_v33  ;;  %s1254_s8 = scalar_lea.vmem %s1315_s3, %s990_s29 }
  0x11   : > { %597 = vmatprep.subr.bf16.mxu0 %v1049_v6  ;;  %995 = vmatprep.subr.bf16.mxu1 %v1049_v6  ;;  %v1078_v11 = vld [vmem:[%s1188_s15 + $0x4] ss:$8 sps:$4 sm:$0xff]   ;;  %v1076_v26 = vld [vmem:[%s1188_s15] ss:$8 sps:$4 sm:$0xff]   ;;  %v1082_v28 = vld [vmem:[%s1188_s15 + $0x14] ss:$8 sps:$4 sm:$0xff]   ;;  %s1265_s9 = scalar_lea.vmem %s1316_s4, %s990_s29 }
  0x12   : > { %v1081_v12 = vld [vmem:[%s1188_s15 + $0x24] ss:$8 sps:$4 sm:$0xff]   ;;  %983 = vmatprep.mubr.msk.bf16.mxu0 %vm578_vm0, %v1078_v11  ;;  %v1079_v27 = vld [vmem:[%s1188_s15 + $0x20] ss:$8 sps:$4 sm:$0xff]   ;;  %v1084_v29 = vld [vmem:[%s1188_s15 + $0x34] ss:$8 sps:$4 sm:$0xff]   ;;  %v720_v37 = vrot.slane %v715_v35, %v719_v34  ;;  %v1256_v38 = vrot.slane %v715_v35, %v723_v36 }
  0x13   : > { %985 = vmatprep.mubr.msk.bf16.mxu1 %vm578_vm0, %v1081_v12  ;;  %v1086_v30 = vld [vmem:[%s1188_s15 + $0x10] ss:$8 sps:$4 sm:$0xff]   ;;  %v743_v40 = vld [vmem:[%s1254_s8] sm:$0xff]  ;;  %v744_v46 = vld [vmem:[%s1254_s8 + $0x8] sm:$0xff] }
  0x14   : > { %598 = vmatpush1.bf16.msra.mxu0 %v1051_v7  ;;  %1007 = vmatpush1.bf16.msra.mxu1 %v1051_v7  ;;  %v1087_v31 = vld [vmem:[%s1188_s15 + $0x30] ss:$8 sps:$4 sm:$0xff]   ;;  %v751_v42 = vld [vmem:[%s1254_s8 + $0x40] sm:$0xff]  ;;  %v752_v48 = vld [vmem:[%s1254_s8 + $0x48] sm:$0xff] }
  0x15   : > { %599 = vmatprep.subr.bf16.mxu0 %v1052_v8  ;;  %996 = vmatprep.subr.bf16.mxu1 %v1052_v8  ;;  %v745_v52 = vld [vmem:[%s1254_s8 + $0x10] sm:$0xff]  ;;  %v746_v60 = vld [vmem:[%s1254_s8 + $0x18] sm:$0xff]  ;;  %v747_v8 = vld [vmem:[%s1254_s8 + $0x20] sm:$0xff] }
  0x16   : > { %v753_v54 = vld [vmem:[%s1254_s8 + $0x50] sm:$0xff]  ;;  %v754_v62 = vld [vmem:[%s1254_s8 + $0x58] sm:$0xff] }
  0x18   : > { %600 = vmatpush1.bf16.msra.mxu0 %v1054_v9  ;;  %1008 = vmatpush1.bf16.msra.mxu1 %v1054_v9 }
  0x19   : > { %601 = vmatprep.subr.bf16.mxu0 %v1055_v10  ;;  %997 = vmatprep.subr.bf16.mxu1 %v1055_v10  ;;  %v755_v10 = vld [vmem:[%s1254_s8 + $0x60] sm:$0xff] }
  0x1c   : > { %602 = vmatpush1.bf16.msra.mxu0 %v1057_v13  ;;  %1009 = vmatpush1.bf16.msra.mxu1 %v1057_v13 }
  0x1d   : > { %603 = vmatprep.subr.bf16.mxu0 %v1058_v14  ;;  %998 = vmatprep.subr.bf16.mxu1 %v1058_v14  ;;  %v748_v14 = vld [vmem:[%s1254_s8 + $0x28] sm:$0xff] }
  0x20   : > { %604 = vmatpush1.bf16.msra.mxu0 %v1060_v15  ;;  %1010 = vmatpush1.bf16.msra.mxu1 %v1060_v15 }
  0x21   : > { %605 = vmatprep.subr.bf16.mxu0 %v1061_v16  ;;  %999 = vmatprep.subr.bf16.mxu1 %v1061_v16  ;;  %v756_v16 = vld [vmem:[%s1254_s8 + $0x68] sm:$0xff] }
  0x24   : > { %606 = vmatpush1.bf16.msra.mxu0 %v1063_v17  ;;  %1011 = vmatpush1.bf16.msra.mxu1 %v1063_v17 }
  0x25   : > { %607 = vmatprep.subr.bf16.mxu0 %v1064_v18  ;;  %1000 = vmatprep.subr.bf16.mxu1 %v1064_v18 }
  0x28   : > { %608 = vmatpush1.bf16.msra.mxu0 %v1066_v19  ;;  %1012 = vmatpush1.bf16.msra.mxu1 %v1066_v19 }
  0x29   : > { %609 = vmatprep.subr.bf16.mxu0 %v1067_v20  ;;  %1001 = vmatprep.subr.bf16.mxu1 %v1067_v20  ;;  %v749_v20 = vld [vmem:[%s1254_s8 + $0x30] sm:$0xff] }
  0x2c   : > { %610 = vmatpush1.bf16.msra.mxu0 %v1069_v21  ;;  %1013 = vmatpush1.bf16.msra.mxu1 %v1069_v21 }
  0x2d   : > { %611 = vmatprep.subr.bf16.mxu0 %v1070_v22  ;;  %1002 = vmatprep.subr.bf16.mxu1 %v1070_v22  ;;  %v757_v22 = vld [vmem:[%s1254_s8 + $0x70] sm:$0xff] }
  0x30   : > { %612 = vmatpush1.bf16.msra.mxu0 %v1072_v23  ;;  %1014 = vmatpush1.bf16.msra.mxu1 %v1072_v23 }
  0x31   : > { %613 = vmatprep.subr.bf16.mxu0 %v1073_v24  ;;  %1003 = vmatprep.subr.bf16.mxu1 %v1073_v24 }
  0x34   : > { %614 = vmatpush1.bf16.msra.mxu0 %v1075_v25  ;;  %1015 = vmatpush1.bf16.msra.mxu1 %v1075_v25 }
  0x37   : > { %624 = vmatmul.mubr.bf16.vlgmr.msra.gmra.mrb[0].mxu0 %v1076_v26  ;;  %644 = vmatmul.mubr.bf16.vlgmr.msra.gmra.mrb[0].mxu1 %v1079_v27 }
  0x38   : > { %984 = vmatprep.mubr.msk.bf16.mxu0 %vm578_vm0, %v1082_v28  ;;  %986 = vmatprep.mubr.msk.bf16.mxu1 %vm578_vm0, %v1084_v29  ;;  %v750_v28 = vld [vmem:[%s1254_s8 + $0x38] sm:$0xff] }
  0x3f   : > { %634 = vmatmul.mubr.bf16.gmra.mrb[4].mxu0 %v1086_v30  ;;  %654 = vmatmul.mubr.bf16.gmra.mrb[4].mxu1 %v1087_v31  ;;  %v758_v30 = vld [vmem:[%s1254_s8 + $0x78] sm:$0xff] }
 0x10a   : > { %v625_v39 = vpop.f32.mrb[0].mxu0  ;;  %v645_v41 = vpop.f32.mrb[0].mxu1 }
 0x10b   : > { %v727_v43 = vadd.f32 %v720_v37, %v625_v39  ;;  %v735_v44 = vadd.f32 %v720_v37, %v645_v41  ;;  %v627_v45 = vpop.f32.mrb[1].mxu0  ;;  %v647_v47 = vpop.f32.mrb[1].mxu1 }
 0x10c   : > { %v728_v49 = vadd.f32 %v1256_v38, %v627_v45  ;;  %v736_v50 = vadd.f32 %v1256_v38, %v647_v47  ;;  %v629_v51 = vpop.f32.mrb[2].mxu0  ;;  %v649_v53 = vpop.f32.mrb[2].mxu1 }
 0x10d   : > { %v759_v55 = vadd.f32 %v743_v40, %v727_v43  ;;  %v767_v56 = vadd.f32 %v751_v42, %v735_v44  ;;  %v729_v57 = vadd.f32 %v720_v37, %v629_v51  ;;  %v737_v58 = vadd.f32 %v720_v37, %v649_v53  ;;  %v631_v59 = vpop.f32.mrb[3].mxu0  ;;  %v651_v61 = vpop.f32.mrb[3].mxu1 }
 0x10e   : > { %v760_v63 = vadd.f32 %v744_v46, %v728_v49  ;;  %v768_v0 = vadd.f32 %v752_v48, %v736_v50  ;;  %v730_v1 = vadd.f32 %v1256_v38, %v631_v59  ;;  %v738_v2 = vadd.f32 %v1256_v38, %v651_v61 }
 0x10f   : > { %775 = vst [vmem:[%s1265_s9] sm:$0xff] %v759_v55  ;;  %783 = vst [vmem:[%s1265_s9 + $0x40] sm:$0xff] %v767_v56  ;;  %v761_v3 = vadd.f32 %v745_v52, %v729_v57  ;;  %v769_v4 = vadd.f32 %v753_v54, %v737_v58 }
 0x110   : > { %776 = vst [vmem:[%s1265_s9 + $0x8] sm:$0xff] %v760_v63  ;;  %784 = vst [vmem:[%s1265_s9 + $0x48] sm:$0xff] %v768_v0  ;;  %v762_v5 = vadd.f32 %v746_v60, %v730_v1  ;;  %v770_v6 = vadd.f32 %v754_v62, %v738_v2 }
 0x111   : > { %777 = vst [vmem:[%s1265_s9 + $0x10] sm:$0xff] %v761_v3  ;;  %785 = vst [vmem:[%s1265_s9 + $0x50] sm:$0xff] %v769_v4 }
 0x112   : > { %778 = vst [vmem:[%s1265_s9 + $0x18] sm:$0xff] %v762_v5  ;;  %786 = vst [vmem:[%s1265_s9 + $0x58] sm:$0xff] %v770_v6  ;;  %v635_v7 = vpop.f32.mrb[4].mxu0  ;;  %v655_v9 = vpop.f32.mrb[4].mxu1 }
 0x113   : > { %v731_v11 = vadd.f32 %v720_v37, %v635_v7  ;;  %v739_v12 = vadd.f32 %v720_v37, %v655_v9  ;;  %v637_v13 = vpop.f32.mrb[5].mxu0  ;;  %v657_v15 = vpop.f32.mrb[5].mxu1 }
 0x114   : > { %v732_v17 = vadd.f32 %v1256_v38, %v637_v13  ;;  %v740_v18 = vadd.f32 %v1256_v38, %v657_v15  ;;  %v639_v19 = vpop.f32.mrb[6].mxu0  ;;  %v659_v21 = vpop.f32.mrb[6].mxu1 }
 0x115   : > { %v763_v23 = vadd.f32 %v747_v8, %v731_v11  ;;  %v771_v24 = vadd.f32 %v755_v10, %v739_v12  ;;  %v733_v25 = vadd.f32 %v720_v37, %v639_v19  ;;  %v741_v26 = vadd.f32 %v720_v37, %v659_v21  ;;  %v641_v27 = vpop.f32.mrb[7].mxu0  ;;  %v661_v29 = vpop.f32.mrb[7].mxu1 }
 0x116   : > { %v764_v31 = vadd.f32 %v748_v14, %v732_v17  ;;  %v772_v32 = vadd.f32 %v756_v16, %v740_v18  ;;  %v734_v33 = vadd.f32 %v1256_v38, %v641_v27  ;;  %v742_v34 = vadd.f32 %v1256_v38, %v661_v29 }
 0x117   : > { %779 = vst [vmem:[%s1265_s9 + $0x20] sm:$0xff] %v763_v23  ;;  %787 = vst [vmem:[%s1265_s9 + $0x60] sm:$0xff] %v771_v24  ;;  %v765_v35 = vadd.f32 %v749_v20, %v733_v25  ;;  %v773_v36 = vadd.f32 %v757_v22, %v741_v26 }
 0x118   : > { %780 = vst [vmem:[%s1265_s9 + $0x28] sm:$0xff] %v764_v31  ;;  %788 = vst [vmem:[%s1265_s9 + $0x68] sm:$0xff] %v772_v32  ;;  %v766_v37 = vadd.f32 %v750_v28, %v734_v33  ;;  %v774_v39 = vadd.f32 %v758_v30, %v742_v34 }
 0x119   : > { %781 = vst [vmem:[%s1265_s9 + $0x30] sm:$0xff] %v765_v35  ;;  %789 = vst [vmem:[%s1265_s9 + $0x70] sm:$0xff] %v773_v36 }
 0x11a   : > { %782 = vst [vmem:[%s1265_s9 + $0x38] sm:$0xff] %v766_v37  ;;  %790 = vst [vmem:[%s1265_s9 + $0x78] sm:$0xff] %v774_v39 }
 0x11b PF: > { %s14_s17 = sadd.s32 1, %s1110_s17   ;;  %s1317_s15 = smov %s1106_s16 }
 0x11c   : > { %p11_p5 = scmp.ge.s32.totalorder %s14_s17, 4   ;;  %s1318_s16 = smov %s1320_s18 }
 0x11e   :  { %13 = sbr.rel (!%p11_p5) target bundleno = 2 (0x2), region = 83 }

// kernel: sam_predictor_forward.15
= control target key start
LH: loop header
LB: loop body
LE: loop exit
PB: predicated region body
PF: predicated region fallthrough
CT: control target
= control target key end

     0   :  { %s2091_s0 = inlined_call_operand.vmem [shape: bf16[2,64,768], index: 0, kind: input, shape index: {}, may-alias: {0,1,2}]   ;;  %s2092_s1 = inlined_call_operand.vmem [shape: bf16[2,64,768], index: 1, kind: input, shape index: {}, may-alias: {0,1,2}]   ;;  %s2093_s2 = inlined_call_operand.vmem [shape: bf16[2,64,768], index: 2, kind: input, shape index: {}, may-alias: {0,1,2}]   ;;  %s2094_s3 = inlined_call_operand.vmem [shape: bf16[2,64,256], index: 3, kind: output, shape index: {}]  }
   0x1   :  { %2098 = sst [smem:[#allocation15_spill]] %s2092_s1 }
   0x2   :  { %2099 = sst [smem:[#allocation16_spill]] %s2093_s2 }
   0x3   :  { %2100 = sst [smem:[#allocation17_spill]] %s2094_s3 }
   0x4   :  { %s1697_s12 = smov 0   ;;  %s1699_s13 = smov 0  }
   0x5   :  { %s1701_s14 = smov 0   ;;  %s1703_s15 = smov 0  }
   0x6   :  { %s1705_s16 = smov 0   ;;  %s1707_s17 = smov 0  }
   0x7   :  { %s1709_s18 = smov 0   ;;  %s1711_s19 = smov 0  }
   0x8   :  { %s1713_s20 = smov 0   ;;  %s1715_s21 = smov 0  }
   0x9   :  { %s1717_s22 = smov 0   ;;  %s1719_s23 = smov 0  }
   0xa   :  { %s1721_s24 = smov 0  }
   0xb LB: > { %2101 = sst [smem:[#allocation9_spill]] %s1631_s14  ;;  %s28_s26 = sadd.s32 1, %s1659_s21  ;;  %s1671_s24 = sphi %s1721_s24, %s13_s24   ;;  %s1667_s23 = sphi %s1719_s23, %s2134_s23   ;;  %s1663_s22 = sphi %s1717_s22, %s2133_s22   ;;  %s1659_s21 = sphi %s1715_s21, %s2132_s21   ;;  %s1655_s20 = sphi %s1713_s20, %s2131_s20   ;;  %s1651_s19 = sphi %s1711_s19, %s2130_s19   ;;  %s1647_s18 = sphi %s1709_s18, %s2129_s18   ;;  %s1643_s17 = sphi %s1707_s17, %s2128_s17   ;;  %s1639_s16 = sphi %s1705_s16, %s2127_s16   ;;  %s1635_s15 = sphi %s1703_s15, %s2126_s15   ;;  %s1631_s14 = sphi %s1701_s14, %s2125_s14   ;;  %s1627_s13 = sphi %s1699_s13, %s2124_s13   ;;  %s1623_s12 = sphi %s1697_s12, %s2123_s12  }
   0xc   : > { %2102 = sst [smem:[#allocation10_spill]] %s1647_s18  ;;  %p29_p0 = scmp.ge.s32.totalorder %s28_s26, 2 }
   0xd   : > { %2103 = sst [smem:[#allocation11_spill]] %s1651_s19  ;;  %s35_s27 = sadd.s32 1, %s1663_s22 }
   0xe   : > { %2104 = sst [smem:[#allocation12_spill]] %s1655_s20  ;;  %s39_s28 = sadd.s32 1, %s1667_s23 }
   0xf   : > { %s50_s29 = sadd.s32 1, %s1643_s17  ;;  %s2136_s26 = smov (%p29_p0, %s28_s26), 0 }
  0x10   : > { %2105 = sst [smem:[#allocation13_spill]] %s2136_s26  ;;  %s2138_s27 = smov (!%p29_p0, %s35_s27), %s1663_s22 }
  0x11   : > { %p57_p1 = scmp.ne.s32.totalorder %s1643_s17, %s1639_s16  ;;  %p58_p2 = scmp.eq.s32.totalorder %s1671_s24, 0 }
  0x12   : > { %p37_p3 = scmp.ge.s32.totalorder %s2138_s27, 2  ;;  %s73_s30 = sadd.s32 2, %s1663_s22 }
  0x13   : > { %p1779_p4 = por %p58_p2, %p57_p1  ;;  %s76_s5 = ssub.s32 %s1659_s21, %s2136_s26 }
  0x14   : > { %s2140_s27 = smov (%p37_p3, %s2138_s27), 0  ;;  %s2142_s28 = smov (!%p37_p3, %s39_s28), %s1667_s23 }
  0x15   : > { %s46_s6 = ssub.s32 %s1663_s22, %s2140_s27  ;;  %s74_s7 = sadd.s32 2, %s2140_s27 }
  0x16   : > { %p41_p5 = scmp.ge.s32.totalorder %s2142_s28, 2  ;;  %s78_s8 = ssub.s32 %s73_s30, %s74_s7 }
  0x17   : > { %s82_s9 = sadd.s32 1, %s1635_s15  ;;  %p89_p6 = scmp.ne.s32.totalorder %s1635_s15, %s1631_s14 }
  0x18   : > { %s2144_s28 = smov (%p41_p5, %s2142_s28), 0  ;;  %s105_s11 = sadd.s32 4, %s1663_s22 }
  0x19   : > { %2107 = sst [smem:[#allocation14_spill]] %s2144_s28  ;;  %p1798_p7 = por %p89_p6, %p58_p2 }
  0x1a   : > { %s43_s25 = ssub.s32 %s1667_s23, %s2144_s28  ;;  %s106_s26 = sadd.s32 4, %s2140_s27 }
  0x1b   : > { %s47_s30 = sor.u32 %s46_s6, %s43_s25  ;;  %s77_s7 = sor.u32 %s76_s5, %s43_s25 }
  0x1c   : > { %p48_p8 = scmp.eq.s32.totalorder %s47_s30, 0  ;;  %s79_s3 = sor.u32 %s78_s8, %s77_s7 }
  0x1d   : > { %p80_p9 = scmp.eq.s32.totalorder %s79_s3, 0  ;;  %s110_s19 = ssub.s32 %s105_s11, %s106_s26 }
  0x1e   : > { %s1807_s20 = scalar_select %p48_p8, %s1643_s17, %s50_s29  }
  0x1f   : > { %s1810_s18 = scalar_select %p80_p9, %s1635_s15, %s82_s9  }
  0x20   : > { %s111_s14 = sor.u32 %s110_s19, %s77_s7  ;;  %s114_s2 = sadd.s32 1, %s1627_s13 }
  0x21   : > { %p112_p10 = scmp.eq.s32.totalorder %s111_s14, 0  ;;  %p121_p11 = scmp.ne.s32.totalorder %s1627_s13, %s1623_s12 }
  0x22   : > { %s2109_s1 = sadd.s32 4294967295, %s1671_s24   ;;  %p1286_p3 = scmp.ge.s32.totalorder %s1671_s24, 8 }
  0x23   : > { %p155_p12 = scmp.eq.s32.totalorder %s2109_s1, 7  ;;  %p1822_p13 = por %p121_p11, %p58_p2 }
  0x24   : > { %s1818_s28 = scalar_select %p112_p10, %s1627_s13, %s114_s2  }
  0x25   : > { %p1829_p0 = por %p155_p12, %p57_p1  ;;  %177 = sbr.rel (%p1286_p3) target bundleno = 80 (0x50), region = 16 }
  0x2c   : > { %180 = sbr.rel (!%p1779_p4) target bundleno = 56 (0x38), region = 20  ;;  %s182_s1 = sand.u32 (%p1779_p4), 1, %s1643_s17  }
  0x2d   : > { %s1400_s2 = smul.u32 (%p1779_p4), 48, %s1667_s23  ;;  %s1287_s14 = sshll.u32 (%p1779_p4), %s182_s1, 5 }
  0x2e   : > { %s184_s8 = scalar_lea.vmem (%p1779_p4), [#allocation5], %s1287_s14 }
  0x2f   : > { %s189_s19 = sadd.s32 (%p1779_p4), %s1663_s22, %s1400_s2 }
  0x30   : > { %s1288_s25 = sshll.u32 (%p1779_p4), %s189_s19, 2 }
  0x31   : > { %s191_s5 = scalar_lea.vmem (%p1779_p4), %s2091_s0, %s1288_s25 }
  0x32   : > { %v207_v0 = vld [vmem:[%s191_s5] sm:$0xf] (%p1779_p4)  ;;  %v209_v1 = vld [vmem:[%s191_s5 + $0x18] sm:$0xf] (%p1779_p4)  ;;  %v211_v2 = vld [vmem:[%s191_s5 + $0x30] sm:$0xf] (%p1779_p4) }
  0x33   : > { %208 = vst [vmem:[%s184_s8] sm:$0xf] %v207_v0  ;;  %210 = vst [vmem:[%s184_s8 + $0x4] sm:$0xf] %v209_v1  ;;  %v213_v3 = vld [vmem:[%s191_s5 + $0x48] sm:$0xf] }
  0x34   : > { %212 = vst [vmem:[%s184_s8 + $0x8] sm:$0xf] %v211_v2  ;;  %v215_v4 = vld [vmem:[%s191_s5 + $0x60] sm:$0xf]  ;;  %v217_v5 = vld [vmem:[%s191_s5 + $0x78] sm:$0xf] }
  0x35   : > { %214 = vst [vmem:[%s184_s8 + $0xc] sm:$0xf] %v213_v3  ;;  %216 = vst [vmem:[%s184_s8 + $0x10] sm:$0xf] %v215_v4  ;;  %v219_v6 = vld [vmem:[%s191_s5 + $0x90] sm:$0xf] }
  0x36   : > { %218 = vst [vmem:[%s184_s8 + $0x14] sm:$0xf] %v217_v5  ;;  %v221_v7 = vld [vmem:[%s191_s5 + $0xa8] sm:$0xf]  ;;  %220 = vst [vmem:[%s184_s8 + $0x18] sm:$0xf] %v219_v6 }
  0x37   : > { %222 = vst [vmem:[%s184_s8 + $0x1c] sm:$0xf] %v221_v7 }
  0x38 PF: > { %261 = sbr.rel (!%p1798_p7) target bundleno = 68 (0x44), region = 61  ;;  %s263_s4 = sand.u32 (%p1798_p7), 1, %s1635_s15  }
  0x39   : > { %s1174_s9 = smul.u32 (%p1798_p7), 24, %s1659_s21  ;;  %s1289_s11 = sshll.u32 (%p1798_p7), %s263_s4, 4 }
  0x3a   : > { %s1176_s30 = smul.u32 (%p1798_p7), 48, %s1667_s23  ;;  %s2112_s25 = sld [smem:[#allocation15_spill]] (%p1798_p7) }
  0x3b   : > { %s1175_s7 = sadd.s32 (%p1798_p7), %s1663_s22, %s1174_s9  ;;  %s265_s10 = scalar_lea.vmem (%p1798_p7), [#allocation6], %s1289_s11 }
  0x3c   : > { %s1177_s1 = sadd.s32 (%p1798_p7), %s1176_s30, %s1175_s7 }
  0x3d   : > { %s1290_s2 = sshll.u32 (%p1798_p7), %s1177_s1, 2 }
  0x40   : > { %s1179_s26 = scalar_lea.vmem %s2112_s25, %s1290_s2 }
  0x41   : > { %v1291_v8 = vld [vmem:[%s1179_s26 + $0x8] sm:$0xf]  ;;  %v1292_v9 = vld [vmem:[%s1179_s26 + $0x20] sm:$0xf]  ;;  %v1293_v10 = vld [vmem:[%s1179_s26 + $0x38] sm:$0xf] }
  0x42   : > { %290 = vst [vmem:[%s265_s10] sm:$0xf] %v1291_v8  ;;  %292 = vst [vmem:[%s265_s10 + $0x4] sm:$0xf] %v1292_v9  ;;  %v1294_v11 = vld [vmem:[%s1179_s26 + $0x50] sm:$0xf] }
  0x43   : > { %294 = vst [vmem:[%s265_s10 + $0x8] sm:$0xf] %v1293_v10  ;;  %296 = vst [vmem:[%s265_s10 + $0xc] sm:$0xf] %v1294_v11 }
  0x44 PF: > { %327 = sbr.rel (!%p1822_p13) target bundleno = 80 (0x50), region = 102  ;;  %s329_s29 = sand.u32 (%p1822_p13), 1, %s1627_s13  }
  0x45   : > { %s1183_s5 = smul.u32 (%p1822_p13), 24, %s1659_s21  ;;  %s1295_s8 = sshll.u32 (%p1822_p13), %s329_s29, 4 }
  0x46   : > { %s1185_s4 = smul.u32 (%p1822_p13), 48, %s1667_s23  ;;  %s2113_s2 = sld [smem:[#allocation16_spill]] (%p1822_p13) }
  0x47   : > { %s1184_s9 = sadd.s32 (%p1822_p13), %s1663_s22, %s1183_s5  ;;  %s331_s6 = scalar_lea.vmem (%p1822_p13), [#allocation7], %s1295_s8 }
  0x48   : > { %s1186_s30 = sadd.s32 (%p1822_p13), %s1185_s4, %s1184_s9 }
  0x49   : > { %s1296_s11 = sshll.u32 (%p1822_p13), %s1186_s30, 2 }
  0x4c   : > { %s1188_s14 = scalar_lea.vmem %s2113_s2, %s1296_s11 }
  0x4d   : > { %v1297_v12 = vld [vmem:[%s1188_s14 + $0x10] sm:$0xf]  ;;  %v1298_v13 = vld [vmem:[%s1188_s14 + $0x28] sm:$0xf]  ;;  %v1299_v14 = vld [vmem:[%s1188_s14 + $0x40] sm:$0xf] }
  0x4e   : > { %356 = vst [vmem:[%s331_s6] sm:$0xf] %v1297_v12  ;;  %358 = vst [vmem:[%s331_s6 + $0x4] sm:$0xf] %v1298_v13  ;;  %v1300_v15 = vld [vmem:[%s1188_s14 + $0x58] sm:$0xf] }
  0x4f   : > { %360 = vst [vmem:[%s331_s6 + $0x8] sm:$0xf] %v1299_v14  ;;  %362 = vst [vmem:[%s331_s6 + $0xc] sm:$0xf] %v1300_v15 }
  0x50 PF: > { %p1301_p1 = scmp.ge.s32.totalorder %s1671_s24, 1  ;;  %p392_p2 = scmp.lt.s32.totalorder %s1671_s24, 9 }
  0x52   : > { %p393_p4 = pnand %p1301_p1, %p392_p2 }
  0x53   : > { %s2114_s19 = sld [smem:[#allocation9_spill]] (!%p393_p4)  ;;  %s399_s25 = sand.u32 (!%p393_p4), 1, %s1639_s16  }
  0x54   : > { %396 = sbr.rel (%p393_p4) target bundleno = 969 (0x3c9), region = 143  ;;  %s1302_s10 = sshll.u32 (!%p393_p4), %s399_s25, 5 }
  0x55   : > { %s413_s5 = sand.u32 (!%p393_p4), 1, %s1623_s12   ;;  %s1869_s4 = scalar_lea.vmem (!%p393_p4), [#allocation5], %s1302_s10 }
  0x56   : > { %s1867_s8 = sshll.u32 (!%p393_p4), %s413_s5, 4  ;;  %s1873_s11 = scalar_lea.vmem (!%p393_p4), [#allocation8], %s1302_s10 }
  0x57   : > { %s415_s30 = scalar_lea.vmem (!%p393_p4), [#allocation7], %s1867_s8  ;;  %s2115_s7 = sld [smem:[#allocation10_spill]] (!%p393_p4) }
  0x59   : > { %s406_s26 = sand.u32 (!%p393_p4), 1, %s2114_s19  }
  0x5a   : > { %s1864_s29 = sshll.u32 (!%p393_p4), %s406_s26, 4 }
  0x5b   : > { %s408_s9 = scalar_lea.vmem [#allocation6], %s1864_s29 }
  0x5d   : > { %p1306_p5 = scmp.ne.s32.totalorder %s2115_s7, 0 }
  0x5e   : > { %vm454_vm0 = vcmask (!%p1306_p5), 7168   ;;  %v1673_v16 = vmov (!%p1306_p5), -inf   ;;  %v1674_v17 = vmov (!%p1306_p5), 0.0  }
  0x5f   : > { %453 = sbr.rel (%p1306_p5) target bundleno = 107 (0x6b), region = 159  ;;  %455 = vst.msk [vmem:[#allocation2] sm:$0xff] (!%p1306_p5), %vm454_vm0, %v1673_v16  ;;  %456 = vst.msk [vmem:[#allocation2 + $0x8] sm:$0xff] (!%p1306_p5), %vm454_vm0, %v1673_v16 }
  0x60   : > { %457 = vst.msk [vmem:[#allocation2 + $0x10] sm:$0xff] (!%p1306_p5), %vm454_vm0, %v1673_v16  ;;  %458 = vst.msk [vmem:[#allocation2 + $0x18] sm:$0xff] (!%p1306_p5), %vm454_vm0, %v1673_v16 }
  0x61   : > { %459 = vst.msk [vmem:[#allocation2 + $0x20] sm:$0xff] (!%p1306_p5), %vm454_vm0, %v1673_v16  ;;  %460 = vst.msk [vmem:[#allocation2 + $0x28] sm:$0xff] (!%p1306_p5), %vm454_vm0, %v1673_v16 }
  0x62   : > { %461 = vst.msk [vmem:[#allocation2 + $0x30] sm:$0xff] (!%p1306_p5), %vm454_vm0, %v1673_v16  ;;  %462 = vst.msk [vmem:[#allocation2 + $0x38] sm:$0xff] (!%p1306_p5), %vm454_vm0, %v1673_v16 }
  0x63   : > { %463 = vst.msk [vmem:[#allocation3] sm:$0xff] (!%p1306_p5), %vm454_vm0, %v1674_v17  ;;  %464 = vst.msk [vmem:[#allocation3 + $0x8] sm:$0xff] (!%p1306_p5), %vm454_vm0, %v1674_v17 }
  0x64   : > { %465 = vst.msk [vmem:[#allocation3 + $0x10] sm:$0xff] (!%p1306_p5), %vm454_vm0, %v1674_v17  ;;  %466 = vst.msk [vmem:[#allocation3 + $0x18] sm:$0xff] (!%p1306_p5), %vm454_vm0, %v1674_v17 }
  0x65   : > { %467 = vst.msk [vmem:[#allocation3 + $0x20] sm:$0xff] (!%p1306_p5), %vm454_vm0, %v1674_v17  ;;  %468 = vst.msk [vmem:[#allocation3 + $0x28] sm:$0xff] (!%p1306_p5), %vm454_vm0, %v1674_v17 }
  0x66   : > { %469 = vst.msk [vmem:[#allocation3 + $0x30] sm:$0xff] %vm454_vm0, %v1674_v17  ;;  %470 = vst.msk [vmem:[#allocation3 + $0x38] sm:$0xff] %vm454_vm0, %v1674_v17 }
  0x67   : > { %471 = vst [vmem:[#allocation4] sm:$0xff] %v1674_v17  ;;  %472 = vst [vmem:[#allocation4 + $0x8] sm:$0xff] %v1674_v17 }
  0x68   : > { %473 = vst [vmem:[#allocation4 + $0x10] sm:$0xff] %v1674_v17  ;;  %474 = vst [vmem:[#allocation4 + $0x18] sm:$0xff] %v1674_v17 }
  0x69   : > { %475 = vst [vmem:[#allocation4 + $0x20] sm:$0xff] %v1674_v17  ;;  %476 = vst [vmem:[#allocation4 + $0x28] sm:$0xff] %v1674_v17 }
  0x6a   : > { %477 = vst [vmem:[#allocation4 + $0x30] sm:$0xff] %v1674_v17  ;;  %478 = vst [vmem:[#allocation4 + $0x38] sm:$0xff] %v1674_v17 }
  0x6b PF: > { %v1511_v18 = vld [vmem:[%s408_s9] sm:$0xff]   ;;  %v1512_v19 = vld [vmem:[%s408_s9 + $0x8] sm:$0xff]   ;;  %vm604_vm1 = vcmask 261120   ;;  %v1675_v40 = vmov 0   ;;  %vm773_vm2 = vcmask 7168   ;;  %s2116_s12 = sld [smem:[#allocation10_spill]] }
  0x6c   : > { %1376 = vmatprep.subr.bf16.mxu0 %v1511_v18  ;;  %v1513_v20 = vld [vmem:[%s1869_s4] sm:$0xff]   ;;  %v1514_v21 = vld [vmem:[%s1869_s4 + $0x8] sm:$0xff]   ;;  %v1515_v22 = vld [vmem:[%s1869_s4 + $0x10] sm:$0xff]   ;;  %1509 = vset.pattern.permute.xlu0 %v1675_v40 }
  0x6d   : > { %1377 = vmatpush3.bf16.xpose.msra.mxu0 %v1511_v18  ;;  %1380 = vmatprep.mubr.bf16.mxu0 %v1513_v20  ;;  %v1516_v23 = vld [vmem:[%s1869_s4 + $0x18] sm:$0xff]   ;;  %v598_v41 = vld [vmem:[#allocation2 + $0x10] sm:$0xff]  ;;  %v596_v42 = vld [vmem:[#allocation2] sm:$0xff] }
  0x6e   : > { %1378 = vmatprep.subr.bf16.mxu0 %v1512_v19  ;;  %1510 = vset.pattern.permute.xlu1 %v1675_v40  ;;  %v599_v47 = vld [vmem:[#allocation2 + $0x18] sm:$0xff]  ;;  %v597_v48 = vld [vmem:[#allocation2 + $0x8] sm:$0xff]  ;;  %v600_v56 = vld [vmem:[#allocation2 + $0x20] sm:$0xff] }
  0x6f   : > { %v601_v59 = vld [vmem:[#allocation2 + $0x28] sm:$0xff]  ;;  %v1936_v62 = vld [vmem:[#allocation2 + $0x30] sm:$0xff]  ;;  %v1939_v2 = vld [vmem:[#allocation2 + $0x38] sm:$0xff] }
  0x70   : > { %v1517_v13 = vld [vmem:[%s415_s30] sm:$0xff]   ;;  %v1518_v17 = vld [vmem:[%s415_s30 + $0x8] sm:$0xff]  }
  0x71   : > { %1388 = vmatprep.subr.bf16.mxu1 %v1517_v13  ;;  %p1319_p6 = scmp.ne.s32.totalorder %s2116_s12, 1 }
  0x72   : > { %1389 = vmatpush3.bf16.msra.mxu1 %v1517_v13 }
  0x73   : > { %1390 = vmatprep.subr.bf16.mxu1 %v1518_v17 }
  0x75   : > { %1379 = vmatpush3.bf16.xpose.msra.mxu0 %v1512_v19 }
  0x76   : > { %1391 = vmatpush3.bf16.msra.mxu1 %v1518_v17  ;;  %v727_v17 = vld [vmem:[#allocation3 + $0x10] sm:$0xff] }
  0x7c   : > { %1381 = vmatmul.mubr.bf16.vlgmr.msra.gmra.mrb[0].mxu0 %v1514_v21 }
  0x7d   : > { %1384 = vmatprep.mubr.bf16.mxu0 %v1515_v22 }
  0x84   : > { %1385 = vmatmul.mubr.bf16.gmra.mrb[4].mxu0 %v1516_v23 }
 0x14f   : > { %v1900_v24 = vpop.f32.mrb[0].mxu0 }
 0x150   : > { %v1902_v25 = vpop.f32.mrb[1].mxu0  ;;  %v611_v26 = vsel %vm604_vm1, %v1900_v24, -inf }
 0x151   : > { %612 = vmax.xlane.f32.xlu1 %v611_v26  ;;  %v1906_v27 = vpop.f32.mrb[2].mxu0  ;;  %v605_v28 = vsel %vm604_vm1, %v1902_v25, -inf }
 0x152   : > { %606 = vmax.xlane.f32.xlu0 %v605_v28  ;;  %v1910_v29 = vpop.f32.mrb[3].mxu0  ;;  %v614_v30 = vsel %vm604_vm1, %v1906_v27, -inf }
 0x153   : > { %v608_v31 = vsel %vm604_vm1, %v1910_v29, -inf }
 0x155   : > { %615 = vmax.xlane.f32.xlu1 %v614_v30 }
 0x156   : > { %609 = vmax.xlane.f32.xlu0 %v608_v31 }
 0x157   : > { %v1916_v32 = vpop.f32.mrb[4].mxu0 }
 0x158   : > { %v1918_v33 = vpop.f32.mrb[5].mxu0  ;;  %v623_v38 = vsel %vm604_vm1, %v1916_v32, -inf }
 0x159   : > { %v1920_v34 = vpop.f32.mrb[6].mxu0  ;;  %v617_v35 = vsel %vm604_vm1, %v1918_v33, -inf }
 0x15a   : > { %618 = vmax.xlane.f32.xlu0 %v617_v35  ;;  %v1924_v36 = vpop.f32.mrb[7].mxu0  ;;  %v626_v39 = vsel %vm604_vm1, %v1920_v34, -inf }
 0x15b   : > { %v620_v37 = vsel %vm604_vm1, %v1924_v36, -inf }
 0x15c   : > { %621 = vmax.xlane.f32.xlu1 %v620_v37 }
 0x15e   : > { %624 = vmax.xlane.f32.xlu0 %v623_v38 }
 0x160   : > { %627 = vmax.xlane.f32.xlu1 %v626_v39 }
 0x1de   : > { %v613_v43 = vpop.xlane.xlu1 %612 }
 0x1df   : > { %v631_v44 = vmax.f32 %v598_v41, %v613_v43  ;;  %v607_v45 = vpop.xlane.xlu0 %606 }
 0x1e0   : > { %v629_v46 = vmax.f32 %v596_v42, %v607_v45 }
 0x1e1   : > { %949 = vst.msk [vmem:[#allocation2 + $0x10] sm:$0xff] %vm773_vm2, %v631_v44  ;;  %673 = vperm.xlu1 %1510, %v631_v44   ;;  %v639_v0 = vsub.f32 %v598_v41, %v631_v44 }
 0x1e2   : > { %v637_v49 = vsub.f32 %v596_v42, %v629_v46  ;;  %947 = vst.msk [vmem:[#allocation2] sm:$0xff] %vm773_vm2, %v629_v46  ;;  %v616_v50 = vpop.xlane.xlu1 %615  ;;  %663 = vperm.xlu0 %1509, %v629_v46  }
 0x1e3   : > { %v632_v51 = vmax.f32 %v599_v47, %v616_v50  ;;  %v610_v52 = vpop.xlane.xlu0 %609  ;;  %v649_v9 = vmul.f32 1.442695, %v639_v0 }
 0x1e4   : > { %v645_v53 = vmul.f32 1.442695, %v637_v49  ;;  %v630_v54 = vmax.f32 %v597_v48, %v610_v52 }
 0x1e5   : > { %v640_v55 = vsub.f32 %v599_v47, %v632_v51  ;;  %950 = vst.msk [vmem:[#allocation2 + $0x18] sm:$0xff] %vm773_vm2, %v632_v51  ;;  %678 = vperm.xlu1 %1510, %v632_v51  }
 0x1e6   : > { %1519 = vpow2.f32 %v645_v53  ;;  %948 = vst.msk [vmem:[#allocation2 + $0x8] sm:$0xff] %vm773_vm2, %v630_v54  ;;  %v638_v10 = vsub.f32 %v597_v48, %v630_v54 }
 0x1e7   : > { %v651_v57 = vmul.f32 1.442695, %v640_v55  ;;  %v619_v58 = vpop.xlane.xlu0 %618 }
 0x1e8   : > { %v633_v60 = vmax.f32 %v600_v56, %v619_v58  ;;  %v647_v15 = vmul.f32 1.442695, %v638_v10 }
 0x1e9   : > { %1521 = vpow2.f32 %v651_v57  ;;  %668 = vperm.xlu1 %1510, %v630_v54   ;;  %v622_v61 = vpop.xlane.xlu1 %621 }
 0x1ea   : > { %951 = vst.msk [vmem:[#allocation2 + $0x20] sm:$0xff] %vm773_vm2, %v633_v60  ;;  %v634_v63 = vmax.f32 %v601_v59, %v622_v61  ;;  %v641_v16 = vsub.f32 %v600_v56, %v633_v60 }
 0x1eb   : > { %v625_v1 = vpop.xlane.xlu0 %624 }
 0x1ec   : > { %v642_v3 = vsub.f32 %v601_v59, %v634_v63  ;;  %952 = vst.msk [vmem:[#allocation2 + $0x28] sm:$0xff] %vm773_vm2, %v634_v63  ;;  %v1943_v4 = vmax.f32 %v1936_v62, %v625_v1  ;;  %v653_v18 = vmul.f32 1.442695, %v641_v16 }
 0x1ed   : > { %v628_v5 = vpop.xlane.xlu1 %627 }
 0x1ee   : > { %v655_v6 = vmul.f32 1.442695, %v642_v3  ;;  %v643_v7 = vsub.f32 %v1936_v62, %v1943_v4  ;;  %953 = vst.msk [vmem:[#allocation2 + $0x30] sm:$0xff] %vm773_vm2, %v1943_v4  ;;  %v1950_v8 = vmax.f32 %v1939_v2, %v628_v5  ;;  %693 = vperm.xlu1 %1510, %v1943_v4  }
 0x1f0   : > { %v1953_v11 = vpop.eup %1519  ;;  %1523 = vpow2.f32 %v655_v6  ;;  %v644_v12 = vsub.f32 %v1939_v2, %v1950_v8  ;;  %954 = vst.msk [vmem:[#allocation2 + $0x38] sm:$0xff] %vm773_vm2, %v1950_v8 }
 0x1f1   : > { %792 = vperm.xlu0 %1509, %v1953_v11   ;;  %1525 = vpow2.f32 %v649_v9  ;;  %v657_v9 = vmul.f32 1.442695, %v643_v7 }
 0x1f2   : > { %683 = vperm.xlu1 %1510, %v633_v60   ;;  %1527 = vpow2.f32 %v647_v15 }
 0x1f3   : > { %v1962_v14 = vpop.eup %1521  ;;  %1529 = vpow2.f32 %v653_v18 }
 0x1f5   : > { %807 = vperm.xlu0 %1509, %v1962_v14  }
 0x1f6   : > { %688 = vperm.xlu1 %1510, %v634_v63  }
 0x1fa   : > { %v1967_v19 = vpop.eup %1523  ;;  %698 = vperm.xlu1 %1510, %v1950_v8  }
 0x1fb   : > { %817 = vperm.xlu0 %1509, %v1967_v19   ;;  %v1971_v20 = vpop.eup %1525 }
 0x1fc   : > { %v1974_v21 = vpop.eup %1527 }
 0x1fd   : > { %v1977_v22 = vpop.eup %1529 }
 0x1fe   : > { %802 = vperm.xlu1 %1510, %v1971_v20  }
 0x202   : > { %797 = vperm.xlu1 %1510, %v1974_v21  }
 0x206   : > { %812 = vperm.xlu1 %1510, %v1977_v22  }
 0x260   : > { %v674_v23 = vpop.permute.xlu1 %673 }
 0x261   : > { %v703_v26 = vsub.f32 %v1900_v24, %v674_v23  ;;  %v664_v28 = vpop.permute.xlu0 %663  ;;  %v725_v23 = vld [vmem:[#allocation3] sm:$0xff] }
 0x262   : > { %v701_v30 = vsub.f32 %v1902_v25, %v664_v28  ;;  %v733_v62 = vmul.f32 %v1953_v11, %v725_v23  ;;  %v731_v11 = vld [vmem:[#allocation3 + $0x30] sm:$0xff] }
 0x263   : > { %v713_v31 = vmul.f32 1.442695, %v703_v26  ;;  %v735_v26 = vmul.f32 %v1971_v20, %v727_v17 }
 0x264   : > { %v709_v35 = vmul.f32 1.442695, %v701_v30  ;;  %v679_v37 = vpop.permute.xlu1 %678  ;;  %v728_v30 = vld [vmem:[#allocation3 + $0x18] sm:$0xff] }
 0x265   : > { %1531 = vpow2.f32 %v713_v31  ;;  %v704_v38 = vsub.f32 %v1906_v27, %v679_v37  ;;  %v726_v37 = vld [vmem:[#allocation3 + $0x8] sm:$0xff] }
 0x266   : > { %1533 = vpow2.f32 %v709_v35  ;;  %v736_v35 = vmul.f32 %v1962_v14, %v728_v30 }
 0x267   : > { %v715_v39 = vmul.f32 1.442695, %v704_v38 }
 0x268   : > { %v669_v40 = vpop.permute.xlu1 %668 }
 0x269   : > { %1535 = vpow2.f32 %v715_v39  ;;  %v702_v41 = vsub.f32 %v1910_v29, %v669_v40  ;;  %v734_v40 = vmul.f32 %v1974_v21, %v726_v37  ;;  %v732_v21 = vld [vmem:[#allocation3 + $0x38] sm:$0xff] }
 0x26b   : > { %v711_v42 = vmul.f32 1.442695, %v702_v41 }
 0x26d   : > { %1537 = vpow2.f32 %v711_v42  ;;  %v694_v43 = vpop.permute.xlu1 %693 }
 0x26e   : > { %v707_v24 = vsub.f32 %v1916_v32, %v694_v43 }
 0x26f   : > { %v1532_v44 = vpop.eup %1531 }
 0x270   : > { %v1534_v45 = vpop.eup %1533  ;;  %v721_v25 = vmul.f32 1.442695, %v707_v24  ;;  %v747_v46 = vsel %vm604_vm1, %v1532_v44, 0.0  ;;  %v793_v8 = vpop.permute.xlu0 %792  ;;  %v729_v24 = vld [vmem:[#allocation3 + $0x20] sm:$0xff] }
 0x271   : > { %748 = vadd.xlane.f32.xlu0 %v747_v46  ;;  %v684_v47 = vpop.permute.xlu1 %683  ;;  %v741_v27 = vsel %vm604_vm1, %v1534_v45, 0.0  ;;  %v737_v14 = vmul.f32 %v1977_v22, %v729_v24  ;;  %v785_v22 = vld [vmem:[#allocation4 + $0x18] sm:$0xff] }
 0x272   : > { %1539 = vpow2.f32 %v721_v25  ;;  %v705_v48 = vsub.f32 %v1918_v33, %v684_v47  ;;  %742 = vadd.xlane.f32.xlu1 %v741_v27  ;;  %v730_v27 = vld [vmem:[#allocation3 + $0x28] sm:$0xff] }
 0x273   : > { %v1536_v49 = vpop.eup %1535 }
 0x274   : > { %v717_v29 = vmul.f32 1.442695, %v705_v48  ;;  %v750_v50 = vsel %vm604_vm1, %v1536_v49, 0.0  ;;  %v839_v51 = vpack.c.bf16 %v1536_v49, %v1532_v44  ;;  %v808_v15 = vpop.permute.xlu0 %807  ;;  %v738_v49 = vmul.f32 %v1967_v19, %v730_v27 }
 0x275   : > { %v689_v52 = vpop.permute.xlu1 %688 }
 0x276   : > { %1541 = vpow2.f32 %v717_v29  ;;  %v706_v32 = vsub.f32 %v1924_v36, %v689_v52  ;;  %751 = vadd.xlane.f32.xlu1 %v750_v50  ;;  %v782_v52 = vld [vmem:[#allocation4] sm:$0xff] }
 0x277   : > { %v1538_v53 = vpop.eup %1537 }
 0x278   : > { %v719_v54 = vmul.f32 1.442695, %v706_v32  ;;  %v744_v55 = vsel %vm604_vm1, %v1538_v53, 0.0  ;;  %v838_v56 = vpack.c.bf16 %v1538_v53, %v1534_v45  ;;  %v783_v53 = vld [vmem:[#allocation4 + $0x8] sm:$0xff] }
 0x279   : > { %745 = vadd.xlane.f32.xlu0 %v744_v55  ;;  %v699_v57 = vpop.permute.xlu1 %698 }
 0x27a   : > { %1543 = vpow2.f32 %v719_v54  ;;  %v708_v33 = vsub.f32 %v1920_v34, %v699_v57  ;;  %1392 = vmatprep.mubr.msk.bf16.mxu1 %vm604_vm1, %v838_v56  ;;  %v659_v34 = vmul.f32 1.442695, %v644_v12  ;;  %v2006_v16 = vpop.permute.xlu0 %817  ;;  %v830_v54 = vmul.f32 %v793_v8, %v782_v52 }
 0x27b   : > { %1393 = vmatmul.mubr.msk.bf16.vlgmr.msra.gmra.mrb[0].mxu1 %vm604_vm1, %v839_v51  ;;  %v784_v51 = vld [vmem:[#allocation4 + $0x10] sm:$0xff]  ;;  %v833_v56 = vmul.f32 %v808_v15, %v785_v22 }
 0x27c   : > { %v1540_v58 = vpop.eup %1539  ;;  %v723_v59 = vmul.f32 1.442695, %v708_v33 }
 0x27d   : > { %v759_v60 = vsel %vm604_vm1, %v1540_v58, 0.0  ;;  %v803_v2 = vpop.permute.xlu1 %802 }
 0x27e   : > { %1545 = vpow2.f32 %v723_v59  ;;  %760 = vadd.xlane.f32.xlu0 %v759_v60  ;;  %v832_v32 = vmul.f32 %v803_v2, %v784_v51 }
 0x27f   : > { %1547 = vpow2.f32 %v659_v34  ;;  %v789_v34 = vld [vmem:[#allocation4 + $0x38] sm:$0xff] }
 0x280   : > { %v1542_v36 = vpop.eup %1541  ;;  %1549 = vpow2.f32 %v657_v9 }
 0x281   : > { %v753_v61 = vsel %vm604_vm1, %v1542_v36, 0.0  ;;  %v798_v12 = vpop.permute.xlu1 %797 }
 0x282   : > { %754 = vadd.xlane.f32.xlu0 %v753_v61 }
 0x284   : > { %v1544_v63 = vpop.eup %1543 }
 0x285   : > { %v840_v0 = vpack.c.bf16 %v1544_v63, %v1542_v36  ;;  %v756_v6 = vsel %vm604_vm1, %v1544_v63, 0.0  ;;  %v2008_v18 = vpop.permute.xlu1 %812  ;;  %v788_v63 = vld [vmem:[#allocation4 + $0x30] sm:$0xff] }
 0x287   : > { %1396 = vmatprep.mubr.msk.bf16.mxu1 %vm604_vm1, %v840_v0 }
 0x288   : > { %v1546_v1 = vpop.eup %1545 }
 0x289   : > { %v762_v3 = vsel %vm604_vm1, %v1546_v1, 0.0  ;;  %v841_v5 = vpack.c.bf16 %v1546_v1, %v1540_v58  ;;  %v1548_v10 = vpop.eup %1547  ;;  %v831_v58 = vmul.f32 %v798_v12, %v783_v53  ;;  %v786_v1 = vld [vmem:[#allocation4 + $0x20] sm:$0xff] }
 0x28a   : > { %763 = vadd.xlane.f32.xlu1 %v762_v3  ;;  %v1550_v13 = vpop.eup %1549  ;;  %v740_v46 = vmul.f32 %v1548_v10, %v732_v21  ;;  %v834_v9 = vmul.f32 %v2008_v18, %v786_v1 }
 0x28b   : > { %1397 = vmatmul.mubr.msk.bf16.gmra.mrb[4].mxu1 %vm604_vm1, %v841_v5  ;;  %v739_v42 = vmul.f32 %v1550_v13, %v731_v11  ;;  %v787_v5 = vld [vmem:[#allocation4 + $0x28] sm:$0xff] }
 0x28c   : > { %v835_v12 = vmul.f32 %v2006_v16, %v787_v5 }
 0x28e   : > { %757 = vadd.xlane.f32.xlu1 %v756_v6 }
 0x298   : > { %827 = vperm.xlu0 %1509, %v1548_v10  }
 0x29f   : > { %822 = vperm.xlu1 %1510, %v1550_v13  }
 0x2fe   : > { %v749_v28 = vpop.xlane.xlu0 %748 }
 0x2ff   : > { %v767_v4 = vadd.f32 %v749_v28, %v735_v26  ;;  %v743_v7 = vpop.xlane.xlu1 %742 }
 0x300   : > { %v765_v31 = vadd.f32 %v743_v7, %v733_v62  ;;  %v1676_v7 = vmov (!%p1319_p6), 0  }
 0x301   : > { %776 = vst.msk [vmem:[#allocation3 + $0x10] sm:$0xff] %vm773_vm2, %v767_v4  ;;  %1552 = vset.pattern.permute.xlu1 (!%p1319_p6), %v1676_v7  ;;  %1551 = vset.pattern.permute.xlu0 (!%p1319_p6), %v1676_v7 }
 0x302   : > { %774 = vst.msk [vmem:[#allocation3] sm:$0xff] %vm773_vm2, %v765_v31 }
 0x303   : > { %v752_v38 = vpop.xlane.xlu1 %751 }
 0x304   : > { %v768_v39 = vadd.f32 %v752_v38, %v736_v35 }
 0x306   : > { %777 = vst.msk [vmem:[#allocation3 + $0x18] sm:$0xff] %vm773_vm2, %v768_v39  ;;  %v746_v20 = vpop.xlane.xlu0 %745 }
 0x307   : > { %v766_v41 = vadd.f32 %v746_v20, %v734_v40 }
 0x308   : > { %v961_v62 = vld [vmem:[#allocation3 + $0x10] sm:$0xff] (!%p1319_p6) }
 0x309   : > { %775 = vst.msk [vmem:[#allocation3 + $0x8] sm:$0xff] %vm773_vm2, %v766_v41  ;;  %v959_v18 = vld [vmem:[#allocation3] sm:$0xff] (!%p1319_p6)  ;;  %1553 = vrcp.f32 (!%p1319_p6), %v961_v62 }
 0x30a   : > { %1555 = vrcp.f32 (!%p1319_p6), %v959_v18 }
 0x30b   : > { %v761_v43 = vpop.xlane.xlu0 %760 }
 0x30c   : > { %v771_v44 = vadd.f32 %v761_v43, %v739_v42 }
 0x30d   : > { %v962_v4 = vld [vmem:[#allocation3 + $0x18] sm:$0xff] (!%p1319_p6) }
 0x30e   : > { %780 = vst.msk [vmem:[#allocation3 + $0x30] sm:$0xff] %vm773_vm2, %v771_v44  ;;  %1557 = vrcp.f32 (!%p1319_p6), %v962_v4 }
 0x30f   : > { %v755_v45 = vpop.xlane.xlu0 %754 }
 0x310   : > { %v769_v25 = vadd.f32 %v755_v45, %v737_v14  ;;  %v960_v16 = vld [vmem:[#allocation3 + $0x8] sm:$0xff] (!%p1319_p6) }
 0x311   : > { %1559 = vrcp.f32 (!%p1319_p6), %v960_v16 }
 0x312   : > { %778 = vst.msk [vmem:[#allocation3 + $0x20] sm:$0xff] %vm773_vm2, %v769_v25 }
 0x313   : > { %v1554_v38 = vpop.eup (!%p1319_p6), %1553 }
 0x314   : > { %v1556_v39 = vpop.eup (!%p1319_p6), %1555  ;;  %995 = vperm.xlu1 (!%p1319_p6), %1552, %v1554_v38  }
 0x315   : > { %v965_v37 = vld [vmem:[#allocation3 + $0x30] sm:$0xff] (!%p1319_p6)  ;;  %985 = vperm.xlu0 (!%p1319_p6), %1551, %v1556_v39  }
 0x317   : > { %v764_v47 = vpop.xlane.xlu1 %763  ;;  %v828_v3 = vpop.permute.xlu0 %827 }
 0x318   : > { %v772_v48 = vadd.f32 %v764_v47, %v740_v46  ;;  %v837_v13 = vmul.f32 %v828_v3, %v789_v34  ;;  %v1558_v40 = vpop.eup (!%p1319_p6), %1557 }
 0x319   : > { %v963_v31 = vld [vmem:[#allocation3 + $0x20] sm:$0xff] (!%p1319_p6)  ;;  %1000 = vperm.xlu1 (!%p1319_p6), %1552, %v1558_v40  }
 0x31a   : > { %781 = vst.msk [vmem:[#allocation3 + $0x38] sm:$0xff] %vm773_vm2, %v772_v48 }
 0x31b   : > { %v758_v29 = vpop.xlane.xlu1 %757  ;;  %v1560_v20 = vpop.eup (!%p1319_p6), %1559 }
 0x31c   : > { %v770_v50 = vadd.f32 %v758_v29, %v738_v49  ;;  %990 = vperm.xlu0 (!%p1319_p6), %1551, %v1560_v20  }
 0x31e   : > { %779 = vst.msk [vmem:[#allocation3 + $0x28] sm:$0xff] %vm773_vm2, %v770_v50 }
 0x31f   : > { %v823_v0 = vpop.permute.xlu1 %822 }
 0x320   : > { %v836_v6 = vmul.f32 %v823_v0, %v788_v63 }
 0x321   : > { %v966_v35 = vld [vmem:[#allocation3 + $0x38] sm:$0xff] (!%p1319_p6) }
 0x325   : > { %v964_v30 = vld [vmem:[#allocation3 + $0x28] sm:$0xff] (!%p1319_p6) }
 0x326   : > { %1561 = vrcp.f32 (!%p1319_p6), %v964_v30 }
 0x327   : > { %1563 = vrcp.f32 (!%p1319_p6), %v963_v31 }
 0x328   : > { %1565 = vrcp.f32 (!%p1319_p6), %v966_v35 }
 0x329   : > { %1567 = vrcp.f32 (!%p1319_p6), %v965_v37 }
 0x330   : > { %v1562_v41 = vpop.eup (!%p1319_p6), %1561 }
 0x331   : > { %v1564_v11 = vpop.eup (!%p1319_p6), %1563  ;;  %1010 = vperm.xlu1 (!%p1319_p6), %1552, %v1562_v41  }
 0x332   : > { %v1566_v42 = vpop.eup (!%p1319_p6), %1565  ;;  %1005 = vperm.xlu0 (!%p1319_p6), %1551, %v1564_v11  }
 0x333   : > { %v1568_v43 = vpop.eup (!%p1319_p6), %1567 }
 0x335   : > { %1020 = vperm.xlu1 (!%p1319_p6), %1552, %v1566_v42  }
 0x336   : > { %1015 = vperm.xlu0 (!%p1319_p6), %1551, %v1568_v43  }
 0x34e   : > { %v1394_v55 = vpop.f32.mrb[0].mxu1 }
 0x34f   : > { %v933_v57 = vadd.f32 %v1394_v55, %v832_v32  ;;  %v900_v33 = vpop.f32.mrb[1].mxu1 }
 0x350   : > { %v931_v59 = vadd.f32 %v900_v33, %v830_v54  ;;  %v1395_v60 = vpop.f32.mrb[2].mxu1 }
 0x351   : > { %941 = vst [vmem:[#allocation4 + $0x10] sm:$0xff] %v933_v57  ;;  %v934_v36 = vadd.f32 %v1395_v60, %v833_v56  ;;  %v903_v19 = vpop.f32.mrb[3].mxu1 }
 0x352   : > { %939 = vst [vmem:[#allocation4] sm:$0xff] %v931_v59  ;;  %v932_v61 = vadd.f32 %v903_v19, %v831_v58 }
 0x353   : > { %942 = vst [vmem:[#allocation4 + $0x18] sm:$0xff] %v934_v36 }
 0x354   : > { %940 = vst [vmem:[#allocation4 + $0x8] sm:$0xff] %v932_v61 }
 0x358   : > { %v977_v14 = vld [vmem:[#allocation4 + $0x10] sm:$0xff] (!%p1319_p6) }
 0x359   : > { %v975_v25 = vld [vmem:[#allocation4] sm:$0xff] (!%p1319_p6) }
 0x35a   : > { %v978_v45 = vld [vmem:[#allocation4 + $0x18] sm:$0xff] (!%p1319_p6) }
 0x35b   : > { %v976_v21 = vld [vmem:[#allocation4 + $0x8] sm:$0xff] (!%p1319_p6) }
 0x35e   : > { %v1398_v10 = vpop.f32.mrb[4].mxu1  ;;  %958 = sbr.rel (%p1319_p6) target bundleno = 955 (0x3bb), region = 163 }
 0x35f   : > { %v937_v2 = vadd.f32 %v1398_v10, %v836_v6  ;;  %v916_v8 = vpop.f32.mrb[5].mxu1 }
 0x360   : > { %v935_v15 = vadd.f32 %v916_v8, %v834_v9  ;;  %v1399_v17 = vpop.f32.mrb[6].mxu1 }
 0x361   : > { %945 = vst [vmem:[#allocation4 + $0x30] sm:$0xff] %v937_v2  ;;  %v938_v23 = vadd.f32 %v1399_v17, %v837_v13  ;;  %v919_v26 = vpop.f32.mrb[7].mxu1 }
 0x362   : > { %943 = vst [vmem:[#allocation4 + $0x20] sm:$0xff] %v935_v15  ;;  %v936_v28 = vadd.f32 %v919_v26, %v835_v12 }
 0x363   : > { %946 = vst [vmem:[#allocation4 + $0x38] sm:$0xff] %v938_v23 }
 0x364   : > { %944 = vst [vmem:[#allocation4 + $0x28] sm:$0xff] %v936_v28 }
 0x368   : > { %v981_v57 = vld [vmem:[#allocation4 + $0x30] sm:$0xff] }
 0x369   : > { %v979_v52 = vld [vmem:[#allocation4 + $0x20] sm:$0xff] }
 0x36a   : > { %v982_v56 = vld [vmem:[#allocation4 + $0x38] sm:$0xff] }
 0x36b   : > { %v980_v50 = vld [vmem:[#allocation4 + $0x28] sm:$0xff] }
 0x393   : > { %v996_v24 = vpop.permute.xlu1 %995 }
 0x394   : > { %v986_v44 = vpop.permute.xlu0 %985  ;;  %v1025_v47 = vmul.f32 %v996_v24, %v977_v14 }
 0x395   : > { %v1023_v49 = vmul.f32 %v986_v44, %v975_v25 }
 0x398   : > { %v1001_v46 = vpop.permute.xlu1 %1000 }
 0x399   : > { %v1026_v27 = vmul.f32 %v1001_v46, %v978_v45 }
 0x39b   : > { %v991_v48 = vpop.permute.xlu0 %990  ;;  %v1349_v51 = vpack.c.bf16 %v1026_v27, %v1025_v47 }
 0x39c   : > { %v1024_v29 = vmul.f32 %v991_v48, %v976_v21 }
 0x39d   : > { %1361 = vst [vmem:[%s1873_s11 + $0x8] sm:$0xff] %v1349_v51  }
 0x39e   : > { %v1344_v22 = vpack.c.bf16 %v1024_v29, %v1023_v49 }
 0x3a0   : > { %1345 = vst [vmem:[%s1873_s11] sm:$0xff] %v1344_v22  }
 0x3b0   : > { %v1011_v32 = vpop.permute.xlu1 %1010 }
 0x3b1   : > { %v1028_v53 = vmul.f32 %v1011_v32, %v980_v50  ;;  %v1006_v54 = vpop.permute.xlu0 %1005 }
 0x3b2   : > { %v1027_v55 = vmul.f32 %v1006_v54, %v979_v52 }
 0x3b4   : > { %v1354_v33 = vpack.c.bf16 %v1028_v53, %v1027_v55  ;;  %v1021_v58 = vpop.permute.xlu1 %1020 }
 0x3b5   : > { %v1030_v59 = vmul.f32 %v1021_v58, %v982_v56  ;;  %v1016_v60 = vpop.permute.xlu0 %1015 }
 0x3b6   : > { %1362 = vst [vmem:[%s1873_s11 + $0x10] sm:$0xff] %v1354_v33   ;;  %v1029_v36 = vmul.f32 %v1016_v60, %v981_v57 }
 0x3b8   : > { %v1359_v19 = vpack.c.bf16 %v1030_v59, %v1029_v36 }
 0x3ba   : > { %1363 = vst [vmem:[%s1873_s11 + $0x18] sm:$0xff] %v1359_v19  }
 0x3bb PF: > { %1077 = sbr.rel (!%p1829_p0) target bundleno = 969 (0x3c9), region = 167  ;;  %s2117_s16 = sld [smem:[#allocation12_spill]] (%p1829_p0)  ;;  %v1100_v61 = vld [vmem:[%s1873_s11] sm:$0xf] (%p1829_p0)  ;;  %v1102_v63 = vld [vmem:[%s1873_s11 + $0x4] sm:$0xf] (%p1829_p0) }
 0x3bc   : > { %s2118_s1 = sld [smem:[#allocation11_spill]] (%p1829_p0)  ;;  %v1104_v0 = vld [vmem:[%s1873_s11 + $0x8] sm:$0xf] (%p1829_p0)  ;;  %v1106_v1 = vld [vmem:[%s1873_s11 + $0xc] sm:$0xf] (%p1829_p0)  ;;  %s2119_s25 = sld [smem:[#allocation17_spill]] (%p1829_p0) }
 0x3bd   : > { %v1108_v34 = vld [vmem:[%s1873_s11 + $0x10] sm:$0xf] (%p1829_p0)  ;;  %v1110_v3 = vld [vmem:[%s1873_s11 + $0x14] sm:$0xf] (%p1829_p0) }
 0x3c1   : > { %s1329_s2 = sshll.u32 (%p1829_p0), %s2117_s16, 4  ;;  %v1112_v5 = vld [vmem:[%s1873_s11 + $0x18] sm:$0xf] (%p1829_p0)  ;;  %v1114_v6 = vld [vmem:[%s1873_s11 + $0x1c] sm:$0xf] (%p1829_p0) }
 0x3c2   : > { %s1082_s14 = sadd.s32 %s2118_s1, %s1329_s2 }
 0x3c3   : > { %s1330_s6 = sshll.u32 %s1082_s14, 2 }
 0x3c4   : > { %s1084_s26 = scalar_lea.vmem %s2119_s25, %s1330_s6 }
 0x3c5   : > { %1101 = vst [vmem:[%s1084_s26] sm:$0xf] %v1100_v61  ;;  %1103 = vst [vmem:[%s1084_s26 + $0x8] sm:$0xf] %v1102_v63 }
 0x3c6   : > { %1105 = vst [vmem:[%s1084_s26 + $0x10] sm:$0xf] %v1104_v0  ;;  %1107 = vst [vmem:[%s1084_s26 + $0x18] sm:$0xf] %v1106_v1 }
 0x3c7   : > { %1109 = vst [vmem:[%s1084_s26 + $0x20] sm:$0xf] %v1108_v34  ;;  %1111 = vst [vmem:[%s1084_s26 + $0x28] sm:$0xf] %v1110_v3 }
 0x3c8   : > { %1113 = vst [vmem:[%s1084_s26 + $0x30] sm:$0xf] %v1112_v5  ;;  %1115 = vst [vmem:[%s1084_s26 + $0x38] sm:$0xf] %v1114_v6 }
 0x3c9 PF: > { %s13_s24 = sadd.s32 1, %s1671_s24   ;;  %s2121_s29 = sld [smem:[#allocation13_spill]] }
 0x3ca   : > { %p2047_p7 = scmp.ge.s32.totalorder %s13_s24, 10   ;;  %s2122_s5 = sld [smem:[#allocation14_spill]] }
 0x3cb   : > { %s2123_s12 = smov %s1627_s13  ;;  %s2124_s13 = smov %s1818_s28 }
 0x3cc   : > { %s2125_s14 = smov %s1635_s15  ;;  %s2126_s15 = smov %s1810_s18 }
 0x3cd   : > { %s2127_s16 = smov %s1643_s17  ;;  %s2128_s17 = smov %s1807_s20 }
 0x3ce   : > { %s2129_s18 = smov %s1659_s21  ;;  %s2130_s19 = smov %s1663_s22 }
 0x3cf   : > { %s2131_s20 = smov %s1667_s23  ;;  %s2132_s21 = smov %s2121_s29 }
 0x3d0   : > { %s2133_s22 = smov %s2140_s27  ;;  %s2134_s23 = smov %s2122_s5 }
 0x3d1   :  { %12 = sbr.rel (!%p2047_p7) target bundleno = 11 (0xb), region = 255 }

// kernel: sam_predictor_forward.14
= control target key start
LH: loop header
LB: loop body
LE: loop exit
PB: predicated region body
PF: predicated region fallthrough
CT: control target
= control target key end

     0   :  { %s1632_s18 = smov 0   ;;  %s1634_s19 = smov 0   ;;  %s2072_s0 = inlined_call_operand.vmem [shape: f32[128,256], index: 0, kind: input, shape index: {}]   ;;  %s2073_s1 = inlined_call_operand.vmem [shape: bf16[256,768], index: 1, kind: input, shape index: {}]   ;;  %s2074_s2 = inlined_call_operand.vmem [shape: f32[1,768], index: 2, kind: input, shape index: {}]   ;;  %s2075_s3 = inlined_call_operand.vmem [shape: f32[1,256], index: 3, kind: input, shape index: {}]   ;;  %s2076_s4 = inlined_call_operand.vmem [shape: f32[1,256], index: 4, kind: input, shape index: {}]   ;;  %s2077_s5 = inlined_call_operand.vmem [shape: bf16[128,768], index: 5, kind: output, shape index: {}]  }
   0x1   :  { %s1636_s20 = smov 0   ;;  %s1638_s21 = smov 0  }
   0x2   :  { %s1640_s22 = smov 0   ;;  %s1642_s23 = smov 0  }
   0x3   :  { %s1644_s24 = smov 0   ;;  %s1646_s25 = smov 0  }
   0x4   :  { %s1648_s26 = smov 0  }
   0x5 LB: > { %s1290_s27 = sadd.s32 4294967295, %s1600_s26   ;;  %s30_s28 = sadd.s32 1, %s1592_s24  ;;  %s1600_s26 = sphi %s1648_s26, %s15_s26   ;;  %s1596_s25 = sphi %s1646_s25, %s2086_s25   ;;  %s1592_s24 = sphi %s1644_s24, %s2085_s24   ;;  %s1588_s23 = sphi %s1642_s23, %s2084_s23   ;;  %s1584_s22 = sphi %s1640_s22, %s2083_s22   ;;  %s1580_s21 = sphi %s1638_s21, %s2082_s21   ;;  %s1576_s20 = sphi %s1636_s20, %s2081_s20   ;;  %s1572_s19 = sphi %s1634_s19, %s2080_s19   ;;  %s1568_s18 = sphi %s1632_s18, %s2079_s18  }
   0x6   : > { %p32_p0 = scmp.ge.s32.totalorder %s30_s28, 3  ;;  %s34_s29 = sadd.s32 1, %s1596_s25 }
   0x7   : > { %s71_s30 = sadd.s32 1, %s1580_s21  ;;  %p78_p1 = scmp.ne.s32.totalorder %s1580_s21, %s1576_s20 }
   0x8   : > { %s2088_s28 = smov (%p32_p0, %s30_s28), 0  ;;  %s2090_s29 = smov (!%p32_p0, %s34_s29), %s1596_s25 }
   0x9   : > { %s67_s6 = ssub.s32 %s1592_s24, %s2088_s28  ;;  %p79_p2 = scmp.eq.s32.totalorder %s1600_s26, 0 }
   0xa   : > { %p36_p3 = scmp.ge.s32.totalorder %s2090_s29, 2  ;;  %p69_p4 = scmp.eq.s32.totalorder %s67_s6, 0 }
   0xb   : > { %p80_p5 = por %p79_p2, %p78_p1  ;;  %s167_s7 = sadd.s32 1, %s1572_s19 }
   0xc   : > { %s2092_s29 = smov (%p36_p3, %s2090_s29), 0  ;;  %p177_p6 = scmp.ne.s32.totalorder %s1572_s19, %s1568_s18 }
   0xd   : > { %s1693_s8 = scalar_select %p69_p4, %s1580_s21, %s71_s30  }
   0xe   : > { %s162_s9 = ssub.s32 %s1596_s25, %s2092_s29  ;;  %p178_p7 = scmp.eq.s32.totalorder %s1290_s27, 5 }
   0xf   : > { %s164_s10 = sor.u32 %s162_s9, %s67_s6  ;;  %p1293_p10 = scmp.ge.s32.totalorder %s1600_s26, 6 }
  0x10   : > { %p165_p8 = scmp.eq.s32.totalorder %s164_s10, 0  ;;  %p1699_p9 = por %p178_p7, %p177_p6 }
  0x11   : > { %206 = sbr.rel (%p1293_p10) target bundleno = 44 (0x2c), region = 24 }
  0x12   : > { %s1704_s12 = scalar_select %p165_p8, %s1572_s19, %s167_s7  }
  0x18   : > { %224 = sbr.rel (!%p80_p5) target bundleno = 44 (0x2c), region = 32  ;;  %s226_s13 = sand.u32 (%p80_p5), 1, %s1580_s21  }
  0x19   : > { %s1351_s14 = sshll.u32 (%p80_p5), %s1592_s24, 3  ;;  %s1294_s15 = sshll.u32 (%p80_p5), %s226_s13, 8 }
  0x1a   : > { %s1712_s27 = scalar_lea.vmem (%p80_p5), %s2073_s1, %s1351_s14  ;;  %s1717_s30 = scalar_lea.vmem (%p80_p5), [#allocation3], %s1294_s15 }
  0x1b   : > { %v324_v0 = vld [vmem:[%s1712_s27] sm:$0xff] (%p80_p5)  ;;  %v326_v1 = vld [vmem:[%s1712_s27 + $0x18] sm:$0xff] (%p80_p5)  ;;  %v328_v2 = vld [vmem:[%s1712_s27 + $0x30] sm:$0xff] (%p80_p5) }
  0x1c   : > { %325 = vst [vmem:[%s1717_s30] sm:$0xff] (%p80_p5), %v324_v0  ;;  %327 = vst [vmem:[%s1717_s30 + $0x8] sm:$0xff] (%p80_p5), %v326_v1  ;;  %v330_v3 = vld [vmem:[%s1712_s27 + $0x48] sm:$0xff] (%p80_p5)  ;;  %v332_v4 = vld [vmem:[%s1712_s27 + $0x60] sm:$0xff] (%p80_p5) }
  0x1d   : > { %329 = vst [vmem:[%s1717_s30 + $0x10] sm:$0xff] (%p80_p5), %v328_v2  ;;  %v334_v5 = vld [vmem:[%s1712_s27 + $0x78] sm:$0xff] (%p80_p5)  ;;  %331 = vst [vmem:[%s1717_s30 + $0x18] sm:$0xff] (%p80_p5), %v330_v3  ;;  %v336_v6 = vld [vmem:[%s1712_s27 + $0x90] sm:$0xff] (%p80_p5) }
  0x1e   : > { %333 = vst [vmem:[%s1717_s30 + $0x20] sm:$0xff] (%p80_p5), %v332_v4  ;;  %335 = vst [vmem:[%s1717_s30 + $0x28] sm:$0xff] (%p80_p5), %v334_v5  ;;  %v338_v7 = vld [vmem:[%s1712_s27 + $0xa8] sm:$0xff] (%p80_p5)  ;;  %v340_v8 = vld [vmem:[%s1712_s27 + $0xc0] sm:$0xff] (%p80_p5) }
  0x1f   : > { %337 = vst [vmem:[%s1717_s30 + $0x30] sm:$0xff] %v336_v6  ;;  %339 = vst [vmem:[%s1717_s30 + $0x38] sm:$0xff] %v338_v7  ;;  %v342_v9 = vld [vmem:[%s1712_s27 + $0xd8] sm:$0xff]  ;;  %v344_v10 = vld [vmem:[%s1712_s27 + $0xf0] sm:$0xff] }
  0x20   : > { %341 = vst [vmem:[%s1717_s30 + $0x40] sm:$0xff] %v340_v8  ;;  %v346_v11 = vld [vmem:[%s1712_s27 + $0x108] sm:$0xff]  ;;  %343 = vst [vmem:[%s1717_s30 + $0x48] sm:$0xff] %v342_v9  ;;  %v348_v12 = vld [vmem:[%s1712_s27 + $0x120] sm:$0xff] }
  0x21   : > { %345 = vst [vmem:[%s1717_s30 + $0x50] sm:$0xff] %v344_v10  ;;  %347 = vst [vmem:[%s1717_s30 + $0x58] sm:$0xff] %v346_v11  ;;  %v350_v13 = vld [vmem:[%s1712_s27 + $0x138] sm:$0xff]  ;;  %v352_v14 = vld [vmem:[%s1712_s27 + $0x150] sm:$0xff] }
  0x22   : > { %349 = vst [vmem:[%s1717_s30 + $0x60] sm:$0xff] %v348_v12  ;;  %351 = vst [vmem:[%s1717_s30 + $0x68] sm:$0xff] %v350_v13  ;;  %v354_v15 = vld [vmem:[%s1712_s27 + $0x168] sm:$0xff]  ;;  %v356_v16 = vld [vmem:[%s1712_s27 + $0x180] sm:$0xff] }
  0x23   : > { %353 = vst [vmem:[%s1717_s30 + $0x70] sm:$0xff] %v352_v14  ;;  %v358_v17 = vld [vmem:[%s1712_s27 + $0x198] sm:$0xff]  ;;  %355 = vst [vmem:[%s1717_s30 + $0x78] sm:$0xff] %v354_v15  ;;  %v360_v18 = vld [vmem:[%s1712_s27 + $0x1b0] sm:$0xff] }
  0x24   : > { %357 = vst [vmem:[%s1717_s30 + $0x80] sm:$0xff] %v356_v16  ;;  %359 = vst [vmem:[%s1717_s30 + $0x88] sm:$0xff] %v358_v17  ;;  %v362_v19 = vld [vmem:[%s1712_s27 + $0x1c8] sm:$0xff]  ;;  %v364_v20 = vld [vmem:[%s1712_s27 + $0x1e0] sm:$0xff] }
  0x25   : > { %361 = vst [vmem:[%s1717_s30 + $0x90] sm:$0xff] %v360_v18  ;;  %363 = vst [vmem:[%s1717_s30 + $0x98] sm:$0xff] %v362_v19  ;;  %v366_v21 = vld [vmem:[%s1712_s27 + $0x1f8] sm:$0xff]  ;;  %v368_v22 = vld [vmem:[%s1712_s27 + $0x210] sm:$0xff] }
  0x26   : > { %365 = vst [vmem:[%s1717_s30 + $0xa0] sm:$0xff] %v364_v20  ;;  %v370_v23 = vld [vmem:[%s1712_s27 + $0x228] sm:$0xff]  ;;  %367 = vst [vmem:[%s1717_s30 + $0xa8] sm:$0xff] %v366_v21  ;;  %v372_v24 = vld [vmem:[%s1712_s27 + $0x240] sm:$0xff] }
  0x27   : > { %369 = vst [vmem:[%s1717_s30 + $0xb0] sm:$0xff] %v368_v22  ;;  %371 = vst [vmem:[%s1717_s30 + $0xb8] sm:$0xff] %v370_v23  ;;  %v374_v25 = vld [vmem:[%s1712_s27 + $0x258] sm:$0xff]  ;;  %v376_v26 = vld [vmem:[%s1712_s27 + $0x270] sm:$0xff] }
  0x28   : > { %373 = vst [vmem:[%s1717_s30 + $0xc0] sm:$0xff] %v372_v24  ;;  %375 = vst [vmem:[%s1717_s30 + $0xc8] sm:$0xff] %v374_v25  ;;  %v378_v27 = vld [vmem:[%s1712_s27 + $0x288] sm:$0xff]  ;;  %v380_v28 = vld [vmem:[%s1712_s27 + $0x2a0] sm:$0xff] }
  0x29   : > { %377 = vst [vmem:[%s1717_s30 + $0xd0] sm:$0xff] %v376_v26  ;;  %v382_v29 = vld [vmem:[%s1712_s27 + $0x2b8] sm:$0xff]  ;;  %379 = vst [vmem:[%s1717_s30 + $0xd8] sm:$0xff] %v378_v27  ;;  %v384_v30 = vld [vmem:[%s1712_s27 + $0x2d0] sm:$0xff] }
  0x2a   : > { %381 = vst [vmem:[%s1717_s30 + $0xe0] sm:$0xff] %v380_v28  ;;  %383 = vst [vmem:[%s1717_s30 + $0xe8] sm:$0xff] %v382_v29  ;;  %v386_v31 = vld [vmem:[%s1712_s27 + $0x2e8] sm:$0xff] }
  0x2b   : > { %385 = vst [vmem:[%s1717_s30 + $0xf0] sm:$0xff] %v384_v30  ;;  %387 = vst [vmem:[%s1717_s30 + $0xf8] sm:$0xff] %v386_v31 }
  0x2c PF: > { %p1297_p11 = scmp.ge.s32.totalorder %s1600_s26, 1  ;;  %p400_p12 = scmp.lt.s32.totalorder %s1600_s26, 7 }
  0x2e   : > { %p401_p13 = pnand %p1297_p11, %p400_p12 }
  0x2f   : > { %s1300_s6 = sshll.u32 (!%p401_p13), %s1588_s23, 3  ;;  %s407_s14 = sand.u32 (!%p401_p13), 1, %s1576_s20  }
  0x30   : > { %404 = sbr.rel (%p401_p13) target bundleno = 621 (0x26d), region = 74  ;;  %p449_p0 = scmp.lt.s32.totalorder (!%p401_p13), %s1300_s6, 15 }
  0x31   : > { %s1298_s15 = sshll.u32 (!%p401_p13), %s407_s14, 8  ;;  %s444_s14 = sand.u32 (!%p401_p13), 1, %s1568_s18  }
  0x32   : > { %s1835_s16 = scalar_lea.vmem (!%p401_p13), [#allocation3], %s1298_s15  ;;  %s1299_s15 = sshll.u32 (!%p401_p13), %s444_s14, 6 }
  0x33   : > { %v1466_v56 = vld [vmem:[%s1835_s16 + $0x4] ss:$8 sps:$4 sm:$0xff] (!%p401_p13)   ;;  %v1468_v57 = vld [vmem:[%s1835_s16] ss:$8 sps:$4 sm:$0xff] (!%p401_p13)   ;;  %v1469_v58 = vld [vmem:[%s1835_s16 + $0x14] ss:$8 sps:$4 sm:$0xff] (!%p401_p13)  }
  0x34   : > { %905 = vmatprep.subr.bf16.mxu0 (!%p401_p13), %v1466_v56  ;;  %1361 = vmatprep.subr.bf16.mxu1 (!%p401_p13), %v1466_v56  ;;  %v1471_v59 = vld [vmem:[%s1835_s16 + $0x10] ss:$8 sps:$4 sm:$0xff] (!%p401_p13)   ;;  %v1472_v60 = vld [vmem:[%s1835_s16 + $0x24] ss:$8 sps:$4 sm:$0xff] (!%p401_p13)   ;;  %v1474_v61 = vld [vmem:[%s1835_s16 + $0x20] ss:$8 sps:$4 sm:$0xff] (!%p401_p13)  }
  0x35   : > { %906 = vmatpush1.bf16.msra.mxu0 (!%p401_p13), %v1468_v57  ;;  %1377 = vmatpush1.bf16.msra.mxu1 (!%p401_p13), %v1468_v57  ;;  %v1475_v62 = vld [vmem:[%s1835_s16 + $0x34] ss:$8 sps:$4 sm:$0xff] (!%p401_p13)   ;;  %v1477_v63 = vld [vmem:[%s1835_s16 + $0x30] ss:$8 sps:$4 sm:$0xff] (!%p401_p13)   ;;  %v1478_v0 = vld [vmem:[%s1835_s16 + $0x44] ss:$8 sps:$4 sm:$0xff] (!%p401_p13)  }
  0x36   : > { %907 = vmatprep.subr.bf16.mxu0 (!%p401_p13), %v1469_v58  ;;  %1362 = vmatprep.subr.bf16.mxu1 (!%p401_p13), %v1469_v58  ;;  %v1480_v1 = vld [vmem:[%s1835_s16 + $0x40] ss:$8 sps:$4 sm:$0xff] (!%p401_p13)   ;;  %v1481_v2 = vld [vmem:[%s1835_s16 + $0x54] ss:$8 sps:$4 sm:$0xff] (!%p401_p13)   ;;  %v1483_v3 = vld [vmem:[%s1835_s16 + $0x50] ss:$8 sps:$4 sm:$0xff] (!%p401_p13)  }
  0x37   : > { %s2094_s6 = smov (!%p449_p0, %s1300_s6), 15  ;;  %v1484_v4 = vld [vmem:[%s1835_s16 + $0x64] ss:$8 sps:$4 sm:$0xff]   ;;  %v1486_v5 = vld [vmem:[%s1835_s16 + $0x60] ss:$8 sps:$4 sm:$0xff]   ;;  %s1393_s18 = smul.u32 (%p1699_p9), 48, %s1588_s23 }
  0x38   : > { %s1352_s7 = sshll.u32 %s2094_s6, 4  ;;  %v1487_v6 = vld [vmem:[%s1835_s16 + $0x74] ss:$8 sps:$4 sm:$0xff]   ;;  %v1489_v7 = vld [vmem:[%s1835_s16 + $0x70] ss:$8 sps:$4 sm:$0xff]   ;;  %s2010_s6 = sshll.u32 %s1584_s22, 1 }
  0x39   : > { %s456_s13 = scalar_lea.vmem %s2072_s0, %s1352_s7  ;;  %908 = vmatpush1.bf16.msra.mxu0 %v1471_v59  ;;  %1378 = vmatpush1.bf16.msra.mxu1 %v1471_v59  ;;  %v1490_v8 = vld [vmem:[%s1835_s16 + $0x84] ss:$8 sps:$4 sm:$0xff]   ;;  %v1492_v9 = vld [vmem:[%s1835_s16 + $0x80] ss:$8 sps:$4 sm:$0xff]   ;;  %p462_p1 = scmp.lt.s32.totalorder %s2010_s6, 5 }
  0x3a   : > { %v1786_v32 = vld [vmem:[%s456_s13] sm:$0xff]  ;;  %v1788_v33 = vld [vmem:[%s456_s13 + $0x8] sm:$0xff]  ;;  %v1796_v37 = vld [vmem:[%s456_s13 + $0x10] sm:$0xff]  ;;  %909 = vmatprep.subr.bf16.mxu0 %v1472_v60  ;;  %1363 = vmatprep.subr.bf16.mxu1 %v1472_v60  ;;  %s2020_s22 = scalar_lea.vmem [#allocation4], %s1299_s15 }
  0x3b   : > { %v1790_v34 = vld [vmem:[%s456_s13 + $0x40] sm:$0xff]  ;;  %v506_v35 = vadd.f32 %v1788_v33, %v1786_v32  ;;  %v1794_v36 = vld [vmem:[%s456_s13 + $0x48] sm:$0xff]  ;;  %v1798_v38 = vld [vmem:[%s456_s13 + $0x18] sm:$0xff]  ;;  %s463_s7 = scalar_select %p462_p1, %s2010_s6, 5 }
  0x3c   : > { %v518_v39 = vadd.f32 %v1794_v36, %v1790_v34  ;;  %v1802_v40 = vld [vmem:[%s456_s13 + $0x50] sm:$0xff]  ;;  %v1804_v41 = vld [vmem:[%s456_s13 + $0x58] sm:$0xff]  ;;  %v509_v42 = vadd.f32 %v1798_v38, %v1796_v37  ;;  %v1810_v44 = vld [vmem:[%s456_s13 + $0x20] sm:$0xff] }
  0x3d   : > { %507 = vadd.xlane.f32.xlu0 %v506_v35  ;;  %v521_v43 = vadd.f32 %v1804_v41, %v1802_v40  ;;  %v1812_v45 = vld [vmem:[%s456_s13 + $0x28] sm:$0xff]  ;;  %v1814_v46 = vld [vmem:[%s456_s13 + $0x30] sm:$0xff]  ;;  %v1816_v47 = vld [vmem:[%s456_s13 + $0x38] sm:$0xff]  ;;  %910 = vmatpush1.bf16.msra.mxu0 %v1474_v61 }
  0x3e   : > { %519 = vadd.xlane.f32.xlu1 %v518_v39  ;;  %v512_v48 = vadd.f32 %v1812_v45, %v1810_v44  ;;  %v515_v49 = vadd.f32 %v1816_v47, %v1814_v46  ;;  %v1822_v50 = vld [vmem:[%s456_s13 + $0x60] sm:$0xff]  ;;  %v1824_v51 = vld [vmem:[%s456_s13 + $0x68] sm:$0xff]  ;;  %v1826_v52 = vld [vmem:[%s456_s13 + $0x70] sm:$0xff]  ;;  %1379 = vmatpush1.bf16.msra.mxu1 %v1474_v61 }
  0x3f   : > { %v1828_v53 = vld [vmem:[%s456_s13 + $0x78] sm:$0xff]  ;;  %v524_v54 = vadd.f32 %v1824_v51, %v1822_v50  ;;  %911 = vmatprep.subr.bf16.mxu0 %v1475_v62  ;;  %1364 = vmatprep.subr.bf16.mxu1 %v1475_v62  ;;  %s464_s13 = scalar_lea.vmem %s2074_s2, %s463_s7 }
  0x40   : > { %v527_v55 = vadd.f32 %v1828_v53, %v1826_v52 }
  0x41   : > { %510 = vadd.xlane.f32.xlu0 %v509_v42  ;;  %912 = vmatpush1.bf16.msra.mxu0 %v1477_v63 }
  0x42   : > { %522 = vadd.xlane.f32.xlu1 %v521_v43  ;;  %1380 = vmatpush1.bf16.msra.mxu1 %v1477_v63 }
  0x43   : > { %913 = vmatprep.subr.bf16.mxu0 %v1478_v0  ;;  %1365 = vmatprep.subr.bf16.mxu1 %v1478_v0 }
  0x45   : > { %513 = vadd.xlane.f32.xlu0 %v512_v48  ;;  %914 = vmatpush1.bf16.msra.mxu0 %v1480_v1 }
  0x46   : > { %516 = vadd.xlane.f32.xlu1 %v515_v49  ;;  %1381 = vmatpush1.bf16.msra.mxu1 %v1480_v1 }
  0x47   : > { %915 = vmatprep.subr.bf16.mxu0 %v1481_v2  ;;  %1366 = vmatprep.subr.bf16.mxu1 %v1481_v2  ;;  %v1493_v2 = vld [vmem:[%s1835_s16 + $0x94] ss:$8 sps:$4 sm:$0xff]  }
  0x49   : > { %525 = vadd.xlane.f32.xlu0 %v524_v54  ;;  %916 = vmatpush1.bf16.msra.mxu0 %v1483_v3 }
  0x4a   : > { %528 = vadd.xlane.f32.xlu1 %v527_v55  ;;  %1382 = vmatpush1.bf16.msra.mxu1 %v1483_v3  ;;  %v1495_v3 = vld [vmem:[%s1835_s16 + $0x90] ss:$8 sps:$4 sm:$0xff]  }
  0x4b   : > { %917 = vmatprep.subr.bf16.mxu0 %v1484_v4  ;;  %1367 = vmatprep.subr.bf16.mxu1 %v1484_v4  ;;  %v1496_v4 = vld [vmem:[%s1835_s16 + $0xa4] ss:$8 sps:$4 sm:$0xff]  }
  0x4d   : > { %918 = vmatpush1.bf16.msra.mxu0 %v1486_v5 }
  0x4e   : > { %1383 = vmatpush1.bf16.msra.mxu1 %v1486_v5  ;;  %919 = vmatprep.subr.bf16.mxu0 %v1487_v6  ;;  %v1498_v5 = vld [vmem:[%s1835_s16 + $0xa0] ss:$8 sps:$4 sm:$0xff]  }
  0x4f   : > { %1368 = vmatprep.subr.bf16.mxu1 %v1487_v6  ;;  %v1499_v6 = vld [vmem:[%s1835_s16 + $0xb4] ss:$8 sps:$4 sm:$0xff]  }
  0x51   : > { %920 = vmatpush1.bf16.msra.mxu0 %v1489_v7 }
  0x52   : > { %1384 = vmatpush1.bf16.msra.mxu1 %v1489_v7  ;;  %921 = vmatprep.subr.bf16.mxu0 %v1490_v8  ;;  %v1501_v7 = vld [vmem:[%s1835_s16 + $0xb0] ss:$8 sps:$4 sm:$0xff]  }
  0x53   : > { %1369 = vmatprep.subr.bf16.mxu1 %v1490_v8  ;;  %v1502_v8 = vld [vmem:[%s1835_s16 + $0xc4] ss:$8 sps:$4 sm:$0xff]  }
  0x55   : > { %922 = vmatpush1.bf16.msra.mxu0 %v1492_v9 }
  0x56   : > { %1385 = vmatpush1.bf16.msra.mxu1 %v1492_v9  ;;  %923 = vmatprep.subr.bf16.mxu0 %v1493_v2  ;;  %v1504_v9 = vld [vmem:[%s1835_s16 + $0xc0] ss:$8 sps:$4 sm:$0xff]  }
  0x57   : > { %1370 = vmatprep.subr.bf16.mxu1 %v1493_v2 }
  0x59   : > { %924 = vmatpush1.bf16.msra.mxu0 %v1495_v3 }
  0x5a   : > { %1386 = vmatpush1.bf16.msra.mxu1 %v1495_v3  ;;  %925 = vmatprep.subr.bf16.mxu0 %v1496_v4 }
  0x5b   : > { %1371 = vmatprep.subr.bf16.mxu1 %v1496_v4 }
  0x5d   : > { %926 = vmatpush1.bf16.msra.mxu0 %v1498_v5 }
  0x5e   : > { %1387 = vmatpush1.bf16.msra.mxu1 %v1498_v5  ;;  %927 = vmatprep.subr.bf16.mxu0 %v1499_v6 }
  0x5f   : > { %1372 = vmatprep.subr.bf16.mxu1 %v1499_v6 }
  0x61   : > { %928 = vmatpush1.bf16.msra.mxu0 %v1501_v7 }
  0x62   : > { %1388 = vmatpush1.bf16.msra.mxu1 %v1501_v7  ;;  %929 = vmatprep.subr.bf16.mxu0 %v1502_v8 }
  0x63   : > { %1373 = vmatprep.subr.bf16.mxu1 %v1502_v8 }
  0x65   : > { %930 = vmatpush1.bf16.msra.mxu0 %v1504_v9 }
  0x66   : > { %1389 = vmatpush1.bf16.msra.mxu1 %v1504_v9 }
  0xca   : > { %v508_v10 = vpop.xlane.xlu0 %507 }
  0xcb   : > { %v531_v11 = vmul.f32 0.00390625, %v508_v10  ;;  %v520_v12 = vpop.xlane.xlu1 %519  ;;  %v1505_v10 = vld [vmem:[%s1835_s16 + $0xd4] ss:$8 sps:$4 sm:$0xff]  }
  0xcc   : > { %v535_v13 = vmul.f32 0.00390625, %v520_v12  ;;  %931 = vmatprep.subr.bf16.mxu0 %v1505_v10  ;;  %1374 = vmatprep.subr.bf16.mxu1 %v1505_v10  ;;  %v1508_v12 = vld [vmem:[%s1835_s16 + $0xe4] ss:$8 sps:$4 sm:$0xff]  }
  0xcd   : > { %v1856_v14 = vsub.f32 %v1786_v32, %v531_v11  ;;  %v1859_v15 = vsub.f32 %v1788_v33, %v531_v11  ;;  %v1507_v11 = vld [vmem:[%s1835_s16 + $0xd0] ss:$8 sps:$4 sm:$0xff]  }
  0xce   : > { %v1862_v16 = vsub.f32 %v1790_v34, %v535_v13  ;;  %v1865_v17 = vsub.f32 %v1794_v36, %v535_v13  ;;  %v511_v18 = vpop.xlane.xlu0 %510  ;;  %932 = vmatpush1.bf16.msra.mxu0 %v1507_v11  ;;  %1390 = vmatpush1.bf16.msra.mxu1 %v1507_v11  ;;  %v1510_v13 = vld [vmem:[%s1835_s16 + $0xe0] ss:$8 sps:$4 sm:$0xff]  }
  0xcf   : > { %v532_v19 = vmul.f32 0.00390625, %v511_v18  ;;  %v523_v20 = vpop.xlane.xlu1 %522  ;;  %v555_v21 = vmul.f32 %v1856_v14, %v1856_v14  ;;  %v556_v22 = vmul.f32 %v1859_v15, %v1859_v15  ;;  %v1511_v18 = vld [vmem:[%s1835_s16 + $0xf4] ss:$8 sps:$4 sm:$0xff]   ;;  %933 = vmatprep.subr.bf16.mxu0 %v1508_v12  ;;  %1375 = vmatprep.subr.bf16.mxu1 %v1508_v12 }
  0xd0   : > { %v536_v23 = vmul.f32 0.00390625, %v523_v20  ;;  %v563_v24 = vmul.f32 %v1862_v16, %v1862_v16  ;;  %v564_v25 = vmul.f32 %v1865_v17, %v1865_v17 }
  0xd1   : > { %v1876_v26 = vsub.f32 %v1796_v37, %v532_v19  ;;  %v1879_v27 = vsub.f32 %v1798_v38, %v532_v19  ;;  %v571_v28 = vadd.f32 %v556_v22, %v555_v21  ;;  %v1513_v19 = vld [vmem:[%s1835_s16 + $0xf0] ss:$8 sps:$4 sm:$0xff]   ;;  %s1123_s16 = sadd.s32 (%p1699_p9), %s1393_s18, %s2010_s6 }
  0xd2   : > { %v1882_v29 = vsub.f32 %v1802_v40, %v536_v23  ;;  %v1885_v30 = vsub.f32 %v1804_v41, %v536_v23  ;;  %v514_v31 = vpop.xlane.xlu0 %513  ;;  %v583_v34 = vadd.f32 %v564_v25, %v563_v24  ;;  %934 = vmatpush1.bf16.msra.mxu0 %v1510_v13  ;;  %1391 = vmatpush1.bf16.msra.mxu1 %v1510_v13  ;;  %v636_v23 = vlaneseq  ;;  %s1348_s11 = sshll.u32 (%p1699_p9), %s1123_s16, 2 }
  0xd3   : > { %v533_v32 = vmul.f32 0.00390625, %v514_v31  ;;  %572 = vadd.xlane.f32.xlu0 %v571_v28  ;;  %v517_v33 = vpop.xlane.xlu1 %516  ;;  %v557_v35 = vmul.f32 %v1876_v26, %v1876_v26  ;;  %v558_v36 = vmul.f32 %v1879_v27, %v1879_v27  ;;  %935 = vmatprep.subr.bf16.mxu0 %v1511_v18  ;;  %s1125_s27 = scalar_lea.vmem (%p1699_p9), %s2077_s5, %s1348_s11 }
  0xd4   : > { %v534_v37 = vmul.f32 0.00390625, %v517_v33  ;;  %v565_v38 = vmul.f32 %v1882_v29, %v1882_v29  ;;  %v566_v39 = vmul.f32 %v1885_v30, %v1885_v30  ;;  %1376 = vmatprep.subr.bf16.mxu1 %v1511_v18 }
  0xd5   : > { %v1896_v40 = vsub.f32 %v1810_v44, %v533_v32  ;;  %v1899_v41 = vsub.f32 %v1812_v45, %v533_v32  ;;  %v574_v42 = vadd.f32 %v558_v36, %v557_v35 }
  0xd6   : > { %v1902_v43 = vsub.f32 %v1814_v46, %v534_v37  ;;  %v1905_v48 = vsub.f32 %v1816_v47, %v534_v37  ;;  %v526_v49 = vpop.xlane.xlu0 %525  ;;  %v586_v56 = vadd.f32 %v566_v39, %v565_v38  ;;  %936 = vmatpush1.bf16.msra.mxu0 %v1513_v19  ;;  %1392 = vmatpush1.bf16.msra.mxu1 %v1513_v19 }
  0xd7   : > { %v537_v54 = vmul.f32 0.00390625, %v526_v49  ;;  %584 = vadd.xlane.f32.xlu0 %v583_v34  ;;  %575 = vadd.xlane.f32.xlu1 %v574_v42  ;;  %v529_v55 = vpop.xlane.xlu1 %528  ;;  %v559_v44 = vmul.f32 %v1896_v40, %v1896_v40  ;;  %v560_v45 = vmul.f32 %v1899_v41, %v1899_v41  ;;  %v637_v34 = vshrl.u32 %v636_v23, 7 }
  0xd8   : > { %v538_v57 = vmul.f32 0.00390625, %v529_v55  ;;  %v561_v46 = vmul.f32 %v1902_v43, %v1902_v43  ;;  %v562_v47 = vmul.f32 %v1905_v48, %v1905_v48 }
  0xd9   : > { %v1916_v58 = vsub.f32 %v1822_v50, %v537_v54  ;;  %v1919_v59 = vsub.f32 %v1824_v51, %v537_v54  ;;  %v577_v60 = vadd.f32 %v560_v45, %v559_v44  ;;  %v1949_v49 = vsub.s32 0, %v637_v34  ;;  %v504_v44 = vld [vmem:[%s2075_s3] sm:$0x3] }
  0xda   : > { %v1922_v61 = vsub.f32 %v1826_v52, %v538_v57  ;;  %v1925_v62 = vsub.f32 %v1828_v53, %v538_v57  ;;  %v580_v63 = vadd.f32 %v562_v47, %v561_v46  ;;  %v1951_v54 = vsub.s32 1, %v637_v34 }
  0xdb   : > { %587 = vadd.xlane.f32.xlu1 %v586_v56  ;;  %578 = vadd.xlane.f32.xlu0 %v577_v60  ;;  %v567_v50 = vmul.f32 %v1916_v58, %v1916_v58  ;;  %v568_v51 = vmul.f32 %v1919_v59, %v1919_v59 }
  0xdc   : > { %v569_v0 = vmul.f32 %v1922_v61, %v1922_v61  ;;  %v570_v52 = vmul.f32 %v1925_v62, %v1925_v62 }
  0xdd   : > { %v589_v1 = vadd.f32 %v568_v51, %v567_v50  ;;  %v1960_v50 = vrot.slane %v504_v44, %v1949_v49  ;;  %v1963_v51 = vrot.slane %v504_v44, %v1951_v54 }
  0xde   : > { %v592_v53 = vadd.f32 %v570_v52, %v569_v0 }
  0xdf   : > { %581 = vadd.xlane.f32.xlu1 %v580_v63  ;;  %590 = vadd.xlane.f32.xlu0 %v589_v1  ;;  %v505_v63 = vld [vmem:[%s2076_s4] sm:$0x3] }
  0xe0   : > { %v1968_v2 = vrot.slane %v505_v63, %v1949_v49  ;;  %v670_v6 = vrot.slane %v505_v63, %v1951_v54 }
  0xe3   : > { %593 = vadd.xlane.f32.xlu1 %v592_v53 }
 0x160   : > { %v573_v20 = vpop.xlane.xlu0 %572 }
 0x161   : > { %v595_v21 = vmul.f32 0.00390625, %v573_v20 }
 0x163   : > { %v603_v22 = vadd.f32 1e-06, %v595_v21 }
 0x164   : > { %v576_v24 = vpop.xlane.xlu1 %575  ;;  %v585_v25 = vpop.xlane.xlu0 %584 }
 0x165   : > { %1514 = vrsqrt.f32 %v603_v22  ;;  %v596_v28 = vmul.f32 0.00390625, %v576_v24  ;;  %v599_v31 = vmul.f32 0.00390625, %v585_v25 }
 0x167   : > { %v604_v32 = vadd.f32 1e-06, %v596_v28  ;;  %v607_v33 = vadd.f32 1e-06, %v599_v31 }
 0x168   : > { %v588_v35 = vpop.xlane.xlu1 %587  ;;  %v579_v36 = vpop.xlane.xlu0 %578 }
 0x169   : > { %1516 = vrsqrt.f32 %v604_v32  ;;  %v600_v37 = vmul.f32 0.00390625, %v588_v35  ;;  %v597_v38 = vmul.f32 0.00390625, %v579_v36 }
 0x16a   : > { %1518 = vrsqrt.f32 %v607_v33 }
 0x16b   : > { %v608_v39 = vadd.f32 1e-06, %v600_v37  ;;  %v605_v42 = vadd.f32 1e-06, %v597_v38 }
 0x16c   : > { %v582_v55 = vpop.xlane.xlu1 %581  ;;  %v591_v56 = vpop.xlane.xlu0 %590 }
 0x16d   : > { %1520 = vrsqrt.f32 %v608_v39  ;;  %v598_v45 = vmul.f32 0.00390625, %v582_v55  ;;  %v601_v57 = vmul.f32 0.00390625, %v591_v56 }
 0x16e   : > { %1522 = vrsqrt.f32 %v605_v42 }
 0x16f   : > { %v1515_v46 = vpop.eup %1514  ;;  %v606_v47 = vadd.f32 1e-06, %v598_v45  ;;  %v609_v60 = vadd.f32 1e-06, %v601_v57 }
 0x170   : > { %v594_v0 = vpop.xlane.xlu1 %593  ;;  %v620_v52 = vmul.f32 %v1515_v46, %v1859_v15  ;;  %v619_v1 = vmul.f32 %v1515_v46, %v1856_v14 }
 0x171   : > { %1524 = vrsqrt.f32 %v606_v47  ;;  %v602_v53 = vmul.f32 0.00390625, %v594_v0 }
 0x172   : > { %1526 = vrsqrt.f32 %v609_v60  ;;  %v647_v5 = vmul.f32 %v1963_v51, %v620_v52  ;;  %v646_v7 = vmul.f32 %v1960_v50, %v619_v1 }
 0x173   : > { %v1517_v3 = vpop.eup %1516  ;;  %v610_v4 = vadd.f32 1e-06, %v602_v53 }
 0x174   : > { %v1519_v8 = vpop.eup %1518  ;;  %v622_v9 = vmul.f32 %v1517_v3, %v1879_v27  ;;  %v621_v15 = vmul.f32 %v1517_v3, %v1876_v26  ;;  %v674_v18 = vadd.f32 %v670_v6, %v647_v5  ;;  %v673_v19 = vadd.f32 %v1968_v2, %v646_v7 }
 0x175   : > { %1528 = vrsqrt.f32 %v610_v4  ;;  %v628_v14 = vmul.f32 %v1519_v8, %v1865_v17  ;;  %v627_v10 = vmul.f32 %v1519_v8, %v1862_v16 }
 0x176   : > { %v649_v11 = vmul.f32 %v1963_v51, %v622_v9  ;;  %v648_v12 = vmul.f32 %v1960_v50, %v621_v15 }
 0x177   : > { %v1521_v13 = vpop.eup %1520  ;;  %v655_v20 = vmul.f32 %v1963_v51, %v628_v14  ;;  %v654_v21 = vmul.f32 %v1960_v50, %v627_v10 }
 0x178   : > { %v1523_v27 = vpop.eup %1522  ;;  %v676_v22 = vadd.f32 %v670_v6, %v649_v11  ;;  %v675_v26 = vadd.f32 %v1968_v2, %v648_v12  ;;  %v630_v17 = vmul.f32 %v1521_v13, %v1885_v30  ;;  %v629_v16 = vmul.f32 %v1521_v13, %v1882_v29 }
 0x179   : > { %v624_v23 = vmul.f32 %v1523_v27, %v1899_v41  ;;  %v623_v24 = vmul.f32 %v1523_v27, %v1896_v40  ;;  %v682_v34 = vadd.f32 %v670_v6, %v655_v20  ;;  %v681_v35 = vadd.f32 %v1968_v2, %v654_v21 }
 0x17a   : > { %v706_v25 = vpack.c.bf16 %v676_v22, %v674_v18  ;;  %v705_v28 = vpack.c.bf16 %v675_v26, %v673_v19  ;;  %v657_v31 = vmul.f32 %v1963_v51, %v630_v17  ;;  %v656_v32 = vmul.f32 %v1960_v50, %v629_v16 }
 0x17b   : > { %v1525_v33 = vpop.eup %1524  ;;  %v651_v36 = vmul.f32 %v1963_v51, %v624_v23  ;;  %v650_v30 = vmul.f32 %v1960_v50, %v623_v24 }
 0x17c   : > { %v1527_v37 = vpop.eup %1526  ;;  %937 = vmatprep.mubr.bf16.mxu0 %v706_v25  ;;  %v684_v29 = vadd.f32 %v670_v6, %v657_v31  ;;  %v683_v41 = vadd.f32 %v1968_v2, %v656_v32  ;;  %v626_v40 = vmul.f32 %v1525_v33, %v1905_v48  ;;  %v625_v38 = vmul.f32 %v1525_v33, %v1902_v43 }
 0x17d   : > { %938 = vmatmul.mubr.bf16.vlgmr.msra.gmra.mrb[0].mxu0 %v705_v28  ;;  %v632_v39 = vmul.f32 %v1527_v37, %v1919_v59  ;;  %v631_v42 = vmul.f32 %v1527_v37, %v1916_v58  ;;  %v678_v46 = vadd.f32 %v670_v6, %v651_v36  ;;  %v677_v47 = vadd.f32 %v1968_v2, %v650_v30 }
 0x17e   : > { %v710_v55 = vpack.c.bf16 %v684_v29, %v682_v34  ;;  %v709_v56 = vpack.c.bf16 %v683_v41, %v681_v35  ;;  %v653_v44 = vmul.f32 %v1963_v51, %v626_v40  ;;  %v652_v45 = vmul.f32 %v1960_v50, %v625_v38 }
 0x17f   : > { %v1529_v57 = vpop.eup %1528  ;;  %v659_v60 = vmul.f32 %v1963_v51, %v632_v39  ;;  %v658_v48 = vmul.f32 %v1960_v50, %v631_v42 }
 0x180   : > { %957 = vmatprep.mubr.bf16.mxu1 %v710_v55  ;;  %v680_v43 = vadd.f32 %v670_v6, %v653_v44  ;;  %v679_v59 = vadd.f32 %v1968_v2, %v652_v45  ;;  %v634_v58 = vmul.f32 %v1529_v57, %v1925_v62  ;;  %v633_v63 = vmul.f32 %v1529_v57, %v1922_v61  ;;  %v1029_v61 = vld [vmem:[%s464_s13] sm:$0x3] }
 0x181   : > { %958 = vmatmul.mubr.bf16.vlgmr.msra.gmra.mrb[0].mxu1 %v709_v56  ;;  %v686_v3 = vadd.f32 %v670_v6, %v659_v60  ;;  %v685_v5 = vadd.f32 %v1968_v2, %v658_v48 }
 0x182   : > { %v708_v0 = vpack.c.bf16 %v680_v43, %v678_v46  ;;  %v707_v52 = vpack.c.bf16 %v679_v59, %v677_v47  ;;  %v661_v1 = vmul.f32 %v1963_v51, %v634_v58  ;;  %v660_v53 = vmul.f32 %v1960_v50, %v633_v63 }
 0x183   : > { %v1034_v50 = vrot.slane %v1029_v61, %v1949_v49  ;;  %v1038_v51 = vrot.slane %v1029_v61, %v1951_v54 }
 0x184   : > { %947 = vmatprep.mubr.bf16.mxu0 %v708_v0  ;;  %v688_v4 = vadd.f32 %v670_v6, %v661_v1  ;;  %v687_v7 = vadd.f32 %v1968_v2, %v660_v53 }
 0x185   : > { %948 = vmatmul.mubr.bf16.gmra.mrb[4].mxu0 %v707_v52 }
 0x186   : > { %v712_v62 = vpack.c.bf16 %v688_v4, %v686_v3  ;;  %v711_v8 = vpack.c.bf16 %v687_v7, %v685_v5 }
 0x188   : > { %967 = vmatprep.mubr.bf16.mxu1 %v712_v62 }
 0x189   : > { %968 = vmatmul.mubr.bf16.gmra.mrb[4].mxu1 %v711_v8 }
 0x250   : > { %v939_v2 = vpop.f32.mrb[0].mxu0 }
 0x251   : > { %v1041_v6 = vadd.f32 %v1034_v50, %v939_v2  ;;  %v941_v9 = vpop.f32.mrb[1].mxu0 }
 0x252   : > { %v1042_v15 = vadd.f32 %v1038_v51, %v941_v9  ;;  %v943_v14 = vpop.f32.mrb[2].mxu0 }
 0x253   : > { %v1043_v10 = vadd.f32 %v1034_v50, %v943_v14  ;;  %v945_v11 = vpop.f32.mrb[3].mxu0 }
 0x254   : > { %v1353_v12 = vpack.c.bf16 %v1042_v15, %v1041_v6  ;;  %v1044_v13 = vadd.f32 %v1038_v51, %v945_v11  ;;  %v959_v18 = vpop.f32.mrb[0].mxu1 }
 0x255   : > { %v1049_v19 = vadd.f32 %v1034_v50, %v959_v18  ;;  %v961_v20 = vpop.f32.mrb[1].mxu1 }
 0x256   : > { %1105 = vst [vmem:[%s2020_s22] sm:$0xff] %v1353_v12  ;;  %v1354_v49 = vpack.c.bf16 %v1044_v13, %v1043_v10  ;;  %v1050_v54 = vadd.f32 %v1038_v51, %v961_v20  ;;  %v963_v21 = vpop.f32.mrb[2].mxu1 }
 0x257   : > { %v1051_v27 = vadd.f32 %v1034_v50, %v963_v21  ;;  %v965_v22 = vpop.f32.mrb[3].mxu1 }
 0x258   : > { %1106 = vst [vmem:[%s2020_s22 + $0x8] sm:$0xff] %v1354_v49  ;;  %v1357_v26 = vpack.c.bf16 %v1050_v54, %v1049_v19  ;;  %v1052_v17 = vadd.f32 %v1038_v51, %v965_v22  ;;  %v949_v16 = vpop.f32.mrb[4].mxu0 }
 0x259   : > { %v1045_v23 = vadd.f32 %v1034_v50, %v949_v16  ;;  %v951_v24 = vpop.f32.mrb[5].mxu0 }
 0x25a   : > { %1109 = vst [vmem:[%s2020_s22 + $0x20] sm:$0xff] %v1357_v26  ;;  %v1358_v25 = vpack.c.bf16 %v1052_v17, %v1051_v27  ;;  %v1046_v28 = vadd.f32 %v1038_v51, %v951_v24  ;;  %v953_v31 = vpop.f32.mrb[6].mxu0 }
 0x25b   : > { %v1047_v32 = vadd.f32 %v1034_v50, %v953_v31  ;;  %v955_v33 = vpop.f32.mrb[7].mxu0 }
 0x25c   : > { %1110 = vst [vmem:[%s2020_s22 + $0x28] sm:$0xff] %v1358_v25  ;;  %v1355_v34 = vpack.c.bf16 %v1046_v28, %v1045_v23  ;;  %v1048_v35 = vadd.f32 %v1038_v51, %v955_v33  ;;  %v969_v36 = vpop.f32.mrb[4].mxu1 }
 0x25d   : > { %v1053_v30 = vadd.f32 %v1034_v50, %v969_v36  ;;  %v971_v37 = vpop.f32.mrb[5].mxu1  ;;  %v1167_v44 = vld [vmem:[%s2020_s22] sm:$0xff] (%p1699_p9) }
 0x25e   : > { %1107 = vst [vmem:[%s2020_s22 + $0x10] sm:$0xff] %v1355_v34  ;;  %v1356_v29 = vpack.c.bf16 %v1048_v35, %v1047_v32  ;;  %v1054_v41 = vadd.f32 %v1038_v51, %v971_v37  ;;  %v973_v40 = vpop.f32.mrb[6].mxu1  ;;  %1119 = sbr.rel (!%p1699_p9) target bundleno = 621 (0x26d), region = 90  ;;  %1168 = vst [vmem:[%s1125_s27] sm:$0xff] (%p1699_p9), %v1167_v44 }
 0x25f   : > { %v1055_v38 = vadd.f32 %v1034_v50, %v973_v40  ;;  %v975_v39 = vpop.f32.mrb[7].mxu1  ;;  %v1169_v45 = vld [vmem:[%s2020_s22 + $0x8] sm:$0xff] (%p1699_p9) }
 0x260   : > { %1108 = vst [vmem:[%s2020_s22 + $0x18] sm:$0xff] %v1356_v29  ;;  %v1359_v42 = vpack.c.bf16 %v1054_v41, %v1053_v30  ;;  %v1056_v55 = vadd.f32 %v1038_v51, %v975_v39  ;;  %1170 = vst [vmem:[%s1125_s27 + $0x18] sm:$0xff] (%p1699_p9), %v1169_v45 }
 0x261   : > { %v1175_v47 = vld [vmem:[%s2020_s22 + $0x20] sm:$0xff] (%p1699_p9) }
 0x262   : > { %1111 = vst [vmem:[%s2020_s22 + $0x30] sm:$0xff] %v1359_v42  ;;  %v1360_v56 = vpack.c.bf16 %v1056_v55, %v1055_v38  ;;  %1176 = vst [vmem:[%s1125_s27 + $0x60] sm:$0xff] (%p1699_p9), %v1175_v47 }
 0x263   : > { %v1177_v60 = vld [vmem:[%s2020_s22 + $0x28] sm:$0xff] (%p1699_p9) }
 0x264   : > { %1112 = vst [vmem:[%s2020_s22 + $0x38] sm:$0xff] %v1360_v56  ;;  %1178 = vst [vmem:[%s1125_s27 + $0x78] sm:$0xff] (%p1699_p9), %v1177_v60 }
 0x265   : > { %v1171_v57 = vld [vmem:[%s2020_s22 + $0x10] sm:$0xff] }
 0x266   : > { %1172 = vst [vmem:[%s1125_s27 + $0x30] sm:$0xff] %v1171_v57 }
 0x267   : > { %v1173_v46 = vld [vmem:[%s2020_s22 + $0x18] sm:$0xff] }
 0x268   : > { %1174 = vst [vmem:[%s1125_s27 + $0x48] sm:$0xff] %v1173_v46 }
 0x269   : > { %v1179_v48 = vld [vmem:[%s2020_s22 + $0x30] sm:$0xff] }
 0x26a   : > { %1180 = vst [vmem:[%s1125_s27 + $0x90] sm:$0xff] %v1179_v48 }
 0x26b   : > { %v1181_v43 = vld [vmem:[%s2020_s22 + $0x38] sm:$0xff] }
 0x26c   : > { %1182 = vst [vmem:[%s1125_s27 + $0xa8] sm:$0xff] %v1181_v43 }
 0x26d PF: > { %s15_s26 = sadd.s32 1, %s1600_s26   ;;  %s2079_s18 = smov %s1572_s19 }
 0x26e   : > { %p12_p2 = scmp.ge.s32.totalorder %s15_s26, 8   ;;  %s2080_s19 = smov %s1704_s12 }
 0x26f   : > { %s2081_s20 = smov %s1580_s21  ;;  %s2082_s21 = smov %s1693_s8 }
 0x270   : > { %s2083_s22 = smov %s1592_s24  ;;  %s2084_s23 = smov %s1596_s25 }
 0x271   : > { %s2085_s24 = smov %s2088_s28  ;;  %s2086_s25 = smov %s2092_s29 }
 0x272   :  { %14 = sbr.rel (!%p12_p2) target bundleno = 5 (0x5), region = 165 }

// kernel: sam_predictor_forward.16
= control target key start
LH: loop header
LB: loop body
LE: loop exit
PB: predicated region body
PF: predicated region fallthrough
CT: control target
= control target key end

     0   :  { %s1199_s15 = smov 0   ;;  %s1201_s16 = smov 0   ;;  %s1397_s0 = inlined_call_operand.vmem [shape: bf16[128,256], index: 0, kind: input, shape index: {}]   ;;  %s1398_s1 = inlined_call_operand.vmem [shape: bf16[256,256], index: 1, kind: input, shape index: {}]   ;;  %s1399_s2 = inlined_call_operand.vmem [shape: f32[1,256], index: 2, kind: input, shape index: {}]   ;;  %s1400_s3 = inlined_call_operand.vmem [shape: f32[128,256], index: 3, kind: input, shape index: {}]   ;;  %s1401_s4 = inlined_call_operand.vmem [shape: f32[128,256], index: 4, kind: output, shape index: {}]  }
   0x1   :  { %s1203_s17 = smov 0  }
   0x2 LB: > { %s33_s18 = sadd.s32 1, %s1168_s16  ;;  %p979_p0 = scmp.ge.s32.totalorder %s1172_s17, 1  ;;  %s1172_s17 = sphi %s1203_s17, %s14_s17   ;;  %s1168_s16 = sphi %s1201_s16, %s1403_s16   ;;  %s1164_s15 = sphi %s1199_s15, %s1402_s15  }
   0x3   : > { %p35_p1 = scmp.ge.s32.totalorder %s33_s18, 2  ;;  %p240_p2 = scmp.lt.s32.totalorder %s1172_s17, 3 }
   0x5   : > { %s1405_s18 = smov (%p35_p1, %s33_s18), 0  ;;  %p241_p3 = pnand %p979_p0, %p240_p2 }
   0x6   : > { %v1090_v0 = vld [vmem:[%s1398_s1 + $0x4] ss:$8 sps:$4 sm:$0xff] (!%p241_p3)   ;;  %v1092_v1 = vld [vmem:[%s1398_s1] ss:$8 sps:$4 sm:$0xff] (!%p241_p3)   ;;  %v1093_v2 = vld [vmem:[%s1398_s1 + $0x14] ss:$8 sps:$4 sm:$0xff] (!%p241_p3)   ;;  %v755_v40 = vlaneseq (!%p241_p3) }
   0x7   : > { %244 = sbr.rel (%p241_p3) target bundleno = 299 (0x12b), region = 36  ;;  %629 = vmatprep.subr.bf16.mxu0 (!%p241_p3), %v1090_v0  ;;  %1034 = vmatprep.subr.bf16.mxu1 (!%p241_p3), %v1090_v0  ;;  %v1095_v3 = vld [vmem:[%s1398_s1 + $0x10] ss:$8 sps:$4 sm:$0xff] (!%p241_p3)   ;;  %v1096_v4 = vld [vmem:[%s1398_s1 + $0x24] ss:$8 sps:$4 sm:$0xff] (!%p241_p3)   ;;  %s980_s29 = sshll.u32 (!%p241_p3), %s1164_s15, 3 }
   0x8   : > { %630 = vmatpush1.bf16.msra.mxu0 (!%p241_p3), %v1092_v1  ;;  %1050 = vmatpush1.bf16.msra.mxu1 (!%p241_p3), %v1092_v1  ;;  %v1098_v5 = vld [vmem:[%s1398_s1 + $0x20] ss:$8 sps:$4 sm:$0xff] (!%p241_p3)   ;;  %v1099_v6 = vld [vmem:[%s1398_s1 + $0x34] ss:$8 sps:$4 sm:$0xff] (!%p241_p3)   ;;  %p302_p4 = scmp.lt.s32.totalorder (!%p241_p3), %s980_s29, 15  ;;  %v756_v41 = vshrl.u32 (!%p241_p3), %v755_v40, 7 }
   0x9   : > { %631 = vmatprep.subr.bf16.mxu0 (!%p241_p3), %v1093_v2  ;;  %1035 = vmatprep.subr.bf16.mxu1 (!%p241_p3), %v1093_v2  ;;  %v1101_v7 = vld [vmem:[%s1398_s1 + $0x30] ss:$8 sps:$4 sm:$0xff] (!%p241_p3)   ;;  %v1102_v8 = vld [vmem:[%s1398_s1 + $0x44] ss:$8 sps:$4 sm:$0xff] (!%p241_p3)   ;;  %v1104_v9 = vld [vmem:[%s1398_s1 + $0x40] ss:$8 sps:$4 sm:$0xff] (!%p241_p3)  }
   0xa   : > { %v1105_v10 = vld [vmem:[%s1398_s1 + $0x54] ss:$8 sps:$4 sm:$0xff] (!%p241_p3)   ;;  %v1107_v11 = vld [vmem:[%s1398_s1 + $0x50] ss:$8 sps:$4 sm:$0xff] (!%p241_p3)   ;;  %v1108_v12 = vld [vmem:[%s1398_s1 + $0x64] ss:$8 sps:$4 sm:$0xff] (!%p241_p3)  }
   0xb   : > { %v1110_v14 = vld [vmem:[%s1398_s1 + $0x60] ss:$8 sps:$4 sm:$0xff] (!%p241_p3)   ;;  %v1111_v16 = vld [vmem:[%s1398_s1 + $0x74] ss:$8 sps:$4 sm:$0xff] (!%p241_p3)   ;;  %v1113_v17 = vld [vmem:[%s1398_s1 + $0x70] ss:$8 sps:$4 sm:$0xff] (!%p241_p3)  }
   0xc   : > { %632 = vmatpush1.bf16.msra.mxu0 (!%p241_p3), %v1095_v3  ;;  %1051 = vmatpush1.bf16.msra.mxu1 (!%p241_p3), %v1095_v3  ;;  %v1114_v18 = vld [vmem:[%s1398_s1 + $0x84] ss:$8 sps:$4 sm:$0xff] (!%p241_p3)   ;;  %v1116_v19 = vld [vmem:[%s1398_s1 + $0x80] ss:$8 sps:$4 sm:$0xff] (!%p241_p3)   ;;  %v1117_v20 = vld [vmem:[%s1398_s1 + $0x94] ss:$8 sps:$4 sm:$0xff] (!%p241_p3)  }
   0xd   : > { %633 = vmatprep.subr.bf16.mxu0 (!%p241_p3), %v1096_v4  ;;  %1036 = vmatprep.subr.bf16.mxu1 (!%p241_p3), %v1096_v4  ;;  %v1119_v21 = vld [vmem:[%s1398_s1 + $0x90] ss:$8 sps:$4 sm:$0xff] (!%p241_p3)   ;;  %v1120_v22 = vld [vmem:[%s1398_s1 + $0xa4] ss:$8 sps:$4 sm:$0xff] (!%p241_p3)   ;;  %v1122_v23 = vld [vmem:[%s1398_s1 + $0xa0] ss:$8 sps:$4 sm:$0xff] (!%p241_p3)  }
   0xe   : > { %s1407_s29 = smov (!%p302_p4, %s980_s29), 15  ;;  %v1123_v24 = vld [vmem:[%s1398_s1 + $0xb4] ss:$8 sps:$4 sm:$0xff]   ;;  %v1125_v25 = vld [vmem:[%s1398_s1 + $0xb0] ss:$8 sps:$4 sm:$0xff]   ;;  %v757_v42 = vsub.s32 0, %v756_v41 }
   0xf   : > { %s1031_s19 = sshll.u32 %s1407_s29, 3  ;;  %v1126_v26 = vld [vmem:[%s1398_s1 + $0xc4] ss:$8 sps:$4 sm:$0xff]   ;;  %v1128_v27 = vld [vmem:[%s1398_s1 + $0xc0] ss:$8 sps:$4 sm:$0xff]   ;;  %s1032_s22 = sshll.u32 %s1407_s29, 4 }
  0x10   : > { %634 = vmatpush1.bf16.msra.mxu0 %v1098_v5  ;;  %1052 = vmatpush1.bf16.msra.mxu1 %v1098_v5  ;;  %s1262_s24 = scalar_lea.vmem %s1397_s0, %s1031_s19  ;;  %v1129_v28 = vld [vmem:[%s1398_s1 + $0xd4] ss:$8 sps:$4 sm:$0xff]   ;;  %v1131_v29 = vld [vmem:[%s1398_s1 + $0xd0] ss:$8 sps:$4 sm:$0xff]   ;;  %v1132_v30 = vld [vmem:[%s1398_s1 + $0xe4] ss:$8 sps:$4 sm:$0xff]   ;;  %s1339_s28 = scalar_lea.vmem %s1400_s3, %s1032_s22 }
  0x11   : > { %635 = vmatprep.subr.bf16.mxu0 %v1099_v6  ;;  %1037 = vmatprep.subr.bf16.mxu1 %v1099_v6  ;;  %v1140_v13 = vld [vmem:[%s1262_s24 + $0x4] ss:$8 sps:$4 sm:$0xff]   ;;  %v1134_v31 = vld [vmem:[%s1398_s1 + $0xe0] ss:$8 sps:$4 sm:$0xff]   ;;  %v1135_v32 = vld [vmem:[%s1398_s1 + $0xf4] ss:$8 sps:$4 sm:$0xff]   ;;  %s1350_s30 = scalar_lea.vmem %s1401_s4, %s1032_s22 }
  0x12   : > { %v1143_v15 = vld [vmem:[%s1262_s24 + $0x24] ss:$8 sps:$4 sm:$0xff]   ;;  %661 = vmatprep.mubr.bf16.mxu0 %v1140_v13  ;;  %v1137_v33 = vld [vmem:[%s1398_s1 + $0xf0] ss:$8 sps:$4 sm:$0xff]   ;;  %v1138_v34 = vld [vmem:[%s1262_s24] ss:$8 sps:$4 sm:$0xff]  }
  0x13   : > { %681 = vmatprep.mubr.bf16.mxu1 %v1143_v15  ;;  %v1141_v35 = vld [vmem:[%s1262_s24 + $0x20] ss:$8 sps:$4 sm:$0xff]   ;;  %v1144_v36 = vld [vmem:[%s1262_s24 + $0x14] ss:$8 sps:$4 sm:$0xff]   ;;  %v1148_v38 = vld [vmem:[%s1262_s24 + $0x10] ss:$8 sps:$4 sm:$0xff]  }
  0x14   : > { %636 = vmatpush1.bf16.msra.mxu0 %v1101_v7  ;;  %1053 = vmatpush1.bf16.msra.mxu1 %v1101_v7  ;;  %v1146_v37 = vld [vmem:[%s1262_s24 + $0x34] ss:$8 sps:$4 sm:$0xff]   ;;  %v1149_v39 = vld [vmem:[%s1262_s24 + $0x30] ss:$8 sps:$4 sm:$0xff]   ;;  %v753_v43 = vld [vmem:[%s1399_s2] sm:$0x3] }
  0x15   : > { %637 = vmatprep.subr.bf16.mxu0 %v1102_v8  ;;  %1038 = vmatprep.subr.bf16.mxu1 %v1102_v8  ;;  %v761_v44 = vsub.s32 1, %v756_v41  ;;  %v758_v45 = vrot.slane %v753_v43, %v757_v42  ;;  %v781_v48 = vld [vmem:[%s1339_s28] sm:$0xff]  ;;  %v782_v54 = vld [vmem:[%s1339_s28 + $0x8] sm:$0xff]  ;;  %v783_v60 = vld [vmem:[%s1339_s28 + $0x10] sm:$0xff] }
  0x16   : > { %v789_v50 = vld [vmem:[%s1339_s28 + $0x40] sm:$0xff]  ;;  %v790_v56 = vld [vmem:[%s1339_s28 + $0x48] sm:$0xff]  ;;  %v791_v62 = vld [vmem:[%s1339_s28 + $0x50] sm:$0xff] }
  0x17   : > { %v1341_v46 = vrot.slane %v753_v43, %v761_v44  ;;  %v784_v4 = vld [vmem:[%s1339_s28 + $0x18] sm:$0xff] }
  0x18   : > { %638 = vmatpush1.bf16.msra.mxu0 %v1104_v9  ;;  %1054 = vmatpush1.bf16.msra.mxu1 %v1104_v9  ;;  %v792_v6 = vld [vmem:[%s1339_s28 + $0x58] sm:$0xff] }
  0x19   : > { %639 = vmatprep.subr.bf16.mxu0 %v1105_v10  ;;  %1039 = vmatprep.subr.bf16.mxu1 %v1105_v10 }
  0x1c   : > { %640 = vmatpush1.bf16.msra.mxu0 %v1107_v11  ;;  %1055 = vmatpush1.bf16.msra.mxu1 %v1107_v11 }
  0x1d   : > { %641 = vmatprep.subr.bf16.mxu0 %v1108_v12  ;;  %1040 = vmatprep.subr.bf16.mxu1 %v1108_v12 }
  0x20   : > { %642 = vmatpush1.bf16.msra.mxu0 %v1110_v14  ;;  %1056 = vmatpush1.bf16.msra.mxu1 %v1110_v14 }
  0x21   : > { %643 = vmatprep.subr.bf16.mxu0 %v1111_v16  ;;  %1041 = vmatprep.subr.bf16.mxu1 %v1111_v16  ;;  %v785_v16 = vld [vmem:[%s1339_s28 + $0x20] sm:$0xff] }
  0x24   : > { %644 = vmatpush1.bf16.msra.mxu0 %v1113_v17  ;;  %1057 = vmatpush1.bf16.msra.mxu1 %v1113_v17 }
  0x25   : > { %645 = vmatprep.subr.bf16.mxu0 %v1114_v18  ;;  %1042 = vmatprep.subr.bf16.mxu1 %v1114_v18  ;;  %v793_v18 = vld [vmem:[%s1339_s28 + $0x60] sm:$0xff] }
  0x28   : > { %646 = vmatpush1.bf16.msra.mxu0 %v1116_v19  ;;  %1058 = vmatpush1.bf16.msra.mxu1 %v1116_v19 }
  0x29   : > { %647 = vmatprep.subr.bf16.mxu0 %v1117_v20  ;;  %1043 = vmatprep.subr.bf16.mxu1 %v1117_v20 }
  0x2c   : > { %648 = vmatpush1.bf16.msra.mxu0 %v1119_v21  ;;  %1059 = vmatpush1.bf16.msra.mxu1 %v1119_v21 }
  0x2d   : > { %649 = vmatprep.subr.bf16.mxu0 %v1120_v22  ;;  %1044 = vmatprep.subr.bf16.mxu1 %v1120_v22  ;;  %v786_v22 = vld [vmem:[%s1339_s28 + $0x28] sm:$0xff] }
  0x30   : > { %650 = vmatpush1.bf16.msra.mxu0 %v1122_v23  ;;  %1060 = vmatpush1.bf16.msra.mxu1 %v1122_v23 }
  0x31   : > { %651 = vmatprep.subr.bf16.mxu0 %v1123_v24  ;;  %1045 = vmatprep.subr.bf16.mxu1 %v1123_v24  ;;  %v794_v24 = vld [vmem:[%s1339_s28 + $0x68] sm:$0xff] }
  0x34   : > { %652 = vmatpush1.bf16.msra.mxu0 %v1125_v25  ;;  %1061 = vmatpush1.bf16.msra.mxu1 %v1125_v25 }
  0x35   : > { %653 = vmatprep.subr.bf16.mxu0 %v1126_v26  ;;  %1046 = vmatprep.subr.bf16.mxu1 %v1126_v26 }
  0x38   : > { %654 = vmatpush1.bf16.msra.mxu0 %v1128_v27  ;;  %1062 = vmatpush1.bf16.msra.mxu1 %v1128_v27 }
  0x39   : > { %655 = vmatprep.subr.bf16.mxu0 %v1129_v28  ;;  %1047 = vmatprep.subr.bf16.mxu1 %v1129_v28  ;;  %v787_v28 = vld [vmem:[%s1339_s28 + $0x30] sm:$0xff] }
  0x3c   : > { %656 = vmatpush1.bf16.msra.mxu0 %v1131_v29  ;;  %1063 = vmatpush1.bf16.msra.mxu1 %v1131_v29 }
  0x3d   : > { %657 = vmatprep.subr.bf16.mxu0 %v1132_v30  ;;  %1048 = vmatprep.subr.bf16.mxu1 %v1132_v30  ;;  %v795_v30 = vld [vmem:[%s1339_s28 + $0x70] sm:$0xff] }
  0x40   : > { %658 = vmatpush1.bf16.msra.mxu0 %v1134_v31  ;;  %1064 = vmatpush1.bf16.msra.mxu1 %v1134_v31 }
  0x41   : > { %659 = vmatprep.subr.bf16.mxu0 %v1135_v32  ;;  %1049 = vmatprep.subr.bf16.mxu1 %v1135_v32 }
  0x44   : > { %660 = vmatpush1.bf16.msra.mxu0 %v1137_v33  ;;  %1065 = vmatpush1.bf16.msra.mxu1 %v1137_v33 }
  0x47   : > { %662 = vmatmul.mubr.bf16.vlgmr.msra.gmra.mrb[0].mxu0 %v1138_v34  ;;  %682 = vmatmul.mubr.bf16.vlgmr.msra.gmra.mrb[0].mxu1 %v1141_v35 }
  0x48   : > { %671 = vmatprep.mubr.bf16.mxu0 %v1144_v36  ;;  %691 = vmatprep.mubr.bf16.mxu1 %v1146_v37  ;;  %v788_v36 = vld [vmem:[%s1339_s28 + $0x38] sm:$0xff] }
  0x4f   : > { %672 = vmatmul.mubr.bf16.gmra.mrb[4].mxu0 %v1148_v38  ;;  %692 = vmatmul.mubr.bf16.gmra.mrb[4].mxu1 %v1149_v39  ;;  %v796_v38 = vld [vmem:[%s1339_s28 + $0x78] sm:$0xff] }
 0x11a   : > { %v663_v47 = vpop.f32.mrb[0].mxu0  ;;  %v683_v49 = vpop.f32.mrb[0].mxu1 }
 0x11b   : > { %v765_v51 = vadd.f32 %v758_v45, %v663_v47  ;;  %v773_v52 = vadd.f32 %v758_v45, %v683_v49  ;;  %v665_v53 = vpop.f32.mrb[1].mxu0  ;;  %v685_v55 = vpop.f32.mrb[1].mxu1 }
 0x11c   : > { %v766_v57 = vadd.f32 %v1341_v46, %v665_v53  ;;  %v774_v58 = vadd.f32 %v1341_v46, %v685_v55  ;;  %v667_v59 = vpop.f32.mrb[2].mxu0  ;;  %v687_v61 = vpop.f32.mrb[2].mxu1 }
 0x11d   : > { %v797_v63 = vadd.f32 %v781_v48, %v765_v51  ;;  %v805_v0 = vadd.f32 %v789_v50, %v773_v52  ;;  %v767_v1 = vadd.f32 %v758_v45, %v667_v59  ;;  %v775_v2 = vadd.f32 %v758_v45, %v687_v61  ;;  %v669_v3 = vpop.f32.mrb[3].mxu0  ;;  %v689_v5 = vpop.f32.mrb[3].mxu1 }
 0x11e   : > { %v798_v7 = vadd.f32 %v782_v54, %v766_v57  ;;  %v806_v8 = vadd.f32 %v790_v56, %v774_v58  ;;  %v768_v9 = vadd.f32 %v1341_v46, %v669_v3  ;;  %v776_v10 = vadd.f32 %v1341_v46, %v689_v5 }
 0x11f   : > { %813 = vst [vmem:[%s1350_s30] sm:$0xff] %v797_v63  ;;  %821 = vst [vmem:[%s1350_s30 + $0x40] sm:$0xff] %v805_v0  ;;  %v799_v11 = vadd.f32 %v783_v60, %v767_v1  ;;  %v807_v12 = vadd.f32 %v791_v62, %v775_v2 }
 0x120   : > { %814 = vst [vmem:[%s1350_s30 + $0x8] sm:$0xff] %v798_v7  ;;  %822 = vst [vmem:[%s1350_s30 + $0x48] sm:$0xff] %v806_v8  ;;  %v800_v13 = vadd.f32 %v784_v4, %v768_v9  ;;  %v808_v14 = vadd.f32 %v792_v6, %v776_v10 }
 0x121   : > { %815 = vst [vmem:[%s1350_s30 + $0x10] sm:$0xff] %v799_v11  ;;  %823 = vst [vmem:[%s1350_s30 + $0x50] sm:$0xff] %v807_v12 }
 0x122   : > { %816 = vst [vmem:[%s1350_s30 + $0x18] sm:$0xff] %v800_v13  ;;  %824 = vst [vmem:[%s1350_s30 + $0x58] sm:$0xff] %v808_v14  ;;  %v673_v15 = vpop.f32.mrb[4].mxu0  ;;  %v693_v17 = vpop.f32.mrb[4].mxu1 }
 0x123   : > { %v769_v19 = vadd.f32 %v758_v45, %v673_v15  ;;  %v777_v20 = vadd.f32 %v758_v45, %v693_v17  ;;  %v675_v21 = vpop.f32.mrb[5].mxu0  ;;  %v695_v23 = vpop.f32.mrb[5].mxu1 }
 0x124   : > { %v770_v25 = vadd.f32 %v1341_v46, %v675_v21  ;;  %v778_v26 = vadd.f32 %v1341_v46, %v695_v23  ;;  %v677_v27 = vpop.f32.mrb[6].mxu0  ;;  %v697_v29 = vpop.f32.mrb[6].mxu1 }
 0x125   : > { %v801_v31 = vadd.f32 %v785_v16, %v769_v19  ;;  %v809_v32 = vadd.f32 %v793_v18, %v777_v20  ;;  %v771_v33 = vadd.f32 %v758_v45, %v677_v27  ;;  %v779_v34 = vadd.f32 %v758_v45, %v697_v29  ;;  %v679_v35 = vpop.f32.mrb[7].mxu0  ;;  %v699_v37 = vpop.f32.mrb[7].mxu1 }
 0x126   : > { %v802_v39 = vadd.f32 %v786_v22, %v770_v25  ;;  %v810_v40 = vadd.f32 %v794_v24, %v778_v26  ;;  %v772_v41 = vadd.f32 %v1341_v46, %v679_v35  ;;  %v780_v42 = vadd.f32 %v1341_v46, %v699_v37 }
 0x127   : > { %817 = vst [vmem:[%s1350_s30 + $0x20] sm:$0xff] %v801_v31  ;;  %825 = vst [vmem:[%s1350_s30 + $0x60] sm:$0xff] %v809_v32  ;;  %v803_v43 = vadd.f32 %v787_v28, %v771_v33  ;;  %v811_v44 = vadd.f32 %v795_v30, %v779_v34 }
 0x128   : > { %818 = vst [vmem:[%s1350_s30 + $0x28] sm:$0xff] %v802_v39  ;;  %826 = vst [vmem:[%s1350_s30 + $0x68] sm:$0xff] %v810_v40  ;;  %v804_v45 = vadd.f32 %v788_v36, %v772_v41  ;;  %v812_v47 = vadd.f32 %v796_v38, %v780_v42 }
 0x129   : > { %819 = vst [vmem:[%s1350_s30 + $0x30] sm:$0xff] %v803_v43  ;;  %827 = vst [vmem:[%s1350_s30 + $0x70] sm:$0xff] %v811_v44 }
 0x12a   : > { %820 = vst [vmem:[%s1350_s30 + $0x38] sm:$0xff] %v804_v45  ;;  %828 = vst [vmem:[%s1350_s30 + $0x78] sm:$0xff] %v812_v47 }
 0x12b PF: > { %s14_s17 = sadd.s32 1, %s1172_s17   ;;  %s1402_s15 = smov %s1168_s16 }
 0x12c   : > { %p11_p5 = scmp.ge.s32.totalorder %s14_s17, 4   ;;  %s1403_s16 = smov %s1405_s18 }
 0x12e   :  { %13 = sbr.rel (!%p11_p5) target bundleno = 2 (0x2), region = 83 }

// kernel: sam_predictor_forward.17
= control target key start
LH: loop header
LB: loop body
LE: loop exit
PB: predicated region body
PF: predicated region fallthrough
CT: control target
= control target key end

     0   :  { %s2130_s18 = smov 0   ;;  %s2132_s19 = smov 0   ;;  %s2897_s0 = inlined_call_operand.vmem [shape: f32[128,256], index: 0, kind: input, shape index: {}]   ;;  %s2898_s1 = inlined_call_operand.vmem [shape: bf16[256,1024], index: 1, kind: input, shape index: {}]   ;;  %s2899_s2 = inlined_call_operand.vmem [shape: f32[1,1024], index: 2, kind: input, shape index: {}]   ;;  %s2900_s3 = inlined_call_operand.vmem [shape: f32[1,256], index: 3, kind: input, shape index: {}]   ;;  %s2901_s4 = inlined_call_operand.vmem [shape: f32[1,256], index: 4, kind: input, shape index: {}]   ;;  %s2902_s5 = inlined_call_operand.vmem [shape: bf16[128,1024], index: 5, kind: output, shape index: {}]  }
   0x1   :  { %s2134_s20 = smov 0   ;;  %s2136_s21 = smov 0  }
   0x2   :  { %s2138_s22 = smov 0   ;;  %s2140_s23 = smov 0  }
   0x3   :  { %s2142_s24 = smov 0   ;;  %s2144_s25 = smov 0  }
   0x4   :  { %s2146_s26 = smov 0  }
   0x5 LB: > { %s1722_s27 = sadd.s32 4294967295, %s2097_s26   ;;  %s30_s28 = sadd.s32 1, %s2089_s24  ;;  %s2097_s26 = sphi %s2146_s26, %s15_s26   ;;  %s2093_s25 = sphi %s2144_s25, %s2911_s25   ;;  %s2089_s24 = sphi %s2142_s24, %s2910_s24   ;;  %s2085_s23 = sphi %s2140_s23, %s2909_s23   ;;  %s2081_s22 = sphi %s2138_s22, %s2908_s22   ;;  %s2077_s21 = sphi %s2136_s21, %s2907_s21   ;;  %s2073_s20 = sphi %s2134_s20, %s2906_s20   ;;  %s2069_s19 = sphi %s2132_s19, %s2905_s19   ;;  %s2065_s18 = sphi %s2130_s18, %s2904_s18  }
   0x6   : > { %p32_p0 = scmp.ge.s32.totalorder %s30_s28, 4  ;;  %s34_s29 = sadd.s32 1, %s2093_s25 }
   0x7   : > { %s71_s30 = sadd.s32 1, %s2077_s21  ;;  %p78_p1 = scmp.ne.s32.totalorder %s2077_s21, %s2073_s20 }
   0x8   : > { %s2913_s28 = smov (%p32_p0, %s30_s28), 0  ;;  %s2915_s29 = smov (!%p32_p0, %s34_s29), %s2093_s25 }
   0x9   : > { %s67_s6 = ssub.s32 %s2089_s24, %s2913_s28  ;;  %p79_p2 = scmp.eq.s32.totalorder %s2097_s26, 0 }
   0xa   : > { %p36_p3 = scmp.ge.s32.totalorder %s2915_s29, 2  ;;  %p69_p4 = scmp.eq.s32.totalorder %s67_s6, 0 }
   0xb   : > { %p80_p5 = por %p79_p2, %p78_p1  ;;  %s167_s7 = sadd.s32 1, %s2069_s19 }
   0xc   : > { %s2917_s29 = smov (%p36_p3, %s2915_s29), 0  ;;  %p177_p6 = scmp.ne.s32.totalorder %s2069_s19, %s2065_s18 }
   0xd   : > { %s2191_s8 = scalar_select %p69_p4, %s2077_s21, %s71_s30  }
   0xe   : > { %s162_s9 = ssub.s32 %s2093_s25, %s2917_s29  ;;  %p178_p7 = scmp.eq.s32.totalorder %s1722_s27, 7 }
   0xf   : > { %s164_s10 = sor.u32 %s162_s9, %s67_s6  ;;  %p1725_p10 = scmp.ge.s32.totalorder %s2097_s26, 8 }
  0x10   : > { %p165_p8 = scmp.eq.s32.totalorder %s164_s10, 0  ;;  %p2197_p9 = por %p178_p7, %p177_p6 }
  0x11   : > { %206 = sbr.rel (%p1725_p10) target bundleno = 60 (0x3c), region = 24 }
  0x12   : > { %s2202_s12 = scalar_select %p165_p8, %s2069_s19, %s167_s7  }
  0x18   : > { %224 = sbr.rel (!%p80_p5) target bundleno = 60 (0x3c), region = 32  ;;  %s226_s13 = sand.u32 (%p80_p5), 1, %s2077_s21  }
  0x19   : > { %s1783_s14 = sshll.u32 (%p80_p5), %s2089_s24, 3  ;;  %s1726_s15 = sshll.u32 (%p80_p5), %s226_s13, 8 }
  0x1a   : > { %s2210_s27 = scalar_lea.vmem (%p80_p5), %s2898_s1, %s1783_s14  ;;  %s2215_s30 = scalar_lea.vmem (%p80_p5), [#allocation3], %s1726_s15 }
  0x1b   : > { %v324_v0 = vld [vmem:[%s2210_s27] sm:$0xff] (%p80_p5) }
  0x1c   : > { %v326_v1 = vld [vmem:[%s2210_s27 + $0x20] sm:$0xff] (%p80_p5)  ;;  %325 = vst [vmem:[%s2215_s30] sm:$0xff] (%p80_p5), %v324_v0 }
  0x1d   : > { %v328_v2 = vld [vmem:[%s2210_s27 + $0x40] sm:$0xff] (%p80_p5)  ;;  %327 = vst [vmem:[%s2215_s30 + $0x8] sm:$0xff] (%p80_p5), %v326_v1 }
  0x1e   : > { %329 = vst [vmem:[%s2215_s30 + $0x10] sm:$0xff] (%p80_p5), %v328_v2  ;;  %v330_v3 = vld [vmem:[%s2210_s27 + $0x60] sm:$0xff] (%p80_p5) }
  0x1f   : > { %v332_v4 = vld [vmem:[%s2210_s27 + $0x80] sm:$0xff]  ;;  %331 = vst [vmem:[%s2215_s30 + $0x18] sm:$0xff] %v330_v3 }
  0x20   : > { %v334_v5 = vld [vmem:[%s2210_s27 + $0xa0] sm:$0xff]  ;;  %333 = vst [vmem:[%s2215_s30 + $0x20] sm:$0xff] %v332_v4 }
  0x21   : > { %335 = vst [vmem:[%s2215_s30 + $0x28] sm:$0xff] %v334_v5  ;;  %v336_v6 = vld [vmem:[%s2210_s27 + $0xc0] sm:$0xff] }
  0x22   : > { %v338_v7 = vld [vmem:[%s2210_s27 + $0xe0] sm:$0xff]  ;;  %337 = vst [vmem:[%s2215_s30 + $0x30] sm:$0xff] %v336_v6 }
  0x23   : > { %v340_v8 = vld [vmem:[%s2210_s27 + $0x100] sm:$0xff]  ;;  %339 = vst [vmem:[%s2215_s30 + $0x38] sm:$0xff] %v338_v7 }
  0x24   : > { %341 = vst [vmem:[%s2215_s30 + $0x40] sm:$0xff] %v340_v8  ;;  %v342_v9 = vld [vmem:[%s2210_s27 + $0x120] sm:$0xff] }
  0x25   : > { %v344_v10 = vld [vmem:[%s2210_s27 + $0x140] sm:$0xff]  ;;  %343 = vst [vmem:[%s2215_s30 + $0x48] sm:$0xff] %v342_v9 }
  0x26   : > { %v346_v11 = vld [vmem:[%s2210_s27 + $0x160] sm:$0xff]  ;;  %345 = vst [vmem:[%s2215_s30 + $0x50] sm:$0xff] %v344_v10 }
  0x27   : > { %347 = vst [vmem:[%s2215_s30 + $0x58] sm:$0xff] %v346_v11  ;;  %v348_v12 = vld [vmem:[%s2210_s27 + $0x180] sm:$0xff] }
  0x28   : > { %v350_v13 = vld [vmem:[%s2210_s27 + $0x1a0] sm:$0xff]  ;;  %349 = vst [vmem:[%s2215_s30 + $0x60] sm:$0xff] %v348_v12 }
  0x29   : > { %v352_v14 = vld [vmem:[%s2210_s27 + $0x1c0] sm:$0xff]  ;;  %351 = vst [vmem:[%s2215_s30 + $0x68] sm:$0xff] %v350_v13 }
  0x2a   : > { %353 = vst [vmem:[%s2215_s30 + $0x70] sm:$0xff] %v352_v14  ;;  %v354_v15 = vld [vmem:[%s2210_s27 + $0x1e0] sm:$0xff] }
  0x2b   : > { %v356_v16 = vld [vmem:[%s2210_s27 + $0x200] sm:$0xff]  ;;  %355 = vst [vmem:[%s2215_s30 + $0x78] sm:$0xff] %v354_v15 }
  0x2c   : > { %v358_v17 = vld [vmem:[%s2210_s27 + $0x220] sm:$0xff]  ;;  %357 = vst [vmem:[%s2215_s30 + $0x80] sm:$0xff] %v356_v16 }
  0x2d   : > { %359 = vst [vmem:[%s2215_s30 + $0x88] sm:$0xff] %v358_v17  ;;  %v360_v18 = vld [vmem:[%s2210_s27 + $0x240] sm:$0xff] }
  0x2e   : > { %v362_v19 = vld [vmem:[%s2210_s27 + $0x260] sm:$0xff]  ;;  %361 = vst [vmem:[%s2215_s30 + $0x90] sm:$0xff] %v360_v18 }
  0x2f   : > { %v364_v20 = vld [vmem:[%s2210_s27 + $0x280] sm:$0xff]  ;;  %363 = vst [vmem:[%s2215_s30 + $0x98] sm:$0xff] %v362_v19 }
  0x30   : > { %365 = vst [vmem:[%s2215_s30 + $0xa0] sm:$0xff] %v364_v20  ;;  %v366_v21 = vld [vmem:[%s2210_s27 + $0x2a0] sm:$0xff] }
  0x31   : > { %v368_v22 = vld [vmem:[%s2210_s27 + $0x2c0] sm:$0xff]  ;;  %367 = vst [vmem:[%s2215_s30 + $0xa8] sm:$0xff] %v366_v21 }
  0x32   : > { %v370_v23 = vld [vmem:[%s2210_s27 + $0x2e0] sm:$0xff]  ;;  %369 = vst [vmem:[%s2215_s30 + $0xb0] sm:$0xff] %v368_v22 }
  0x33   : > { %371 = vst [vmem:[%s2215_s30 + $0xb8] sm:$0xff] %v370_v23  ;;  %v372_v24 = vld [vmem:[%s2210_s27 + $0x300] sm:$0xff] }
  0x34   : > { %v374_v25 = vld [vmem:[%s2210_s27 + $0x320] sm:$0xff]  ;;  %373 = vst [vmem:[%s2215_s30 + $0xc0] sm:$0xff] %v372_v24 }
  0x35   : > { %v376_v26 = vld [vmem:[%s2210_s27 + $0x340] sm:$0xff]  ;;  %375 = vst [vmem:[%s2215_s30 + $0xc8] sm:$0xff] %v374_v25 }
  0x36   : > { %377 = vst [vmem:[%s2215_s30 + $0xd0] sm:$0xff] %v376_v26  ;;  %v378_v27 = vld [vmem:[%s2210_s27 + $0x360] sm:$0xff] }
  0x37   : > { %v380_v28 = vld [vmem:[%s2210_s27 + $0x380] sm:$0xff]  ;;  %379 = vst [vmem:[%s2215_s30 + $0xd8] sm:$0xff] %v378_v27 }
  0x38   : > { %v382_v29 = vld [vmem:[%s2210_s27 + $0x3a0] sm:$0xff]  ;;  %381 = vst [vmem:[%s2215_s30 + $0xe0] sm:$0xff] %v380_v28 }
  0x39   : > { %383 = vst [vmem:[%s2215_s30 + $0xe8] sm:$0xff] %v382_v29  ;;  %v384_v30 = vld [vmem:[%s2210_s27 + $0x3c0] sm:$0xff] }
  0x3a   : > { %v386_v31 = vld [vmem:[%s2210_s27 + $0x3e0] sm:$0xff]  ;;  %385 = vst [vmem:[%s2215_s30 + $0xf0] sm:$0xff] %v384_v30 }
  0x3b   : > { %387 = vst [vmem:[%s2215_s30 + $0xf8] sm:$0xff] %v386_v31 }
  0x3c PF: > { %p1729_p11 = scmp.ge.s32.totalorder %s2097_s26, 1  ;;  %p400_p12 = scmp.lt.s32.totalorder %s2097_s26, 9 }
  0x3e   : > { %p401_p13 = pnand %p1729_p11, %p400_p12 }
  0x3f   : > { %s1732_s6 = sshll.u32 (!%p401_p13), %s2085_s23, 3  ;;  %s407_s14 = sand.u32 (!%p401_p13), 1, %s2073_s20  }
  0x40   : > { %404 = sbr.rel (%p401_p13) target bundleno = 746 (0x2ea), region = 74  ;;  %p449_p0 = scmp.lt.s32.totalorder (!%p401_p13), %s1732_s6, 15 }
  0x41   : > { %s1730_s15 = sshll.u32 (!%p401_p13), %s407_s14, 8 }
  0x42   : > { %s2333_s16 = scalar_lea.vmem (!%p401_p13), [#allocation3], %s1730_s15 }
  0x43   : > { %v1899_v56 = vld [vmem:[%s2333_s16 + $0x4] ss:$8 sps:$4 sm:$0xff] (!%p401_p13)   ;;  %v1901_v57 = vld [vmem:[%s2333_s16] ss:$8 sps:$4 sm:$0xff] (!%p401_p13)   ;;  %v1902_v58 = vld [vmem:[%s2333_s16 + $0x14] ss:$8 sps:$4 sm:$0xff] (!%p401_p13)  }
  0x44   : > { %905 = vmatprep.subr.bf16.mxu0 (!%p401_p13), %v1899_v56  ;;  %1794 = vmatprep.subr.bf16.mxu1 (!%p401_p13), %v1899_v56  ;;  %v1904_v59 = vld [vmem:[%s2333_s16 + $0x10] ss:$8 sps:$4 sm:$0xff] (!%p401_p13)   ;;  %v1905_v60 = vld [vmem:[%s2333_s16 + $0x24] ss:$8 sps:$4 sm:$0xff] (!%p401_p13)   ;;  %v1907_v61 = vld [vmem:[%s2333_s16 + $0x20] ss:$8 sps:$4 sm:$0xff] (!%p401_p13)  }
  0x45   : > { %906 = vmatpush1.bf16.msra.mxu0 (!%p401_p13), %v1901_v57  ;;  %1810 = vmatpush1.bf16.msra.mxu1 (!%p401_p13), %v1901_v57  ;;  %v1908_v62 = vld [vmem:[%s2333_s16 + $0x34] ss:$8 sps:$4 sm:$0xff] (!%p401_p13)   ;;  %v1910_v63 = vld [vmem:[%s2333_s16 + $0x30] ss:$8 sps:$4 sm:$0xff] (!%p401_p13)   ;;  %v1911_v0 = vld [vmem:[%s2333_s16 + $0x44] ss:$8 sps:$4 sm:$0xff] (!%p401_p13)  }
  0x46   : > { %907 = vmatprep.subr.bf16.mxu0 (!%p401_p13), %v1902_v58  ;;  %1795 = vmatprep.subr.bf16.mxu1 (!%p401_p13), %v1902_v58  ;;  %v1913_v1 = vld [vmem:[%s2333_s16 + $0x40] ss:$8 sps:$4 sm:$0xff] (!%p401_p13)   ;;  %v1914_v2 = vld [vmem:[%s2333_s16 + $0x54] ss:$8 sps:$4 sm:$0xff] (!%p401_p13)   ;;  %v1916_v3 = vld [vmem:[%s2333_s16 + $0x50] ss:$8 sps:$4 sm:$0xff] (!%p401_p13)  }
  0x47   : > { %s2919_s6 = smov (!%p449_p0, %s1732_s6), 15  ;;  %v1917_v4 = vld [vmem:[%s2333_s16 + $0x64] ss:$8 sps:$4 sm:$0xff]   ;;  %v1919_v5 = vld [vmem:[%s2333_s16 + $0x60] ss:$8 sps:$4 sm:$0xff]   ;;  %s1793_s15 = sshll.u32 (%p2197_p9), %s2085_s23, 6 }
  0x48   : > { %s1784_s7 = sshll.u32 %s2919_s6, 4  ;;  %v1920_v6 = vld [vmem:[%s2333_s16 + $0x74] ss:$8 sps:$4 sm:$0xff]   ;;  %v1922_v7 = vld [vmem:[%s2333_s16 + $0x70] ss:$8 sps:$4 sm:$0xff]   ;;  %s2508_s6 = sshll.u32 %s2081_s22, 1 }
  0x49   : > { %s456_s13 = scalar_lea.vmem %s2897_s0, %s1784_s7  ;;  %908 = vmatpush1.bf16.msra.mxu0 %v1904_v59  ;;  %1811 = vmatpush1.bf16.msra.mxu1 %v1904_v59  ;;  %v1923_v8 = vld [vmem:[%s2333_s16 + $0x84] ss:$8 sps:$4 sm:$0xff]   ;;  %v1925_v9 = vld [vmem:[%s2333_s16 + $0x80] ss:$8 sps:$4 sm:$0xff]   ;;  %p462_p1 = scmp.lt.s32.totalorder %s2508_s6, 7 }
  0x4a   : > { %v2284_v32 = vld [vmem:[%s456_s13] sm:$0xff]  ;;  %v2286_v33 = vld [vmem:[%s456_s13 + $0x8] sm:$0xff]  ;;  %v2294_v37 = vld [vmem:[%s456_s13 + $0x10] sm:$0xff]  ;;  %909 = vmatprep.subr.bf16.mxu0 %v1905_v60  ;;  %1796 = vmatprep.subr.bf16.mxu1 %v1905_v60  ;;  %s444_s22 = sand.u32 1, %s2065_s18  }
  0x4b   : > { %v2288_v34 = vld [vmem:[%s456_s13 + $0x40] sm:$0xff]  ;;  %v506_v35 = vadd.f32 %v2286_v33, %v2284_v32  ;;  %v2292_v36 = vld [vmem:[%s456_s13 + $0x48] sm:$0xff]  ;;  %v2296_v38 = vld [vmem:[%s456_s13 + $0x18] sm:$0xff]  ;;  %s463_s7 = scalar_select %p462_p1, %s2508_s6, 7 }
  0x4c   : > { %v518_v39 = vadd.f32 %v2292_v36, %v2288_v34  ;;  %v2300_v40 = vld [vmem:[%s456_s13 + $0x50] sm:$0xff]  ;;  %v2302_v41 = vld [vmem:[%s456_s13 + $0x58] sm:$0xff]  ;;  %v509_v42 = vadd.f32 %v2296_v38, %v2294_v37  ;;  %v2308_v44 = vld [vmem:[%s456_s13 + $0x20] sm:$0xff]  ;;  %s1731_s18 = sshll.u32 %s444_s22, 6 }
  0x4d   : > { %507 = vadd.xlane.f32.xlu0 %v506_v35  ;;  %v521_v43 = vadd.f32 %v2302_v41, %v2300_v40  ;;  %v2310_v45 = vld [vmem:[%s456_s13 + $0x28] sm:$0xff]  ;;  %v2312_v46 = vld [vmem:[%s456_s13 + $0x30] sm:$0xff]  ;;  %v2314_v47 = vld [vmem:[%s456_s13 + $0x38] sm:$0xff]  ;;  %910 = vmatpush1.bf16.msra.mxu0 %v1907_v61  ;;  %s2677_s14 = scalar_lea.vmem [#allocation4], %s1731_s18 }
  0x4e   : > { %519 = vadd.xlane.f32.xlu1 %v518_v39  ;;  %v512_v48 = vadd.f32 %v2310_v45, %v2308_v44  ;;  %v515_v49 = vadd.f32 %v2314_v47, %v2312_v46  ;;  %v2320_v50 = vld [vmem:[%s456_s13 + $0x60] sm:$0xff]  ;;  %v2322_v51 = vld [vmem:[%s456_s13 + $0x68] sm:$0xff]  ;;  %v2324_v52 = vld [vmem:[%s456_s13 + $0x70] sm:$0xff]  ;;  %1812 = vmatpush1.bf16.msra.mxu1 %v1907_v61 }
  0x4f   : > { %v2326_v53 = vld [vmem:[%s456_s13 + $0x78] sm:$0xff]  ;;  %v524_v54 = vadd.f32 %v2322_v51, %v2320_v50  ;;  %911 = vmatprep.subr.bf16.mxu0 %v1908_v62  ;;  %1797 = vmatprep.subr.bf16.mxu1 %v1908_v62  ;;  %s464_s13 = scalar_lea.vmem %s2899_s2, %s463_s7 }
  0x50   : > { %v527_v55 = vadd.f32 %v2326_v53, %v2324_v52 }
  0x51   : > { %510 = vadd.xlane.f32.xlu0 %v509_v42  ;;  %912 = vmatpush1.bf16.msra.mxu0 %v1910_v63 }
  0x52   : > { %522 = vadd.xlane.f32.xlu1 %v521_v43  ;;  %1813 = vmatpush1.bf16.msra.mxu1 %v1910_v63 }
  0x53   : > { %913 = vmatprep.subr.bf16.mxu0 %v1911_v0  ;;  %1798 = vmatprep.subr.bf16.mxu1 %v1911_v0 }
  0x55   : > { %513 = vadd.xlane.f32.xlu0 %v512_v48  ;;  %914 = vmatpush1.bf16.msra.mxu0 %v1913_v1 }
  0x56   : > { %516 = vadd.xlane.f32.xlu1 %v515_v49  ;;  %1814 = vmatpush1.bf16.msra.mxu1 %v1913_v1 }
  0x57   : > { %915 = vmatprep.subr.bf16.mxu0 %v1914_v2  ;;  %1799 = vmatprep.subr.bf16.mxu1 %v1914_v2  ;;  %v1926_v2 = vld [vmem:[%s2333_s16 + $0x94] ss:$8 sps:$4 sm:$0xff]  }
  0x59   : > { %525 = vadd.xlane.f32.xlu0 %v524_v54  ;;  %916 = vmatpush1.bf16.msra.mxu0 %v1916_v3 }
  0x5a   : > { %528 = vadd.xlane.f32.xlu1 %v527_v55  ;;  %1815 = vmatpush1.bf16.msra.mxu1 %v1916_v3  ;;  %v1928_v3 = vld [vmem:[%s2333_s16 + $0x90] ss:$8 sps:$4 sm:$0xff]  }
  0x5b   : > { %917 = vmatprep.subr.bf16.mxu0 %v1917_v4  ;;  %1800 = vmatprep.subr.bf16.mxu1 %v1917_v4  ;;  %v1929_v4 = vld [vmem:[%s2333_s16 + $0xa4] ss:$8 sps:$4 sm:$0xff]  }
  0x5d   : > { %918 = vmatpush1.bf16.msra.mxu0 %v1919_v5 }
  0x5e   : > { %1816 = vmatpush1.bf16.msra.mxu1 %v1919_v5  ;;  %919 = vmatprep.subr.bf16.mxu0 %v1920_v6  ;;  %v1931_v5 = vld [vmem:[%s2333_s16 + $0xa0] ss:$8 sps:$4 sm:$0xff]  }
  0x5f   : > { %1801 = vmatprep.subr.bf16.mxu1 %v1920_v6  ;;  %v1932_v6 = vld [vmem:[%s2333_s16 + $0xb4] ss:$8 sps:$4 sm:$0xff]  }
  0x61   : > { %920 = vmatpush1.bf16.msra.mxu0 %v1922_v7 }
  0x62   : > { %1817 = vmatpush1.bf16.msra.mxu1 %v1922_v7  ;;  %921 = vmatprep.subr.bf16.mxu0 %v1923_v8  ;;  %v1934_v7 = vld [vmem:[%s2333_s16 + $0xb0] ss:$8 sps:$4 sm:$0xff]  }
  0x63   : > { %1802 = vmatprep.subr.bf16.mxu1 %v1923_v8  ;;  %v1935_v8 = vld [vmem:[%s2333_s16 + $0xc4] ss:$8 sps:$4 sm:$0xff]  }
  0x65   : > { %922 = vmatpush1.bf16.msra.mxu0 %v1925_v9 }
  0x66   : > { %1818 = vmatpush1.bf16.msra.mxu1 %v1925_v9  ;;  %923 = vmatprep.subr.bf16.mxu0 %v1926_v2  ;;  %v1937_v9 = vld [vmem:[%s2333_s16 + $0xc0] ss:$8 sps:$4 sm:$0xff]  }
  0x67   : > { %1803 = vmatprep.subr.bf16.mxu1 %v1926_v2 }
  0x69   : > { %924 = vmatpush1.bf16.msra.mxu0 %v1928_v3 }
  0x6a   : > { %1819 = vmatpush1.bf16.msra.mxu1 %v1928_v3  ;;  %925 = vmatprep.subr.bf16.mxu0 %v1929_v4 }
  0x6b   : > { %1804 = vmatprep.subr.bf16.mxu1 %v1929_v4 }
  0x6d   : > { %926 = vmatpush1.bf16.msra.mxu0 %v1931_v5 }
  0x6e   : > { %1820 = vmatpush1.bf16.msra.mxu1 %v1931_v5  ;;  %927 = vmatprep.subr.bf16.mxu0 %v1932_v6 }
  0x6f   : > { %1805 = vmatprep.subr.bf16.mxu1 %v1932_v6 }
  0x71   : > { %928 = vmatpush1.bf16.msra.mxu0 %v1934_v7 }
  0x72   : > { %1821 = vmatpush1.bf16.msra.mxu1 %v1934_v7  ;;  %929 = vmatprep.subr.bf16.mxu0 %v1935_v8 }
  0x73   : > { %1806 = vmatprep.subr.bf16.mxu1 %v1935_v8 }
  0x75   : > { %930 = vmatpush1.bf16.msra.mxu0 %v1937_v9 }
  0x76   : > { %1822 = vmatpush1.bf16.msra.mxu1 %v1937_v9 }
  0xda   : > { %v508_v10 = vpop.xlane.xlu0 %507 }
  0xdb   : > { %v531_v11 = vmul.f32 0.00390625, %v508_v10  ;;  %v520_v12 = vpop.xlane.xlu1 %519  ;;  %v1938_v10 = vld [vmem:[%s2333_s16 + $0xd4] ss:$8 sps:$4 sm:$0xff]  }
  0xdc   : > { %v535_v13 = vmul.f32 0.00390625, %v520_v12  ;;  %931 = vmatprep.subr.bf16.mxu0 %v1938_v10  ;;  %1807 = vmatprep.subr.bf16.mxu1 %v1938_v10  ;;  %v1941_v12 = vld [vmem:[%s2333_s16 + $0xe4] ss:$8 sps:$4 sm:$0xff]  }
  0xdd   : > { %v2354_v14 = vsub.f32 %v2284_v32, %v531_v11  ;;  %v2357_v15 = vsub.f32 %v2286_v33, %v531_v11  ;;  %v1940_v11 = vld [vmem:[%s2333_s16 + $0xd0] ss:$8 sps:$4 sm:$0xff]  }
  0xde   : > { %v2360_v16 = vsub.f32 %v2288_v34, %v535_v13  ;;  %v2363_v17 = vsub.f32 %v2292_v36, %v535_v13  ;;  %v511_v18 = vpop.xlane.xlu0 %510  ;;  %932 = vmatpush1.bf16.msra.mxu0 %v1940_v11  ;;  %1823 = vmatpush1.bf16.msra.mxu1 %v1940_v11  ;;  %v1943_v13 = vld [vmem:[%s2333_s16 + $0xe0] ss:$8 sps:$4 sm:$0xff]  }
  0xdf   : > { %v532_v19 = vmul.f32 0.00390625, %v511_v18  ;;  %v523_v20 = vpop.xlane.xlu1 %522  ;;  %v555_v21 = vmul.f32 %v2354_v14, %v2354_v14  ;;  %v556_v22 = vmul.f32 %v2357_v15, %v2357_v15  ;;  %v1944_v18 = vld [vmem:[%s2333_s16 + $0xf4] ss:$8 sps:$4 sm:$0xff]   ;;  %933 = vmatprep.subr.bf16.mxu0 %v1941_v12  ;;  %1808 = vmatprep.subr.bf16.mxu1 %v1941_v12 }
  0xe0   : > { %v536_v23 = vmul.f32 0.00390625, %v523_v20  ;;  %v563_v24 = vmul.f32 %v2360_v16, %v2360_v16  ;;  %v564_v25 = vmul.f32 %v2363_v17, %v2363_v17 }
  0xe1   : > { %v2374_v26 = vsub.f32 %v2294_v37, %v532_v19  ;;  %v2377_v27 = vsub.f32 %v2296_v38, %v532_v19  ;;  %v571_v28 = vadd.f32 %v556_v22, %v555_v21  ;;  %v1946_v19 = vld [vmem:[%s2333_s16 + $0xf0] ss:$8 sps:$4 sm:$0xff]   ;;  %s1555_s16 = sadd.s32 (%p2197_p9), %s1793_s15, %s2508_s6 }
  0xe2   : > { %v2380_v29 = vsub.f32 %v2300_v40, %v536_v23  ;;  %v2383_v30 = vsub.f32 %v2302_v41, %v536_v23  ;;  %v514_v31 = vpop.xlane.xlu0 %513  ;;  %v583_v34 = vadd.f32 %v564_v25, %v563_v24  ;;  %934 = vmatpush1.bf16.msra.mxu0 %v1943_v13  ;;  %1824 = vmatpush1.bf16.msra.mxu1 %v1943_v13  ;;  %v636_v23 = vlaneseq  ;;  %s1780_s11 = sshll.u32 (%p2197_p9), %s1555_s16, 2 }
  0xe3   : > { %v533_v32 = vmul.f32 0.00390625, %v514_v31  ;;  %572 = vadd.xlane.f32.xlu0 %v571_v28  ;;  %v517_v33 = vpop.xlane.xlu1 %516  ;;  %v557_v35 = vmul.f32 %v2374_v26, %v2374_v26  ;;  %v558_v36 = vmul.f32 %v2377_v27, %v2377_v27  ;;  %935 = vmatprep.subr.bf16.mxu0 %v1944_v18  ;;  %s1557_s27 = scalar_lea.vmem (%p2197_p9), %s2902_s5, %s1780_s11 }
  0xe4   : > { %v534_v37 = vmul.f32 0.00390625, %v517_v33  ;;  %v565_v38 = vmul.f32 %v2380_v29, %v2380_v29  ;;  %v566_v39 = vmul.f32 %v2383_v30, %v2383_v30  ;;  %1809 = vmatprep.subr.bf16.mxu1 %v1944_v18 }
  0xe5   : > { %v2394_v40 = vsub.f32 %v2308_v44, %v533_v32  ;;  %v2397_v41 = vsub.f32 %v2310_v45, %v533_v32  ;;  %v574_v42 = vadd.f32 %v558_v36, %v557_v35 }
  0xe6   : > { %v2400_v43 = vsub.f32 %v2312_v46, %v534_v37  ;;  %v2403_v48 = vsub.f32 %v2314_v47, %v534_v37  ;;  %v526_v49 = vpop.xlane.xlu0 %525  ;;  %v586_v56 = vadd.f32 %v566_v39, %v565_v38  ;;  %936 = vmatpush1.bf16.msra.mxu0 %v1946_v19  ;;  %1825 = vmatpush1.bf16.msra.mxu1 %v1946_v19 }
  0xe7   : > { %v537_v54 = vmul.f32 0.00390625, %v526_v49  ;;  %584 = vadd.xlane.f32.xlu0 %v583_v34  ;;  %575 = vadd.xlane.f32.xlu1 %v574_v42  ;;  %v529_v55 = vpop.xlane.xlu1 %528  ;;  %v559_v44 = vmul.f32 %v2394_v40, %v2394_v40  ;;  %v560_v45 = vmul.f32 %v2397_v41, %v2397_v41  ;;  %v637_v34 = vshrl.u32 %v636_v23, 7 }
  0xe8   : > { %v538_v57 = vmul.f32 0.00390625, %v529_v55  ;;  %v561_v46 = vmul.f32 %v2400_v43, %v2400_v43  ;;  %v562_v47 = vmul.f32 %v2403_v48, %v2403_v48 }
  0xe9   : > { %v2414_v58 = vsub.f32 %v2320_v50, %v537_v54  ;;  %v2417_v59 = vsub.f32 %v2322_v51, %v537_v54  ;;  %v577_v60 = vadd.f32 %v560_v45, %v559_v44  ;;  %v2447_v49 = vsub.s32 0, %v637_v34  ;;  %v504_v44 = vld [vmem:[%s2900_s3] sm:$0x3] }
  0xea   : > { %v2420_v61 = vsub.f32 %v2324_v52, %v538_v57  ;;  %v2423_v62 = vsub.f32 %v2326_v53, %v538_v57  ;;  %v580_v63 = vadd.f32 %v562_v47, %v561_v46  ;;  %v2449_v54 = vsub.s32 1, %v637_v34 }
  0xeb   : > { %587 = vadd.xlane.f32.xlu1 %v586_v56  ;;  %578 = vadd.xlane.f32.xlu0 %v577_v60  ;;  %v567_v50 = vmul.f32 %v2414_v58, %v2414_v58  ;;  %v568_v51 = vmul.f32 %v2417_v59, %v2417_v59 }
  0xec   : > { %v569_v0 = vmul.f32 %v2420_v61, %v2420_v61  ;;  %v570_v52 = vmul.f32 %v2423_v62, %v2423_v62 }
  0xed   : > { %v589_v1 = vadd.f32 %v568_v51, %v567_v50  ;;  %v2458_v50 = vrot.slane %v504_v44, %v2447_v49  ;;  %v2461_v51 = vrot.slane %v504_v44, %v2449_v54 }
  0xee   : > { %v592_v53 = vadd.f32 %v570_v52, %v569_v0 }
  0xef   : > { %581 = vadd.xlane.f32.xlu1 %v580_v63  ;;  %590 = vadd.xlane.f32.xlu0 %v589_v1  ;;  %v505_v63 = vld [vmem:[%s2901_s4] sm:$0x3] }
  0xf0   : > { %v2466_v2 = vrot.slane %v505_v63, %v2447_v49  ;;  %v670_v6 = vrot.slane %v505_v63, %v2449_v54 }
  0xf3   : > { %593 = vadd.xlane.f32.xlu1 %v592_v53 }
 0x170   : > { %v573_v20 = vpop.xlane.xlu0 %572 }
 0x171   : > { %v595_v21 = vmul.f32 0.00390625, %v573_v20 }
 0x173   : > { %v603_v22 = vadd.f32 1e-06, %v595_v21 }
 0x174   : > { %v576_v24 = vpop.xlane.xlu1 %575  ;;  %v585_v25 = vpop.xlane.xlu0 %584 }
 0x175   : > { %1947 = vrsqrt.f32 %v603_v22  ;;  %v596_v28 = vmul.f32 0.00390625, %v576_v24  ;;  %v599_v31 = vmul.f32 0.00390625, %v585_v25 }
 0x177   : > { %v604_v32 = vadd.f32 1e-06, %v596_v28  ;;  %v607_v33 = vadd.f32 1e-06, %v599_v31 }
 0x178   : > { %v588_v35 = vpop.xlane.xlu1 %587  ;;  %v579_v36 = vpop.xlane.xlu0 %578 }
 0x179   : > { %1949 = vrsqrt.f32 %v604_v32  ;;  %v600_v37 = vmul.f32 0.00390625, %v588_v35  ;;  %v597_v38 = vmul.f32 0.00390625, %v579_v36 }
 0x17a   : > { %1951 = vrsqrt.f32 %v607_v33 }
 0x17b   : > { %v608_v39 = vadd.f32 1e-06, %v600_v37  ;;  %v605_v42 = vadd.f32 1e-06, %v597_v38 }
 0x17c   : > { %v582_v55 = vpop.xlane.xlu1 %581  ;;  %v591_v56 = vpop.xlane.xlu0 %590 }
 0x17d   : > { %1953 = vrsqrt.f32 %v608_v39  ;;  %v598_v45 = vmul.f32 0.00390625, %v582_v55  ;;  %v601_v57 = vmul.f32 0.00390625, %v591_v56 }
 0x17e   : > { %1955 = vrsqrt.f32 %v605_v42 }
 0x17f   : > { %v1948_v46 = vpop.eup %1947  ;;  %v606_v47 = vadd.f32 1e-06, %v598_v45  ;;  %v609_v60 = vadd.f32 1e-06, %v601_v57 }
 0x180   : > { %v594_v0 = vpop.xlane.xlu1 %593  ;;  %v620_v52 = vmul.f32 %v1948_v46, %v2357_v15  ;;  %v619_v1 = vmul.f32 %v1948_v46, %v2354_v14 }
 0x181   : > { %1957 = vrsqrt.f32 %v606_v47  ;;  %v602_v53 = vmul.f32 0.00390625, %v594_v0 }
 0x182   : > { %1959 = vrsqrt.f32 %v609_v60  ;;  %v647_v5 = vmul.f32 %v2461_v51, %v620_v52  ;;  %v646_v7 = vmul.f32 %v2458_v50, %v619_v1 }
 0x183   : > { %v1950_v3 = vpop.eup %1949  ;;  %v610_v4 = vadd.f32 1e-06, %v602_v53 }
 0x184   : > { %v1952_v8 = vpop.eup %1951  ;;  %v622_v9 = vmul.f32 %v1950_v3, %v2377_v27  ;;  %v621_v15 = vmul.f32 %v1950_v3, %v2374_v26  ;;  %v674_v18 = vadd.f32 %v670_v6, %v647_v5  ;;  %v673_v19 = vadd.f32 %v2466_v2, %v646_v7 }
 0x185   : > { %1961 = vrsqrt.f32 %v610_v4  ;;  %v628_v14 = vmul.f32 %v1952_v8, %v2363_v17  ;;  %v627_v10 = vmul.f32 %v1952_v8, %v2360_v16 }
 0x186   : > { %v649_v11 = vmul.f32 %v2461_v51, %v622_v9  ;;  %v648_v12 = vmul.f32 %v2458_v50, %v621_v15 }
 0x187   : > { %v1954_v13 = vpop.eup %1953  ;;  %v655_v20 = vmul.f32 %v2461_v51, %v628_v14  ;;  %v654_v21 = vmul.f32 %v2458_v50, %v627_v10 }
 0x188   : > { %v1956_v27 = vpop.eup %1955  ;;  %v676_v22 = vadd.f32 %v670_v6, %v649_v11  ;;  %v675_v26 = vadd.f32 %v2466_v2, %v648_v12  ;;  %v630_v17 = vmul.f32 %v1954_v13, %v2383_v30  ;;  %v629_v16 = vmul.f32 %v1954_v13, %v2380_v29 }
 0x189   : > { %v624_v23 = vmul.f32 %v1956_v27, %v2397_v41  ;;  %v623_v24 = vmul.f32 %v1956_v27, %v2394_v40  ;;  %v682_v34 = vadd.f32 %v670_v6, %v655_v20  ;;  %v681_v35 = vadd.f32 %v2466_v2, %v654_v21 }
 0x18a   : > { %v706_v25 = vpack.c.bf16 %v676_v22, %v674_v18  ;;  %v705_v28 = vpack.c.bf16 %v675_v26, %v673_v19  ;;  %v657_v31 = vmul.f32 %v2461_v51, %v630_v17  ;;  %v656_v32 = vmul.f32 %v2458_v50, %v629_v16 }
 0x18b   : > { %v1958_v33 = vpop.eup %1957  ;;  %v651_v36 = vmul.f32 %v2461_v51, %v624_v23  ;;  %v650_v30 = vmul.f32 %v2458_v50, %v623_v24 }
 0x18c   : > { %v1960_v37 = vpop.eup %1959  ;;  %937 = vmatprep.mubr.bf16.mxu0 %v706_v25  ;;  %v684_v29 = vadd.f32 %v670_v6, %v657_v31  ;;  %v683_v41 = vadd.f32 %v2466_v2, %v656_v32  ;;  %v626_v40 = vmul.f32 %v1958_v33, %v2403_v48  ;;  %v625_v38 = vmul.f32 %v1958_v33, %v2400_v43 }
 0x18d   : > { %938 = vmatmul.mubr.bf16.vlgmr.msra.gmra.mrb[0].mxu0 %v705_v28  ;;  %v632_v39 = vmul.f32 %v1960_v37, %v2417_v59  ;;  %v631_v42 = vmul.f32 %v1960_v37, %v2414_v58  ;;  %v678_v46 = vadd.f32 %v670_v6, %v651_v36  ;;  %v677_v47 = vadd.f32 %v2466_v2, %v650_v30 }
 0x18e   : > { %v710_v55 = vpack.c.bf16 %v684_v29, %v682_v34  ;;  %v709_v56 = vpack.c.bf16 %v683_v41, %v681_v35  ;;  %v653_v44 = vmul.f32 %v2461_v51, %v626_v40  ;;  %v652_v45 = vmul.f32 %v2458_v50, %v625_v38 }
 0x18f   : > { %v1962_v57 = vpop.eup %1961  ;;  %v659_v60 = vmul.f32 %v2461_v51, %v632_v39  ;;  %v658_v48 = vmul.f32 %v2458_v50, %v631_v42 }
 0x190   : > { %957 = vmatprep.mubr.bf16.mxu1 %v710_v55  ;;  %v680_v43 = vadd.f32 %v670_v6, %v653_v44  ;;  %v679_v59 = vadd.f32 %v2466_v2, %v652_v45  ;;  %v634_v58 = vmul.f32 %v1962_v57, %v2423_v62  ;;  %v633_v63 = vmul.f32 %v1962_v57, %v2420_v61  ;;  %v1029_v61 = vld [vmem:[%s464_s13] sm:$0x3] }
 0x191   : > { %958 = vmatmul.mubr.bf16.vlgmr.msra.gmra.mrb[0].mxu1 %v709_v56  ;;  %v686_v3 = vadd.f32 %v670_v6, %v659_v60  ;;  %v685_v5 = vadd.f32 %v2466_v2, %v658_v48 }
 0x192   : > { %v708_v0 = vpack.c.bf16 %v680_v43, %v678_v46  ;;  %v707_v52 = vpack.c.bf16 %v679_v59, %v677_v47  ;;  %v661_v1 = vmul.f32 %v2461_v51, %v634_v58  ;;  %v660_v53 = vmul.f32 %v2458_v50, %v633_v63 }
 0x193   : > { %v2516_v50 = vrot.slane %v1029_v61, %v2447_v49  ;;  %v2519_v51 = vrot.slane %v1029_v61, %v2449_v54 }
 0x194   : > { %947 = vmatprep.mubr.bf16.mxu0 %v708_v0  ;;  %v688_v4 = vadd.f32 %v670_v6, %v661_v1  ;;  %v687_v7 = vadd.f32 %v2466_v2, %v660_v53 }
 0x195   : > { %948 = vmatmul.mubr.bf16.gmra.mrb[4].mxu0 %v707_v52  ;;  %v2099_v52 = vmov -1.0  }
 0x196   : > { %v712_v8 = vpack.c.bf16 %v688_v4, %v686_v3  ;;  %v711_v62 = vpack.c.bf16 %v687_v7, %v685_v5 }
 0x198   : > { %967 = vmatprep.mubr.bf16.mxu1 %v712_v8 }
 0x199   : > { %968 = vmatmul.mubr.bf16.gmra.mrb[4].mxu1 %v711_v62 }
 0x260   : > { %v939_v2 = vpop.f32.mrb[0].mxu0 }
 0x261   : > { %v1041_v6 = vadd.f32 %v2516_v50, %v939_v2  ;;  %v941_v9 = vpop.f32.mrb[1].mxu0 }
 0x262   : > { %v1042_v15 = vadd.f32 %v2519_v51, %v941_v9  ;;  %v943_v14 = vpop.f32.mrb[2].mxu0 }
 0x263   : > { %v1073_v10 = vmul.f32 0.70710677, %v1041_v6  ;;  %v1043_v11 = vadd.f32 %v2516_v50, %v943_v14  ;;  %v945_v12 = vpop.f32.mrb[3].mxu0  ;;  %v2546_v55 = vmul.f32 0.5, %v1041_v6 }
 0x264   : > { %v1074_v13 = vmul.f32 0.70710677, %v1042_v15  ;;  %v959_v18 = vpop.f32.mrb[0].mxu1  ;;  %v1044_v49 = vadd.f32 %v2519_v51, %v945_v12  ;;  %v2548_v56 = vmul.f32 0.5, %v1042_v15 }
 0x265   : > { %v1121_v19 = vand.u32 2147483647, %v1073_v10  ;;  %v2524_v20 = vmul.f32 0.70710677, %v1043_v11  ;;  %v961_v21 = vpop.f32.mrb[1].mxu1  ;;  %v2533_v34 = vadd.f32 %v2516_v50, %v959_v18  ;;  %vm1089_vm0 = vcmp.ge.f32.partialorder %v1073_v10, 0.0 }
 0x266   : > { %v1122_v54 = vand.u32 2147483647, %v1074_v13  ;;  %v963_v22 = vpop.f32.mrb[2].mxu1  ;;  %v2528_v25 = vmul.f32 0.70710677, %v1044_v49  ;;  %vm1090_vm1 = vcmp.ge.f32.partialorder %v1074_v13, 0.0  ;;  %v2556_v46 = vadd.f32 %v2519_v51, %v961_v21 }
 0x267   : > { %v1137_v27 = vmul.f32 0.3275911, %v1121_v19  ;;  %v1345_v26 = vsub.f32 0.0, %v1121_v19  ;;  %v1123_v16 = vand.u32 2147483647, %v2524_v20  ;;  %v965_v28 = vpop.f32.mrb[3].mxu1  ;;  %v2562_v59 = vadd.f32 %v2516_v50, %v963_v22 }
 0x268   : > { %v1138_v17 = vmul.f32 0.3275911, %v1122_v54  ;;  %v1346_v24 = vsub.f32 0.0, %v1122_v54  ;;  %v2530_v31 = vpop.f32.mrb[4].mxu0  ;;  %v1124_v36 = vand.u32 2147483647, %v2528_v25  ;;  %v2592_v12 = vadd.f32 %v2519_v51, %v965_v28 }
 0x269   : > { %v1153_v23 = vadd.f32 1.0, %v1137_v27  ;;  %v1139_v33 = vmul.f32 0.3275911, %v1123_v16  ;;  %v2535_v35 = vpop.f32.mrb[5].mxu0  ;;  %v1361_v37 = vmul.f32 %v1345_v26, %v1121_v19  ;;  %v2551_v44 = vmul.f32 0.70710677, %v2533_v34 }
 0x26a   : > { %v1154_v32 = vadd.f32 1.0, %v1138_v17  ;;  %v2538_v30 = vpop.f32.mrb[6].mxu0  ;;  %v1362_v38 = vmul.f32 %v1346_v24, %v1122_v54  ;;  %v1140_v39 = vmul.f32 0.3275911, %v1124_v36  ;;  %v1347_v48 = vsub.f32 0.0, %v1123_v16 }
 0x26b   : > { %1963 = vrcp.f32 %v1153_v23  ;;  %v1155_v29 = vadd.f32 1.0, %v1139_v33  ;;  %v2540_v41 = vpop.f32.mrb[7].mxu0  ;;  %v1377_v60 = vmul.f32 1.442695, %v1361_v37  ;;  %v1129_v43 = vand.u32 2147483647, %v2551_v44 }
 0x26c   : > { %1965 = vrcp.f32 %v1154_v32  ;;  %v2542_v40 = vpop.f32.mrb[4].mxu1  ;;  %v1156_v57 = vadd.f32 1.0, %v1140_v39  ;;  %v1379_v58 = vmul.f32 1.442695, %v1362_v38  ;;  %v2564_v63 = vmul.f32 0.5, %v1043_v11 }
 0x26d   : > { %v2544_v42 = vpop.f32.mrb[5].mxu1  ;;  %1967 = vrcp.f32 %v1155_v29  ;;  %v1348_v0 = vsub.f32 0.0, %v1124_v36  ;;  %v2568_v1 = vsel %vm1089_vm0, 1.0, %v2099_v52  ;;  %v2570_v53 = vmul.f32 0.5, %v1044_v49 }
 0x26e   : > { %v2553_v45 = vpop.f32.mrb[6].mxu1  ;;  %1969 = vrcp.f32 %v1156_v57  ;;  %v1145_v3 = vmul.f32 0.3275911, %v1129_v43  ;;  %v2573_v4 = vmul.f32 0.70710677, %v2556_v46  ;;  %v2577_v5 = vsel %vm1090_vm1, 1.0, %v2099_v52 }
 0x26f   : > { %v2558_v47 = vpop.f32.mrb[7].mxu1  ;;  %vm1091_vm2 = vcmp.ge.f32.partialorder %v2524_v20, 0.0  ;;  %v1353_v7 = vsub.f32 0.0, %v1129_v43  ;;  %v2581_v8 = vmul.f32 0.70710677, %v2562_v59  ;;  %1971 = vpow2.f32 %v1377_v60 }
 0x270   : > { %v1363_v62 = vmul.f32 %v1347_v48, %v1123_v16  ;;  %v1161_v61 = vadd.f32 1.0, %v1145_v3  ;;  %v1130_v2 = vand.u32 2147483647, %v2573_v4  ;;  %1973 = vpow2.f32 %v1379_v58 }
 0x271   : > { %vm1092_vm3 = vcmp.ge.f32.partialorder %v2528_v25, 0.0  ;;  %v1364_v9 = vmul.f32 %v1348_v0, %v1124_v36  ;;  %v1131_v15 = vand.u32 2147483647, %v2581_v8  ;;  %v1369_v18 = vmul.f32 %v1353_v7, %v1129_v43 }
 0x272   : > { %1975 = vrcp.f32 %v1161_v61  ;;  %v1146_v11 = vmul.f32 0.3275911, %v1130_v2  ;;  %v1354_v19 = vsub.f32 0.0, %v1130_v2  ;;  %v1381_v21 = vmul.f32 1.442695, %v1363_v62 }
 0x273   : > { %v1147_v49 = vmul.f32 0.3275911, %v1131_v15  ;;  %v1355_v22 = vsub.f32 0.0, %v1131_v15  ;;  %v1383_v16 = vmul.f32 1.442695, %v1364_v9  ;;  %v2609_v43 = vsel %vm1091_vm2, 1.0, %v2099_v52 }
 0x274   : > { %v1162_v27 = vadd.f32 1.0, %v1146_v11  ;;  %v1370_v23 = vmul.f32 %v1354_v19, %v1130_v2  ;;  %v2600_v33 = vmul.f32 0.70710677, %v2592_v12  ;;  %v1393_v29 = vmul.f32 1.442695, %v1369_v18 }
 0x275   : > { %v2584_v6 = vpop.eup %1963  ;;  %v1163_v24 = vadd.f32 1.0, %v1147_v49  ;;  %v1371_v38 = vmul.f32 %v1355_v22, %v1131_v15  ;;  %v2618_v15 = vsel %vm1092_vm3, 1.0, %v2099_v52  ;;  %vm1097_vm4 = vcmp.ge.f32.partialorder %v2551_v44, 0.0 }
 0x276   : > { %v2588_v14 = vpop.eup %1965  ;;  %v1201_v10 = vmul.f32 1.0614054, %v2584_v6  ;;  %1977 = vrcp.f32 %v1162_v27  ;;  %v1395_v58 = vmul.f32 1.442695, %v1370_v23  ;;  %v1132_v61 = vand.u32 2147483647, %v2600_v33 }
 0x277   : > { %v1202_v13 = vmul.f32 1.0614054, %v2588_v14  ;;  %v2595_v26 = vpop.eup %1967  ;;  %1979 = vrcp.f32 %v1163_v24  ;;  %v1397_v20 = vmul.f32 1.442695, %v1371_v38  ;;  %v2633_v24 = vadd.f32 %v2519_v51, %v2535_v35 }
 0x278   : > { %v1217_v54 = vadd.f32 -1.4531521, %v1201_v10  ;;  %v1203_v28 = vmul.f32 1.0614054, %v2595_v26  ;;  %v2602_v36 = vpop.eup %1969  ;;  %1981 = vpow2.f32 %v1381_v21  ;;  %v1148_v19 = vmul.f32 0.3275911, %v1132_v61 }
 0x279   : > { %v1218_v17 = vadd.f32 -1.4531521, %v1202_v13  ;;  %v1204_v60 = vmul.f32 1.0614054, %v2602_v36  ;;  %1983 = vpow2.f32 %v1383_v16  ;;  %v1972_v0 = vpop.eup %1971  ;;  %v2626_v21 = vadd.f32 %v2516_v50, %v2530_v31 }
 0x27a   : > { %v1233_v32 = vmul.f32 %v2584_v6, %v1217_v54  ;;  %v1219_v57 = vadd.f32 -1.4531521, %v1203_v28  ;;  %v1974_v2 = vpop.eup %1973  ;;  %1985 = vpow2.f32 %v1393_v29  ;;  %vm1098_vm5 = vcmp.ge.f32.partialorder %v2573_v4, 0.0 }
 0x27b   : > { %v1234_v37 = vmul.f32 %v2588_v14, %v1218_v17  ;;  %v1220_v62 = vadd.f32 -1.4531521, %v1204_v60  ;;  %1987 = vpow2.f32 %v1395_v58  ;;  %v1164_v17 = vadd.f32 1.0, %v1148_v19 }
 0x27c   : > { %v1249_v39 = vadd.f32 1.4214138, %v1233_v32  ;;  %v1235_v7 = vmul.f32 %v2595_v26, %v1219_v57  ;;  %v2620_v10 = vpop.eup %1975  ;;  %1989 = vpow2.f32 %v1397_v20  ;;  %v2643_v60 = vmul.f32 0.70710677, %v2626_v21 }
 0x27d   : > { %v1250_v48 = vadd.f32 1.4214138, %v1234_v37  ;;  %v1236_v18 = vmul.f32 %v2602_v36, %v1220_v62  ;;  %v1209_v54 = vmul.f32 1.0614054, %v2620_v10  ;;  %1991 = vrcp.f32 %v1164_v17 }
 0x27e   : > { %v1265_v3 = vmul.f32 %v2584_v6, %v1249_v39  ;;  %v1251_v13 = vadd.f32 1.4214138, %v1235_v7  ;;  %v2653_v17 = vand.u32 2147483647, %v2643_v60  ;;  %v2693_v44 = vadd.f32 %v2516_v50, %v2538_v30 }
 0x27f   : > { %v1266_v9 = vmul.f32 %v2588_v14, %v1250_v48  ;;  %v1252_v22 = vadd.f32 1.4214138, %v1236_v18  ;;  %v1225_v23 = vadd.f32 -1.4531521, %v1209_v54  ;;  %v1114_v4 = vsel %vm1098_vm5, 1.0, %v2099_v52 }
 0x280   : > { %v1281_v11 = vadd.f32 -0.28449672, %v1265_v3  ;;  %v1267_v27 = vmul.f32 %v2595_v26, %v1251_v13  ;;  %v2635_v32 = vpop.eup %1977  ;;  %v1356_v13 = vsub.f32 0.0, %v1132_v61  ;;  %vm1099_vm6 = vcmp.ge.f32.partialorder %v2581_v8, 0.0 }
 0x281   : > { %v1282_v49 = vadd.f32 -0.28449672, %v1266_v9  ;;  %v1268_v31 = vmul.f32 %v2602_v36, %v1252_v22  ;;  %v2638_v29 = vpop.eup %1979  ;;  %v1241_v39 = vmul.f32 %v2620_v10, %v1225_v23  ;;  %v1210_v57 = vmul.f32 1.0614054, %v2635_v32 }
 0x282   : > { %v1297_v25 = vmul.f32 %v2584_v6, %v1281_v11  ;;  %v1283_v37 = vadd.f32 -0.28449672, %v1267_v27  ;;  %v1982_v48 = vpop.eup %1981  ;;  %v1211_v7 = vmul.f32 1.0614054, %v2638_v29  ;;  %vm1100_vm7 = vcmp.ge.f32.partialorder %v2600_v33, 0.0 }
 0x283   : > { %v1298_v16 = vmul.f32 %v2588_v14, %v1282_v49  ;;  %v1284_v3 = vadd.f32 -0.28449672, %v1268_v31  ;;  %v1984_v62 = vpop.eup %1983  ;;  %v1257_v20 = vadd.f32 1.4214138, %v1241_v39  ;;  %v1226_v11 = vadd.f32 -1.4531521, %v1210_v57 }
 0x284   : > { %v1313_v28 = vadd.f32 0.2548296, %v1297_v25  ;;  %v1299_v58 = vmul.f32 %v2595_v26, %v1283_v37  ;;  %v1227_v54 = vadd.f32 -1.4531521, %v1211_v7  ;;  %v1986_v25 = vpop.eup %1985  ;;  %vm1093_vm8 = vcmp.ge.f32.partialorder %v2643_v60, 0.0 }
 0x285   : > { %v1314_v38 = vadd.f32 0.2548296, %v1298_v16  ;;  %v1300_v49 = vmul.f32 %v2602_v36, %v1284_v3  ;;  %v1242_v22 = vmul.f32 %v2635_v32, %v1226_v11 }
 0x286   : > { %v1329_v35 = vmul.f32 %v2584_v6, %v1313_v28  ;;  %v1315_v19 = vadd.f32 0.2548296, %v1299_v58  ;;  %v1273_v6 = vmul.f32 %v2620_v10, %v1257_v20  ;;  %v1988_v28 = vpop.eup %1987  ;;  %v1141_v20 = vmul.f32 0.3275911, %v2653_v17 }
 0x287   : > { %v1330_v9 = vmul.f32 %v2588_v14, %v1314_v38  ;;  %v1316_v23 = vadd.f32 0.2548296, %v1300_v49  ;;  %v1372_v38 = vmul.f32 %v1356_v13, %v1132_v61  ;;  %v1990_v3 = vpop.eup %1989 }
 0x288   : > { %v1409_v18 = vmul.f32 %v1972_v0, %v1329_v35  ;;  %v1331_v14 = vmul.f32 %v2595_v26, %v1315_v19  ;;  %v1243_v0 = vmul.f32 %v2638_v29, %v1227_v54  ;;  %v1289_v31 = vadd.f32 -0.28449672, %v1273_v6  ;;  %v2665_v11 = vpop.eup %1991 }
 0x289   : > { %v1410_v27 = vmul.f32 %v1974_v2, %v1330_v9  ;;  %v1258_v2 = vadd.f32 1.4214138, %v1242_v22  ;;  %v1332_v35 = vmul.f32 %v2602_v36, %v1316_v23  ;;  %v1157_v49 = vadd.f32 1.0, %v1141_v20 }
 0x28a   : > { %v1425_v16 = vsub.f32 1.0, %v1409_v18  ;;  %v1411_v57 = vmul.f32 %v1982_v48, %v1331_v14  ;;  %v1259_v58 = vadd.f32 1.4214138, %v1243_v0  ;;  %v1305_v7 = vmul.f32 %v2620_v10, %v1289_v31 }
 0x28b   : > { %v1426_v37 = vsub.f32 1.0, %v1410_v27  ;;  %v1274_v9 = vmul.f32 %v2635_v32, %v1258_v2  ;;  %v1412_v13 = vmul.f32 %v1984_v62, %v1332_v35  ;;  %v1212_v62 = vmul.f32 1.0614054, %v2665_v11 }
 0x28c   : > { %v1441_v39 = vmul.f32 %v1425_v16, %v2568_v1  ;;  %v1427_v61 = vsub.f32 1.0, %v1411_v57  ;;  %v1275_v1 = vmul.f32 %v2638_v29, %v1259_v58  ;;  %v1321_v36 = vadd.f32 0.2548296, %v1305_v7 }
 0x28d   : > { %v1442_v26 = vmul.f32 %v1426_v37, %v2577_v5  ;;  %v1290_v19 = vadd.f32 -0.28449672, %v1274_v9  ;;  %v1428_v27 = vsub.f32 1.0, %v1412_v13  ;;  %1993 = vrcp.f32 %v1157_v49 }
 0x28e   : > { %v1457_v18 = vadd.f32 1.0, %v1441_v39  ;;  %v1443_v54 = vmul.f32 %v1427_v61, %v2609_v43  ;;  %v1291_v6 = vadd.f32 -0.28449672, %v1275_v1  ;;  %v1337_v16 = vmul.f32 %v2620_v10, %v1321_v36 }
 0x28f   : > { %v1458_v48 = vadd.f32 1.0, %v1442_v26  ;;  %v1306_v14 = vmul.f32 %v2635_v32, %v1290_v19  ;;  %v1444_v0 = vmul.f32 %v1428_v27, %v2618_v15  ;;  %v1228_v43 = vadd.f32 -1.4531521, %v1212_v62 }
 0x290   : > { %v1473_v5 = vmul.f32 %v1457_v18, %v2546_v55  ;;  %v1459_v23 = vadd.f32 1.0, %v1443_v54  ;;  %v1307_v37 = vmul.f32 %v2638_v29, %v1291_v6  ;;  %v1417_v55 = vmul.f32 %v1986_v25, %v1337_v16 }
 0x291   : > { %v1474_v22 = vmul.f32 %v1458_v48, %v2548_v56  ;;  %v1322_v2 = vadd.f32 0.2548296, %v1306_v14  ;;  %v1460_v57 = vadd.f32 1.0, %v1444_v0  ;;  %v1399_v35 = vmul.f32 1.442695, %v1372_v38 }
 0x292   : > { %v1475_v39 = vmul.f32 %v1459_v23, %v2564_v63  ;;  %v1323_v56 = vadd.f32 0.2548296, %v1307_v37  ;;  %v1113_v15 = vsel %vm1097_vm4, 1.0, %v2099_v52  ;;  %v1433_v10 = vsub.f32 1.0, %v1417_v55 }
 0x293   : > { %v1785_v31 = vpack.c.bf16 %v1474_v22, %v1473_v5  ;;  %v1338_v58 = vmul.f32 %v2635_v32, %v1322_v2  ;;  %v1244_v25 = vmul.f32 %v2665_v11, %v1228_v43  ;;  %v1476_v26 = vmul.f32 %v1460_v57, %v2570_v53 }
 0x294   : > { %v1339_v63 = vmul.f32 %v2638_v29, %v1323_v56  ;;  %v2689_v38 = vmul.f32 0.70710677, %v2633_v24  ;;  %v1449_v7 = vmul.f32 %v1433_v10, %v1113_v15  ;;  %1995 = vpow2.f32 %v1399_v35 }
 0x295   : > { %1537 = vst [vmem:[%s2677_s14] sm:$0xff] %v1785_v31  ;;  %v1418_v9 = vmul.f32 %v1988_v28, %v1338_v58  ;;  %v1260_v20 = vadd.f32 1.4214138, %v1244_v25  ;;  %v1786_v32 = vpack.c.bf16 %v1476_v26, %v1475_v39  ;;  %v2700_v1 = vmul.f32 0.70710677, %v2693_v44 }
 0x296   : > { %v1419_v18 = vmul.f32 %v1990_v3, %v1339_v63  ;;  %v1465_v61 = vadd.f32 1.0, %v1449_v7  ;;  %v1126_v29 = vand.u32 2147483647, %v2689_v38  ;;  %v1065_v28 = vmul.f32 0.5, %v2533_v34 }
 0x297   : > { %v1434_v13 = vsub.f32 1.0, %v1418_v9  ;;  %v1276_v53 = vmul.f32 %v2665_v11, %v1260_v20  ;;  %1538 = vst [vmem:[%s2677_s14 + $0x8] sm:$0xff] %v1786_v32  ;;  %v1349_v36 = vsub.f32 0.0, %v2653_v17  ;;  %v2704_v3 = vpop.eup %1993  ;;  %v1066_v19 = vmul.f32 0.5, %v2556_v46 }
 0x298   : > { %v1435_v49 = vsub.f32 1.0, %v1419_v18  ;;  %v1142_v5 = vmul.f32 0.3275911, %v1126_v29  ;;  %v1481_v54 = vmul.f32 %v1465_v61, %v1065_v28  ;;  %v1205_v22 = vmul.f32 1.0614054, %v2704_v3 }
 0x299   : > { %v1450_v48 = vmul.f32 %v1434_v13, %v1114_v4  ;;  %v1292_v30 = vadd.f32 -0.28449672, %v1276_v53  ;;  %v1127_v34 = vand.u32 2147483647, %v2700_v1  ;;  %v2713_v14 = vadd.f32 %v2519_v51, %v2540_v41 }
 0x29a   : > { %v1158_v16 = vadd.f32 1.0, %v1142_v5  ;;  %v1221_v23 = vadd.f32 -1.4531521, %v1205_v22  ;;  %v1365_v8 = vmul.f32 %v1349_v36, %v2653_v17  ;;  %v1115_v0 = vsel %vm1099_vm6, 1.0, %v2099_v52 }
 0x29b   : > { %v1466_v27 = vadd.f32 1.0, %v1450_v48  ;;  %v1308_v6 = vmul.f32 %v2665_v11, %v1292_v30  ;;  %v1143_v37 = vmul.f32 0.3275911, %v1127_v34  ;;  %v1451_v55 = vmul.f32 %v1435_v49, %v1115_v0 }
 0x29c   : > { %1997 = vrcp.f32 %v1158_v16  ;;  %v1237_v43 = vmul.f32 %v2704_v3, %v1221_v23  ;;  %v2720_v41 = vmul.f32 0.70710677, %v2713_v14  ;;  %v2724_v56 = vadd.f32 %v2516_v50, %v2542_v40 }
 0x29d   : > { %v1482_v62 = vmul.f32 %v1466_v27, %v1066_v19  ;;  %v1324_v46 = vadd.f32 0.2548296, %v1308_v6  ;;  %v1159_v57 = vadd.f32 1.0, %v1143_v37  ;;  %v1385_v15 = vmul.f32 1.442695, %v1365_v8 }
 0x29e   : > { %v1996_v39 = vpop.eup %1995  ;;  %v1253_v35 = vadd.f32 1.4214138, %v1237_v43  ;;  %v1350_v10 = vsub.f32 0.0, %v1126_v29  ;;  %v2731_v58 = vadd.f32 %v2519_v51, %v2544_v42  ;;  %v1467_v25 = vadd.f32 1.0, %v1451_v55 }
 0x29f   : > { %v1789_v31 = vpack.c.bf16 %v1482_v62, %v1481_v54  ;;  %v1340_v2 = vmul.f32 %v2665_v11, %v1324_v46  ;;  %1999 = vrcp.f32 %v1159_v57  ;;  %v1128_v11 = vand.u32 2147483647, %v2720_v41 }
 0x2a0   : > { %v1269_v63 = vmul.f32 %v2704_v3, %v1253_v35  ;;  %v1067_v40 = vmul.f32 0.5, %v2562_v59  ;;  %v1116_v7 = vsel %vm1100_vm7, 1.0, %v2099_v52  ;;  %v2737_v9 = vmul.f32 0.70710677, %v2724_v56 }
 0x2a1   : > { %1541 = vst [vmem:[%s2677_s14 + $0x20] sm:$0xff] %v1789_v31  ;;  %v1420_v17 = vmul.f32 %v1996_v39, %v1340_v2  ;;  %v1144_v33 = vmul.f32 0.3275911, %v1128_v11  ;;  %v1068_v20 = vmul.f32 0.5, %v2592_v12  ;;  %2001 = vpow2.f32 %v1385_v15 }
 0x2a2   : > { %v1285_v18 = vadd.f32 -0.28449672, %v1269_v63  ;;  %v1366_v61 = vmul.f32 %v1350_v10, %v1126_v29  ;;  %v1133_v13 = vand.u32 2147483647, %v2737_v9  ;;  %v2742_v53 = vmul.f32 0.70710677, %v2731_v58 }
 0x2a3   : > { %v1436_v26 = vsub.f32 1.0, %v1420_v17  ;;  %v1160_v42 = vadd.f32 1.0, %v1144_v33  ;;  %v1483_v4 = vmul.f32 %v1467_v25, %v1067_v40  ;;  %v1351_v48 = vsub.f32 0.0, %v1127_v34 }
 0x2a4   : > { %v1301_v28 = vmul.f32 %v2704_v3, %v1285_v18  ;;  %v1149_v12 = vmul.f32 0.3275911, %v1133_v13  ;;  %v1387_v49 = vmul.f32 1.442695, %v1366_v61  ;;  %v2749_v54 = vand.u32 2147483647, %v2742_v53 }
 0x2a5   : > { %v1452_v32 = vmul.f32 %v1436_v26, %v1116_v7  ;;  %2003 = vrcp.f32 %v1160_v42  ;;  %v1367_v22 = vmul.f32 %v1351_v48, %v1127_v34  ;;  %v2753_v16 = vadd.f32 %v2516_v50, %v2553_v45 }
 0x2a6   : > { %v2745_v30 = vpop.eup %1997  ;;  %v1317_v19 = vadd.f32 0.2548296, %v1301_v28  ;;  %v1165_v5 = vadd.f32 1.0, %v1149_v12  ;;  %v1150_v23 = vmul.f32 0.3275911, %v2749_v54  ;;  %v1352_v37 = vsub.f32 0.0, %v1128_v11 }
 0x2a7   : > { %v1468_v59 = vadd.f32 1.0, %v1452_v32  ;;  %v1206_v29 = vmul.f32 1.0614054, %v2745_v30  ;;  %v1357_v34 = vsub.f32 0.0, %v1133_v13  ;;  %v2764_v50 = vmul.f32 0.70710677, %v2753_v16 }
 0x2a8   : > { %v1333_v46 = vmul.f32 %v2704_v3, %v1317_v19  ;;  %2005 = vrcp.f32 %v1165_v5  ;;  %v1166_v31 = vadd.f32 1.0, %v1150_v23  ;;  %v1389_v2 = vmul.f32 1.442695, %v1367_v22 }
 0x2a9   : > { %v1484_v36 = vmul.f32 %v1468_v59, %v1068_v20  ;;  %v1222_v6 = vadd.f32 -1.4531521, %v1206_v29  ;;  %v2755_v62 = vpop.eup %1999  ;;  %2007 = vpow2.f32 %v1387_v49  ;;  %v2767_v39 = vand.u32 2147483647, %v2764_v50 }
 0x2aa   : > { %v1207_v0 = vmul.f32 1.0614054, %v2755_v62  ;;  %2009 = vrcp.f32 %v1166_v31  ;;  %v2771_v57 = vadd.f32 %v2519_v51, %v2558_v47  ;;  %v1368_v15 = vmul.f32 %v1352_v37, %v1128_v11 }
 0x2ab   : > { %v1790_v27 = vpack.c.bf16 %v1484_v36, %v1483_v4  ;;  %v1238_v8 = vmul.f32 %v2745_v30, %v1222_v6  ;;  %v2002_v45 = vpop.eup %2001  ;;  %v1061_v25 = vmul.f32 0.5, %v2626_v21  ;;  %v1373_v26 = vmul.f32 %v1357_v34, %v1133_v13 }
 0x2ac   : > { %v1223_v3 = vadd.f32 -1.4531521, %v1207_v0  ;;  %v1413_v43 = vmul.f32 %v2002_v45, %v1333_v46  ;;  %v1151_v63 = vmul.f32 0.3275911, %v2767_v39  ;;  %v1109_v40 = vsel %vm1093_vm8, 1.0, %v2099_v52 }
 0x2ad   : > { %1542 = vst [vmem:[%s2677_s14 + $0x28] sm:$0xff] %v1790_v27  ;;  %v1254_v55 = vadd.f32 1.4214138, %v1238_v8  ;;  %2011 = vpow2.f32 %v1389_v2  ;;  %v2784_v11 = vmul.f32 0.70710677, %v2771_v57  ;;  %vm1094_vm9 = vcmp.ge.f32.partialorder %v2689_v38, 0.0 }
 0x2ae   : > { %v1239_v35 = vmul.f32 %v2755_v62, %v1223_v3  ;;  %v1429_v51 = vsub.f32 1.0, %v1413_v43  ;;  %v1167_v20 = vadd.f32 1.0, %v1151_v63  ;;  %v1391_v18 = vmul.f32 1.442695, %v1368_v15 }
 0x2af   : > { %v1270_v17 = vmul.f32 %v2745_v30, %v1254_v55  ;;  %v2775_v10 = vpop.eup %2003  ;;  %v1401_v42 = vmul.f32 1.442695, %v1373_v26  ;;  %v1358_v13 = vsub.f32 0.0, %v2749_v54  ;;  %v1110_v12 = vsel %vm1094_vm9, 1.0, %v2099_v52 }
 0x2b0   : > { %v1255_v33 = vadd.f32 1.4214138, %v1239_v35  ;;  %v1208_v47 = vmul.f32 1.0614054, %v2775_v10  ;;  %2013 = vrcp.f32 %v1167_v20  ;;  %v1445_v48 = vmul.f32 %v1429_v51, %v1109_v40 }
 0x2b1   : > { %v1286_v7 = vadd.f32 -0.28449672, %v1270_v17  ;;  %v2796_v36 = vand.u32 2147483647, %v2784_v11  ;;  %2015 = vpow2.f32 %v1391_v18  ;;  %v1374_v22 = vmul.f32 %v1358_v13, %v2749_v54 }
 0x2b2   : > { %v1271_v32 = vmul.f32 %v2755_v62, %v1255_v33  ;;  %v2789_v61 = vpop.eup %2005  ;;  %v1224_v60 = vadd.f32 -1.4531521, %v1208_v47  ;;  %2017 = vpow2.f32 %v1401_v42  ;;  %v1461_v34 = vadd.f32 1.0, %v1445_v48 }
 0x2b3   : > { %v1302_v21 = vmul.f32 %v2745_v30, %v1286_v7  ;;  %v1213_v28 = vmul.f32 1.0614054, %v2789_v61  ;;  %v2008_v19 = vpop.eup %2007  ;;  %v1152_v46 = vmul.f32 0.3275911, %v2796_v36  ;;  %v1359_v31 = vsub.f32 0.0, %v2767_v39 }
 0x2b4   : > { %v1287_v59 = vadd.f32 -0.28449672, %v1271_v32  ;;  %v1240_v38 = vmul.f32 %v2775_v10, %v1224_v60  ;;  %v2800_v27 = vpop.eup %2009  ;;  %vm1095_vm10 = vcmp.ge.f32.partialorder %v2700_v1, 0.0  ;;  %v1403_v35 = vmul.f32 1.442695, %v1374_v22 }
 0x2b5   : > { %v1318_v4 = vadd.f32 0.2548296, %v1302_v21  ;;  %v1229_v5 = vadd.f32 -1.4531521, %v1213_v28  ;;  %v1214_v37 = vmul.f32 1.0614054, %v2800_v27  ;;  %v1477_v33 = vmul.f32 %v1461_v34, %v1061_v25 }
 0x2b6   : > { %v1303_v49 = vmul.f32 %v2755_v62, %v1287_v59  ;;  %v1256_v6 = vadd.f32 1.4214138, %v1240_v38  ;;  %v1168_v45 = vadd.f32 1.0, %v1152_v46  ;;  %v1062_v51 = vmul.f32 0.5, %v2633_v24 }
 0x2b7   : > { %v1334_v29 = vmul.f32 %v2745_v30, %v1318_v4  ;;  %v1245_v0 = vmul.f32 %v2789_v61, %v1229_v5  ;;  %v2012_v55 = vpop.eup %2011  ;;  %v1230_v54 = vadd.f32 -1.4531521, %v1214_v37  ;;  %v1375_v47 = vmul.f32 %v1359_v31, %v2767_v39 }
 0x2b8   : > { %v1319_v8 = vadd.f32 0.2548296, %v1303_v49  ;;  %v1272_v30 = vmul.f32 %v2775_v10, %v1256_v6  ;;  %2019 = vrcp.f32 %v1168_v45  ;;  %v1111_v60 = vsel %vm1095_vm10, 1.0, %v2099_v52 }
 0x2b9   : > { %v1414_v23 = vmul.f32 %v2008_v19, %v1334_v29  ;;  %v1261_v43 = vadd.f32 1.4214138, %v1245_v0  ;;  %v1246_v40 = vmul.f32 %v2800_v27, %v1230_v54  ;;  %2021 = vpow2.f32 %v1403_v35 }
 0x2ba   : > { %v1335_v2 = vmul.f32 %v2755_v62, %v1319_v8  ;;  %v1288_v17 = vadd.f32 -0.28449672, %v1272_v30  ;;  %v2812_v7 = vpop.eup %2013  ;;  %vm1096_vm11 = vcmp.ge.f32.partialorder %v2720_v41, 0.0  ;;  %v1360_v1 = vsub.f32 0.0, %v2796_v36 }
 0x2bb   : > { %v1430_v3 = vsub.f32 1.0, %v1414_v23  ;;  %v1277_v63 = vmul.f32 %v2789_v61, %v1261_v43  ;;  %v1262_v18 = vadd.f32 1.4214138, %v1246_v40  ;;  %v1215_v13 = vmul.f32 1.0614054, %v2812_v7  ;;  %v2016_v4 = vpop.eup %2015 }
 0x2bc   : > { %v1415_v26 = vmul.f32 %v2012_v55, %v1335_v2  ;;  %v1304_v62 = vmul.f32 %v2775_v10, %v1288_v17  ;;  %v2018_v59 = vpop.eup %2017  ;;  %v1405_v49 = vmul.f32 1.442695, %v1375_v47  ;;  %v1112_v41 = vsel %vm1096_vm11, 1.0, %v2099_v52 }
 0x2bd   : > { %v1446_v15 = vmul.f32 %v1430_v3, %v1110_v12  ;;  %v1293_v32 = vadd.f32 -0.28449672, %v1277_v63  ;;  %v1278_v39 = vmul.f32 %v2800_v27, %v1262_v18  ;;  %v1231_v12 = vadd.f32 -1.4531521, %v1215_v13 }
 0x2be   : > { %v1431_v21 = vsub.f32 1.0, %v1415_v26  ;;  %v1320_v42 = vadd.f32 0.2548296, %v1304_v62  ;;  %vm1101_vm12 = vcmp.ge.f32.partialorder %v2737_v9, 0.0  ;;  %v1376_v37 = vmul.f32 %v1360_v1, %v2796_v36 }
 0x2bf   : > { %v1462_v20 = vadd.f32 1.0, %v1446_v15  ;;  %v1309_v24 = vmul.f32 %v2789_v61, %v1293_v32  ;;  %v1294_v29 = vadd.f32 -0.28449672, %v1278_v39  ;;  %v1247_v6 = vmul.f32 %v2812_v7, %v1231_v12 }
 0x2c0   : > { %v1447_v28 = vmul.f32 %v1431_v21, %v1111_v60  ;;  %v1336_v48 = vmul.f32 %v2775_v10, %v1320_v42  ;;  %2023 = vpow2.f32 %v1405_v49  ;;  %v1063_v45 = vmul.f32 0.5, %v2693_v44 }
 0x2c1   : > { %v1478_v25 = vmul.f32 %v1462_v20, %v1062_v51  ;;  %v1325_v19 = vadd.f32 0.2548296, %v1309_v24  ;;  %v1310_v46 = vmul.f32 %v2800_v27, %v1294_v29  ;;  %v1263_v0 = vadd.f32 1.4214138, %v1247_v6 }
 0x2c2   : > { %v1416_v5 = vmul.f32 %v2016_v4, %v1336_v48  ;;  %v2020_v10 = vpop.eup %2019  ;;  %v1463_v23 = vadd.f32 1.0, %v1447_v28  ;;  %v1064_v55 = vmul.f32 0.5, %v2713_v14  ;;  %v1407_v63 = vmul.f32 1.442695, %v1376_v37 }
 0x2c3   : > { %v1787_v38 = vpack.c.bf16 %v1478_v25, %v1477_v33  ;;  %v1341_v22 = vmul.f32 %v2789_v61, %v1325_v19  ;;  %v1326_v30 = vadd.f32 0.2548296, %v1310_v46  ;;  %v1216_v31 = vmul.f32 1.0614054, %v2020_v10  ;;  %v2022_v36 = vpop.eup %2021 }
 0x2c4   : > { %v1432_v8 = vsub.f32 1.0, %v1416_v5  ;;  %v1279_v2 = vmul.f32 %v2812_v7, %v1263_v0  ;;  %v1117_v61 = vsel %vm1101_vm12, 1.0, %v2099_v52  ;;  %v1479_v35 = vmul.f32 %v1463_v23, %v1063_v45  ;;  %v1609_v0 = vld [vmem:[%s2677_s14 + $0x28] sm:$0xff] (%p2197_p9) }
 0x2c5   : > { %1539 = vst [vmem:[%s2677_s14 + $0x10] sm:$0xff] %v1787_v38  ;;  %v1421_v34 = vmul.f32 %v2018_v59, %v1341_v22  ;;  %v1342_v54 = vmul.f32 %v2800_v27, %v1326_v30  ;;  %v1232_v17 = vadd.f32 -1.4531521, %v1216_v31  ;;  %vm1102_vm13 = vcmp.ge.f32.partialorder %v2742_v53, 0.0  ;;  %1610 = vst [vmem:[%s1557_s27 + $0xa0] sm:$0xff] (%p2197_p9), %v1609_v0 }
 0x2c6   : > { %v1448_v3 = vmul.f32 %v1432_v8, %v1112_v41  ;;  %v1295_v26 = vadd.f32 -0.28449672, %v1279_v2  ;;  %v1118_v27 = vsel %vm1102_vm13, 1.0, %v2099_v52  ;;  %2025 = vpow2.f32 %v1407_v63 }
 0x2c7   : > { %v1437_v43 = vsub.f32 1.0, %v1421_v34  ;;  %v1422_v44 = vmul.f32 %v2022_v36, %v1342_v54  ;;  %v1248_v14 = vmul.f32 %v2020_v10, %v1232_v17  ;;  %v1069_v32 = vmul.f32 0.5, %v2724_v56 }
 0x2c8   : > { %v1464_v15 = vadd.f32 1.0, %v1448_v3  ;;  %v1311_v51 = vmul.f32 %v2812_v7, %v1295_v26  ;;  %v1070_v4 = vmul.f32 0.5, %v2731_v58  ;;  %vm1103_vm14 = vcmp.ge.f32.partialorder %v2764_v50, 0.0 }
 0x2c9   : > { %v1453_v40 = vmul.f32 %v1437_v43, %v1117_v61  ;;  %v1438_v62 = vsub.f32 1.0, %v1422_v44  ;;  %v1264_v47 = vadd.f32 1.4214138, %v1248_v14  ;;  %v1119_v1 = vsel %vm1103_vm14, 1.0, %v2099_v52 }
 0x2ca   : > { %v1480_v33 = vmul.f32 %v1464_v15, %v1064_v55  ;;  %v1327_v21 = vadd.f32 0.2548296, %v1311_v51  ;;  %v2024_v42 = vpop.eup %2023  ;;  %vm1104_vm15 = vcmp.ge.f32.partialorder %v2784_v11, 0.0  ;;  %v1071_v50 = vmul.f32 0.5, %v2753_v16  ;;  %v1601_v16 = vld [vmem:[%s2677_s14 + $0x8] sm:$0xff] (%p2197_p9) }
 0x2cb   : > { %v1469_v9 = vadd.f32 1.0, %v1453_v40  ;;  %v1454_v18 = vmul.f32 %v1438_v62, %v1118_v27  ;;  %v1280_v60 = vmul.f32 %v2020_v10, %v1264_v47  ;;  %v1120_v5 = vsel %vm1104_vm15, 1.0, %v2099_v52  ;;  %v1599_v52 = vld [vmem:[%s2677_s14] sm:$0xff] (%p2197_p9)  ;;  %1602 = vst [vmem:[%s1557_s27 + $0x20] sm:$0xff] (%p2197_p9), %v1601_v16 }
 0x2cc   : > { %v1788_v20 = vpack.c.bf16 %v1480_v33, %v1479_v35  ;;  %v1343_v53 = vmul.f32 %v2812_v7, %v1327_v21  ;;  %v1072_v22 = vmul.f32 0.5, %v2771_v57  ;;  %v1603_v57 = vld [vmem:[%s2677_s14 + $0x10] sm:$0xff] (%p2197_p9)  ;;  %1600 = vst [vmem:[%s1557_s27] sm:$0xff] (%p2197_p9), %v1599_v52 }
 0x2cd   : > { %v1485_v13 = vmul.f32 %v1469_v9, %v1069_v32  ;;  %v1470_v25 = vadd.f32 1.0, %v1454_v18  ;;  %v1296_v24 = vadd.f32 -0.28449672, %v1280_v60  ;;  %1604 = vst [vmem:[%s1557_s27 + $0x40] sm:$0xff] (%p2197_p9), %v1603_v57 }
 0x2ce   : > { %1540 = vst [vmem:[%s2677_s14 + $0x18] sm:$0xff] %v1788_v20  ;;  %v1423_v39 = vmul.f32 %v2024_v42, %v1343_v53 }
 0x2cf   : > { %v1486_v59 = vmul.f32 %v1470_v25, %v1070_v4  ;;  %v1312_v28 = vmul.f32 %v2020_v10, %v1296_v24 }
 0x2d0   : > { %v1439_v48 = vsub.f32 1.0, %v1423_v39  ;;  %v2026_v19 = vpop.eup %2025 }
 0x2d1   : > { %v1791_v12 = vpack.c.bf16 %v1486_v59, %v1485_v13  ;;  %v1328_v56 = vadd.f32 0.2548296, %v1312_v28 }
 0x2d2   : > { %v1455_v38 = vmul.f32 %v1439_v48, %v1119_v1 }
 0x2d3   : > { %1543 = vst [vmem:[%s2677_s14 + $0x30] sm:$0xff] %v1791_v12  ;;  %v1344_v7 = vmul.f32 %v2020_v10, %v1328_v56  ;;  %v1607_v10 = vld [vmem:[%s2677_s14 + $0x20] sm:$0xff] (%p2197_p9) }
 0x2d4   : > { %v1471_v29 = vadd.f32 1.0, %v1455_v38  ;;  %1608 = vst [vmem:[%s1557_s27 + $0x80] sm:$0xff] (%p2197_p9), %v1607_v10 }
 0x2d5   : > { %v1424_v58 = vmul.f32 %v2026_v19, %v1344_v7  ;;  %v1605_v11 = vld [vmem:[%s2677_s14 + $0x18] sm:$0xff] (%p2197_p9) }
 0x2d6   : > { %v1487_v41 = vmul.f32 %v1471_v29, %v1071_v50  ;;  %1606 = vst [vmem:[%s1557_s27 + $0x60] sm:$0xff] (%p2197_p9), %v1605_v11 }
 0x2d7   : > { %v1440_v49 = vsub.f32 1.0, %v1424_v58 }
 0x2d9   : > { %v1456_v6 = vmul.f32 %v1440_v49, %v1120_v5 }
 0x2da   : > { %v1611_v37 = vld [vmem:[%s2677_s14 + $0x30] sm:$0xff] (%p2197_p9) }
 0x2db   : > { %v1472_v46 = vadd.f32 1.0, %v1456_v6  ;;  %1551 = sbr.rel (!%p2197_p9) target bundleno = 746 (0x2ea), region = 90  ;;  %1612 = vst [vmem:[%s1557_s27 + $0xc0] sm:$0xff] (%p2197_p9), %v1611_v37 }
 0x2dd   : > { %v1488_v23 = vmul.f32 %v1472_v46, %v1072_v22 }
 0x2df   : > { %v1792_v8 = vpack.c.bf16 %v1488_v23, %v1487_v41 }
 0x2e1   : > { %1544 = vst [vmem:[%s2677_s14 + $0x38] sm:$0xff] %v1792_v8 }
 0x2e8   : > { %v1613_v34 = vld [vmem:[%s2677_s14 + $0x38] sm:$0xff] }
 0x2e9   : > { %1614 = vst [vmem:[%s1557_s27 + $0xe0] sm:$0xff] %v1613_v34 }
 0x2ea PF: > { %s15_s26 = sadd.s32 1, %s2097_s26   ;;  %s2904_s18 = smov %s2069_s19 }
 0x2eb   : > { %p12_p2 = scmp.ge.s32.totalorder %s15_s26, 10   ;;  %s2905_s19 = smov %s2202_s12 }
 0x2ec   : > { %s2906_s20 = smov %s2077_s21  ;;  %s2907_s21 = smov %s2191_s8 }
 0x2ed   : > { %s2908_s22 = smov %s2089_s24  ;;  %s2909_s23 = smov %s2093_s25 }
 0x2ee   : > { %s2910_s24 = smov %s2913_s28  ;;  %s2911_s25 = smov %s2917_s29 }
 0x2ef   :  { %14 = sbr.rel (!%p12_p2) target bundleno = 5 (0x5), region = 165 }

// kernel: sam_predictor_forward.18
= control target key start
LH: loop header
LB: loop body
LE: loop exit
PB: predicated region body
PF: predicated region fallthrough
CT: control target
= control target key end

     0   :  { %s1710_s15 = smov 0   ;;  %s1712_s16 = smov 0   ;;  %s1948_s0 = inlined_call_operand.vmem [shape: bf16[128,1024], index: 0, kind: input, shape index: {}]   ;;  %s1949_s1 = inlined_call_operand.vmem [shape: bf16[1024,256], index: 1, kind: input, shape index: {}]   ;;  %s1950_s2 = inlined_call_operand.vmem [shape: f32[1,256], index: 2, kind: input, shape index: {}]   ;;  %s1951_s3 = inlined_call_operand.vmem [shape: f32[128,256], index: 3, kind: input, shape index: {}]   ;;  %s1952_s4 = inlined_call_operand.vmem [shape: f32[128,256], index: 4, kind: output, shape index: {}]  }
   0x1   :  { %s1714_s17 = smov 0   ;;  %s1716_s18 = smov 0  }
   0x2   :  { %s1718_s19 = smov 0   ;;  %s1720_s20 = smov 0  }
   0x3   :  { %s1722_s21 = smov 0  }
   0x4 LB: > { %s26_s22 = sadd.s32 1, %s1674_s19  ;;  %s33_s23 = sadd.s32 1, %s1678_s20  ;;  %s1682_s21 = sphi %s1722_s21, %s14_s21   ;;  %s1678_s20 = sphi %s1720_s20, %s1958_s20   ;;  %s1674_s19 = sphi %s1718_s19, %s1957_s19   ;;  %s1670_s18 = sphi %s1716_s18, %s1956_s18   ;;  %s1666_s17 = sphi %s1714_s17, %s1955_s17   ;;  %s1662_s16 = sphi %s1712_s16, %s1954_s16   ;;  %s1658_s15 = sphi %s1710_s15, %s1953_s15  }
   0x5   : > { %p27_p0 = scmp.ge.s32.totalorder %s26_s22, 2  ;;  %p49_p1 = scmp.ne.s32.totalorder %s1662_s16, %s1658_s15 }
   0x6   : > { %p50_p2 = scmp.eq.s32.totalorder %s1682_s21, 0  ;;  %s42_s27 = sadd.s32 1, %s1662_s16 }
   0x7   : > { %s1960_s22 = smov (%p27_p0, %s26_s22), 0  ;;  %s1962_s23 = smov (!%p27_p0, %s33_s23), %s1678_s20 }
   0x8   : > { %p51_p3 = por %p50_p2, %p49_p1  ;;  %p35_p4 = scmp.ge.s32.totalorder %s1962_s23, 2 }
   0x9   : > { %s38_s24 = ssub.s32 %s1674_s19, %s1960_s22  ;;  %p1330_p6 = scmp.ge.s32.totalorder %s1682_s21, 4 }
   0xa   : > { %s1964_s23 = smov (%p35_p4, %s1962_s23), 0 }
   0xb   : > { %s37_s25 = ssub.s32 %s1678_s20, %s1964_s23  ;;  %193 = sbr.rel (%p1330_p6) target bundleno = 33 (0x21), region = 20 }
   0xc   : > { %s39_s26 = sor.u32 %s38_s24, %s37_s25 }
   0xd   : > { %p40_p5 = scmp.eq.s32.totalorder %s39_s26, 0 }
   0xf   : > { %s1761_s28 = scalar_select %p40_p5, %s1662_s16, %s42_s27  }
  0x12   : > { %196 = sbr.rel (!%p51_p3) target bundleno = 33 (0x21), region = 24  ;;  %s198_s29 = sand.u32 (%p51_p3), 1, %s1662_s16  }
  0x13   : > { %s1333_s30 = sshll.u32 (%p51_p3), %s1674_s19, 2  ;;  %s1331_s5 = sshll.u32 (%p51_p3), %s198_s29, 7 }
  0x14   : > { %s1431_s6 = sshll.u32 (%p51_p3), %s1678_s20, 6  ;;  %s200_s12 = scalar_lea.vmem (%p51_p3), [#allocation3], %s1331_s5 }
  0x15   : > { %s204_s7 = sadd.s32 (%p51_p3), %s1431_s6, %s1333_s30 }
  0x16   : > { %s1335_s8 = sshll.u32 (%p51_p3), %s204_s7, 2 }
  0x17   : > { %s1770_s11 = scalar_lea.vmem (%p51_p3), %s1948_s0, %s1335_s8 }
  0x18   : > { %v219_v0 = vld [vmem:[%s1770_s11] sm:$0xff] (%p51_p3)  ;;  %v221_v1 = vld [vmem:[%s1770_s11 + $0x8] sm:$0xff] (%p51_p3) }
  0x19   : > { %v223_v2 = vld [vmem:[%s1770_s11 + $0x20] sm:$0xff]  ;;  %220 = vst [vmem:[%s200_s12] sm:$0xff] %v219_v0  ;;  %222 = vst [vmem:[%s200_s12 + $0x8] sm:$0xff] %v221_v1  ;;  %v225_v3 = vld [vmem:[%s1770_s11 + $0x28] sm:$0xff] }
  0x1a   : > { %224 = vst [vmem:[%s200_s12 + $0x10] sm:$0xff] %v223_v2  ;;  %v227_v4 = vld [vmem:[%s1770_s11 + $0x40] sm:$0xff]  ;;  %v229_v5 = vld [vmem:[%s1770_s11 + $0x48] sm:$0xff]  ;;  %226 = vst [vmem:[%s200_s12 + $0x18] sm:$0xff] %v225_v3 }
  0x1b   : > { %228 = vst [vmem:[%s200_s12 + $0x20] sm:$0xff] %v227_v4  ;;  %230 = vst [vmem:[%s200_s12 + $0x28] sm:$0xff] %v229_v5  ;;  %v231_v6 = vld [vmem:[%s1770_s11 + $0x60] sm:$0xff]  ;;  %v233_v7 = vld [vmem:[%s1770_s11 + $0x68] sm:$0xff] }
  0x1c   : > { %v235_v8 = vld [vmem:[%s1770_s11 + $0x80] sm:$0xff]  ;;  %232 = vst [vmem:[%s200_s12 + $0x30] sm:$0xff] %v231_v6  ;;  %234 = vst [vmem:[%s200_s12 + $0x38] sm:$0xff] %v233_v7  ;;  %v237_v9 = vld [vmem:[%s1770_s11 + $0x88] sm:$0xff] }
  0x1d   : > { %236 = vst [vmem:[%s200_s12 + $0x40] sm:$0xff] %v235_v8  ;;  %v239_v10 = vld [vmem:[%s1770_s11 + $0xa0] sm:$0xff]  ;;  %v241_v11 = vld [vmem:[%s1770_s11 + $0xa8] sm:$0xff]  ;;  %238 = vst [vmem:[%s200_s12 + $0x48] sm:$0xff] %v237_v9 }
  0x1e   : > { %240 = vst [vmem:[%s200_s12 + $0x50] sm:$0xff] %v239_v10  ;;  %242 = vst [vmem:[%s200_s12 + $0x58] sm:$0xff] %v241_v11  ;;  %v243_v12 = vld [vmem:[%s1770_s11 + $0xc0] sm:$0xff]  ;;  %v245_v13 = vld [vmem:[%s1770_s11 + $0xc8] sm:$0xff] }
  0x1f   : > { %v247_v14 = vld [vmem:[%s1770_s11 + $0xe0] sm:$0xff]  ;;  %244 = vst [vmem:[%s200_s12 + $0x60] sm:$0xff] %v243_v12  ;;  %246 = vst [vmem:[%s200_s12 + $0x68] sm:$0xff] %v245_v13  ;;  %v249_v15 = vld [vmem:[%s1770_s11 + $0xe8] sm:$0xff] }
  0x20   : > { %248 = vst [vmem:[%s200_s12 + $0x70] sm:$0xff] %v247_v14  ;;  %250 = vst [vmem:[%s200_s12 + $0x78] sm:$0xff] %v249_v15 }
  0x21 PF: > { %p1336_p7 = scmp.ge.s32.totalorder %s1682_s21, 1  ;;  %p285_p8 = scmp.lt.s32.totalorder %s1682_s21, 5 }
  0x23   : > { %p286_p9 = pnand %p1336_p7, %p285_p8 }
  0x24   : > { %s292_s13 = sand.u32 (!%p286_p9), 1, %s1658_s15   ;;  %s1338_s14 = sshll.u32 (!%p286_p9), %s1666_s17, 6 }
  0x25   : > { %289 = sbr.rel (%p286_p9) target bundleno = 376 (0x178), region = 55  ;;  %s1337_s24 = sshll.u32 (!%p286_p9), %s292_s13, 7 }
  0x26   : > { %p350_p10 = scmp.lt.s32.totalorder (!%p286_p9), %s1338_s14, 127  ;;  %s1341_s25 = sshll.u32 (!%p286_p9), %s1670_s18, 3 }
  0x27   : > { %p367_p11 = scmp.lt.s32.totalorder (!%p286_p9), %s1341_s25, 15  ;;  %s1808_s18 = scalar_lea.vmem (!%p286_p9), [#allocation3], %s1337_s24 }
  0x28   : > { %p1347_p12 = scmp.ne.s32.totalorder (!%p286_p9), %s1666_s17, 0 }
  0x2c   : > { %s1966_s14 = smov (!%p350_p10, %s1338_s14), 127  ;;  %s1968_s25 = smov (!%p367_p11, %s1341_s25), 15 }
  0x2d   : > { %s1432_s26 = sshll.u32 %s1966_s14, 3  ;;  %s1433_s5 = sshll.u32 %s1968_s25, 4  ;;  %v1684_v16 = vmov (!%p1347_p12), 0.0  }
  0x2e   : > { %s1796_s30 = scalar_lea.vmem %s1949_s1, %s1432_s26  ;;  %s1801_s8 = scalar_lea.vmem %s1951_s3, %s1433_s5  ;;  %393 = vst [vmem:[#allocation2] sm:$0xff] (!%p1347_p12), %v1684_v16  ;;  %394 = vst [vmem:[#allocation2 + $0x8] sm:$0xff] (!%p1347_p12), %v1684_v16 }
  0x2f   : > { %s1806_s10 = scalar_lea.vmem %s1952_s4, %s1433_s5  ;;  %392 = sbr.rel (%p1347_p12) target bundleno = 54 (0x36), region = 63  ;;  %395 = vst [vmem:[#allocation2 + $0x10] sm:$0xff] (!%p1347_p12), %v1684_v16  ;;  %396 = vst [vmem:[#allocation2 + $0x18] sm:$0xff] (!%p1347_p12), %v1684_v16 }
  0x30   : > { %397 = vst [vmem:[#allocation2 + $0x20] sm:$0xff] (!%p1347_p12), %v1684_v16  ;;  %398 = vst [vmem:[#allocation2 + $0x28] sm:$0xff] (!%p1347_p12), %v1684_v16 }
  0x31   : > { %399 = vst [vmem:[#allocation2 + $0x30] sm:$0xff] (!%p1347_p12), %v1684_v16  ;;  %400 = vst [vmem:[#allocation2 + $0x38] sm:$0xff] (!%p1347_p12), %v1684_v16 }
  0x32   : > { %401 = vst [vmem:[#allocation2 + $0x40] sm:$0xff] (!%p1347_p12), %v1684_v16  ;;  %402 = vst [vmem:[#allocation2 + $0x48] sm:$0xff] (!%p1347_p12), %v1684_v16 }
  0x33   : > { %403 = vst [vmem:[#allocation2 + $0x50] sm:$0xff] (!%p1347_p12), %v1684_v16  ;;  %404 = vst [vmem:[#allocation2 + $0x58] sm:$0xff] (!%p1347_p12), %v1684_v16 }
  0x34   : > { %405 = vst [vmem:[#allocation2 + $0x60] sm:$0xff] (!%p1347_p12), %v1684_v16  ;;  %406 = vst [vmem:[#allocation2 + $0x68] sm:$0xff] (!%p1347_p12), %v1684_v16 }
  0x35   : > { %407 = vst [vmem:[#allocation2 + $0x70] sm:$0xff] (!%p1347_p12), %v1684_v16  ;;  %408 = vst [vmem:[#allocation2 + $0x78] sm:$0xff] (!%p1347_p12), %v1684_v16 }
  0x36 PF: > { %v1508_v17 = vld [vmem:[%s1796_s30 + $0x4] ss:$8 sps:$4 sm:$0xff]   ;;  %v1512_v19 = vld [vmem:[%s1796_s30] ss:$8 sps:$4 sm:$0xff]   ;;  %v1514_v21 = vld [vmem:[%s1796_s30 + $0x14] ss:$8 sps:$4 sm:$0xff]  }
  0x37   : > { %v1510_v18 = vld [vmem:[%s1796_s30 + $0x104] ss:$8 sps:$4 sm:$0xff]   ;;  %905 = vmatprep.subr.bf16.mxu1 %v1508_v17  ;;  %v1513_v20 = vld [vmem:[%s1796_s30 + $0x100] ss:$8 sps:$4 sm:$0xff]   ;;  %v1516_v22 = vld [vmem:[%s1796_s30 + $0x114] ss:$8 sps:$4 sm:$0xff]  }
  0x38   : > { %978 = vmatprep.subr.bf16.mxu0 %v1510_v18  ;;  %906 = vmatpush1.bf16.msra.mxu1 %v1512_v19  ;;  %v1518_v23 = vld [vmem:[%s1796_s30 + $0x10] ss:$8 sps:$4 sm:$0xff]   ;;  %v1520_v25 = vld [vmem:[%s1796_s30 + $0x24] ss:$8 sps:$4 sm:$0xff]   ;;  %v1524_v27 = vld [vmem:[%s1796_s30 + $0x20] ss:$8 sps:$4 sm:$0xff]  }
  0x39   : > { %979 = vmatpush1.bf16.msra.mxu0 %v1513_v20  ;;  %907 = vmatprep.subr.bf16.mxu1 %v1514_v21  ;;  %v1519_v24 = vld [vmem:[%s1796_s30 + $0x110] ss:$8 sps:$4 sm:$0xff]   ;;  %v1522_v26 = vld [vmem:[%s1796_s30 + $0x124] ss:$8 sps:$4 sm:$0xff]   ;;  %v1525_v28 = vld [vmem:[%s1796_s30 + $0x120] ss:$8 sps:$4 sm:$0xff]  }
  0x3a   : > { %980 = vmatprep.subr.bf16.mxu0 %v1516_v22  ;;  %v1526_v29 = vld [vmem:[%s1796_s30 + $0x34] ss:$8 sps:$4 sm:$0xff]   ;;  %v1530_v31 = vld [vmem:[%s1796_s30 + $0x30] ss:$8 sps:$4 sm:$0xff]   ;;  %v1532_v33 = vld [vmem:[%s1796_s30 + $0x44] ss:$8 sps:$4 sm:$0xff]  }
  0x3b   : > { %v1528_v30 = vld [vmem:[%s1796_s30 + $0x134] ss:$8 sps:$4 sm:$0xff]   ;;  %v1531_v32 = vld [vmem:[%s1796_s30 + $0x130] ss:$8 sps:$4 sm:$0xff]   ;;  %v1534_v34 = vld [vmem:[%s1796_s30 + $0x144] ss:$8 sps:$4 sm:$0xff]  }
  0x3c   : > { %908 = vmatpush1.bf16.msra.mxu1 %v1518_v23  ;;  %v1536_v35 = vld [vmem:[%s1796_s30 + $0x40] ss:$8 sps:$4 sm:$0xff]   ;;  %v1538_v37 = vld [vmem:[%s1796_s30 + $0x54] ss:$8 sps:$4 sm:$0xff]   ;;  %v1542_v39 = vld [vmem:[%s1796_s30 + $0x50] ss:$8 sps:$4 sm:$0xff]  }
  0x3d   : > { %981 = vmatpush1.bf16.msra.mxu0 %v1519_v24  ;;  %909 = vmatprep.subr.bf16.mxu1 %v1520_v25  ;;  %v1537_v36 = vld [vmem:[%s1796_s30 + $0x140] ss:$8 sps:$4 sm:$0xff]   ;;  %v1540_v38 = vld [vmem:[%s1796_s30 + $0x154] ss:$8 sps:$4 sm:$0xff]   ;;  %v1543_v40 = vld [vmem:[%s1796_s30 + $0x150] ss:$8 sps:$4 sm:$0xff]  }
  0x3e   : > { %982 = vmatprep.subr.bf16.mxu0 %v1522_v26  ;;  %v1544_v41 = vld [vmem:[%s1796_s30 + $0x64] ss:$8 sps:$4 sm:$0xff]   ;;  %v1548_v43 = vld [vmem:[%s1796_s30 + $0x60] ss:$8 sps:$4 sm:$0xff]   ;;  %v1550_v45 = vld [vmem:[%s1796_s30 + $0x74] ss:$8 sps:$4 sm:$0xff]  }
  0x3f   : > { %v1546_v42 = vld [vmem:[%s1796_s30 + $0x164] ss:$8 sps:$4 sm:$0xff]   ;;  %v1549_v44 = vld [vmem:[%s1796_s30 + $0x160] ss:$8 sps:$4 sm:$0xff]   ;;  %v1552_v46 = vld [vmem:[%s1796_s30 + $0x174] ss:$8 sps:$4 sm:$0xff]  }
  0x40   : > { %910 = vmatpush1.bf16.msra.mxu1 %v1524_v27  ;;  %v1554_v47 = vld [vmem:[%s1796_s30 + $0x70] ss:$8 sps:$4 sm:$0xff]   ;;  %v1556_v49 = vld [vmem:[%s1796_s30 + $0x84] ss:$8 sps:$4 sm:$0xff]   ;;  %v1560_v51 = vld [vmem:[%s1796_s30 + $0x80] ss:$8 sps:$4 sm:$0xff]  }
  0x41   : > { %983 = vmatpush1.bf16.msra.mxu0 %v1525_v28  ;;  %911 = vmatprep.subr.bf16.mxu1 %v1526_v29  ;;  %v1555_v48 = vld [vmem:[%s1796_s30 + $0x170] ss:$8 sps:$4 sm:$0xff]   ;;  %v1558_v50 = vld [vmem:[%s1796_s30 + $0x184] ss:$8 sps:$4 sm:$0xff]   ;;  %v1561_v52 = vld [vmem:[%s1796_s30 + $0x180] ss:$8 sps:$4 sm:$0xff]  }
  0x42   : > { %984 = vmatprep.subr.bf16.mxu0 %v1528_v30  ;;  %v1562_v53 = vld [vmem:[%s1796_s30 + $0x94] ss:$8 sps:$4 sm:$0xff]   ;;  %v1566_v55 = vld [vmem:[%s1796_s30 + $0x90] ss:$8 sps:$4 sm:$0xff]   ;;  %v1568_v57 = vld [vmem:[%s1796_s30 + $0xa4] ss:$8 sps:$4 sm:$0xff]  }
  0x43   : > { %v1564_v54 = vld [vmem:[%s1796_s30 + $0x194] ss:$8 sps:$4 sm:$0xff]   ;;  %v1567_v56 = vld [vmem:[%s1796_s30 + $0x190] ss:$8 sps:$4 sm:$0xff]   ;;  %v1570_v58 = vld [vmem:[%s1796_s30 + $0x1a4] ss:$8 sps:$4 sm:$0xff]  }
  0x44   : > { %912 = vmatpush1.bf16.msra.mxu1 %v1530_v31  ;;  %v1572_v59 = vld [vmem:[%s1796_s30 + $0xa0] ss:$8 sps:$4 sm:$0xff]   ;;  %v1574_v61 = vld [vmem:[%s1796_s30 + $0xb4] ss:$8 sps:$4 sm:$0xff]   ;;  %v1578_v63 = vld [vmem:[%s1796_s30 + $0xb0] ss:$8 sps:$4 sm:$0xff]  }
  0x45   : > { %985 = vmatpush1.bf16.msra.mxu0 %v1531_v32  ;;  %913 = vmatprep.subr.bf16.mxu1 %v1532_v33  ;;  %v1573_v60 = vld [vmem:[%s1796_s30 + $0x1a0] ss:$8 sps:$4 sm:$0xff]   ;;  %v1576_v62 = vld [vmem:[%s1796_s30 + $0x1b4] ss:$8 sps:$4 sm:$0xff]   ;;  %v1579_v0 = vld [vmem:[%s1796_s30 + $0x1b0] ss:$8 sps:$4 sm:$0xff]  }
  0x46   : > { %986 = vmatprep.subr.bf16.mxu0 %v1534_v34  ;;  %v1580_v1 = vld [vmem:[%s1796_s30 + $0xc4] ss:$8 sps:$4 sm:$0xff]   ;;  %v1584_v5 = vld [vmem:[%s1796_s30 + $0xc0] ss:$8 sps:$4 sm:$0xff]   ;;  %v1586_v7 = vld [vmem:[%s1796_s30 + $0xd4] ss:$8 sps:$4 sm:$0xff]  }
  0x47   : > { %v1606_v2 = vld [vmem:[%s1808_s18 + $0x4] ss:$16 sps:$4 sm:$0xff]   ;;  %v1609_v4 = vld [vmem:[%s1808_s18 + $0xc] ss:$16 sps:$4 sm:$0xff]   ;;  %v1585_v6 = vld [vmem:[%s1796_s30 + $0x1c0] ss:$8 sps:$4 sm:$0xff]  }
  0x48   : > { %914 = vmatpush1.bf16.msra.mxu1 %v1536_v35  ;;  %v1582_v3 = vld [vmem:[%s1796_s30 + $0x1c4] ss:$8 sps:$4 sm:$0xff]   ;;  %937 = vmatprep.mubr.bf16.mxu1 %v1606_v2  ;;  %v1588_v8 = vld [vmem:[%s1796_s30 + $0x1d4] ss:$8 sps:$4 sm:$0xff]   ;;  %v1590_v9 = vld [vmem:[%s1796_s30 + $0xd0] ss:$8 sps:$4 sm:$0xff]  }
  0x49   : > { %987 = vmatpush1.bf16.msra.mxu0 %v1537_v36  ;;  %915 = vmatprep.subr.bf16.mxu1 %v1538_v37  ;;  %v1591_v10 = vld [vmem:[%s1796_s30 + $0x1d0] ss:$8 sps:$4 sm:$0xff]   ;;  %v1592_v11 = vld [vmem:[%s1796_s30 + $0xe4] ss:$8 sps:$4 sm:$0xff]   ;;  %v1596_v13 = vld [vmem:[%s1796_s30 + $0xe0] ss:$8 sps:$4 sm:$0xff]  }
  0x4a   : > { %988 = vmatprep.subr.bf16.mxu0 %v1540_v38  ;;  %1010 = vmatprep.mubr.bf16.mxu0 %v1609_v4  ;;  %v1594_v12 = vld [vmem:[%s1796_s30 + $0x1e4] ss:$8 sps:$4 sm:$0xff]   ;;  %v1597_v14 = vld [vmem:[%s1796_s30 + $0x1e0] ss:$8 sps:$4 sm:$0xff]   ;;  %v1598_v15 = vld [vmem:[%s1796_s30 + $0xf4] ss:$8 sps:$4 sm:$0xff]  }
  0x4b   : > { %v1600_v16 = vld [vmem:[%s1796_s30 + $0x1f4] ss:$8 sps:$4 sm:$0xff]   ;;  %v1602_v17 = vld [vmem:[%s1796_s30 + $0xf0] ss:$8 sps:$4 sm:$0xff]   ;;  %v425_v34 = vld [vmem:[#allocation2] sm:$0xff]  ;;  %p1428_p13 = scmp.ne.s32.totalorder %s1666_s17, 1 }
  0x4c   : > { %916 = vmatpush1.bf16.msra.mxu1 %v1542_v39  ;;  %v1603_v18 = vld [vmem:[%s1796_s30 + $0x1f0] ss:$8 sps:$4 sm:$0xff]   ;;  %v1610_v21 = vld [vmem:[%s1808_s18 + $0x24] ss:$16 sps:$4 sm:$0xff]   ;;  %v1612_v22 = vld [vmem:[%s1808_s18 + $0x2c] ss:$16 sps:$4 sm:$0xff]  }
  0x4d   : > { %989 = vmatpush1.bf16.msra.mxu0 %v1543_v40  ;;  %917 = vmatprep.subr.bf16.mxu1 %v1544_v41  ;;  %v1604_v19 = vld [vmem:[%s1808_s18] ss:$16 sps:$4 sm:$0xff]   ;;  %v1607_v20 = vld [vmem:[%s1808_s18 + $0x8] ss:$16 sps:$4 sm:$0xff]   ;;  %v1616_v25 = vld [vmem:[%s1808_s18 + $0x44] ss:$16 sps:$4 sm:$0xff]  }
  0x4e   : > { %990 = vmatprep.subr.bf16.mxu0 %v1546_v42  ;;  %v1614_v23 = vld [vmem:[%s1808_s18 + $0x20] ss:$16 sps:$4 sm:$0xff]   ;;  %v1615_v24 = vld [vmem:[%s1808_s18 + $0x28] ss:$16 sps:$4 sm:$0xff]   ;;  %v1618_v26 = vld [vmem:[%s1808_s18 + $0x4c] ss:$16 sps:$4 sm:$0xff]  }
  0x4f   : > { %v1620_v27 = vld [vmem:[%s1808_s18 + $0x40] ss:$16 sps:$4 sm:$0xff]   ;;  %v1621_v28 = vld [vmem:[%s1808_s18 + $0x48] ss:$16 sps:$4 sm:$0xff]   ;;  %v1622_v29 = vld [vmem:[%s1808_s18 + $0x64] ss:$16 sps:$4 sm:$0xff]  }
  0x50   : > { %918 = vmatpush1.bf16.msra.mxu1 %v1548_v43  ;;  %v1624_v30 = vld [vmem:[%s1808_s18 + $0x6c] ss:$16 sps:$4 sm:$0xff]   ;;  %v1626_v31 = vld [vmem:[%s1808_s18 + $0x60] ss:$16 sps:$4 sm:$0xff]   ;;  %v1627_v32 = vld [vmem:[%s1808_s18 + $0x68] ss:$16 sps:$4 sm:$0xff]  }
  0x51   : > { %991 = vmatpush1.bf16.msra.mxu0 %v1549_v44  ;;  %919 = vmatprep.subr.bf16.mxu1 %v1550_v45  ;;  %v426_v38 = vld [vmem:[#allocation2 + $0x8] sm:$0xff]  ;;  %v427_v42 = vld [vmem:[#allocation2 + $0x10] sm:$0xff] }
  0x52   : > { %992 = vmatprep.subr.bf16.mxu0 %v1552_v46 }
  0x54   : > { %920 = vmatpush1.bf16.msra.mxu1 %v1554_v47  ;;  %v428_v47 = vld [vmem:[#allocation2 + $0x18] sm:$0xff] }
  0x55   : > { %993 = vmatpush1.bf16.msra.mxu0 %v1555_v48  ;;  %921 = vmatprep.subr.bf16.mxu1 %v1556_v49 }
  0x56   : > { %994 = vmatprep.subr.bf16.mxu0 %v1558_v50 }
  0x58   : > { %922 = vmatpush1.bf16.msra.mxu1 %v1560_v51 }
  0x59   : > { %995 = vmatpush1.bf16.msra.mxu0 %v1561_v52  ;;  %923 = vmatprep.subr.bf16.mxu1 %v1562_v53 }
  0x5a   : > { %996 = vmatprep.subr.bf16.mxu0 %v1564_v54  ;;  %v429_v54 = vld [vmem:[#allocation2 + $0x20] sm:$0xff] }
  0x5c   : > { %924 = vmatpush1.bf16.msra.mxu1 %v1566_v55 }
  0x5d   : > { %997 = vmatpush1.bf16.msra.mxu0 %v1567_v56  ;;  %925 = vmatprep.subr.bf16.mxu1 %v1568_v57 }
  0x5e   : > { %998 = vmatprep.subr.bf16.mxu0 %v1570_v58  ;;  %v430_v58 = vld [vmem:[#allocation2 + $0x28] sm:$0xff] }
  0x60   : > { %926 = vmatpush1.bf16.msra.mxu1 %v1572_v59 }
  0x61   : > { %999 = vmatpush1.bf16.msra.mxu0 %v1573_v60  ;;  %927 = vmatprep.subr.bf16.mxu1 %v1574_v61 }
  0x62   : > { %1000 = vmatprep.subr.bf16.mxu0 %v1576_v62  ;;  %v431_v62 = vld [vmem:[#allocation2 + $0x30] sm:$0xff] }
  0x64   : > { %928 = vmatpush1.bf16.msra.mxu1 %v1578_v63 }
  0x65   : > { %1001 = vmatpush1.bf16.msra.mxu0 %v1579_v0  ;;  %929 = vmatprep.subr.bf16.mxu1 %v1580_v1 }
  0x66   : > { %1002 = vmatprep.subr.bf16.mxu0 %v1582_v3  ;;  %v432_v3 = vld [vmem:[#allocation2 + $0x38] sm:$0xff] }
  0x68   : > { %930 = vmatpush1.bf16.msra.mxu1 %v1584_v5 }
  0x69   : > { %1003 = vmatpush1.bf16.msra.mxu0 %v1585_v6  ;;  %931 = vmatprep.subr.bf16.mxu1 %v1586_v7 }
  0x6a   : > { %1004 = vmatprep.subr.bf16.mxu0 %v1588_v8 }
  0x6c   : > { %932 = vmatpush1.bf16.msra.mxu1 %v1590_v9 }
  0x6d   : > { %1005 = vmatpush1.bf16.msra.mxu0 %v1591_v10  ;;  %933 = vmatprep.subr.bf16.mxu1 %v1592_v11  ;;  %v433_v10 = vld [vmem:[#allocation2 + $0x40] sm:$0xff] }
  0x6e   : > { %1006 = vmatprep.subr.bf16.mxu0 %v1594_v12 }
  0x70   : > { %934 = vmatpush1.bf16.msra.mxu1 %v1596_v13 }
  0x71   : > { %1007 = vmatpush1.bf16.msra.mxu0 %v1597_v14  ;;  %935 = vmatprep.subr.bf16.mxu1 %v1598_v15  ;;  %v434_v14 = vld [vmem:[#allocation2 + $0x48] sm:$0xff] }
  0x72   : > { %1008 = vmatprep.subr.bf16.mxu0 %v1600_v16 }
  0x74   : > { %936 = vmatpush1.bf16.msra.mxu1 %v1602_v17 }
  0x75   : > { %1009 = vmatpush1.bf16.msra.mxu0 %v1603_v18  ;;  %v435_v18 = vld [vmem:[#allocation2 + $0x50] sm:$0xff] }
  0x77   : > { %938 = vmatmul.mubr.bf16.vlgmr.msra.gmra.mrb[0].mxu1 %v1604_v19 }
  0x78   : > { %1011 = vmatmul.mubr.bf16.vlgmr.msra.gmra.mrb[0].mxu0 %v1607_v20  ;;  %947 = vmatprep.mubr.bf16.mxu1 %v1610_v21 }
  0x79   : > { %1020 = vmatprep.mubr.bf16.mxu0 %v1612_v22 }
  0x7f   : > { %948 = vmatmul.mubr.bf16.gmra.mrb[4].mxu1 %v1614_v23  ;;  %v436_v23 = vld [vmem:[#allocation2 + $0x58] sm:$0xff] }
  0x80   : > { %1021 = vmatmul.mubr.bf16.gmra.mrb[4].mxu0 %v1615_v24  ;;  %957 = vmatprep.mubr.bf16.mxu1 %v1616_v25 }
  0x81   : > { %1030 = vmatprep.mubr.bf16.mxu0 %v1618_v26 }
  0x87   : > { %958 = vmatmul.mubr.bf16.gmra.mrb[8].mxu1 %v1620_v27 }
  0x88   : > { %1031 = vmatmul.mubr.bf16.gmra.mrb[8].mxu0 %v1621_v28  ;;  %967 = vmatprep.mubr.bf16.mxu1 %v1622_v29 }
  0x89   : > { %1040 = vmatprep.mubr.bf16.mxu0 %v1624_v30  ;;  %v437_v30 = vld [vmem:[#allocation2 + $0x60] sm:$0xff] }
  0x8f   : > { %968 = vmatmul.mubr.bf16.gmra.mrb[12].mxu1 %v1626_v31 }
  0x90   : > { %1041 = vmatmul.mubr.bf16.gmra.mrb[12].mxu0 %v1627_v32 }
 0x14a   : > { %v939_v33 = vpop.f32.mrb[0].mxu1 }
 0x14b   : > { %v1012_v35 = vpop.f32.mrb[0].mxu0  ;;  %v941_v37 = vpop.f32.mrb[1].mxu1 }
 0x14c   : > { %v1013_v36 = vadd.f32 %v1012_v35, %v939_v33  ;;  %v1014_v39 = vpop.f32.mrb[1].mxu0  ;;  %v943_v41 = vpop.f32.mrb[2].mxu1 }
 0x14d   : > { %v1015_v40 = vadd.f32 %v1014_v39, %v941_v37  ;;  %v1016_v43 = vpop.f32.mrb[2].mxu0  ;;  %v945_v46 = vpop.f32.mrb[3].mxu1 }
 0x14e   : > { %v1051_v44 = vadd.f32 %v1013_v36, %v425_v34  ;;  %v1017_v45 = vadd.f32 %v1016_v43, %v943_v41  ;;  %v1018_v48 = vpop.f32.mrb[3].mxu0  ;;  %v438_v34 = vld [vmem:[#allocation2 + $0x68] sm:$0xff]  ;;  %v440_v43 = vld [vmem:[#allocation2 + $0x78] sm:$0xff] }
 0x14f   : > { %v1052_v49 = vadd.f32 %v1015_v40, %v426_v38  ;;  %v1019_v50 = vadd.f32 %v1018_v48, %v945_v46  ;;  %v439_v38 = vld [vmem:[#allocation2 + $0x70] sm:$0xff] }
 0x150   : > { %1067 = vst [vmem:[#allocation2] sm:$0xff] %v1051_v44  ;;  %v1053_v51 = vadd.f32 %v1017_v45, %v427_v42 }
 0x151   : > { %1068 = vst [vmem:[#allocation2 + $0x8] sm:$0xff] %v1052_v49  ;;  %v1054_v52 = vadd.f32 %v1019_v50, %v428_v47  ;;  %v1105_v49 = vlaneseq (!%p1428_p13) }
 0x152   : > { %1069 = vst [vmem:[#allocation2 + $0x10] sm:$0xff] %v1053_v51  ;;  %v949_v53 = vpop.f32.mrb[4].mxu1  ;;  %v1103_v51 = vld [vmem:[%s1950_s2] sm:$0x3] (!%p1428_p13) }
 0x153   : > { %1070 = vst [vmem:[#allocation2 + $0x18] sm:$0xff] %v1054_v52  ;;  %v1022_v55 = vpop.f32.mrb[4].mxu0  ;;  %v951_v57 = vpop.f32.mrb[5].mxu1  ;;  %v1106_v50 = vshrl.u32 (!%p1428_p13), %v1105_v49, 7 }
 0x154   : > { %v1023_v56 = vadd.f32 %v1022_v55, %v949_v53  ;;  %v1024_v59 = vpop.f32.mrb[5].mxu0  ;;  %v953_v61 = vpop.f32.mrb[6].mxu1 }
 0x155   : > { %v1025_v60 = vadd.f32 %v1024_v59, %v951_v57  ;;  %v1026_v63 = vpop.f32.mrb[6].mxu0  ;;  %v955_v2 = vpop.f32.mrb[7].mxu1  ;;  %v1107_v53 = vsub.s32 (!%p1428_p13), 0, %v1106_v50  ;;  %v1111_v55 = vsub.s32 (!%p1428_p13), 1, %v1106_v50  ;;  %v1131_v57 = vld [vmem:[%s1801_s8] sm:$0xff] (!%p1428_p13)  ;;  %v1133_v59 = vld [vmem:[%s1801_s8 + $0x10] sm:$0xff] (!%p1428_p13) }
 0x156   : > { %v1055_v0 = vadd.f32 %v1023_v56, %v429_v54  ;;  %v1027_v1 = vadd.f32 %v1026_v63, %v953_v61  ;;  %v1028_v4 = vpop.f32.mrb[7].mxu0  ;;  %v1134_v61 = vld [vmem:[%s1801_s8 + $0x18] sm:$0xff] (!%p1428_p13) }
 0x157   : > { %v1056_v5 = vadd.f32 %v1025_v60, %v430_v58  ;;  %v1029_v6 = vadd.f32 %v1028_v4, %v955_v2  ;;  %v1087_v52 = vld [vmem:[#allocation2] sm:$0xff] (!%p1428_p13)  ;;  %v1132_v58 = vld [vmem:[%s1801_s8 + $0x8] sm:$0xff] (!%p1428_p13)  ;;  %v1108_v63 = vrot.slane (!%p1428_p13), %v1103_v51, %v1107_v53 }
 0x158   : > { %1071 = vst [vmem:[#allocation2 + $0x20] sm:$0xff] %v1055_v0  ;;  %v1057_v7 = vadd.f32 %v1027_v1, %v431_v62  ;;  %v1088_v54 = vld [vmem:[#allocation2 + $0x8] sm:$0xff] (!%p1428_p13)  ;;  %v1112_v0 = vrot.slane (!%p1428_p13), %v1103_v51, %v1111_v55  ;;  %v1135_v4 = vld [vmem:[%s1801_s8 + $0x20] sm:$0xff] (!%p1428_p13) }
 0x159   : > { %1072 = vst [vmem:[#allocation2 + $0x28] sm:$0xff] %v1056_v5  ;;  %v1058_v8 = vadd.f32 %v1029_v6, %v432_v3  ;;  %v1089_v56 = vld [vmem:[#allocation2 + $0x10] sm:$0xff] (!%p1428_p13)  ;;  %v1136_v5 = vld [vmem:[%s1801_s8 + $0x28] sm:$0xff] (!%p1428_p13) }
 0x15a   : > { %1073 = vst [vmem:[#allocation2 + $0x30] sm:$0xff] %v1057_v7  ;;  %v959_v9 = vpop.f32.mrb[8].mxu1  ;;  %v1090_v60 = vld [vmem:[#allocation2 + $0x18] sm:$0xff] (!%p1428_p13)  ;;  %v1137_v6 = vld [vmem:[%s1801_s8 + $0x30] sm:$0xff] (!%p1428_p13)  ;;  %v1115_v7 = vadd.f32 (!%p1428_p13), %v1108_v63, %v1087_v52 }
 0x15b   : > { %1074 = vst [vmem:[#allocation2 + $0x38] sm:$0xff] %v1058_v8  ;;  %v1032_v11 = vpop.f32.mrb[8].mxu0  ;;  %v961_v13 = vpop.f32.mrb[9].mxu1  ;;  %v1116_v8 = vadd.f32 (!%p1428_p13), %v1112_v0, %v1088_v54 }
 0x15c   : > { %v1033_v12 = vadd.f32 %v1032_v11, %v959_v9  ;;  %v1034_v15 = vpop.f32.mrb[9].mxu0  ;;  %v963_v17 = vpop.f32.mrb[10].mxu1  ;;  %v1117_v9 = vadd.f32 (!%p1428_p13), %v1108_v63, %v1089_v56  ;;  %v1138_v11 = vld [vmem:[%s1801_s8 + $0x38] sm:$0xff] (!%p1428_p13) }
 0x15d   : > { %v1035_v16 = vadd.f32 %v1034_v15, %v961_v13  ;;  %v1036_v19 = vpop.f32.mrb[10].mxu0  ;;  %v965_v22 = vpop.f32.mrb[11].mxu1 }
 0x15e   : > { %v1059_v20 = vadd.f32 %v1033_v12, %v433_v10  ;;  %v1037_v21 = vadd.f32 %v1036_v19, %v963_v17  ;;  %v1038_v24 = vpop.f32.mrb[11].mxu0  ;;  %v1118_v10 = vadd.f32 (!%p1428_p13), %v1112_v0, %v1090_v60  ;;  %v1140_v19 = vld [vmem:[%s1801_s8 + $0x48] sm:$0xff] (!%p1428_p13) }
 0x15f   : > { %v1060_v25 = vadd.f32 %v1035_v16, %v434_v14  ;;  %v1039_v26 = vadd.f32 %v1038_v24, %v965_v22  ;;  %v1091_v62 = vld [vmem:[#allocation2 + $0x20] sm:$0xff] (!%p1428_p13)  ;;  %v1148_v24 = vadd.f32 (!%p1428_p13), %v1132_v58, %v1116_v8 }
 0x160   : > { %1075 = vst [vmem:[#allocation2 + $0x40] sm:$0xff] %v1059_v20  ;;  %v1061_v27 = vadd.f32 %v1037_v21, %v435_v18  ;;  %v1092_v1 = vld [vmem:[#allocation2 + $0x28] sm:$0xff] (!%p1428_p13)  ;;  %v1119_v14 = vadd.f32 (!%p1428_p13), %v1108_v63, %v1091_v62  ;;  %v1139_v18 = vld [vmem:[%s1801_s8 + $0x40] sm:$0xff] (!%p1428_p13) }
 0x161   : > { %1076 = vst [vmem:[#allocation2 + $0x48] sm:$0xff] %v1060_v25  ;;  %v1062_v28 = vadd.f32 %v1039_v26, %v436_v23  ;;  %v1093_v2 = vld [vmem:[#allocation2 + $0x30] sm:$0xff] (!%p1428_p13)  ;;  %v1120_v15 = vadd.f32 (!%p1428_p13), %v1112_v0, %v1092_v1  ;;  %v1147_v23 = vadd.f32 (!%p1428_p13), %v1131_v57, %v1115_v7  ;;  %v1149_v25 = vadd.f32 (!%p1428_p13), %v1133_v59, %v1117_v9 }
 0x162   : > { %1077 = vst [vmem:[#allocation2 + $0x50] sm:$0xff] %v1061_v27  ;;  %v969_v29 = vpop.f32.mrb[12].mxu1  ;;  %v1094_v3 = vld [vmem:[#allocation2 + $0x38] sm:$0xff] (!%p1428_p13)  ;;  %v1121_v16 = vadd.f32 (!%p1428_p13), %v1108_v63, %v1093_v2  ;;  %v1150_v26 = vadd.f32 (!%p1428_p13), %v1134_v61, %v1118_v10  ;;  %1164 = vst [vmem:[%s1806_s10 + $0x8] sm:$0xff] (!%p1428_p13), %v1148_v24 }
 0x163   : > { %1078 = vst [vmem:[#allocation2 + $0x58] sm:$0xff] %v1062_v28  ;;  %v1042_v31 = vpop.f32.mrb[12].mxu0  ;;  %v971_v33 = vpop.f32.mrb[13].mxu1  ;;  %v1122_v17 = vadd.f32 (!%p1428_p13), %v1112_v0, %v1094_v3  ;;  %1163 = vst [vmem:[%s1806_s10] sm:$0xff] (!%p1428_p13), %v1147_v23 }
 0x164   : > { %v1043_v32 = vadd.f32 %v1042_v31, %v969_v29  ;;  %v1044_v35 = vpop.f32.mrb[13].mxu0  ;;  %v973_v37 = vpop.f32.mrb[14].mxu1  ;;  %v1152_v31 = vadd.f32 (!%p1428_p13), %v1136_v5, %v1120_v15  ;;  %1165 = vst [vmem:[%s1806_s10 + $0x10] sm:$0xff] (!%p1428_p13), %v1149_v25  ;;  %1166 = vst [vmem:[%s1806_s10 + $0x18] sm:$0xff] (!%p1428_p13), %v1150_v26 }
 0x165   : > { %v1045_v36 = vadd.f32 %v1044_v35, %v971_v33  ;;  %v1046_v39 = vpop.f32.mrb[14].mxu0  ;;  %v975_v42 = vpop.f32.mrb[15].mxu1  ;;  %1086 = sbr.rel (%p1428_p13) target bundleno = 376 (0x178), region = 67  ;;  %v1154_v33 = vadd.f32 (!%p1428_p13), %v1138_v11, %v1122_v17  ;;  %v1142_v35 = vld [vmem:[%s1801_s8 + $0x58] sm:$0xff] (!%p1428_p13) }
 0x166   : > { %v1063_v40 = vadd.f32 %v1043_v32, %v437_v30  ;;  %v1047_v41 = vadd.f32 %v1046_v39, %v973_v37  ;;  %v1048_v44 = vpop.f32.mrb[15].mxu0  ;;  %v1151_v30 = vadd.f32 (!%p1428_p13), %v1135_v4, %v1119_v14  ;;  %v1153_v32 = vadd.f32 (!%p1428_p13), %v1137_v6, %v1121_v16  ;;  %1168 = vst [vmem:[%s1806_s10 + $0x28] sm:$0xff] (!%p1428_p13), %v1152_v31 }
 0x167   : > { %v1064_v45 = vadd.f32 %v1045_v36, %v438_v34  ;;  %v1049_v46 = vadd.f32 %v1048_v44, %v975_v42  ;;  %v1095_v12 = vld [vmem:[#allocation2 + $0x40] sm:$0xff] (!%p1428_p13)  ;;  %v1141_v34 = vld [vmem:[%s1801_s8 + $0x50] sm:$0xff] (!%p1428_p13)  ;;  %1170 = vst [vmem:[%s1806_s10 + $0x38] sm:$0xff] (!%p1428_p13), %v1154_v33 }
 0x168   : > { %1079 = vst [vmem:[#allocation2 + $0x60] sm:$0xff] %v1063_v40  ;;  %v1065_v47 = vadd.f32 %v1047_v41, %v439_v38  ;;  %v1096_v13 = vld [vmem:[#allocation2 + $0x48] sm:$0xff] (!%p1428_p13)  ;;  %v1143_v36 = vld [vmem:[%s1801_s8 + $0x60] sm:$0xff] (!%p1428_p13)  ;;  %v1123_v37 = vadd.f32 (!%p1428_p13), %v1108_v63, %v1095_v12  ;;  %v1145_v42 = vld [vmem:[%s1801_s8 + $0x70] sm:$0xff] (!%p1428_p13) }
 0x169   : > { %1080 = vst [vmem:[#allocation2 + $0x68] sm:$0xff] %v1064_v45  ;;  %v1066_v48 = vadd.f32 %v1049_v46, %v440_v43  ;;  %v1097_v20 = vld [vmem:[#allocation2 + $0x50] sm:$0xff] (!%p1428_p13)  ;;  %v1124_v38 = vadd.f32 (!%p1428_p13), %v1112_v0, %v1096_v13  ;;  %v1144_v41 = vld [vmem:[%s1801_s8 + $0x68] sm:$0xff] (!%p1428_p13)  ;;  %v1146_v43 = vld [vmem:[%s1801_s8 + $0x78] sm:$0xff] (!%p1428_p13) }
 0x16a   : > { %1081 = vst [vmem:[#allocation2 + $0x70] sm:$0xff] %v1065_v47  ;;  %v1098_v21 = vld [vmem:[#allocation2 + $0x58] sm:$0xff] (!%p1428_p13)  ;;  %v1125_v39 = vadd.f32 (!%p1428_p13), %v1108_v63, %v1097_v20  ;;  %1167 = vst [vmem:[%s1806_s10 + $0x20] sm:$0xff] (!%p1428_p13), %v1151_v30 }
 0x16b   : > { %1082 = vst [vmem:[#allocation2 + $0x78] sm:$0xff] %v1066_v48  ;;  %v1126_v40 = vadd.f32 (!%p1428_p13), %v1112_v0, %v1098_v21  ;;  %1169 = vst [vmem:[%s1806_s10 + $0x30] sm:$0xff] (!%p1428_p13), %v1153_v32  ;;  %v1155_v48 = vadd.f32 (!%p1428_p13), %v1139_v18, %v1123_v37  ;;  %v1156_v49 = vadd.f32 (!%p1428_p13), %v1140_v19, %v1124_v38 }
 0x16c   : > { %v1157_v50 = vadd.f32 %v1141_v34, %v1125_v39 }
 0x16d   : > { %v1158_v51 = vadd.f32 %v1142_v35, %v1126_v40  ;;  %1171 = vst [vmem:[%s1806_s10 + $0x40] sm:$0xff] %v1155_v48  ;;  %1172 = vst [vmem:[%s1806_s10 + $0x48] sm:$0xff] %v1156_v49 }
 0x16e   : > { %1173 = vst [vmem:[%s1806_s10 + $0x50] sm:$0xff] %v1157_v50 }
 0x16f   : > { %v1099_v22 = vld [vmem:[#allocation2 + $0x60] sm:$0xff]  ;;  %1174 = vst [vmem:[%s1806_s10 + $0x58] sm:$0xff] %v1158_v51 }
 0x170   : > { %v1100_v27 = vld [vmem:[#allocation2 + $0x68] sm:$0xff]  ;;  %v1127_v44 = vadd.f32 %v1108_v63, %v1099_v22 }
 0x171   : > { %v1101_v28 = vld [vmem:[#allocation2 + $0x70] sm:$0xff]  ;;  %v1128_v45 = vadd.f32 %v1112_v0, %v1100_v27 }
 0x172   : > { %v1102_v29 = vld [vmem:[#allocation2 + $0x78] sm:$0xff]  ;;  %v1129_v46 = vadd.f32 %v1108_v63, %v1101_v28  ;;  %v1159_v52 = vadd.f32 %v1143_v36, %v1127_v44 }
 0x173   : > { %v1130_v47 = vadd.f32 %v1112_v0, %v1102_v29  ;;  %v1160_v53 = vadd.f32 %v1144_v41, %v1128_v45 }
 0x174   : > { %v1161_v54 = vadd.f32 %v1145_v42, %v1129_v46  ;;  %1175 = vst [vmem:[%s1806_s10 + $0x60] sm:$0xff] %v1159_v52 }
 0x175   : > { %v1162_v55 = vadd.f32 %v1146_v43, %v1130_v47  ;;  %1176 = vst [vmem:[%s1806_s10 + $0x68] sm:$0xff] %v1160_v53 }
 0x176   : > { %1177 = vst [vmem:[%s1806_s10 + $0x70] sm:$0xff] %v1161_v54 }
 0x177   : > { %1178 = vst [vmem:[%s1806_s10 + $0x78] sm:$0xff] %v1162_v55 }
 0x178 PF: > { %s14_s21 = sadd.s32 1, %s1682_s21   ;;  %s1953_s15 = smov %s1662_s16 }
 0x179   : > { %p11_p0 = scmp.ge.s32.totalorder %s14_s21, 6   ;;  %s1954_s16 = smov %s1761_s28 }
 0x17a   : > { %s1955_s17 = smov %s1674_s19  ;;  %s1956_s18 = smov %s1678_s20 }
 0x17b   : > { %s1957_s19 = smov %s1960_s22  ;;  %s1958_s20 = smov %s1964_s23 }
 0x17c   :  { %13 = sbr.rel (!%p11_p0) target bundleno = 4 (0x4), region = 111 }

// kernel: sam_predictor_forward.24
= control target key start
LH: loop header
LB: loop body
LE: loop exit
PB: predicated region body
PF: predicated region fallthrough
CT: control target
= control target key end

     0   :  { %s1201_s15 = smov 0   ;;  %s1203_s16 = smov 0   ;;  %s1506_s0 = inlined_call_operand.vmem [shape: f32[128,256], index: 0, kind: input, shape index: {}]   ;;  %s1507_s1 = inlined_call_operand.vmem [shape: bf16[256,256], index: 1, kind: input, shape index: {}]   ;;  %s1508_s2 = inlined_call_operand.vmem [shape: f32[1,256], index: 2, kind: input, shape index: {}]   ;;  %s1509_s3 = inlined_call_operand.vmem [shape: f32[1,256], index: 3, kind: input, shape index: {}]   ;;  %s1510_s4 = inlined_call_operand.vmem [shape: f32[128,256], index: 4, kind: output, shape index: {}]  }
   0x1   :  { %s1205_s17 = smov 0  }
   0x2 LB: > { %s33_s18 = sadd.s32 1, %s1170_s16  ;;  %p989_p0 = scmp.ge.s32.totalorder %s1174_s17, 1  ;;  %s1174_s17 = sphi %s1205_s17, %s14_s17   ;;  %s1170_s16 = sphi %s1203_s16, %s1512_s16   ;;  %s1166_s15 = sphi %s1201_s15, %s1511_s15  }
   0x3   : > { %p35_p1 = scmp.ge.s32.totalorder %s33_s18, 2  ;;  %p211_p2 = scmp.lt.s32.totalorder %s1174_s17, 3 }
   0x5   : > { %s1514_s18 = smov (%p35_p1, %s33_s18), 0  ;;  %p212_p3 = pnand %p989_p0, %p211_p2 }
   0x6   : > { %v1088_v0 = vld [vmem:[%s1507_s1 + $0x4] ss:$8 sps:$4 sm:$0xff] (!%p212_p3)   ;;  %v1090_v1 = vld [vmem:[%s1507_s1] ss:$8 sps:$4 sm:$0xff] (!%p212_p3)   ;;  %v1091_v2 = vld [vmem:[%s1507_s1 + $0x14] ss:$8 sps:$4 sm:$0xff] (!%p212_p3)  }
   0x7   : > { %215 = sbr.rel (%p212_p3) target bundleno = 621 (0x26d), region = 36  ;;  %545 = vmatprep.subr.bf16.mxu0 (!%p212_p3), %v1088_v0  ;;  %1032 = vmatprep.subr.bf16.mxu1 (!%p212_p3), %v1088_v0  ;;  %v1093_v3 = vld [vmem:[%s1507_s1 + $0x10] ss:$8 sps:$4 sm:$0xff] (!%p212_p3)   ;;  %v1094_v4 = vld [vmem:[%s1507_s1 + $0x24] ss:$8 sps:$4 sm:$0xff] (!%p212_p3)   ;;  %s990_s29 = sshll.u32 (!%p212_p3), %s1166_s15, 3 }
   0x8   : > { %546 = vmatpush1.bf16.msra.mxu0 (!%p212_p3), %v1090_v1  ;;  %1048 = vmatpush1.bf16.msra.mxu1 (!%p212_p3), %v1090_v1  ;;  %v1096_v5 = vld [vmem:[%s1507_s1 + $0x20] ss:$8 sps:$4 sm:$0xff] (!%p212_p3)   ;;  %p259_p4 = scmp.lt.s32.totalorder (!%p212_p3), %s990_s29, 15  ;;  %v1097_v6 = vld [vmem:[%s1507_s1 + $0x34] ss:$8 sps:$4 sm:$0xff] (!%p212_p3)  }
   0x9   : > { %547 = vmatprep.subr.bf16.mxu0 (!%p212_p3), %v1091_v2  ;;  %1033 = vmatprep.subr.bf16.mxu1 (!%p212_p3), %v1091_v2  ;;  %v1099_v7 = vld [vmem:[%s1507_s1 + $0x30] ss:$8 sps:$4 sm:$0xff] (!%p212_p3)   ;;  %v1100_v8 = vld [vmem:[%s1507_s1 + $0x44] ss:$8 sps:$4 sm:$0xff] (!%p212_p3)   ;;  %v1102_v9 = vld [vmem:[%s1507_s1 + $0x40] ss:$8 sps:$4 sm:$0xff] (!%p212_p3)  }
   0xa   : > { %v1103_v10 = vld [vmem:[%s1507_s1 + $0x54] ss:$8 sps:$4 sm:$0xff] (!%p212_p3)   ;;  %v1105_v11 = vld [vmem:[%s1507_s1 + $0x50] ss:$8 sps:$4 sm:$0xff] (!%p212_p3)   ;;  %v1106_v12 = vld [vmem:[%s1507_s1 + $0x64] ss:$8 sps:$4 sm:$0xff] (!%p212_p3)  }
   0xb   : > { %v1108_v18 = vld [vmem:[%s1507_s1 + $0x60] ss:$8 sps:$4 sm:$0xff] (!%p212_p3)   ;;  %v1109_v20 = vld [vmem:[%s1507_s1 + $0x74] ss:$8 sps:$4 sm:$0xff] (!%p212_p3)   ;;  %v1111_v21 = vld [vmem:[%s1507_s1 + $0x70] ss:$8 sps:$4 sm:$0xff] (!%p212_p3)  }
   0xc   : > { %548 = vmatpush1.bf16.msra.mxu0 (!%p212_p3), %v1093_v3  ;;  %1049 = vmatpush1.bf16.msra.mxu1 (!%p212_p3), %v1093_v3  ;;  %v1112_v22 = vld [vmem:[%s1507_s1 + $0x84] ss:$8 sps:$4 sm:$0xff] (!%p212_p3)   ;;  %v1114_v23 = vld [vmem:[%s1507_s1 + $0x80] ss:$8 sps:$4 sm:$0xff] (!%p212_p3)   ;;  %v1115_v24 = vld [vmem:[%s1507_s1 + $0x94] ss:$8 sps:$4 sm:$0xff] (!%p212_p3)  }
   0xd   : > { %549 = vmatprep.subr.bf16.mxu0 (!%p212_p3), %v1094_v4  ;;  %1034 = vmatprep.subr.bf16.mxu1 (!%p212_p3), %v1094_v4  ;;  %v1117_v25 = vld [vmem:[%s1507_s1 + $0x90] ss:$8 sps:$4 sm:$0xff] (!%p212_p3)   ;;  %v1118_v26 = vld [vmem:[%s1507_s1 + $0xa4] ss:$8 sps:$4 sm:$0xff] (!%p212_p3)   ;;  %v1120_v27 = vld [vmem:[%s1507_s1 + $0xa0] ss:$8 sps:$4 sm:$0xff] (!%p212_p3)  }
   0xe   : > { %s1516_s29 = smov (!%p259_p4, %s990_s29), 15  ;;  %v1121_v28 = vld [vmem:[%s1507_s1 + $0xb4] ss:$8 sps:$4 sm:$0xff]   ;;  %v1123_v29 = vld [vmem:[%s1507_s1 + $0xb0] ss:$8 sps:$4 sm:$0xff]  }
   0xf   : > { %s1030_s14 = sshll.u32 %s1516_s29, 4  ;;  %v1124_v30 = vld [vmem:[%s1507_s1 + $0xc4] ss:$8 sps:$4 sm:$0xff]   ;;  %v1126_v31 = vld [vmem:[%s1507_s1 + $0xc0] ss:$8 sps:$4 sm:$0xff]  }
  0x10   : > { %550 = vmatpush1.bf16.msra.mxu0 %v1096_v5  ;;  %1050 = vmatpush1.bf16.msra.mxu1 %v1096_v5  ;;  %s1263_s22 = scalar_lea.vmem %s1506_s0, %s1030_s14  ;;  %v1127_v32 = vld [vmem:[%s1507_s1 + $0xd4] ss:$8 sps:$4 sm:$0xff]   ;;  %v1129_v33 = vld [vmem:[%s1507_s1 + $0xd0] ss:$8 sps:$4 sm:$0xff]   ;;  %v1130_v34 = vld [vmem:[%s1507_s1 + $0xe4] ss:$8 sps:$4 sm:$0xff]   ;;  %s1435_s5 = scalar_lea.vmem %s1510_s4, %s1030_s14 }
  0x11   : > { %551 = vmatprep.subr.bf16.mxu0 %v1097_v6  ;;  %1035 = vmatprep.subr.bf16.mxu1 %v1097_v6  ;;  %v314_v13 = vld [vmem:[%s1263_s22 + $0x8] sm:$0xff]  ;;  %v316_v14 = vld [vmem:[%s1263_s22 + $0x18] sm:$0xff]  ;;  %v313_v38 = vld [vmem:[%s1263_s22] sm:$0xff] }
  0x12   : > { %v346_v15 = vpack.c.bf16 %v316_v14, %v314_v13  ;;  %v322_v16 = vld [vmem:[%s1263_s22 + $0x48] sm:$0xff]  ;;  %v324_v17 = vld [vmem:[%s1263_s22 + $0x58] sm:$0xff]  ;;  %v315_v39 = vld [vmem:[%s1263_s22 + $0x10] sm:$0xff] }
  0x13   : > { %v350_v19 = vpack.c.bf16 %v324_v17, %v322_v16  ;;  %v1132_v35 = vld [vmem:[%s1507_s1 + $0xe0] ss:$8 sps:$4 sm:$0xff]   ;;  %v1133_v36 = vld [vmem:[%s1507_s1 + $0xf4] ss:$8 sps:$4 sm:$0xff]   ;;  %v1135_v37 = vld [vmem:[%s1507_s1 + $0xf0] ss:$8 sps:$4 sm:$0xff]   ;;  %v345_v46 = vpack.c.bf16 %v315_v39, %v313_v38 }
  0x14   : > { %552 = vmatpush1.bf16.msra.mxu0 %v1099_v7  ;;  %1051 = vmatpush1.bf16.msra.mxu1 %v1099_v7  ;;  %v321_v40 = vld [vmem:[%s1263_s22 + $0x40] sm:$0xff]  ;;  %v323_v41 = vld [vmem:[%s1263_s22 + $0x50] sm:$0xff]  ;;  %v318_v42 = vld [vmem:[%s1263_s22 + $0x28] sm:$0xff] }
  0x15   : > { %553 = vmatprep.subr.bf16.mxu0 %v1100_v8  ;;  %1036 = vmatprep.subr.bf16.mxu1 %v1100_v8  ;;  %v320_v43 = vld [vmem:[%s1263_s22 + $0x38] sm:$0xff]  ;;  %v326_v44 = vld [vmem:[%s1263_s22 + $0x68] sm:$0xff]  ;;  %v349_v47 = vpack.c.bf16 %v323_v41, %v321_v40  ;;  %v317_v50 = vld [vmem:[%s1263_s22 + $0x20] sm:$0xff] }
  0x16   : > { %577 = vmatprep.mubr.bf16.mxu0 %v346_v15  ;;  %597 = vmatprep.mubr.bf16.mxu1 %v350_v19  ;;  %v328_v45 = vld [vmem:[%s1263_s22 + $0x78] sm:$0xff]  ;;  %v348_v48 = vpack.c.bf16 %v320_v43, %v318_v42  ;;  %v319_v51 = vld [vmem:[%s1263_s22 + $0x30] sm:$0xff]  ;;  %v325_v52 = vld [vmem:[%s1263_s22 + $0x60] sm:$0xff] }
  0x17   : > { %v352_v49 = vpack.c.bf16 %v328_v45, %v326_v44  ;;  %v327_v53 = vld [vmem:[%s1263_s22 + $0x70] sm:$0xff]  ;;  %v347_v54 = vpack.c.bf16 %v319_v51, %v317_v50 }
  0x18   : > { %554 = vmatpush1.bf16.msra.mxu0 %v1102_v9  ;;  %1052 = vmatpush1.bf16.msra.mxu1 %v1102_v9  ;;  %v351_v55 = vpack.c.bf16 %v327_v53, %v325_v52 }
  0x19   : > { %555 = vmatprep.subr.bf16.mxu0 %v1103_v10  ;;  %1037 = vmatprep.subr.bf16.mxu1 %v1103_v10 }
  0x1c   : > { %556 = vmatpush1.bf16.msra.mxu0 %v1105_v11  ;;  %1053 = vmatpush1.bf16.msra.mxu1 %v1105_v11 }
  0x1d   : > { %557 = vmatprep.subr.bf16.mxu0 %v1106_v12  ;;  %1038 = vmatprep.subr.bf16.mxu1 %v1106_v12 }
  0x20   : > { %558 = vmatpush1.bf16.msra.mxu0 %v1108_v18  ;;  %1054 = vmatpush1.bf16.msra.mxu1 %v1108_v18 }
  0x21   : > { %559 = vmatprep.subr.bf16.mxu0 %v1109_v20  ;;  %1039 = vmatprep.subr.bf16.mxu1 %v1109_v20 }
  0x24   : > { %560 = vmatpush1.bf16.msra.mxu0 %v1111_v21  ;;  %1055 = vmatpush1.bf16.msra.mxu1 %v1111_v21 }
  0x25   : > { %561 = vmatprep.subr.bf16.mxu0 %v1112_v22  ;;  %1040 = vmatprep.subr.bf16.mxu1 %v1112_v22 }
  0x28   : > { %562 = vmatpush1.bf16.msra.mxu0 %v1114_v23  ;;  %1056 = vmatpush1.bf16.msra.mxu1 %v1114_v23 }
  0x29   : > { %563 = vmatprep.subr.bf16.mxu0 %v1115_v24  ;;  %1041 = vmatprep.subr.bf16.mxu1 %v1115_v24 }
  0x2c   : > { %564 = vmatpush1.bf16.msra.mxu0 %v1117_v25  ;;  %1057 = vmatpush1.bf16.msra.mxu1 %v1117_v25 }
  0x2d   : > { %565 = vmatprep.subr.bf16.mxu0 %v1118_v26  ;;  %1042 = vmatprep.subr.bf16.mxu1 %v1118_v26 }
  0x30   : > { %566 = vmatpush1.bf16.msra.mxu0 %v1120_v27  ;;  %1058 = vmatpush1.bf16.msra.mxu1 %v1120_v27 }
  0x31   : > { %567 = vmatprep.subr.bf16.mxu0 %v1121_v28  ;;  %1043 = vmatprep.subr.bf16.mxu1 %v1121_v28 }
  0x34   : > { %568 = vmatpush1.bf16.msra.mxu0 %v1123_v29  ;;  %1059 = vmatpush1.bf16.msra.mxu1 %v1123_v29 }
  0x35   : > { %569 = vmatprep.subr.bf16.mxu0 %v1124_v30  ;;  %1044 = vmatprep.subr.bf16.mxu1 %v1124_v30 }
  0x38   : > { %570 = vmatpush1.bf16.msra.mxu0 %v1126_v31  ;;  %1060 = vmatpush1.bf16.msra.mxu1 %v1126_v31 }
  0x39   : > { %571 = vmatprep.subr.bf16.mxu0 %v1127_v32  ;;  %1045 = vmatprep.subr.bf16.mxu1 %v1127_v32 }
  0x3c   : > { %572 = vmatpush1.bf16.msra.mxu0 %v1129_v33  ;;  %1061 = vmatpush1.bf16.msra.mxu1 %v1129_v33 }
  0x3d   : > { %573 = vmatprep.subr.bf16.mxu0 %v1130_v34  ;;  %1046 = vmatprep.subr.bf16.mxu1 %v1130_v34 }
  0x40   : > { %574 = vmatpush1.bf16.msra.mxu0 %v1132_v35  ;;  %1062 = vmatpush1.bf16.msra.mxu1 %v1132_v35 }
  0x41   : > { %575 = vmatprep.subr.bf16.mxu0 %v1133_v36  ;;  %1047 = vmatprep.subr.bf16.mxu1 %v1133_v36 }
  0x44   : > { %576 = vmatpush1.bf16.msra.mxu0 %v1135_v37  ;;  %1063 = vmatpush1.bf16.msra.mxu1 %v1135_v37 }
  0x47   : > { %578 = vmatmul.mubr.bf16.vlgmr.msra.gmra.mrb[0].mxu0 %v345_v46  ;;  %598 = vmatmul.mubr.bf16.vlgmr.msra.gmra.mrb[0].mxu1 %v349_v47 }
  0x48   : > { %587 = vmatprep.mubr.bf16.mxu0 %v348_v48  ;;  %607 = vmatprep.mubr.bf16.mxu1 %v352_v49 }
  0x4f   : > { %588 = vmatmul.mubr.bf16.gmra.mrb[4].mxu0 %v347_v54  ;;  %608 = vmatmul.mubr.bf16.gmra.mrb[4].mxu1 %v351_v55 }
 0x11a   : > { %v579_v56 = vpop.f32.mrb[0].mxu0  ;;  %v599_v57 = vpop.f32.mrb[0].mxu1 }
 0x11b   : > { %v581_v58 = vpop.f32.mrb[1].mxu0  ;;  %v601_v59 = vpop.f32.mrb[1].mxu1 }
 0x11c   : > { %v583_v60 = vpop.f32.mrb[2].mxu0  ;;  %v603_v61 = vpop.f32.mrb[2].mxu1  ;;  %v671_v62 = vadd.f32 %v581_v58, %v579_v56  ;;  %v683_v63 = vadd.f32 %v601_v59, %v599_v57 }
 0x11d   : > { %v585_v0 = vpop.f32.mrb[3].mxu0  ;;  %v605_v1 = vpop.f32.mrb[3].mxu1 }
 0x11e   : > { %672 = vadd.xlane.f32.xlu0 %v671_v62  ;;  %v686_v2 = vadd.f32 %v605_v1, %v603_v61  ;;  %v674_v3 = vadd.f32 %v585_v0, %v583_v60 }
 0x120   : > { %687 = vadd.xlane.f32.xlu1 %v686_v2 }
 0x122   : > { %684 = vadd.xlane.f32.xlu0 %v683_v63  ;;  %v589_v4 = vpop.f32.mrb[4].mxu0  ;;  %v609_v5 = vpop.f32.mrb[4].mxu1 }
 0x123   : > { %v591_v6 = vpop.f32.mrb[5].mxu0  ;;  %v611_v7 = vpop.f32.mrb[5].mxu1 }
 0x124   : > { %v593_v8 = vpop.f32.mrb[6].mxu0  ;;  %v677_v9 = vadd.f32 %v591_v6, %v589_v4  ;;  %v1344_v10 = vpop.f32.mrb[6].mxu1  ;;  %v689_v11 = vadd.f32 %v611_v7, %v609_v5 }
 0x125   : > { %v595_v12 = vpop.f32.mrb[7].mxu0  ;;  %v615_v13 = vpop.f32.mrb[7].mxu1 }
 0x126   : > { %675 = vadd.xlane.f32.xlu0 %v674_v3  ;;  %678 = vadd.xlane.f32.xlu1 %v677_v9  ;;  %v680_v14 = vadd.f32 %v595_v12, %v593_v8  ;;  %v692_v15 = vadd.f32 %v615_v13, %v1344_v10 }
 0x12a   : > { %690 = vadd.xlane.f32.xlu0 %v689_v11  ;;  %681 = vadd.xlane.f32.xlu1 %v680_v14 }
 0x12e   : > { %693 = vadd.xlane.f32.xlu1 %v692_v15 }
 0x1ab   : > { %v673_v16 = vpop.xlane.xlu0 %672 }
 0x1ac   : > { %v696_v17 = vmul.f32 0.00390625, %v673_v16 }
 0x1ad   : > { %v688_v20 = vpop.xlane.xlu1 %687 }
 0x1ae   : > { %v1347_v18 = vsub.f32 %v579_v56, %v696_v17  ;;  %v1349_v19 = vsub.f32 %v581_v58, %v696_v17  ;;  %v701_v24 = vmul.f32 0.00390625, %v688_v20 }
 0x1af   : > { %v685_v21 = vpop.xlane.xlu0 %684 }
 0x1b0   : > { %v700_v22 = vmul.f32 0.00390625, %v685_v21  ;;  %v720_v23 = vmul.f32 %v1347_v18, %v1347_v18  ;;  %v721_v25 = vmul.f32 %v1349_v19, %v1349_v19  ;;  %v1363_v35 = vsub.f32 %v603_v61, %v701_v24 }
 0x1b1   : > { %v1365_v36 = vsub.f32 %v605_v1, %v701_v24  ;;  %v669_v24 = vld [vmem:[%s1508_s2] sm:$0x3] }
 0x1b2   : > { %v1355_v26 = vsub.f32 %v599_v57, %v700_v22  ;;  %v1357_v27 = vsub.f32 %v601_v59, %v700_v22  ;;  %v736_v30 = vadd.f32 %v721_v25, %v720_v23  ;;  %v730_v52 = vmul.f32 %v1363_v35, %v1363_v35 }
 0x1b3   : > { %v676_v28 = vpop.xlane.xlu0 %675  ;;  %v679_v29 = vpop.xlane.xlu1 %678  ;;  %v731_v53 = vmul.f32 %v1365_v36, %v1365_v36 }
 0x1b4   : > { %v697_v31 = vmul.f32 0.00390625, %v676_v28  ;;  %v698_v32 = vmul.f32 0.00390625, %v679_v29  ;;  %v728_v33 = vmul.f32 %v1355_v26, %v1355_v26  ;;  %v729_v34 = vmul.f32 %v1357_v27, %v1357_v27  ;;  %737 = vadd.xlane.f32.xlu0 %v736_v30 }
 0x1b5   : > { %v751_v63 = vadd.f32 %v731_v53, %v730_v52 }
 0x1b6   : > { %v1367_v37 = vsub.f32 %v583_v60, %v697_v31  ;;  %v1369_v38 = vsub.f32 %v585_v0, %v697_v31  ;;  %v1371_v39 = vsub.f32 %v589_v4, %v698_v32  ;;  %v1373_v40 = vsub.f32 %v591_v6, %v698_v32  ;;  %v670_v31 = vld [vmem:[%s1509_s3] sm:$0x3] }
 0x1b7   : > { %v691_v41 = vpop.xlane.xlu0 %690  ;;  %v682_v42 = vpop.xlane.xlu1 %681  ;;  %v748_v43 = vadd.f32 %v729_v34, %v728_v33 }
 0x1b8   : > { %v702_v44 = vmul.f32 0.00390625, %v691_v41  ;;  %v699_v45 = vmul.f32 0.00390625, %v682_v42  ;;  %v724_v46 = vmul.f32 %v1371_v39, %v1371_v39  ;;  %v725_v47 = vmul.f32 %v1373_v40, %v1373_v40 }
 0x1b9   : > { %749 = vadd.xlane.f32.xlu0 %v748_v43  ;;  %v722_v48 = vmul.f32 %v1367_v37, %v1367_v37  ;;  %v723_v49 = vmul.f32 %v1369_v38, %v1369_v38 }
 0x1ba   : > { %v1383_v50 = vsub.f32 %v609_v5, %v702_v44  ;;  %v1385_v51 = vsub.f32 %v611_v7, %v702_v44  ;;  %v1391_v54 = vsub.f32 %v593_v8, %v699_v45  ;;  %v1393_v55 = vsub.f32 %v595_v12, %v699_v45 }
 0x1bb   : > { %v694_v56 = vpop.xlane.xlu1 %693  ;;  %v742_v57 = vadd.f32 %v725_v47, %v724_v46  ;;  %v739_v58 = vadd.f32 %v723_v49, %v722_v48 }
 0x1bc   : > { %v703_v59 = vmul.f32 0.00390625, %v694_v56  ;;  %v732_v60 = vmul.f32 %v1383_v50, %v1383_v50  ;;  %v733_v61 = vmul.f32 %v1385_v51, %v1385_v51  ;;  %v726_v2 = vmul.f32 %v1391_v54, %v1391_v54 }
 0x1bd   : > { %743 = vadd.xlane.f32.xlu0 %v742_v57  ;;  %740 = vadd.xlane.f32.xlu1 %v739_v58  ;;  %v727_v3 = vmul.f32 %v1393_v55, %v1393_v55 }
 0x1be   : > { %v754_v62 = vadd.f32 %v733_v61, %v732_v60  ;;  %v1400_v0 = vsub.f32 %v1344_v10, %v703_v59  ;;  %v1402_v1 = vsub.f32 %v615_v13, %v703_v59  ;;  %v801_v10 = vlaneseq }
 0x1bf   : > { %v745_v4 = vadd.f32 %v727_v3, %v726_v2 }
 0x1c0   : > { %v734_v5 = vmul.f32 %v1400_v0, %v1400_v0  ;;  %v735_v6 = vmul.f32 %v1402_v1, %v1402_v1  ;;  %v802_v14 = vshrl.u32 %v801_v10, 7 }
 0x1c1   : > { %755 = vadd.xlane.f32.xlu0 %v754_v62  ;;  %752 = vadd.xlane.f32.xlu1 %v751_v63 }
 0x1c2   : > { %v757_v7 = vadd.f32 %v735_v6, %v734_v5  ;;  %v803_v22 = vsub.s32 0, %v802_v14  ;;  %v807_v23 = vsub.s32 1, %v802_v14 }
 0x1c4   : > { %v1418_v34 = vrot.slane %v669_v24, %v803_v22  ;;  %v1420_v41 = vrot.slane %v669_v24, %v807_v23  ;;  %v1422_v45 = vrot.slane %v670_v31, %v803_v22  ;;  %v1424_v46 = vrot.slane %v670_v31, %v807_v23 }
 0x1c5   : > { %746 = vadd.xlane.f32.xlu1 %v745_v4 }
 0x1c9   : > { %758 = vadd.xlane.f32.xlu1 %v757_v7 }
 0x241   : > { %v738_v8 = vpop.xlane.xlu0 %737 }
 0x242   : > { %v760_v9 = vmul.f32 0.00390625, %v738_v8 }
 0x244   : > { %v768_v11 = vadd.f32 1e-06, %v760_v9 }
 0x246   : > { %v750_v12 = vpop.xlane.xlu0 %749  ;;  %1136 = vrsqrt.f32 %v768_v11 }
 0x247   : > { %v764_v13 = vmul.f32 0.00390625, %v750_v12 }
 0x249   : > { %v772_v15 = vadd.f32 1e-06, %v764_v13 }
 0x24a   : > { %v744_v16 = vpop.xlane.xlu0 %743  ;;  %v741_v17 = vpop.xlane.xlu1 %740 }
 0x24b   : > { %1138 = vrsqrt.f32 %v772_v15  ;;  %v762_v20 = vmul.f32 0.00390625, %v744_v16  ;;  %v761_v21 = vmul.f32 0.00390625, %v741_v17 }
 0x24d   : > { %v770_v25 = vadd.f32 1e-06, %v762_v20  ;;  %v769_v28 = vadd.f32 1e-06, %v761_v21 }
 0x24e   : > { %v756_v29 = vpop.xlane.xlu0 %755  ;;  %v753_v30 = vpop.xlane.xlu1 %752 }
 0x24f   : > { %1140 = vrsqrt.f32 %v770_v25  ;;  %v766_v32 = vmul.f32 0.00390625, %v756_v29  ;;  %v765_v33 = vmul.f32 0.00390625, %v753_v30 }
 0x250   : > { %1142 = vrsqrt.f32 %v769_v28  ;;  %v1137_v42 = vpop.eup %1136 }
 0x251   : > { %v774_v43 = vadd.f32 1e-06, %v766_v32  ;;  %v773_v44 = vadd.f32 1e-06, %v765_v33  ;;  %v784_v47 = vmul.f32 %v1137_v42, %v1347_v18  ;;  %v785_v48 = vmul.f32 %v1137_v42, %v1349_v19 }
 0x252   : > { %v747_v49 = vpop.xlane.xlu1 %746 }
 0x253   : > { %1144 = vrsqrt.f32 %v774_v43  ;;  %v763_v52 = vmul.f32 0.00390625, %v747_v49  ;;  %v811_v53 = vmul.f32 %v1418_v34, %v784_v47  ;;  %v812_v56 = vmul.f32 %v1420_v41, %v785_v48 }
 0x254   : > { %1146 = vrsqrt.f32 %v773_v44 }
 0x255   : > { %v1139_v57 = vpop.eup %1138  ;;  %v771_v18 = vadd.f32 1e-06, %v763_v52  ;;  %v838_v19 = vadd.f32 %v1422_v45, %v811_v53  ;;  %v839_v58 = vadd.f32 %v1424_v46, %v812_v56 }
 0x256   : > { %v792_v59 = vmul.f32 %v1139_v57, %v1355_v26  ;;  %v793_v60 = vmul.f32 %v1139_v57, %v1357_v27  ;;  %v759_v61 = vpop.xlane.xlu1 %758 }
 0x257   : > { %1148 = vrsqrt.f32 %v771_v18  ;;  %v767_v62 = vmul.f32 0.00390625, %v759_v61  ;;  %854 = vst [vmem:[%s1435_s5] sm:$0xff] %v838_v19  ;;  %855 = vst [vmem:[%s1435_s5 + $0x8] sm:$0xff] %v839_v58 }
 0x258   : > { %v819_v63 = vmul.f32 %v1418_v34, %v792_v59  ;;  %v820_v2 = vmul.f32 %v1420_v41, %v793_v60 }
 0x259   : > { %v1141_v3 = vpop.eup %1140  ;;  %v775_v4 = vadd.f32 1e-06, %v767_v62 }
 0x25a   : > { %v1143_v5 = vpop.eup %1142  ;;  %v846_v6 = vadd.f32 %v1422_v45, %v819_v63  ;;  %v847_v26 = vadd.f32 %v1424_v46, %v820_v2  ;;  %v788_v27 = vmul.f32 %v1141_v3, %v1371_v39  ;;  %v789_v7 = vmul.f32 %v1141_v3, %v1373_v40 }
 0x25b   : > { %v786_v8 = vmul.f32 %v1143_v5, %v1367_v37  ;;  %v787_v9 = vmul.f32 %v1143_v5, %v1369_v38  ;;  %1150 = vrsqrt.f32 %v775_v4 }
 0x25c   : > { %862 = vst [vmem:[%s1435_s5 + $0x40] sm:$0xff] %v846_v6  ;;  %863 = vst [vmem:[%s1435_s5 + $0x48] sm:$0xff] %v847_v26  ;;  %v815_v10 = vmul.f32 %v1418_v34, %v788_v27  ;;  %v816_v11 = vmul.f32 %v1420_v41, %v789_v7 }
 0x25d   : > { %v1145_v12 = vpop.eup %1144  ;;  %v813_v13 = vmul.f32 %v1418_v34, %v786_v8  ;;  %v814_v39 = vmul.f32 %v1420_v41, %v787_v9 }
 0x25e   : > { %v1147_v40 = vpop.eup %1146  ;;  %v842_v37 = vadd.f32 %v1422_v45, %v815_v10  ;;  %v843_v38 = vadd.f32 %v1424_v46, %v816_v11  ;;  %v796_v14 = vmul.f32 %v1145_v12, %v1383_v50  ;;  %v797_v15 = vmul.f32 %v1145_v12, %v1385_v51 }
 0x25f   : > { %v840_v16 = vadd.f32 %v1422_v45, %v813_v13  ;;  %v841_v17 = vadd.f32 %v1424_v46, %v814_v39  ;;  %v794_v20 = vmul.f32 %v1147_v40, %v1363_v35  ;;  %v795_v21 = vmul.f32 %v1147_v40, %v1365_v36 }
 0x260   : > { %858 = vst [vmem:[%s1435_s5 + $0x20] sm:$0xff] %v842_v37  ;;  %859 = vst [vmem:[%s1435_s5 + $0x28] sm:$0xff] %v843_v38  ;;  %v823_v22 = vmul.f32 %v1418_v34, %v796_v14  ;;  %v824_v23 = vmul.f32 %v1420_v41, %v797_v15 }
 0x261   : > { %v1149_v24 = vpop.eup %1148  ;;  %856 = vst [vmem:[%s1435_s5 + $0x10] sm:$0xff] %v840_v16  ;;  %857 = vst [vmem:[%s1435_s5 + $0x18] sm:$0xff] %v841_v17  ;;  %v821_v50 = vmul.f32 %v1418_v34, %v794_v20  ;;  %v822_v51 = vmul.f32 %v1420_v41, %v795_v21 }
 0x262   : > { %v850_v35 = vadd.f32 %v1422_v45, %v823_v22  ;;  %v851_v36 = vadd.f32 %v1424_v46, %v824_v23  ;;  %v790_v25 = vmul.f32 %v1149_v24, %v1391_v54  ;;  %v791_v28 = vmul.f32 %v1149_v24, %v1393_v55 }
 0x263   : > { %v848_v29 = vadd.f32 %v1422_v45, %v821_v50  ;;  %v849_v30 = vadd.f32 %v1424_v46, %v822_v51 }
 0x264   : > { %866 = vst [vmem:[%s1435_s5 + $0x60] sm:$0xff] %v850_v35  ;;  %867 = vst [vmem:[%s1435_s5 + $0x68] sm:$0xff] %v851_v36  ;;  %v817_v31 = vmul.f32 %v1418_v34, %v790_v25  ;;  %v818_v32 = vmul.f32 %v1420_v41, %v791_v28 }
 0x265   : > { %v1151_v33 = vpop.eup %1150  ;;  %864 = vst [vmem:[%s1435_s5 + $0x50] sm:$0xff] %v848_v29  ;;  %865 = vst [vmem:[%s1435_s5 + $0x58] sm:$0xff] %v849_v30 }
 0x266   : > { %v844_v54 = vadd.f32 %v1422_v45, %v817_v31  ;;  %v845_v42 = vadd.f32 %v1424_v46, %v818_v32  ;;  %v798_v55 = vmul.f32 %v1151_v33, %v1400_v0  ;;  %v799_v43 = vmul.f32 %v1151_v33, %v1402_v1 }
 0x268   : > { %860 = vst [vmem:[%s1435_s5 + $0x30] sm:$0xff] %v844_v54  ;;  %861 = vst [vmem:[%s1435_s5 + $0x38] sm:$0xff] %v845_v42  ;;  %v825_v44 = vmul.f32 %v1418_v34, %v798_v55  ;;  %v826_v47 = vmul.f32 %v1420_v41, %v799_v43 }
 0x26a   : > { %v852_v48 = vadd.f32 %v1422_v45, %v825_v44  ;;  %v853_v49 = vadd.f32 %v1424_v46, %v826_v47 }
 0x26c   : > { %868 = vst [vmem:[%s1435_s5 + $0x70] sm:$0xff] %v852_v48  ;;  %869 = vst [vmem:[%s1435_s5 + $0x78] sm:$0xff] %v853_v49 }
 0x26d PF: > { %s14_s17 = sadd.s32 1, %s1174_s17   ;;  %s1511_s15 = smov %s1170_s16 }
 0x26e   : > { %p11_p5 = scmp.ge.s32.totalorder %s14_s17, 4   ;;  %s1512_s16 = smov %s1514_s18 }
 0x270   :  { %13 = sbr.rel (!%p11_p5) target bundleno = 2 (0x2), region = 77 }

// kernel: sam_predictor_forward.25
= control target key start
LH: loop header
LB: loop body
LE: loop exit
PB: predicated region body
PF: predicated region fallthrough
CT: control target
= control target key end

     0   :  { %9 = vsyncpa [#allocation3], 0  ;;  %s6157_s0 = inlined_call_operand.vmem [shape: f32[2,10,10,256], index: 0, kind: input, shape index: {}]   ;;  %s6158_s1 = inlined_call_operand.vmem [shape: bf16[3,3,256,256], index: 1, kind: input, shape index: {}]   ;;  %s6159_s2 = inlined_call_operand.vmem [shape: f32[1,256], index: 2, kind: input, shape index: {}]   ;;  %s6160_s3 = inlined_call_operand.vmem [shape: f32[1,256], index: 3, kind: input, shape index: {}]   ;;  %s6161_s4 = inlined_call_operand.hbm [shape: f32[2,8,8,256], index: 4, kind: output, shape index: {}]  }
   0x1   :  { %11 = vsyncpa [#allocation3 + $0x1], 0  ;;  %s4582_s15 = smov 0   ;;  %s4584_s16 = smov 0  }
   0x2   :  { %s4586_s17 = smov 0   ;;  %s4588_s18 = smov 0  }
   0x3 LB: > { %s4603_s19 = sadd.s32 4294967295, %s4552_s18   ;;  %s3274_s20 = sadd.s32 4294967294, %s4552_s18   ;;  %s4552_s18 = sphi %s4588_s18, %s6167_s18   ;;  %s4548_s17 = sphi %s4586_s17, %s6166_s17   ;;  %s4544_s16 = sphi %s4584_s16, %s6165_s16   ;;  %s4540_s15 = sphi %s4582_s15, %s6164_s15  }
   0x4   : > { %s4607_s21 = sadd.s32 1, %s4552_s18   ;;  %s113_s22 = sadd.s32 1, %s4548_s17 }
   0x5   : > { %s110_s23 = ssub.s32 %s4552_s18, %s4607_s21  ;;  %p123_p0 = scmp.ne.s32.totalorder %s4548_s17, %s4544_s16 }
   0x6   : > { %p111_p1 = scmp.eq.s32.totalorder %s110_s23, 0  ;;  %p124_p2 = scmp.eq.s32.totalorder %s4603_s19, 1 }
   0x7   : > { %p129_p3 = scmp.ne.s32.totalorder %s4544_s16, %s4540_s15  ;;  %p130_p4 = scmp.eq.s32.totalorder %s3274_s20, 1 }
   0x8   : > { %s4618_s24 = scalar_select %p111_p1, %s4548_s17, %s113_s22  }
   0x9   : > { %p4620_p5 = por %p124_p2, %p123_p0  ;;  %p4624_p6 = por %p130_p4, %p129_p3 }
   0xa   : > { %p3277_p7 = scmp.ge.s32.totalorder %s4552_s18, 1  ;;  %p165_p8 = scmp.lt.s32.totalorder %s4552_s18, 3 }
   0xc   : > { %p166_p9 = pnand %p3277_p7, %p165_p8 }
   0xd   : > { %v4032_v0 = vld [vmem:[%s6158_s1 + $0x104] ss:$8 sps:$4 sm:$0xff] (!%p166_p9)   ;;  %v4036_v2 = vld [vmem:[%s6158_s1 + $0x100] ss:$8 sps:$4 sm:$0xff] (!%p166_p9)   ;;  %v4038_v4 = vld [vmem:[%s6158_s1 + $0x114] ss:$8 sps:$4 sm:$0xff] (!%p166_p9)  }
   0xe   : > { %169 = sbr.rel (%p166_p9) target bundleno = 901 (0x385), region = 36  ;;  %v4034_v1 = vld [vmem:[%s6158_s1 + $0x404] ss:$8 sps:$4 sm:$0xff] (!%p166_p9)   ;;  %574 = vmatprep.subr.bf16.mxu1 (!%p166_p9), %v4032_v0  ;;  %v4037_v3 = vld [vmem:[%s6158_s1 + $0x400] ss:$8 sps:$4 sm:$0xff] (!%p166_p9)   ;;  %p191_p10 = scmp.lt.s32.totalorder (!%p166_p9), %s4603_s19, 1 }
   0xf   : > { %1738 = vmatprep.subr.bf16.mxu0 (!%p166_p9), %v4034_v1  ;;  %575 = vmatpush1.bf16.msra.mxu1 (!%p166_p9), %v4036_v2  ;;  %v4040_v5 = vld [vmem:[%s6158_s1 + $0x414] ss:$8 sps:$4 sm:$0xff] (!%p166_p9)   ;;  %v4042_v6 = vld [vmem:[%s6158_s1 + $0x110] ss:$8 sps:$4 sm:$0xff] (!%p166_p9)   ;;  %v4044_v8 = vld [vmem:[%s6158_s1 + $0x124] ss:$8 sps:$4 sm:$0xff] (!%p166_p9)  }
  0x10   : > { %1739 = vmatpush1.bf16.msra.mxu0 (!%p166_p9), %v4037_v3  ;;  %576 = vmatprep.subr.bf16.mxu1 (!%p166_p9), %v4038_v4  ;;  %v4043_v7 = vld [vmem:[%s6158_s1 + $0x410] ss:$8 sps:$4 sm:$0xff] (!%p166_p9)   ;;  %v4046_v9 = vld [vmem:[%s6158_s1 + $0x424] ss:$8 sps:$4 sm:$0xff] (!%p166_p9)   ;;  %v4048_v10 = vld [vmem:[%s6158_s1 + $0x120] ss:$8 sps:$4 sm:$0xff] (!%p166_p9)  }
  0x11   : > { %1740 = vmatprep.subr.bf16.mxu0 (!%p166_p9), %v4040_v5  ;;  %v4049_v11 = vld [vmem:[%s6158_s1 + $0x420] ss:$8 sps:$4 sm:$0xff] (!%p166_p9)   ;;  %v4050_v12 = vld [vmem:[%s6158_s1 + $0x134] ss:$8 sps:$4 sm:$0xff] (!%p166_p9)   ;;  %v4054_v14 = vld [vmem:[%s6158_s1 + $0x130] ss:$8 sps:$4 sm:$0xff] (!%p166_p9)  }
  0x12   : > { %v4052_v13 = vld [vmem:[%s6158_s1 + $0x434] ss:$8 sps:$4 sm:$0xff] (!%p166_p9)   ;;  %v4055_v15 = vld [vmem:[%s6158_s1 + $0x430] ss:$8 sps:$4 sm:$0xff] (!%p166_p9)   ;;  %v4056_v16 = vld [vmem:[%s6158_s1 + $0x144] ss:$8 sps:$4 sm:$0xff] (!%p166_p9)  }
  0x13   : > { %577 = vmatpush1.bf16.msra.mxu1 (!%p166_p9), %v4042_v6  ;;  %v4058_v17 = vld [vmem:[%s6158_s1 + $0x444] ss:$8 sps:$4 sm:$0xff] (!%p166_p9)   ;;  %v4060_v18 = vld [vmem:[%s6158_s1 + $0x140] ss:$8 sps:$4 sm:$0xff] (!%p166_p9)   ;;  %v4062_v20 = vld [vmem:[%s6158_s1 + $0x154] ss:$8 sps:$4 sm:$0xff] (!%p166_p9)  }
  0x14   : > { %1741 = vmatpush1.bf16.msra.mxu0 (!%p166_p9), %v4043_v7  ;;  %578 = vmatprep.subr.bf16.mxu1 (!%p166_p9), %v4044_v8  ;;  %v4061_v19 = vld [vmem:[%s6158_s1 + $0x440] ss:$8 sps:$4 sm:$0xff] (!%p166_p9)   ;;  %v4064_v21 = vld [vmem:[%s6158_s1 + $0x454] ss:$8 sps:$4 sm:$0xff] (!%p166_p9)   ;;  %v4066_v22 = vld [vmem:[%s6158_s1 + $0x150] ss:$8 sps:$4 sm:$0xff] (!%p166_p9)  }
  0x15   : > { %1742 = vmatprep.subr.bf16.mxu0 %v4046_v9  ;;  %v4067_v23 = vld [vmem:[%s6158_s1 + $0x450] ss:$8 sps:$4 sm:$0xff]   ;;  %v4068_v24 = vld [vmem:[%s6158_s1 + $0x164] ss:$8 sps:$4 sm:$0xff]   ;;  %v4072_v26 = vld [vmem:[%s6158_s1 + $0x160] ss:$8 sps:$4 sm:$0xff]  }
  0x16   : > { %v4070_v25 = vld [vmem:[%s6158_s1 + $0x464] ss:$8 sps:$4 sm:$0xff]   ;;  %v4073_v27 = vld [vmem:[%s6158_s1 + $0x460] ss:$8 sps:$4 sm:$0xff]   ;;  %v4074_v28 = vld [vmem:[%s6158_s1 + $0x174] ss:$8 sps:$4 sm:$0xff]  }
  0x17   : > { %579 = vmatpush1.bf16.msra.mxu1 %v4048_v10  ;;  %v4076_v29 = vld [vmem:[%s6158_s1 + $0x474] ss:$8 sps:$4 sm:$0xff]   ;;  %v4078_v30 = vld [vmem:[%s6158_s1 + $0x170] ss:$8 sps:$4 sm:$0xff]   ;;  %v4080_v32 = vld [vmem:[%s6158_s1 + $0x184] ss:$8 sps:$4 sm:$0xff]  }
  0x18   : > { %1743 = vmatpush1.bf16.msra.mxu0 %v4049_v11  ;;  %580 = vmatprep.subr.bf16.mxu1 %v4050_v12  ;;  %v4079_v31 = vld [vmem:[%s6158_s1 + $0x470] ss:$8 sps:$4 sm:$0xff]   ;;  %v4082_v33 = vld [vmem:[%s6158_s1 + $0x484] ss:$8 sps:$4 sm:$0xff]   ;;  %v4084_v34 = vld [vmem:[%s6158_s1 + $0x180] ss:$8 sps:$4 sm:$0xff]  }
  0x19   : > { %1744 = vmatprep.subr.bf16.mxu0 %v4052_v13  ;;  %v4085_v35 = vld [vmem:[%s6158_s1 + $0x480] ss:$8 sps:$4 sm:$0xff]   ;;  %s192_s5 = scalar_select %p191_p10, %s4603_s19, 1  ;;  %v4086_v36 = vld [vmem:[%s6158_s1 + $0x194] ss:$8 sps:$4 sm:$0xff]   ;;  %vm308_vm0 = vcmask 1046528  }
  0x1a   : > { %v4088_v37 = vld [vmem:[%s6158_s1 + $0x494] ss:$8 sps:$4 sm:$0xff]   ;;  %v4090_v38 = vld [vmem:[%s6158_s1 + $0x190] ss:$8 sps:$4 sm:$0xff]   ;;  %v4092_v40 = vld [vmem:[%s6158_s1 + $0x1a4] ss:$8 sps:$4 sm:$0xff]  }
  0x1b   : > { %581 = vmatpush1.bf16.msra.mxu1 %v4054_v14  ;;  %s3990_s12 = smul.u32 320, %s192_s5  ;;  %v4091_v39 = vld [vmem:[%s6158_s1 + $0x490] ss:$8 sps:$4 sm:$0xff]   ;;  %v4094_v41 = vld [vmem:[%s6158_s1 + $0x4a4] ss:$8 sps:$4 sm:$0xff]   ;;  %vm880_vm1 = vcmask 1045504  }
  0x1c   : > { %1745 = vmatpush1.bf16.msra.mxu0 %v4055_v15  ;;  %582 = vmatprep.subr.bf16.mxu1 %v4056_v16  ;;  %v4096_v42 = vld [vmem:[%s6158_s1 + $0x1a0] ss:$8 sps:$4 sm:$0xff]   ;;  %v4098_v44 = vld [vmem:[%s6158_s1 + $0x1b4] ss:$8 sps:$4 sm:$0xff]   ;;  %v4102_v46 = vld [vmem:[%s6158_s1 + $0x1b0] ss:$8 sps:$4 sm:$0xff]  }
  0x1d   : > { %1746 = vmatprep.subr.bf16.mxu0 %v4058_v17  ;;  %v4097_v43 = vld [vmem:[%s6158_s1 + $0x4a0] ss:$8 sps:$4 sm:$0xff]   ;;  %s4767_s8 = scalar_lea.vmem %s6157_s0, %s3990_s12  ;;  %v4100_v45 = vld [vmem:[%s6158_s1 + $0x4b4] ss:$8 sps:$4 sm:$0xff]   ;;  %v4103_v47 = vld [vmem:[%s6158_s1 + $0x4b0] ss:$8 sps:$4 sm:$0xff]  }
  0x1e   : > { %v4782_v48 = vld [vmem:[%s4767_s8 + $0x8] sm:$0xff]  ;;  %v4785_v49 = vld [vmem:[%s4767_s8 + $0x18] sm:$0x3]  ;;  %v4110_v3 = vld [vmem:[%s6158_s1 + $0x1d4] ss:$8 sps:$4 sm:$0xff]   ;;  %s188_s27 = sand.u32 1, %s4544_s16  }
  0x1f   : > { %583 = vmatpush1.bf16.msra.mxu1 %v4060_v18  ;;  %v4788_v50 = vld [vmem:[%s4767_s8 + $0x28] sm:$0xff]  ;;  %v4791_v51 = vld [vmem:[%s4767_s8 + $0x38] sm:$0x3]  ;;  %v312_v52 = vrot.slane %v4782_v48, 1  ;;  %v313_v53 = vrot.slane %v4785_v49, 1  ;;  %v4836_v9 = vld [vmem:[%s4767_s8] sm:$0xff] }
  0x20   : > { %1747 = vmatpush1.bf16.msra.mxu0 %v4061_v19  ;;  %584 = vmatprep.subr.bf16.mxu1 %v4062_v20  ;;  %v318_v54 = vrot.slane %v4788_v50, 1  ;;  %v319_v55 = vrot.slane %v4791_v51, 1  ;;  %v4104_v56 = vld [vmem:[%s6158_s1 + $0x1c4] ss:$8 sps:$4 sm:$0xff]   ;;  %v4809_v61 = vld [vmem:[%s4767_s8 + $0x58] sm:$0x3] }
  0x21   : > { %1748 = vmatprep.subr.bf16.mxu0 %v4064_v21  ;;  %v4106_v57 = vld [vmem:[%s6158_s1 + $0x4c4] ss:$8 sps:$4 sm:$0xff]   ;;  %v314_v59 = vsel %vm308_vm0, %v312_v52, %v313_v53  ;;  %v325_v0 = vrot.slane %v4809_v61, 1  ;;  %v4108_v1 = vld [vmem:[%s6158_s1 + $0x1c0] ss:$8 sps:$4 sm:$0xff]   ;;  %s3278_s28 = sshll.u32 %s188_s27, 7 }
  0x22   : > { %v4804_v58 = vld [vmem:[%s4767_s8 + $0x48] sm:$0xff]  ;;  %v320_v60 = vsel %vm308_vm0, %v318_v54, %v319_v55  ;;  %v4112_v4 = vld [vmem:[%s6158_s1 + $0x4d4] ss:$8 sps:$4 sm:$0xff]   ;;  %v4114_v6 = vld [vmem:[%s6158_s1 + $0x1d0] ss:$8 sps:$4 sm:$0xff]   ;;  %s6047_s29 = scalar_lea.vmem [#allocation2], %s3278_s28 }
  0x23   : > { %585 = vmatpush1.bf16.msra.mxu1 %v4066_v22  ;;  %v324_v62 = vrot.slane %v4804_v58, 1  ;;  %v374_v63 = vpack.c.bf16 %v320_v60, %v314_v59  ;;  %v4109_v2 = vld [vmem:[%s6158_s1 + $0x4c0] ss:$8 sps:$4 sm:$0xff]   ;;  %v4115_v7 = vld [vmem:[%s6158_s1 + $0x4d0] ss:$8 sps:$4 sm:$0xff]   ;;  %s3829_s30 = sshll.u32 %s4603_s19, 11 }
  0x24   : > { %1749 = vmatpush1.bf16.msra.mxu0 %v4067_v23  ;;  %586 = vmatprep.subr.bf16.mxu1 %v4068_v24  ;;  %v4116_v10 = vld [vmem:[%s6158_s1 + $0x1e4] ss:$8 sps:$4 sm:$0xff]   ;;  %v202_v11 = vld [vmem:[%s4767_s8 + $0x30] sm:$0x3]  ;;  %v4120_v19 = vld [vmem:[%s6158_s1 + $0x1e0] ss:$8 sps:$4 sm:$0xff]   ;;  %s6106_s9 = scalar_lea.hbm %s6161_s4, %s3829_s30 }
  0x25   : > { %1750 = vmatprep.subr.bf16.mxu0 %v4070_v25  ;;  %v4826_v5 = vsel %vm308_vm0, %v324_v62, %v325_v0  ;;  %606 = vmatprep.mubr.bf16.mxu1 %v374_v63  ;;  %v4843_v12 = vld [vmem:[%s4767_s8 + $0x10] sm:$0x3]  ;;  %v4846_v13 = vld [vmem:[%s4767_s8 + $0x20] sm:$0xff]  ;;  %v888_v14 = vrot.slane %v202_v11, 2  ;;  %v4862_v21 = vld [vmem:[%s4767_s8 + $0x68] sm:$0xff]  ;;  %v309_v23 = vrot.slane %v4836_v9, 1 }
  0x26   : > { %v1538_v8 = vpack.c.bf16 %v4826_v5, %v320_v60  ;;  %v206_v15 = vld [vmem:[%s4767_s8 + $0x50] sm:$0x3]  ;;  %v4118_v16 = vld [vmem:[%s6158_s1 + $0x4e4] ss:$8 sps:$4 sm:$0xff]   ;;  %v4121_v20 = vld [vmem:[%s6158_s1 + $0x4e0] ss:$8 sps:$4 sm:$0xff]  }
  0x27   : > { %587 = vmatpush1.bf16.msra.mxu1 %v4072_v26  ;;  %v4853_v17 = vld [vmem:[%s4767_s8 + $0x40] sm:$0xff]  ;;  %v894_v18 = vrot.slane %v206_v15, 2  ;;  %v887_v22 = vrot.slane %v4846_v13, 2  ;;  %v310_v24 = vrot.slane %v4843_v12, 1  ;;  %v315_v25 = vrot.slane %v4846_v13, 1  ;;  %s3212_s5 = sshll.u32 %s6047_s29, 4  ;;  %s6108_s5 = int_to_ptr.vmem [resolvable:$true] %s3212_s5 }
  0x28   : > { %1751 = vmatpush1.bf16.msra.mxu0 %v4073_v27  ;;  %588 = vmatprep.subr.bf16.mxu1 %v4074_v28  ;;  %v893_v26 = vrot.slane %v4853_v17, 2  ;;  %v4870_v27 = vld [vmem:[%s4767_s8 + $0x78] sm:$0x3]  ;;  %v316_v28 = vrot.slane %v202_v11, 1  ;;  %v4128_v55 = vld [vmem:[%s6158_s1] ss:$8 sps:$4 sm:$0xff]  }
  0x29   : > { %1752 = vmatprep.subr.bf16.mxu0 %v4076_v29  ;;  %1770 = vmatprep.mubr.bf16.mxu0 %v1538_v8  ;;  %v321_v29 = vrot.slane %v4853_v17, 1  ;;  %v4136_v59 = vld [vmem:[%s6158_s1 + $0x14] ss:$8 sps:$4 sm:$0xff]   ;;  %v4149_v11 = vld [vmem:[%s6158_s1 + $0x530] ss:$8 sps:$4 sm:$0xff]   ;;  %s6116_s19 = scalar_lea.sflag [#allocation3], %s188_s27 }
  0x2a   : > { %v4139_v60 = vld [vmem:[%s6158_s1 + $0x514] ss:$8 sps:$4 sm:$0xff]   ;;  %s4490_s10 = scalar_lea.vmem %s6108_s5, 2048  ;;  %s4554_s11 = smov [#allocation2]  }
  0x2b   : > { %589 = vmatpush1.bf16.msra.mxu1 %v4078_v30  ;;  %v322_v30 = vrot.slane %v206_v15, 1  ;;  %v4151_v8 = vld [vmem:[%s6158_s1 + $0x534] ss:$8 sps:$4 sm:$0xff]   ;;  %v4976_v15 = vld [vmem:[%s4767_s8 + $0x88] sm:$0xff]  ;;  %p4491_p11 = scmp.ne.s32.totalorder %s6108_s5, %s4490_s10  ;;  %s4494_s13 = sshll.u32 %s4554_s11, 4  ;;  %s4495_s13 = int_to_ptr.vmem [resolvable:$false] %s4494_s13 }
  0x2c   : > { %1753 = vmatpush1.bf16.msra.mxu0 %v4079_v31  ;;  %590 = vmatprep.subr.bf16.mxu1 %v4080_v32  ;;  %v4874_v31 = vsel %vm880_vm1, %v887_v22, %v888_v14  ;;  %v4122_v32 = vld [vmem:[%s6158_s1 + $0x1f4] ss:$8 sps:$4 sm:$0xff]   ;;  %v4157_v14 = vld [vmem:[%s6158_s1 + $0x544] ss:$8 sps:$4 sm:$0xff]   ;;  %s4496_s14 = scalar_lea.vmem %s4495_s13, 4096  ;;  %p4497_p0 = scmp.lt.s32.totalorder %s6108_s5, %s4495_s13 }
  0x2d   : > { %1754 = vmatprep.subr.bf16.mxu0 %v4082_v33  ;;  %v4124_v33 = vld [vmem:[%s6158_s1 + $0x4f4] ss:$8 sps:$4 sm:$0xff]   ;;  %p4492_p12 = pnand %p4491_p11, %p4620_p5  ;;  %p4498_p1 = scmp.lt.s32.totalorder %s4496_s14, %s4490_s10 }
  0x2f   : > { %591 = vmatpush1.bf16.msra.mxu1 %v4084_v34  ;;  %v4883_v34 = vsel %vm880_vm1, %v893_v26, %v894_v18  ;;  %v336_v18 = vrot.slane %v4976_v15, 1  ;;  %v4997_v26 = vld [vmem:[%s4767_s8 + $0x80] sm:$0xff]  ;;  %p4493_p13 = pneg %p4492_p12  ;;  %p4499_p2 = por %p4498_p1, %p4497_p0 }
  0x30   : > { %1755 = vmatpush1.bf16.msra.mxu0 %v4085_v35  ;;  %592 = vmatprep.subr.bf16.mxu1 %v4086_v36  ;;  %v1835_v35 = vpack.c.bf16 %v4883_v34, %v4874_v31  ;;  %v4126_v36 = vld [vmem:[%s6158_s1 + $0x1f0] ss:$8 sps:$4 sm:$0xff]  }
  0x31   : > { %1756 = vmatprep.subr.bf16.mxu0 %v4088_v37  ;;  %v330_v37 = vrot.slane %v4862_v21, 1  ;;  %p4500_p3 = pnand %p4499_p2, %p4493_p13 }
  0x33   : > { %593 = vmatpush1.bf16.msra.mxu1 %v4090_v38  ;;  %v331_v38 = vrot.slane %v4870_v27, 1 }
  0x34   : > { %1757 = vmatpush1.bf16.msra.mxu0 %v4091_v39  ;;  %594 = vmatprep.subr.bf16.mxu1 %v4092_v40  ;;  %v4127_v39 = vld [vmem:[%s6158_s1 + $0x4f0] ss:$8 sps:$4 sm:$0xff]   ;;  %v885_v40 = vrot.slane %v4785_v49, 2  ;;  %v884_v49 = vrot.slane %v4782_v48, 2 }
  0x35   : > { %1758 = vmatprep.subr.bf16.mxu0 %v4094_v41  ;;  %v4130_v41 = vld [vmem:[%s6158_s1 + $0x4] ss:$8 sps:$4 sm:$0xff]   ;;  %v4911_v52 = vsel %vm308_vm0, %v330_v37, %v331_v38  ;;  %v4163_v37 = vld [vmem:[%s6158_s1 + $0x554] ss:$8 sps:$4 sm:$0xff]  }
  0x36   : > { %v4934_v63 = vpack.c.bf16 %v4911_v52, %v4826_v5  ;;  %v4140_v5 = vld [vmem:[%s6158_s1 + $0x20] ss:$8 sps:$4 sm:$0xff]  }
  0x37   : > { %595 = vmatpush1.bf16.msra.mxu1 %v4096_v42  ;;  %v311_v42 = vsel %vm308_vm0, %v309_v23, %v310_v24  ;;  %v4990_v23 = vld [vmem:[%s4767_s8 + $0x60] sm:$0xff]  ;;  %v4993_v24 = vld [vmem:[%s4767_s8 + $0x70] sm:$0x3] }
  0x38   : > { %1759 = vmatpush1.bf16.msra.mxu0 %v4097_v43  ;;  %596 = vmatprep.subr.bf16.mxu1 %v4098_v44  ;;  %v317_v43 = vsel %vm308_vm0, %v315_v25, %v316_v28  ;;  %v4902_v44 = vsel %vm308_vm0, %v321_v29, %v322_v30  ;;  %v327_v25 = vrot.slane %v4990_v23, 1  ;;  %v5000_v28 = vld [vmem:[%s4767_s8 + $0x90] sm:$0x3]  ;;  %v328_v30 = vrot.slane %v4993_v24, 1 }
  0x39   : > { %1760 = vmatprep.subr.bf16.mxu0 %v4100_v45  ;;  %v4133_v45 = vld [vmem:[%s6158_s1 + $0x504] ss:$8 sps:$4 sm:$0xff]   ;;  %v373_v53 = vpack.c.bf16 %v317_v43, %v311_v42  ;;  %v1537_v54 = vpack.c.bf16 %v4902_v44, %v317_v43 }
  0x3a   : > { %v5022_v43 = vld [vmem:[%s4767_s8 + $0xa8] sm:$0xff] }
  0x3b   : > { %597 = vmatpush1.bf16.msra.mxu1 %v4102_v46  ;;  %v881_v46 = vrot.slane %v4836_v9, 2 }
  0x3c   : > { %1761 = vmatpush1.bf16.msra.mxu0 %v4103_v47  ;;  %598 = vmatprep.subr.bf16.mxu1 %v4104_v56  ;;  %v882_v47 = vrot.slane %v4843_v12, 2  ;;  %v4131_v56 = vld [vmem:[%s6158_s1 + $0x500] ss:$8 sps:$4 sm:$0xff]   ;;  %v4154_v12 = vld [vmem:[%s6158_s1 + $0x44] ss:$8 sps:$4 sm:$0xff]  }
  0x3d   : > { %1762 = vmatprep.subr.bf16.mxu0 %v4106_v57  ;;  %v4921_v57 = vsel %vm880_vm1, %v884_v49, %v885_v40  ;;  %v4161_v40 = vld [vmem:[%s6158_s1 + $0x550] ss:$8 sps:$4 sm:$0xff]   ;;  %v342_v49 = vrot.slane %v5022_v43, 1 }
  0x3e   : > { %v4930_v62 = vsel %vm880_vm1, %v881_v46, %v882_v47  ;;  %v5028_v47 = vld [vmem:[%s4767_s8 + $0xb8] sm:$0x3] }
  0x3f   : > { %599 = vmatpush1.bf16.msra.mxu1 %v4108_v1  ;;  %v945_v0 = vpack.c.bf16 %v4874_v31, %v4930_v62  ;;  %v4134_v1 = vld [vmem:[%s6158_s1 + $0x10] ss:$8 sps:$4 sm:$0xff]   ;;  %v4337_v31 = vld [vmem:[%s6158_s1 + $0x724] ss:$8 sps:$4 sm:$0xff]   ;;  %v4332_v62 = vld [vmem:[%s6158_s1 + $0x320] ss:$8 sps:$4 sm:$0xff]  }
  0x40   : > { %1763 = vmatpush1.bf16.msra.mxu0 %v4109_v2  ;;  %600 = vmatprep.subr.bf16.mxu1 %v4110_v3  ;;  %v4137_v2 = vld [vmem:[%s6158_s1 + $0x510] ss:$8 sps:$4 sm:$0xff]   ;;  %v4142_v3 = vld [vmem:[%s6158_s1 + $0x24] ss:$8 sps:$4 sm:$0xff]  }
  0x41   : > { %1764 = vmatprep.subr.bf16.mxu0 %v4112_v4  ;;  %v4145_v4 = vld [vmem:[%s6158_s1 + $0x524] ss:$8 sps:$4 sm:$0xff]  }
  0x43   : > { %601 = vmatpush1.bf16.msra.mxu1 %v4114_v6  ;;  %v4143_v6 = vld [vmem:[%s6158_s1 + $0x520] ss:$8 sps:$4 sm:$0xff]  }
  0x44   : > { %1765 = vmatpush1.bf16.msra.mxu0 %v4115_v7  ;;  %602 = vmatprep.subr.bf16.mxu1 %v4116_v10  ;;  %v4148_v7 = vld [vmem:[%s6158_s1 + $0x34] ss:$8 sps:$4 sm:$0xff]   ;;  %v4146_v10 = vld [vmem:[%s6158_s1 + $0x30] ss:$8 sps:$4 sm:$0xff]  }
  0x45   : > { %1766 = vmatprep.subr.bf16.mxu0 %v4118_v16  ;;  %v4979_v16 = vld [vmem:[%s4767_s8 + $0x98] sm:$0x3] }
  0x46   : > { %v337_v22 = vrot.slane %v4979_v16, 1 }
  0x47   : > { %603 = vmatpush1.bf16.msra.mxu1 %v4120_v19  ;;  %v4152_v19 = vld [vmem:[%s6158_s1 + $0x40] ss:$8 sps:$4 sm:$0xff]  }
  0x48   : > { %1767 = vmatpush1.bf16.msra.mxu0 %v4121_v20  ;;  %604 = vmatprep.subr.bf16.mxu1 %v4122_v32  ;;  %v4155_v20 = vld [vmem:[%s6158_s1 + $0x540] ss:$8 sps:$4 sm:$0xff]   ;;  %v338_v29 = vsel %vm308_vm0, %v336_v18, %v337_v22  ;;  %v333_v32 = vrot.slane %v4997_v26, 1  ;;  %v4175_v22 = vld [vmem:[%s6158_s1 + $0x574] ss:$8 sps:$4 sm:$0xff]  }
  0x49   : > { %1768 = vmatprep.subr.bf16.mxu0 %v4124_v33  ;;  %v334_v33 = vrot.slane %v5000_v28, 1  ;;  %v1540_v38 = vpack.c.bf16 %v338_v29, %v4911_v52  ;;  %v4166_v52 = vld [vmem:[%s6158_s1 + $0x64] ss:$8 sps:$4 sm:$0xff]  }
  0x4b   : > { %605 = vmatpush1.bf16.msra.mxu1 %v4126_v36  ;;  %v4160_v36 = vld [vmem:[%s6158_s1 + $0x54] ss:$8 sps:$4 sm:$0xff]   ;;  %v335_v42 = vsel %vm308_vm0, %v333_v32, %v334_v33  ;;  %v5091_v33 = vld [vmem:[%s4767_s8 + $0xe8] sm:$0xff] }
  0x4c   : > { %1769 = vmatpush1.bf16.msra.mxu0 %v4127_v39  ;;  %807 = vmatprep.subr.bf16.mxu1 %v4130_v41  ;;  %v4158_v39 = vld [vmem:[%s6158_s1 + $0x50] ss:$8 sps:$4 sm:$0xff]   ;;  %v329_v41 = vsel %vm308_vm0, %v327_v25, %v328_v30 }
  0x4d   : > { %2036 = vmatprep.subr.bf16.mxu0 %v4133_v45  ;;  %v5025_v45 = vpack.c.bf16 %v329_v41, %v4902_v44  ;;  %v1539_v46 = vpack.c.bf16 %v335_v42, %v329_v41  ;;  %v343_v44 = vrot.slane %v5028_v47, 1  ;;  %v896_v41 = vrot.slane %v4804_v58, 2 }
  0x4e   : > { %607 = vmatmul.mubr.bf16.vlgmr.msra.gmra.mrb[0].mxu1 %v373_v53  ;;  %v4169_v53 = vld [vmem:[%s6158_s1 + $0x564] ss:$8 sps:$4 sm:$0xff]  }
  0x4f   : > { %1771 = vmatmul.mubr.bf16.vlgmr.msra.gmra.mrb[0].mxu0 %v1537_v54  ;;  %808 = vmatpush1.bf16.msra.mxu1 %v4128_v55  ;;  %v5039_v54 = vld [vmem:[%s4767_s8 + $0xc8] sm:$0xff]  ;;  %v891_v55 = vrot.slane %v4791_v51, 2  ;;  %v4184_v51 = vld [vmem:[%s6158_s1 + $0x94] ss:$8 sps:$4 sm:$0xff]  }
  0x50   : > { %2037 = vmatpush1.bf16.msra.mxu0 %v4131_v56  ;;  %809 = vmatprep.subr.bf16.mxu1 %v4136_v59  ;;  %v5043_v56 = vld [vmem:[%s4767_s8 + $0xd8] sm:$0x3]  ;;  %v348_v59 = vrot.slane %v5039_v54, 1 }
  0x51   : > { %2038 = vmatprep.subr.bf16.mxu0 %v4139_v60  ;;  %616 = vmatprep.mubr.bf16.mxu1 %v4934_v63  ;;  %v4164_v60 = vld [vmem:[%s6158_s1 + $0x60] ss:$8 sps:$4 sm:$0xff]  }
  0x52   : > { %1780 = vmatprep.mubr.bf16.mxu0 %v1540_v38 }
  0x53   : > { %810 = vmatpush1.bf16.msra.mxu1 %v4134_v1  ;;  %v4167_v1 = vld [vmem:[%s6158_s1 + $0x560] ss:$8 sps:$4 sm:$0xff]  }
  0x54   : > { %2039 = vmatpush1.bf16.msra.mxu0 %v4137_v2  ;;  %811 = vmatprep.subr.bf16.mxu1 %v4142_v3  ;;  %v344_v2 = vsel %vm308_vm0, %v342_v49, %v343_v44  ;;  %v349_v3 = vrot.slane %v5043_v56, 1 }
  0x55   : > { %2040 = vmatprep.subr.bf16.mxu0 %v4145_v4  ;;  %v5056_v4 = vld [vmem:[%s4767_s8 + $0xa0] sm:$0xff] }
  0x56   : > { %617 = vmatmul.mubr.bf16.gmra.mrb[4].mxu1 %v5025_v45 }
  0x57   : > { %812 = vmatpush1.bf16.msra.mxu1 %v4140_v5  ;;  %1781 = vmatmul.mubr.bf16.gmra.mrb[4].mxu0 %v1539_v46  ;;  %v5058_v5 = vpack.c.bf16 %v344_v2, %v338_v29  ;;  %v4170_v29 = vld [vmem:[%s6158_s1 + $0x70] ss:$8 sps:$4 sm:$0xff]   ;;  %v4178_v46 = vld [vmem:[%s6158_s1 + $0x84] ss:$8 sps:$4 sm:$0xff]  }
  0x58   : > { %2041 = vmatpush1.bf16.msra.mxu0 %v4143_v6  ;;  %813 = vmatprep.subr.bf16.mxu1 %v4148_v7  ;;  %v5061_v6 = vld [vmem:[%s4767_s8 + $0xb0] sm:$0x3]  ;;  %v339_v7 = vrot.slane %v5056_v4, 1 }
  0x59   : > { %2042 = vmatprep.subr.bf16.mxu0 %v4151_v8  ;;  %v5065_v8 = vld [vmem:[%s4767_s8 + $0xc0] sm:$0xff]  ;;  %626 = vmatprep.mubr.bf16.mxu1 %v5058_v5 }
  0x5b   : > { %814 = vmatpush1.bf16.msra.mxu1 %v4146_v10  ;;  %v5068_v10 = vld [vmem:[%s4767_s8 + $0xd0] sm:$0x3] }
  0x5c   : > { %2043 = vmatpush1.bf16.msra.mxu0 %v4149_v11  ;;  %815 = vmatprep.subr.bf16.mxu1 %v4154_v12  ;;  %v350_v11 = vsel %vm308_vm0, %v348_v59, %v349_v3  ;;  %v340_v12 = vrot.slane %v5061_v6, 1  ;;  %v346_v18 = vrot.slane %v5068_v10, 1  ;;  %v4176_v59 = vld [vmem:[%s6158_s1 + $0x80] ss:$8 sps:$4 sm:$0xff]  }
  0x5d   : > { %2044 = vmatprep.subr.bf16.mxu0 %v4157_v14  ;;  %v345_v14 = vrot.slane %v5065_v8, 1  ;;  %v1542_v25 = vpack.c.bf16 %v350_v11, %v344_v2  ;;  %v5125_v3 = vld [vmem:[%s4767_s8 + $0xe0] sm:$0xff] }
  0x5e   : > { %v341_v30 = vsel %vm308_vm0, %v339_v7, %v340_v12  ;;  %v5130_v12 = vld [vmem:[%s4767_s8 + $0xf0] sm:$0x3] }
  0x5f   : > { %816 = vmatpush1.bf16.msra.mxu1 %v4152_v19  ;;  %v897_v19 = vrot.slane %v4809_v61, 2  ;;  %v4173_v61 = vld [vmem:[%s6158_s1 + $0x570] ss:$8 sps:$4 sm:$0xff]   ;;  %v347_v32 = vsel %vm308_vm0, %v345_v14, %v346_v18  ;;  %1790 = vmatprep.mubr.bf16.mxu0 %v1542_v25  ;;  %v351_v14 = vrot.slane %v5125_v3, 1  ;;  %v5134_v18 = vld [vmem:[%s4767_s8 + $0x100] sm:$0xff] }
  0x60   : > { %2045 = vmatpush1.bf16.msra.mxu0 %v4155_v20  ;;  %817 = vmatprep.subr.bf16.mxu1 %v4160_v36  ;;  %v4172_v20 = vld [vmem:[%s6158_s1 + $0x74] ss:$8 sps:$4 sm:$0xff]   ;;  %v890_v36 = vrot.slane %v4788_v50, 2  ;;  %v1541_v38 = vpack.c.bf16 %v347_v32, %v341_v30 }
  0x61   : > { %2046 = vmatprep.subr.bf16.mxu0 %v4163_v37  ;;  %v5094_v37 = vpack.c.bf16 %v341_v30, %v335_v42  ;;  %v4181_v42 = vld [vmem:[%s6158_s1 + $0x584] ss:$8 sps:$4 sm:$0xff]   ;;  %v898_v25 = vsel %vm880_vm1, %v896_v41, %v897_v19  ;;  %v352_v30 = vrot.slane %v5130_v12, 1  ;;  %v902_v41 = vrot.slane %v4862_v21, 2 }
  0x62   : > { %1791 = vmatmul.mubr.bf16.gmra.mrb[8].mxu0 %v1541_v38  ;;  %v1529_v38 = vrot.slane %v5134_v18, 1 }
  0x63   : > { %818 = vmatpush1.bf16.msra.mxu1 %v4158_v39  ;;  %v5097_v39 = vld [vmem:[%s4767_s8 + $0xf8] sm:$0x3] }
  0x64   : > { %2047 = vmatpush1.bf16.msra.mxu0 %v4161_v40  ;;  %819 = vmatprep.subr.bf16.mxu1 %v4166_v52  ;;  %v354_v40 = vrot.slane %v5091_v33, 1  ;;  %v355_v49 = vrot.slane %v5097_v39, 1  ;;  %v5109_v52 = vld [vmem:[%s4767_s8 + $0x108] sm:$0xff] }
  0x65   : > { %2048 = vmatprep.subr.bf16.mxu0 %v4169_v53  ;;  %v5112_v53 = vld [vmem:[%s4767_s8 + $0x118] sm:$0x3]  ;;  %v1532_v44 = vrot.slane %v5109_v52, 1  ;;  %627 = vmatmul.mubr.bf16.gmra.mrb[8].mxu1 %v5094_v37 }
  0x66   : > { %v1533_v2 = vrot.slane %v5112_v53, 1 }
  0x67   : > { %820 = vmatpush1.bf16.msra.mxu1 %v4164_v60  ;;  %v4179_v60 = vld [vmem:[%s6158_s1 + $0x580] ss:$8 sps:$4 sm:$0xff]  }
  0x68   : > { %2049 = vmatpush1.bf16.msra.mxu0 %v4167_v1  ;;  %821 = vmatprep.subr.bf16.mxu1 %v4172_v20  ;;  %v356_v1 = vsel %vm308_vm0, %v354_v40, %v355_v49  ;;  %v5137_v20 = vld [vmem:[%s4767_s8 + $0x110] sm:$0x3] }
  0x69   : > { %2050 = vmatprep.subr.bf16.mxu0 %v4175_v22  ;;  %v5127_v7 = vpack.c.bf16 %v356_v1, %v350_v11  ;;  %v5142_v22 = vsel %vm880_vm1, %v890_v36, %v891_v55  ;;  %v5146_v11 = vsel %vm308_vm0, %v1532_v44, %v1533_v2  ;;  %v1530_v40 = vrot.slane %v5137_v20, 1  ;;  %v4187_v55 = vld [vmem:[%s6158_s1 + $0x594] ss:$8 sps:$4 sm:$0xff]  }
  0x6a   : > { %v1544_v19 = vpack.c.bf16 %v5146_v11, %v356_v1  ;;  %v237_v36 = vpack.c.bf16 %v4788_v50, %v4782_v48  ;;  %v1836_v1 = vpack.c.bf16 %v898_v25, %v5142_v22  ;;  %v903_v2 = vrot.slane %v4870_v27, 2  ;;  %v4190_v48 = vld [vmem:[%s6158_s1 + $0xa4] ss:$8 sps:$4 sm:$0xff]   ;;  %v4188_v27 = vld [vmem:[%s6158_s1 + $0xa0] ss:$8 sps:$4 sm:$0xff]  }
  0x6b   : > { %822 = vmatpush1.bf16.msra.mxu1 %v4170_v29  ;;  %636 = vmatprep.mubr.bf16.mxu1 %v5127_v7  ;;  %v353_v29 = vsel %vm308_vm0, %v351_v14, %v352_v30  ;;  %v899_v50 = vrot.slane %v4990_v23, 2  ;;  %v900_v14 = vrot.slane %v4993_v24, 2  ;;  %v4196_v24 = vld [vmem:[%s6158_s1 + $0xb4] ss:$8 sps:$4 sm:$0xff]  }
  0x6c   : > { %2051 = vmatpush1.bf16.msra.mxu0 %v4173_v61  ;;  %823 = vmatprep.subr.bf16.mxu1 %v4178_v46  ;;  %v5161_v61 = vsel %vm308_vm0, %v1529_v38, %v1530_v40  ;;  %v4182_v46 = vld [vmem:[%s6158_s1 + $0x90] ss:$8 sps:$4 sm:$0xff]   ;;  %v5172_v49 = vpack.c.bf16 %v353_v29, %v347_v32  ;;  %v4193_v32 = vld [vmem:[%s6158_s1 + $0x5a4] ss:$8 sps:$4 sm:$0xff]   ;;  %v4199_v38 = vld [vmem:[%s6158_s1 + $0x5b4] ss:$8 sps:$4 sm:$0xff]  }
  0x6d   : > { %2052 = vmatprep.subr.bf16.mxu0 %v4181_v42  ;;  %v4185_v42 = vld [vmem:[%s6158_s1 + $0x590] ss:$8 sps:$4 sm:$0xff]   ;;  %1800 = vmatprep.mubr.bf16.mxu0 %v1544_v19  ;;  %v1543_v44 = vpack.c.bf16 %v5161_v61, %v353_v29  ;;  %v5199_v30 = vsel %vm880_vm1, %v899_v50, %v900_v14  ;;  %v908_v40 = vrot.slane %v4976_v15, 2 }
  0x6e   : > { %637 = vmatmul.mubr.bf16.gmra.mrb[12].mxu1 %v5172_v49  ;;  %v4194_v19 = vld [vmem:[%s6158_s1 + $0xb0] ss:$8 sps:$4 sm:$0xff]  }
  0x6f   : > { %824 = vmatpush1.bf16.msra.mxu1 %v4176_v59  ;;  %1801 = vmatmul.mubr.bf16.gmra.mrb[12].mxu0 %v1543_v44  ;;  %v4191_v59 = vld [vmem:[%s6158_s1 + $0x5a0] ss:$8 sps:$4 sm:$0xff]   ;;  %v4197_v29 = vld [vmem:[%s6158_s1 + $0x5b0] ss:$8 sps:$4 sm:$0xff]   ;;  %v911_v44 = vrot.slane %v5056_v4, 2 }
  0x70   : > { %2053 = vmatpush1.bf16.msra.mxu0 %v4179_v60  ;;  %825 = vmatprep.subr.bf16.mxu1 %v4184_v51  ;;  %v5196_v60 = vsel %vm880_vm1, %v902_v41, %v903_v2  ;;  %v905_v41 = vrot.slane %v4997_v26, 2  ;;  %v4202_v2 = vld [vmem:[%s6158_s1 + $0xc4] ss:$8 sps:$4 sm:$0xff]  }
  0x71   : > { %2054 = vmatprep.subr.bf16.mxu0 %v4187_v55  ;;  %839 = vmatprep.mubr.bf16.mxu1 %v237_v36  ;;  %v5206_v51 = vpack.c.bf16 %v5196_v60, %v898_v25  ;;  %v5210_v55 = vpack.c.bf16 %v5199_v30, %v4883_v34  ;;  %v909_v36 = vrot.slane %v4979_v16, 2  ;;  %v914_v25 = vrot.slane %v5022_v43, 2  ;;  %v4205_v16 = vld [vmem:[%s6158_s1 + $0x5c4] ss:$8 sps:$4 sm:$0xff]   ;;  %v4236_v34 = vld [vmem:[%s6158_s1 + $0x220] ss:$8 sps:$4 sm:$0xff]  }
  0x72   : > { %2068 = vmatprep.mubr.bf16.mxu0 %v1836_v1  ;;  %v912_v1 = vrot.slane %v5061_v6, 2 }
  0x73   : > { %826 = vmatpush1.bf16.msra.mxu1 %v4182_v46  ;;  %v906_v46 = vrot.slane %v5000_v28, 2  ;;  %v4200_v28 = vld [vmem:[%s6158_s1 + $0xc0] ss:$8 sps:$4 sm:$0xff]   ;;  %v5238_v6 = vsel %vm880_vm1, %v908_v40, %v909_v36  ;;  %v4209_v40 = vld [vmem:[%s6158_s1 + $0x5d0] ss:$8 sps:$4 sm:$0xff]   ;;  %v917_v36 = vrot.slane %v5065_v8, 2 }
  0x74   : > { %2055 = vmatpush1.bf16.msra.mxu0 %v4185_v42  ;;  %827 = vmatprep.subr.bf16.mxu1 %v4190_v48  ;;  %v915_v42 = vrot.slane %v5028_v47, 2  ;;  %v4203_v47 = vld [vmem:[%s6158_s1 + $0x5c0] ss:$8 sps:$4 sm:$0xff]   ;;  %v5247_v14 = vsel %vm880_vm1, %v911_v44, %v912_v1  ;;  %v924_v44 = vrot.slane %v5130_v12, 2  ;;  %v4214_v1 = vld [vmem:[%s6158_s1 + $0xe4] ss:$8 sps:$4 sm:$0xff]  }
  0x75   : > { %2056 = vmatprep.subr.bf16.mxu0 %v4193_v32  ;;  %v5241_v48 = vsel %vm880_vm1, %v905_v41, %v906_v46  ;;  %v4208_v32 = vld [vmem:[%s6158_s1 + $0xd4] ss:$8 sps:$4 sm:$0xff]   ;;  %v918_v41 = vrot.slane %v5068_v10, 2  ;;  %v926_v46 = vrot.slane %v5091_v33, 2  ;;  %v4212_v10 = vld [vmem:[%s6158_s1 + $0xe0] ss:$8 sps:$4 sm:$0xff]  }
  0x76   : > { %v5244_v50 = vsel %vm880_vm1, %v914_v25, %v915_v42  ;;  %v927_v25 = vrot.slane %v5097_v39, 2  ;;  %v923_v42 = vrot.slane %v5125_v3, 2  ;;  %v4215_v39 = vld [vmem:[%s6158_s1 + $0x5e0] ss:$8 sps:$4 sm:$0xff]  }
  0x77   : > { %828 = vmatpush1.bf16.msra.mxu1 %v4188_v27  ;;  %v5254_v27 = vpack.c.bf16 %v5244_v50, %v5238_v6 }
  0x78   : > { %2057 = vmatpush1.bf16.msra.mxu0 %v4191_v59  ;;  %829 = vmatprep.subr.bf16.mxu1 %v4196_v24  ;;  %v5258_v59 = vpack.c.bf16 %v5247_v14, %v5241_v48  ;;  %v4211_v24 = vld [vmem:[%s6158_s1 + $0x5d4] ss:$8 sps:$4 sm:$0xff]  }
  0x79   : > { %2058 = vmatprep.subr.bf16.mxu0 %v4199_v38  ;;  %v4206_v38 = vld [vmem:[%s6158_s1 + $0xd0] ss:$8 sps:$4 sm:$0xff]  }
  0x7b   : > { %830 = vmatpush1.bf16.msra.mxu1 %v4194_v19  ;;  %v920_v19 = vrot.slane %v5039_v54, 2 }
  0x7c   : > { %2059 = vmatpush1.bf16.msra.mxu0 %v4197_v29  ;;  %831 = vmatprep.subr.bf16.mxu1 %v4202_v2  ;;  %v921_v29 = vrot.slane %v5043_v56, 2  ;;  %v4217_v56 = vld [vmem:[%s6158_s1 + $0x5e4] ss:$8 sps:$4 sm:$0xff]   ;;  %v5293_v2 = vsel %vm880_vm1, %v917_v36, %v918_v41  ;;  %v4224_v41 = vld [vmem:[%s6158_s1 + $0x200] ss:$8 sps:$4 sm:$0xff]  }
  0x7d   : > { %2060 = vmatprep.subr.bf16.mxu0 %v4205_v16  ;;  %v5296_v16 = vsel %vm880_vm1, %v926_v46, %v927_v25  ;;  %v4229_v36 = vld [vmem:[%s6158_s1 + $0x604] ss:$8 sps:$4 sm:$0xff]   ;;  %v4227_v46 = vld [vmem:[%s6158_s1 + $0x600] ss:$8 sps:$4 sm:$0xff]   ;;  %v236_v25 = vpack.c.bf16 %v4846_v13, %v4836_v9  ;;  %v4230_v9 = vld [vmem:[%s6158_s1 + $0x210] ss:$8 sps:$4 sm:$0xff]  }
  0x7e   : > { %v5290_v12 = vsel %vm880_vm1, %v920_v19, %v921_v29  ;;  %v4223_v19 = vld [vmem:[%s6158_s1 + $0x5f4] ss:$8 sps:$4 sm:$0xff]   ;;  %v4226_v29 = vld [vmem:[%s6158_s1 + $0x204] ss:$8 sps:$4 sm:$0xff]   ;;  %v4233_v13 = vld [vmem:[%s6158_s1 + $0x610] ss:$8 sps:$4 sm:$0xff]  }
  0x7f   : > { %832 = vmatpush1.bf16.msra.mxu1 %v4200_v28  ;;  %v5299_v28 = vsel %vm880_vm1, %v923_v42, %v924_v44  ;;  %v4232_v42 = vld [vmem:[%s6158_s1 + $0x214] ss:$8 sps:$4 sm:$0xff]  }
  0x80   : > { %2061 = vmatpush1.bf16.msra.mxu0 %v4203_v47  ;;  %833 = vmatprep.subr.bf16.mxu1 %v4208_v32  ;;  %v4220_v47 = vld [vmem:[%s6158_s1 + $0xf4] ss:$8 sps:$4 sm:$0xff]   ;;  %v5306_v32 = vpack.c.bf16 %v5296_v16, %v5290_v12 }
  0x81   : > { %2062 = vmatprep.subr.bf16.mxu0 %v4211_v24  ;;  %v5310_v24 = vpack.c.bf16 %v5299_v28, %v5293_v2  ;;  %v4235_v44 = vld [vmem:[%s6158_s1 + $0x614] ss:$8 sps:$4 sm:$0xff]  }
  0x83   : > { %834 = vmatpush1.bf16.msra.mxu1 %v4206_v38  ;;  %v4218_v38 = vld [vmem:[%s6158_s1 + $0xf0] ss:$8 sps:$4 sm:$0xff]  }
  0x84   : > { %2063 = vmatpush1.bf16.msra.mxu0 %v4209_v40  ;;  %835 = vmatprep.subr.bf16.mxu1 %v4214_v1  ;;  %v4221_v40 = vld [vmem:[%s6158_s1 + $0x5f0] ss:$8 sps:$4 sm:$0xff]   ;;  %v5343_v1 = vpack.c.bf16 %v4862_v21, %v4804_v58  ;;  %v4238_v58 = vld [vmem:[%s6158_s1 + $0x224] ss:$8 sps:$4 sm:$0xff]  }
  0x85   : > { %2064 = vmatprep.subr.bf16.mxu0 %v4217_v56  ;;  %v1838_v56 = vpack.c.bf16 %v5238_v6, %v5196_v60  ;;  %v4241_v21 = vld [vmem:[%s6158_s1 + $0x624] ss:$8 sps:$4 sm:$0xff]   ;;  %v5371_v60 = vpack.c.bf16 %v4990_v23, %v4853_v17  ;;  %v1837_v6 = vpack.c.bf16 %v5241_v48, %v5199_v30  ;;  %v5385_v17 = vpack.c.bf16 %v5022_v43, %v4976_v15 }
  0x86   : > { %v1840_v30 = vpack.c.bf16 %v5290_v12, %v5244_v50  ;;  %v1830_v48 = vrot.slane %v5109_v52, 2  ;;  %v4250_v15 = vld [vmem:[%s6158_s1 + $0x244] ss:$8 sps:$4 sm:$0xff]   ;;  %v4248_v50 = vld [vmem:[%s6158_s1 + $0x240] ss:$8 sps:$4 sm:$0xff]   ;;  %v5413_v12 = vpack.c.bf16 %v5056_v4, %v4997_v26 }
  0x87   : > { %836 = vmatpush1.bf16.msra.mxu1 %v4212_v10  ;;  %v4244_v10 = vld [vmem:[%s6158_s1 + $0x234] ss:$8 sps:$4 sm:$0xff]   ;;  %v4253_v52 = vld [vmem:[%s6158_s1 + $0x644] ss:$8 sps:$4 sm:$0xff]  }
  0x88   : > { %2065 = vmatpush1.bf16.msra.mxu0 %v4215_v39  ;;  %837 = vmatprep.subr.bf16.mxu1 %v4220_v47  ;;  %v1237_v39 = vpack.c.bf16 %v4997_v26, %v4990_v23  ;;  %v4247_v47 = vld [vmem:[%s6158_s1 + $0x634] ss:$8 sps:$4 sm:$0xff]  }
  0x89   : > { %2066 = vmatprep.subr.bf16.mxu0 %v4223_v19  ;;  %v4242_v19 = vld [vmem:[%s6158_s1 + $0x230] ss:$8 sps:$4 sm:$0xff]  }
  0x8b   : > { %838 = vmatpush1.bf16.msra.mxu1 %v4218_v38  ;;  %v4245_v38 = vld [vmem:[%s6158_s1 + $0x630] ss:$8 sps:$4 sm:$0xff]  }
  0x8c   : > { %2067 = vmatpush1.bf16.msra.mxu0 %v4221_v40  ;;  %1146 = vmatprep.subr.bf16.mxu1 %v4226_v29  ;;  %v1831_v40 = vrot.slane %v5112_v53, 2  ;;  %v4251_v53 = vld [vmem:[%s6158_s1 + $0x640] ss:$8 sps:$4 sm:$0xff]   ;;  %v1839_v29 = vpack.c.bf16 %v5293_v2, %v5247_v14  ;;  %v4259_v14 = vld [vmem:[%s6158_s1 + $0x654] ss:$8 sps:$4 sm:$0xff]   ;;  %v5434_v2 = vpack.c.bf16 %v5091_v33, %v5039_v54 }
  0x8d   : > { %2320 = vmatprep.subr.bf16.mxu0 %v4229_v36  ;;  %v4262_v33 = vld [vmem:[%s6158_s1 + $0x264] ss:$8 sps:$4 sm:$0xff]  }
  0x8e   : > { %840 = vmatmul.mubr.bf16.vlgmr.msra.gmra.mrb[0].mxu1 %v236_v25  ;;  %v5418_v36 = vsel %vm880_vm1, %v1830_v48, %v1831_v40  ;;  %v1828_v25 = vrot.slane %v5137_v20, 2  ;;  %v4254_v20 = vld [vmem:[%s6158_s1 + $0x250] ss:$8 sps:$4 sm:$0xff]   ;;  %v4280_v48 = vld [vmem:[%s6158_s1 + $0x294] ss:$8 sps:$4 sm:$0xff]  }
  0x8f   : > { %2069 = vmatmul.mubr.bf16.vlgmr.msra.gmra.mrb[0].mxu0 %v1835_v35  ;;  %1147 = vmatpush1.bf16.msra.mxu1 %v4224_v41  ;;  %v4239_v35 = vld [vmem:[%s6158_s1 + $0x620] ss:$8 sps:$4 sm:$0xff]   ;;  %v4256_v41 = vld [vmem:[%s6158_s1 + $0x254] ss:$8 sps:$4 sm:$0xff]   ;;  %v4286_v40 = vld [vmem:[%s6158_s1 + $0x2a4] ss:$8 sps:$4 sm:$0xff]  }
  0x90   : > { %2321 = vmatpush1.bf16.msra.mxu0 %v4227_v46  ;;  %1148 = vmatprep.subr.bf16.mxu1 %v4232_v42  ;;  %v1827_v46 = vrot.slane %v5134_v18, 2  ;;  %v1240_v42 = vpack.c.bf16 %v5039_v54, %v5022_v43  ;;  %v1842_v18 = vpack.c.bf16 %v5418_v36, %v5296_v16  ;;  %v4265_v16 = vld [vmem:[%s6158_s1 + $0x664] ss:$8 sps:$4 sm:$0xff]   ;;  %v4433_v43 = vld [vmem:[%s6158_s1 + $0x854] ss:$8 sps:$4 sm:$0xff]  }
  0x91   : > { %2322 = vmatprep.subr.bf16.mxu0 %v4235_v44  ;;  %849 = vmatprep.mubr.bf16.mxu1 %v5343_v1  ;;  %v1239_v44 = vpack.c.bf16 %v5065_v8, %v5056_v4  ;;  %v4488_v54 = vld [vmem:[%s4767_s8 + $0xe8] sm:$0xff]  ;;  %v4489_v4 = vld [vmem:[%s4767_s8 + $0xe0] sm:$0xff] }
  0x92   : > { %2078 = vmatprep.mubr.bf16.mxu0 %v1838_v56  ;;  %v4257_v56 = vld [vmem:[%s6158_s1 + $0x650] ss:$8 sps:$4 sm:$0xff]  }
  0x93   : > { %1149 = vmatpush1.bf16.msra.mxu1 %v4230_v9  ;;  %v5449_v9 = vsel %vm880_vm1, %v1827_v46, %v1828_v25  ;;  %v4293_v46 = vld [vmem:[%s6158_s1 + $0x6b0] ss:$8 sps:$4 sm:$0xff]   ;;  %v4298_v25 = vld [vmem:[%s6158_s1 + $0x2c4] ss:$8 sps:$4 sm:$0xff]  }
  0x94   : > { %2323 = vmatpush1.bf16.msra.mxu0 %v4233_v13  ;;  %1150 = vmatprep.subr.bf16.mxu1 %v4238_v58  ;;  %v4260_v13 = vld [vmem:[%s6158_s1 + $0x260] ss:$8 sps:$4 sm:$0xff]  }
  0x95   : > { %2324 = vmatprep.subr.bf16.mxu0 %v4241_v21  ;;  %v4263_v58 = vld [vmem:[%s6158_s1 + $0x660] ss:$8 sps:$4 sm:$0xff]   ;;  %v5463_v21 = vpack.c.bf16 %v5125_v3, %v5065_v8  ;;  %v4266_v3 = vld [vmem:[%s6158_s1 + $0x270] ss:$8 sps:$4 sm:$0xff]  }
  0x96   : > { %850 = vmatmul.mubr.bf16.gmra.mrb[4].mxu1 %v5371_v60 }
  0x97   : > { %2079 = vmatmul.mubr.bf16.gmra.mrb[4].mxu0 %v1837_v6  ;;  %1151 = vmatpush1.bf16.msra.mxu1 %v4236_v34  ;;  %v1841_v34 = vpack.c.bf16 %v5449_v9, %v5299_v28  ;;  %v4271_v6 = vld [vmem:[%s6158_s1 + $0x674] ss:$8 sps:$4 sm:$0xff]   ;;  %v4269_v28 = vld [vmem:[%s6158_s1 + $0x670] ss:$8 sps:$4 sm:$0xff]  }
  0x98   : > { %2325 = vmatpush1.bf16.msra.mxu0 %v4239_v35  ;;  %1152 = vmatprep.subr.bf16.mxu1 %v4244_v10  ;;  %v4268_v35 = vld [vmem:[%s6158_s1 + $0x274] ss:$8 sps:$4 sm:$0xff]   ;;  %v946_v10 = vpack.c.bf16 %v5142_v22, %v4921_v57  ;;  %v4277_v57 = vld [vmem:[%s6158_s1 + $0x684] ss:$8 sps:$4 sm:$0xff]   ;;  %v4272_v22 = vld [vmem:[%s6158_s1 + $0x280] ss:$8 sps:$4 sm:$0xff]  }
  0x99   : > { %2326 = vmatprep.subr.bf16.mxu0 %v4247_v47  ;;  %859 = vmatprep.mubr.bf16.mxu1 %v5385_v17  ;;  %v4274_v47 = vld [vmem:[%s6158_s1 + $0x284] ss:$8 sps:$4 sm:$0xff]  }
  0x9a   : > { %2088 = vmatprep.mubr.bf16.mxu0 %v1840_v30  ;;  %v4275_v30 = vld [vmem:[%s6158_s1 + $0x680] ss:$8 sps:$4 sm:$0xff]  }
  0x9b   : > { %1153 = vmatpush1.bf16.msra.mxu1 %v4242_v19  ;;  %v4278_v19 = vld [vmem:[%s6158_s1 + $0x290] ss:$8 sps:$4 sm:$0xff]  }
  0x9c   : > { %2327 = vmatpush1.bf16.msra.mxu0 %v4245_v38  ;;  %1154 = vmatprep.subr.bf16.mxu1 %v4250_v15  ;;  %v4281_v38 = vld [vmem:[%s6158_s1 + $0x690] ss:$8 sps:$4 sm:$0xff]   ;;  %v4289_v15 = vld [vmem:[%s6158_s1 + $0x6a4] ss:$8 sps:$4 sm:$0xff]  }
  0x9d   : > { %2328 = vmatprep.subr.bf16.mxu0 %v4253_v52  ;;  %v4284_v52 = vld [vmem:[%s6158_s1 + $0x2a0] ss:$8 sps:$4 sm:$0xff]  }
  0x9e   : > { %860 = vmatmul.mubr.bf16.gmra.mrb[8].mxu1 %v5413_v12 }
  0x9f   : > { %2089 = vmatmul.mubr.bf16.gmra.mrb[8].mxu0 %v1839_v29  ;;  %1155 = vmatpush1.bf16.msra.mxu1 %v4248_v50  ;;  %v4287_v50 = vld [vmem:[%s6158_s1 + $0x6a0] ss:$8 sps:$4 sm:$0xff]   ;;  %v4295_v29 = vld [vmem:[%s6158_s1 + $0x6b4] ss:$8 sps:$4 sm:$0xff]  }
  0xa0   : > { %2329 = vmatpush1.bf16.msra.mxu0 %v4251_v53  ;;  %1156 = vmatprep.subr.bf16.mxu1 %v4256_v41  ;;  %v4292_v53 = vld [vmem:[%s6158_s1 + $0x2b4] ss:$8 sps:$4 sm:$0xff]   ;;  %v4290_v41 = vld [vmem:[%s6158_s1 + $0x2b0] ss:$8 sps:$4 sm:$0xff]  }
  0xa1   : > { %2330 = vmatprep.subr.bf16.mxu0 %v4259_v14  ;;  %869 = vmatprep.mubr.bf16.mxu1 %v5434_v2  ;;  %v4301_v14 = vld [vmem:[%s6158_s1 + $0x6c4] ss:$8 sps:$4 sm:$0xff]  }
  0xa2   : > { %2098 = vmatprep.mubr.bf16.mxu0 %v1842_v18  ;;  %v4296_v18 = vld [vmem:[%s6158_s1 + $0x2c0] ss:$8 sps:$4 sm:$0xff]  }
  0xa3   : > { %1157 = vmatpush1.bf16.msra.mxu1 %v4254_v20  ;;  %v4299_v20 = vld [vmem:[%s6158_s1 + $0x6c0] ss:$8 sps:$4 sm:$0xff]  }
  0xa4   : > { %2331 = vmatpush1.bf16.msra.mxu0 %v4257_v56  ;;  %1158 = vmatprep.subr.bf16.mxu1 %v4262_v33  ;;  %v4304_v56 = vld [vmem:[%s6158_s1 + $0x2d4] ss:$8 sps:$4 sm:$0xff]  }
  0xa5   : > { %2332 = vmatprep.subr.bf16.mxu0 %v4265_v16  ;;  %v4307_v33 = vld [vmem:[%s6158_s1 + $0x6d4] ss:$8 sps:$4 sm:$0xff]   ;;  %v4302_v16 = vld [vmem:[%s6158_s1 + $0x2d0] ss:$8 sps:$4 sm:$0xff]  }
  0xa6   : > { %870 = vmatmul.mubr.bf16.gmra.mrb[12].mxu1 %v5463_v21 }
  0xa7   : > { %2099 = vmatmul.mubr.bf16.gmra.mrb[12].mxu0 %v1841_v34  ;;  %1159 = vmatpush1.bf16.msra.mxu1 %v4260_v13  ;;  %v4305_v13 = vld [vmem:[%s6158_s1 + $0x6d0] ss:$8 sps:$4 sm:$0xff]   ;;  %v4313_v34 = vld [vmem:[%s6158_s1 + $0x6e4] ss:$8 sps:$4 sm:$0xff]  }
  0xa8   : > { %2333 = vmatpush1.bf16.msra.mxu0 %v4263_v58  ;;  %1160 = vmatprep.subr.bf16.mxu1 %v4268_v35  ;;  %v4310_v58 = vld [vmem:[%s6158_s1 + $0x2e4] ss:$8 sps:$4 sm:$0xff]   ;;  %v4308_v35 = vld [vmem:[%s6158_s1 + $0x2e0] ss:$8 sps:$4 sm:$0xff]  }
  0xa9   : > { %2334 = vmatprep.subr.bf16.mxu0 %v4271_v6  ;;  %1178 = vmatprep.mubr.bf16.mxu1 %v946_v10  ;;  %v4311_v6 = vld [vmem:[%s6158_s1 + $0x6e0] ss:$8 sps:$4 sm:$0xff]   ;;  %v4316_v10 = vld [vmem:[%s6158_s1 + $0x2f4] ss:$8 sps:$4 sm:$0xff]  }
  0xaa   : > { %2352 = vmatprep.mubr.bf16.mxu0 %v5343_v1  ;;  %v4283_v1 = vld [vmem:[%s6158_s1 + $0x694] ss:$8 sps:$4 sm:$0xff]  }
  0xab   : > { %1161 = vmatpush1.bf16.msra.mxu1 %v4266_v3  ;;  %v4319_v3 = vld [vmem:[%s6158_s1 + $0x6f4] ss:$8 sps:$4 sm:$0xff]  }
  0xac   : > { %2335 = vmatpush1.bf16.msra.mxu0 %v4269_v28  ;;  %1162 = vmatprep.subr.bf16.mxu1 %v4274_v47  ;;  %v4314_v28 = vld [vmem:[%s6158_s1 + $0x2f0] ss:$8 sps:$4 sm:$0xff]  }
  0xad   : > { %2336 = vmatprep.subr.bf16.mxu0 %v4277_v57  ;;  %v4317_v47 = vld [vmem:[%s6158_s1 + $0x6f0] ss:$8 sps:$4 sm:$0xff]   ;;  %v4322_v57 = vld [vmem:[%s6158_s1 + $0x304] ss:$8 sps:$4 sm:$0xff]  }
  0xaf   : > { %1163 = vmatpush1.bf16.msra.mxu1 %v4272_v22  ;;  %v4325_v22 = vld [vmem:[%s6158_s1 + $0x704] ss:$8 sps:$4 sm:$0xff]  }
  0xb0   : > { %2337 = vmatpush1.bf16.msra.mxu0 %v4275_v30  ;;  %1164 = vmatprep.subr.bf16.mxu1 %v4280_v48  ;;  %v4320_v30 = vld [vmem:[%s6158_s1 + $0x300] ss:$8 sps:$4 sm:$0xff]  }
  0xb1   : > { %2338 = vmatprep.subr.bf16.mxu0 %v4283_v1  ;;  %v4323_v48 = vld [vmem:[%s6158_s1 + $0x700] ss:$8 sps:$4 sm:$0xff]   ;;  %v4328_v1 = vld [vmem:[%s6158_s1 + $0x314] ss:$8 sps:$4 sm:$0xff]  }
  0xb3   : > { %1165 = vmatpush1.bf16.msra.mxu1 %v4278_v19  ;;  %v4331_v19 = vld [vmem:[%s6158_s1 + $0x714] ss:$8 sps:$4 sm:$0xff]  }
  0xb4   : > { %2339 = vmatpush1.bf16.msra.mxu0 %v4281_v38  ;;  %1166 = vmatprep.subr.bf16.mxu1 %v4286_v40  ;;  %v4326_v38 = vld [vmem:[%s6158_s1 + $0x310] ss:$8 sps:$4 sm:$0xff]  }
  0xb5   : > { %2340 = vmatprep.subr.bf16.mxu0 %v4289_v15  ;;  %v4329_v40 = vld [vmem:[%s6158_s1 + $0x710] ss:$8 sps:$4 sm:$0xff]   ;;  %v4334_v15 = vld [vmem:[%s6158_s1 + $0x324] ss:$8 sps:$4 sm:$0xff]  }
  0xb7   : > { %1167 = vmatpush1.bf16.msra.mxu1 %v4284_v52  ;;  %v4338_v52 = vld [vmem:[%s6158_s1 + $0x330] ss:$8 sps:$4 sm:$0xff]  }
  0xb8   : > { %2341 = vmatpush1.bf16.msra.mxu0 %v4287_v50  ;;  %1168 = vmatprep.subr.bf16.mxu1 %v4292_v53  ;;  %v4341_v50 = vld [vmem:[%s6158_s1 + $0x730] ss:$8 sps:$4 sm:$0xff]   ;;  %v4346_v53 = vld [vmem:[%s6158_s1 + $0x344] ss:$8 sps:$4 sm:$0xff]  }
  0xb9   : > { %2342 = vmatprep.subr.bf16.mxu0 %v4295_v29  ;;  %v4349_v29 = vld [vmem:[%s6158_s1 + $0x744] ss:$8 sps:$4 sm:$0xff]  }
  0xbb   : > { %1169 = vmatpush1.bf16.msra.mxu1 %v4290_v41  ;;  %v5644_v41 = vld [vmem:[%s4767_s8 + $0x128] sm:$0xff] }
  0xbc   : > { %2343 = vmatpush1.bf16.msra.mxu0 %v4293_v46  ;;  %1170 = vmatprep.subr.bf16.mxu1 %v4298_v25  ;;  %v4347_v46 = vld [vmem:[%s6158_s1 + $0x740] ss:$8 sps:$4 sm:$0xff]   ;;  %v4352_v25 = vld [vmem:[%s6158_s1 + $0x354] ss:$8 sps:$4 sm:$0xff]  }
  0xbd   : > { %2344 = vmatprep.subr.bf16.mxu0 %v4301_v14  ;;  %v5659_v14 = vld [vmem:[%s4767_s8 + $0x108] sm:$0xff] }
  0xbf   : > { %1171 = vmatpush1.bf16.msra.mxu1 %v4296_v18  ;;  %v2126_v18 = vpack.c.bf16 %v5644_v41, %v5659_v14 }
  0xc0   : > { %2345 = vmatpush1.bf16.msra.mxu0 %v4299_v20  ;;  %1172 = vmatprep.subr.bf16.mxu1 %v4304_v56  ;;  %v4350_v20 = vld [vmem:[%s6158_s1 + $0x350] ss:$8 sps:$4 sm:$0xff]  }
  0xc1   : > { %2346 = vmatprep.subr.bf16.mxu0 %v4307_v33  ;;  %v4353_v56 = vld [vmem:[%s6158_s1 + $0x750] ss:$8 sps:$4 sm:$0xff]   ;;  %v5672_v33 = vld [vmem:[%s4767_s8 + $0x120] sm:$0xff] }
  0xc2   : > { %v2413_v26 = vrot.slane %v5672_v33, 1 }
  0xc3   : > { %1173 = vmatpush1.bf16.msra.mxu1 %v4302_v16  ;;  %v4361_v16 = vld [vmem:[%s6158_s1 + $0x764] ss:$8 sps:$4 sm:$0xff]  }
  0xc4   : > { %2347 = vmatpush1.bf16.msra.mxu0 %v4305_v13  ;;  %1174 = vmatprep.subr.bf16.mxu1 %v4310_v58  ;;  %v5682_v13 = vld [vmem:[%s4767_s8 + $0x100] sm:$0xff] }
  0xc5   : > { %2348 = vmatprep.subr.bf16.mxu0 %v4313_v34  ;;  %v2125_v58 = vpack.c.bf16 %v5672_v33, %v5682_v13  ;;  %v4356_v34 = vld [vmem:[%s6158_s1 + $0x360] ss:$8 sps:$4 sm:$0xff]   ;;  %v1241_v8 = vpack.c.bf16 %v5682_v13, %v4489_v4  ;;  %v4442_v13 = vld [vmem:[%s6158_s1 + $0x884] ss:$8 sps:$4 sm:$0xff]  }
  0xc7   : > { %1175 = vmatpush1.bf16.msra.mxu1 %v4308_v35  ;;  %v4359_v35 = vld [vmem:[%s6158_s1 + $0x760] ss:$8 sps:$4 sm:$0xff]  }
  0xc8   : > { %2349 = vmatpush1.bf16.msra.mxu0 %v4311_v6  ;;  %1176 = vmatprep.subr.bf16.mxu1 %v4316_v10  ;;  %v4364_v6 = vld [vmem:[%s6158_s1 + $0x374] ss:$8 sps:$4 sm:$0xff]  }
  0xc9   : > { %2350 = vmatprep.subr.bf16.mxu0 %v4319_v3  ;;  %v4367_v10 = vld [vmem:[%s6158_s1 + $0x774] ss:$8 sps:$4 sm:$0xff]   ;;  %v4482_v3 = vld [vmem:[%s4767_s8 + $0x28] sm:$0xff] }
  0xcb   : > { %1177 = vmatpush1.bf16.msra.mxu1 %v4314_v28  ;;  %v4483_v28 = vld [vmem:[%s4767_s8 + $0x48] sm:$0xff] }
  0xcc   : > { %2351 = vmatpush1.bf16.msra.mxu0 %v4317_v47  ;;  %1436 = vmatprep.subr.bf16.mxu1 %v4322_v57  ;;  %v1236_v47 = vpack.c.bf16 %v4483_v28, %v4482_v3  ;;  %v4362_v57 = vld [vmem:[%s6158_s1 + $0x370] ss:$8 sps:$4 sm:$0xff]   ;;  %v4418_v28 = vld [vmem:[%s6158_s1 + $0x804] ss:$8 sps:$4 sm:$0xff]  }
  0xcd   : > { %2616 = vmatprep.subr.bf16.mxu0 %v4325_v22  ;;  %v4365_v22 = vld [vmem:[%s6158_s1 + $0x770] ss:$8 sps:$4 sm:$0xff]  }
  0xce   : > { %1179 = vmatmul.mubr.bf16.vlgmr.msra.gmra.mrb[0].mxu1 %v945_v0  ;;  %v4335_v0 = vld [vmem:[%s6158_s1 + $0x720] ss:$8 sps:$4 sm:$0xff]   ;;  %v4413_v3 = vld [vmem:[%s6158_s1 + $0x7f0] ss:$8 sps:$4 sm:$0xff]  }
  0xcf   : > { %2353 = vmatmul.mubr.bf16.vlgmr.msra.gmra.mrb[0].mxu0 %v5371_v60  ;;  %1437 = vmatpush1.bf16.msra.mxu1 %v4320_v30  ;;  %v4340_v60 = vld [vmem:[%s6158_s1 + $0x334] ss:$8 sps:$4 sm:$0xff]   ;;  %v4370_v30 = vld [vmem:[%s6158_s1 + $0x384] ss:$8 sps:$4 sm:$0xff]  }
  0xd0   : > { %2617 = vmatpush1.bf16.msra.mxu0 %v4323_v48  ;;  %1438 = vmatprep.subr.bf16.mxu1 %v4328_v1  ;;  %v4373_v48 = vld [vmem:[%s6158_s1 + $0x784] ss:$8 sps:$4 sm:$0xff]   ;;  %v4368_v1 = vld [vmem:[%s6158_s1 + $0x380] ss:$8 sps:$4 sm:$0xff]  }
  0xd1   : > { %2618 = vmatprep.subr.bf16.mxu0 %v4331_v19  ;;  %1188 = vmatprep.mubr.bf16.mxu1 %v5206_v51  ;;  %v4371_v19 = vld [vmem:[%s6158_s1 + $0x780] ss:$8 sps:$4 sm:$0xff]  }
  0xd2   : > { %2362 = vmatprep.mubr.bf16.mxu0 %v5385_v17  ;;  %v4343_v17 = vld [vmem:[%s6158_s1 + $0x734] ss:$8 sps:$4 sm:$0xff]  }
  0xd3   : > { %1439 = vmatpush1.bf16.msra.mxu1 %v4326_v38  ;;  %v4376_v38 = vld [vmem:[%s6158_s1 + $0x394] ss:$8 sps:$4 sm:$0xff]  }
  0xd4   : > { %2619 = vmatpush1.bf16.msra.mxu0 %v4329_v40  ;;  %1440 = vmatprep.subr.bf16.mxu1 %v4334_v15  ;;  %v4374_v40 = vld [vmem:[%s6158_s1 + $0x390] ss:$8 sps:$4 sm:$0xff]  }
  0xd5   : > { %2620 = vmatprep.subr.bf16.mxu0 %v4337_v31  ;;  %v4377_v15 = vld [vmem:[%s6158_s1 + $0x790] ss:$8 sps:$4 sm:$0xff]   ;;  %v4382_v31 = vld [vmem:[%s6158_s1 + $0x3a4] ss:$8 sps:$4 sm:$0xff]  }
  0xd6   : > { %1189 = vmatmul.mubr.bf16.gmra.mrb[4].mxu1 %v5210_v55 }
  0xd7   : > { %2363 = vmatmul.mubr.bf16.gmra.mrb[4].mxu0 %v5413_v12  ;;  %1441 = vmatpush1.bf16.msra.mxu1 %v4332_v62  ;;  %v4344_v12 = vld [vmem:[%s6158_s1 + $0x340] ss:$8 sps:$4 sm:$0xff]   ;;  %v4385_v62 = vld [vmem:[%s6158_s1 + $0x7a4] ss:$8 sps:$4 sm:$0xff]  }
  0xd8   : > { %2621 = vmatpush1.bf16.msra.mxu0 %v4335_v0  ;;  %1442 = vmatprep.subr.bf16.mxu1 %v4340_v60  ;;  %v4380_v0 = vld [vmem:[%s6158_s1 + $0x3a0] ss:$8 sps:$4 sm:$0xff]  }
  0xd9   : > { %2622 = vmatprep.subr.bf16.mxu0 %v4343_v17  ;;  %1198 = vmatprep.mubr.bf16.mxu1 %v5254_v27  ;;  %v4383_v60 = vld [vmem:[%s6158_s1 + $0x7a0] ss:$8 sps:$4 sm:$0xff]   ;;  %v4388_v17 = vld [vmem:[%s6158_s1 + $0x3b4] ss:$8 sps:$4 sm:$0xff]  }
  0xda   : > { %2372 = vmatprep.mubr.bf16.mxu0 %v5434_v2  ;;  %v4355_v2 = vld [vmem:[%s6158_s1 + $0x754] ss:$8 sps:$4 sm:$0xff]  }
  0xdb   : > { %1443 = vmatpush1.bf16.msra.mxu1 %v4338_v52  ;;  %v4391_v52 = vld [vmem:[%s6158_s1 + $0x7b4] ss:$8 sps:$4 sm:$0xff]  }
  0xdc   : > { %2623 = vmatpush1.bf16.msra.mxu0 %v4341_v50  ;;  %1444 = vmatprep.subr.bf16.mxu1 %v4346_v53  ;;  %v4386_v50 = vld [vmem:[%s6158_s1 + $0x3b0] ss:$8 sps:$4 sm:$0xff]  }
  0xdd   : > { %2624 = vmatprep.subr.bf16.mxu0 %v4349_v29  ;;  %v4389_v53 = vld [vmem:[%s6158_s1 + $0x7b0] ss:$8 sps:$4 sm:$0xff]   ;;  %v4394_v29 = vld [vmem:[%s6158_s1 + $0x3c4] ss:$8 sps:$4 sm:$0xff]  }
  0xde   : > { %1199 = vmatmul.mubr.bf16.gmra.mrb[8].mxu1 %v5258_v59 }
  0xdf   : > { %2373 = vmatmul.mubr.bf16.gmra.mrb[8].mxu0 %v5463_v21  ;;  %1445 = vmatpush1.bf16.msra.mxu1 %v4344_v12  ;;  %v4358_v21 = vld [vmem:[%s6158_s1 + $0x364] ss:$8 sps:$4 sm:$0xff]  }
  0xe0   : > { %2625 = vmatpush1.bf16.msra.mxu0 %v4347_v46  ;;  %1446 = vmatprep.subr.bf16.mxu1 %v4352_v25  ;;  %v4397_v12 = vld [vmem:[%s6158_s1 + $0x7c4] ss:$8 sps:$4 sm:$0xff]   ;;  %v4392_v46 = vld [vmem:[%s6158_s1 + $0x3c0] ss:$8 sps:$4 sm:$0xff]  }
  0xe1   : > { %2626 = vmatprep.subr.bf16.mxu0 %v4355_v2  ;;  %1208 = vmatprep.mubr.bf16.mxu1 %v5306_v32  ;;  %v4395_v25 = vld [vmem:[%s6158_s1 + $0x7c0] ss:$8 sps:$4 sm:$0xff]   ;;  %v4400_v2 = vld [vmem:[%s6158_s1 + $0x3d4] ss:$8 sps:$4 sm:$0xff]  }
  0xe2   : > { %2382 = vmatprep.mubr.bf16.mxu0 %v2126_v18  ;;  %v4403_v18 = vld [vmem:[%s6158_s1 + $0x7d4] ss:$8 sps:$4 sm:$0xff]  }
  0xe3   : > { %1447 = vmatpush1.bf16.msra.mxu1 %v4350_v20  ;;  %v4398_v20 = vld [vmem:[%s6158_s1 + $0x3d0] ss:$8 sps:$4 sm:$0xff]  }
  0xe4   : > { %2627 = vmatpush1.bf16.msra.mxu0 %v4353_v56  ;;  %1448 = vmatprep.subr.bf16.mxu1 %v4358_v21  ;;  %v4401_v56 = vld [vmem:[%s6158_s1 + $0x7d0] ss:$8 sps:$4 sm:$0xff]   ;;  %v4406_v21 = vld [vmem:[%s6158_s1 + $0x3e4] ss:$8 sps:$4 sm:$0xff]  }
  0xe5   : > { %2628 = vmatprep.subr.bf16.mxu0 %v4361_v16  ;;  %v4409_v16 = vld [vmem:[%s6158_s1 + $0x7e4] ss:$8 sps:$4 sm:$0xff]  }
  0xe6   : > { %1209 = vmatmul.mubr.bf16.gmra.mrb[12].mxu1 %v5310_v24 }
  0xe7   : > { %2383 = vmatmul.mubr.bf16.gmra.mrb[12].mxu0 %v2125_v58  ;;  %1449 = vmatpush1.bf16.msra.mxu1 %v4356_v34  ;;  %v4404_v58 = vld [vmem:[%s6158_s1 + $0x3e0] ss:$8 sps:$4 sm:$0xff]  }
  0xe8   : > { %2629 = vmatpush1.bf16.msra.mxu0 %v4359_v35  ;;  %1450 = vmatprep.subr.bf16.mxu1 %v4364_v6  ;;  %v4407_v34 = vld [vmem:[%s6158_s1 + $0x7e0] ss:$8 sps:$4 sm:$0xff]   ;;  %v4412_v35 = vld [vmem:[%s6158_s1 + $0x3f4] ss:$8 sps:$4 sm:$0xff]  }
  0xe9   : > { %2630 = vmatprep.subr.bf16.mxu0 %v4367_v10  ;;  %1468 = vmatprep.mubr.bf16.mxu1 %v1236_v47  ;;  %v4415_v6 = vld [vmem:[%s6158_s1 + $0x7f4] ss:$8 sps:$4 sm:$0xff]   ;;  %v4410_v10 = vld [vmem:[%s6158_s1 + $0x3f0] ss:$8 sps:$4 sm:$0xff]   ;;  %v4484_v47 = vld [vmem:[%s4767_s8 + $0x20] sm:$0xff] }
  0xea   : > { %2648 = vmatprep.mubr.bf16.mxu0 %v4934_v63  ;;  %v4379_v63 = vld [vmem:[%s6158_s1 + $0x794] ss:$8 sps:$4 sm:$0xff]  }
  0xeb   : > { %1451 = vmatpush1.bf16.msra.mxu1 %v4362_v57  ;;  %v4485_v57 = vld [vmem:[%s4767_s8 + $0x40] sm:$0xff] }
  0xec   : > { %2631 = vmatpush1.bf16.msra.mxu0 %v4365_v22  ;;  %1452 = vmatprep.subr.bf16.mxu1 %v4370_v30  ;;  %v1235_v22 = vpack.c.bf16 %v4485_v57, %v4484_v47  ;;  %v4416_v30 = vld [vmem:[%s6158_s1 + $0x800] ss:$8 sps:$4 sm:$0xff]  }
  0xed   : > { %2632 = vmatprep.subr.bf16.mxu0 %v4373_v48  ;;  %v4421_v48 = vld [vmem:[%s6158_s1 + $0x814] ss:$8 sps:$4 sm:$0xff]  }
  0xef   : > { %1453 = vmatpush1.bf16.msra.mxu1 %v4368_v1  ;;  %v4486_v1 = vld [vmem:[%s4767_s8 + $0x68] sm:$0xff] }
  0xf0   : > { %2633 = vmatpush1.bf16.msra.mxu0 %v4371_v19  ;;  %1454 = vmatprep.subr.bf16.mxu1 %v4376_v38  ;;  %v4487_v19 = vld [vmem:[%s4767_s8 + $0x88] sm:$0xff] }
  0xf1   : > { %2634 = vmatprep.subr.bf16.mxu0 %v4379_v63  ;;  %v1238_v38 = vpack.c.bf16 %v4487_v19, %v4486_v1  ;;  %v4419_v63 = vld [vmem:[%s6158_s1 + $0x810] ss:$8 sps:$4 sm:$0xff]  }
  0xf3   : > { %1455 = vmatpush1.bf16.msra.mxu1 %v4374_v40  ;;  %v4424_v40 = vld [vmem:[%s6158_s1 + $0x824] ss:$8 sps:$4 sm:$0xff]  }
  0xf4   : > { %2635 = vmatpush1.bf16.msra.mxu0 %v4377_v15  ;;  %1456 = vmatprep.subr.bf16.mxu1 %v4382_v31  ;;  %v5829_v15 = vld [vmem:[%s4767_s8 + $0x138] sm:$0x3]  ;;  %v4427_v31 = vld [vmem:[%s6158_s1 + $0x834] ss:$8 sps:$4 sm:$0xff]  }
  0xf5   : > { %2636 = vmatprep.subr.bf16.mxu0 %v4385_v62  ;;  %v2416_v62 = vrot.slane %v5644_v41, 1 }
  0xf7   : > { %1457 = vmatpush1.bf16.msra.mxu1 %v4380_v0  ;;  %v4425_v0 = vld [vmem:[%s6158_s1 + $0x830] ss:$8 sps:$4 sm:$0xff]  }
  0xf8   : > { %2637 = vmatpush1.bf16.msra.mxu0 %v4383_v60  ;;  %1458 = vmatprep.subr.bf16.mxu1 %v4388_v17  ;;  %v4430_v60 = vld [vmem:[%s6158_s1 + $0x844] ss:$8 sps:$4 sm:$0xff]   ;;  %v5847_v17 = vld [vmem:[%s4767_s8 + $0x130] sm:$0x3] }
  0xf9   : > { %2638 = vmatprep.subr.bf16.mxu0 %v4391_v52  ;;  %v4431_v52 = vld [vmem:[%s6158_s1 + $0x850] ss:$8 sps:$4 sm:$0xff]  }
  0xfb   : > { %1459 = vmatpush1.bf16.msra.mxu1 %v4386_v50 }
  0xfc   : > { %2639 = vmatpush1.bf16.msra.mxu0 %v4389_v53  ;;  %1460 = vmatprep.subr.bf16.mxu1 %v4394_v29  ;;  %v4440_v53 = vld [vmem:[%s6158_s1 + $0x880] ss:$8 sps:$4 sm:$0xff]   ;;  %v4445_v29 = vld [vmem:[%s6158_s1 + $0x894] ss:$8 sps:$4 sm:$0xff]  }
  0xfd   : > { %2640 = vmatprep.subr.bf16.mxu0 %v4397_v12  ;;  %v4446_v12 = vld [vmem:[%s6158_s1 + $0x8a0] ss:$8 sps:$4 sm:$0xff]  }
  0xff   : > { %1461 = vmatpush1.bf16.msra.mxu1 %v4392_v46  ;;  %v4451_v46 = vld [vmem:[%s6158_s1 + $0x8b4] ss:$8 sps:$4 sm:$0xff]  }
 0x100   : > { %2641 = vmatpush1.bf16.msra.mxu0 %v4395_v25  ;;  %1462 = vmatprep.subr.bf16.mxu1 %v4400_v2  ;;  %v4449_v25 = vld [vmem:[%s6158_s1 + $0x8b0] ss:$8 sps:$4 sm:$0xff]   ;;  %v4454_v2 = vld [vmem:[%s6158_s1 + $0x8c4] ss:$8 sps:$4 sm:$0xff]  }
 0x101   : > { %2642 = vmatprep.subr.bf16.mxu0 %v4403_v18  ;;  %v4452_v18 = vld [vmem:[%s6158_s1 + $0x8c0] ss:$8 sps:$4 sm:$0xff]  }
 0x103   : > { %1463 = vmatpush1.bf16.msra.mxu1 %v4398_v20  ;;  %v4457_v20 = vld [vmem:[%s6158_s1 + $0x8d4] ss:$8 sps:$4 sm:$0xff]  }
 0x104   : > { %2643 = vmatpush1.bf16.msra.mxu0 %v4401_v56  ;;  %1464 = vmatprep.subr.bf16.mxu1 %v4406_v21  ;;  %v4455_v56 = vld [vmem:[%s6158_s1 + $0x8d0] ss:$8 sps:$4 sm:$0xff]   ;;  %v4460_v21 = vld [vmem:[%s6158_s1 + $0x8e4] ss:$8 sps:$4 sm:$0xff]  }
 0x105   : > { %2644 = vmatprep.subr.bf16.mxu0 %v4409_v16  ;;  %v4458_v16 = vld [vmem:[%s6158_s1 + $0x8e0] ss:$8 sps:$4 sm:$0xff]  }
 0x107   : > { %1465 = vmatpush1.bf16.msra.mxu1 %v4404_v58  ;;  %v2708_v58 = vrot.slane %v5644_v41, 2  ;;  %v2705_v41 = vrot.slane %v5672_v33, 2 }
 0x108   : > { %2645 = vmatpush1.bf16.msra.mxu0 %v4407_v34  ;;  %1466 = vmatprep.subr.bf16.mxu1 %v4412_v35  ;;  %v4463_v34 = vld [vmem:[%s6158_s1 + $0x8f4] ss:$8 sps:$4 sm:$0xff]   ;;  %v2709_v35 = vrot.slane %v5829_v15, 2 }
 0x109   : > { %2646 = vmatprep.subr.bf16.mxu0 %v4415_v6  ;;  %v4461_v6 = vld [vmem:[%s6158_s1 + $0x8f0] ss:$8 sps:$4 sm:$0xff]  }
 0x10b   : > { %1467 = vmatpush1.bf16.msra.mxu1 %v4410_v10  ;;  %v2710_v10 = vsel %vm880_vm1, %v2708_v58, %v2709_v35 }
 0x10c   : > { %2647 = vmatpush1.bf16.msra.mxu0 %v4413_v3  ;;  %3830 = vmatprep.subr.bf16.mxu1 %v4418_v28  ;;  %v2714_v3 = vpack.c.bf16 %v2710_v10, %v5418_v36 }
 0x10d   : > { %2908 = vmatprep.subr.bf16.mxu0 %v4418_v28  ;;  %v2706_v28 = vrot.slane %v5847_v17, 2 }
 0x10e   : > { %1469 = vmatmul.mubr.bf16.vlgmr.msra.gmra.mrb[0].mxu1 %v1235_v22 }
 0x10f   : > { %2649 = vmatmul.mubr.bf16.vlgmr.msra.gmra.mrb[0].mxu0 %v5025_v45  ;;  %3846 = vmatpush1.bf16.msra.mxu1 %v4416_v30  ;;  %v4422_v45 = vld [vmem:[%s6158_s1 + $0x820] ss:$8 sps:$4 sm:$0xff]   ;;  %v2707_v47 = vsel %vm880_vm1, %v2705_v41, %v2706_v28 }
 0x110   : > { %2909 = vmatpush1.bf16.msra.mxu0 %v4416_v30  ;;  %3831 = vmatprep.subr.bf16.mxu1 %v4421_v48  ;;  %v2713_v57 = vpack.c.bf16 %v2707_v47, %v5449_v9 }
 0x111   : > { %2910 = vmatprep.subr.bf16.mxu0 %v4421_v48  ;;  %1478 = vmatprep.mubr.bf16.mxu1 %v1238_v38 }
 0x112   : > { %2658 = vmatprep.mubr.bf16.mxu0 %v5058_v5  ;;  %v2417_v5 = vrot.slane %v5829_v15, 1 }
 0x113   : > { %3847 = vmatpush1.bf16.msra.mxu1 %v4419_v63 }
 0x114   : > { %2911 = vmatpush1.bf16.msra.mxu0 %v4419_v63  ;;  %3832 = vmatprep.subr.bf16.mxu1 %v4424_v40  ;;  %v2418_v23 = vsel %vm308_vm0, %v2416_v62, %v2417_v5 }
 0x115   : > { %2912 = vmatprep.subr.bf16.mxu0 %v4424_v40 }
 0x116   : > { %1479 = vmatmul.mubr.bf16.gmra.mrb[4].mxu1 %v1237_v39  ;;  %v2414_v39 = vrot.slane %v5847_v17, 1 }
 0x117   : > { %2659 = vmatmul.mubr.bf16.gmra.mrb[4].mxu0 %v5094_v37  ;;  %3848 = vmatpush1.bf16.msra.mxu1 %v4422_v45  ;;  %v4428_v37 = vld [vmem:[%s6158_s1 + $0x840] ss:$8 sps:$4 sm:$0xff]  }
 0x118   : > { %2913 = vmatpush1.bf16.msra.mxu0 %v4422_v45  ;;  %3833 = vmatprep.subr.bf16.mxu1 %v4427_v31  ;;  %v2415_v50 = vsel %vm308_vm0, %v2413_v26, %v2414_v39 }
 0x119   : > { %2914 = vmatprep.subr.bf16.mxu0 %v4427_v31  ;;  %1488 = vmatprep.mubr.bf16.mxu1 %v1240_v42  ;;  %v2422_v42 = vpack.c.bf16 %v2418_v23, %v5146_v11  ;;  %v4436_v11 = vld [vmem:[%s6158_s1 + $0x864] ss:$8 sps:$4 sm:$0xff]  }
 0x11a   : > { %2668 = vmatprep.mubr.bf16.mxu0 %v5127_v7  ;;  %v1242_v7 = vpack.c.bf16 %v5659_v14, %v4488_v54  ;;  %v4439_v14 = vld [vmem:[%s6158_s1 + $0x874] ss:$8 sps:$4 sm:$0xff]  }
 0x11b   : > { %3849 = vmatpush1.bf16.msra.mxu1 %v4425_v0 }
 0x11c   : > { %2915 = vmatpush1.bf16.msra.mxu0 %v4425_v0  ;;  %3834 = vmatprep.subr.bf16.mxu1 %v4430_v60 }
 0x11d   : > { %2916 = vmatprep.subr.bf16.mxu0 %v4430_v60 }
 0x11e   : > { %1489 = vmatmul.mubr.bf16.gmra.mrb[8].mxu1 %v1239_v44  ;;  %v4434_v44 = vld [vmem:[%s6158_s1 + $0x860] ss:$8 sps:$4 sm:$0xff]  }
 0x11f   : > { %2669 = vmatmul.mubr.bf16.gmra.mrb[8].mxu0 %v5172_v49  ;;  %3850 = vmatpush1.bf16.msra.mxu1 %v4428_v37  ;;  %v2421_v49 = vpack.c.bf16 %v2415_v50, %v5161_v61  ;;  %v4437_v61 = vld [vmem:[%s6158_s1 + $0x870] ss:$8 sps:$4 sm:$0xff]  }
 0x120   : > { %2917 = vmatpush1.bf16.msra.mxu0 %v4428_v37  ;;  %3835 = vmatprep.subr.bf16.mxu1 %v4433_v43 }
 0x121   : > { %2918 = vmatprep.subr.bf16.mxu0 %v4433_v43  ;;  %1498 = vmatprep.mubr.bf16.mxu1 %v1242_v7 }
 0x122   : > { %2678 = vmatprep.mubr.bf16.mxu0 %v2422_v42 }
 0x123   : > { %3851 = vmatpush1.bf16.msra.mxu1 %v4431_v52 }
 0x124   : > { %2919 = vmatpush1.bf16.msra.mxu0 %v4431_v52  ;;  %3836 = vmatprep.subr.bf16.mxu1 %v4436_v11 }
 0x125   : > { %2920 = vmatprep.subr.bf16.mxu0 %v4436_v11 }
 0x126   : > { %1499 = vmatmul.mubr.bf16.gmra.mrb[12].mxu1 %v1241_v8 }
 0x127   : > { %2679 = vmatmul.mubr.bf16.gmra.mrb[12].mxu0 %v2421_v49  ;;  %3852 = vmatpush1.bf16.msra.mxu1 %v4434_v44 }
 0x128   : > { %2921 = vmatpush1.bf16.msra.mxu0 %v4434_v44  ;;  %3837 = vmatprep.subr.bf16.mxu1 %v4439_v14 }
 0x129   : > { %2922 = vmatprep.subr.bf16.mxu0 %v4439_v14  ;;  %2940 = vmatprep.mubr.bf16.mxu0 %v5206_v51  ;;  %v4443_v51 = vld [vmem:[%s6158_s1 + $0x890] ss:$8 sps:$4 sm:$0xff]  }
 0x12a   : > { %2960 = vmatprep.mubr.bf16.mxu1 %v5306_v32  ;;  %v4448_v32 = vld [vmem:[%s6158_s1 + $0x8a4] ss:$8 sps:$4 sm:$0xff]  }
 0x12b   : > { %3853 = vmatpush1.bf16.msra.mxu1 %v4437_v61 }
 0x12c   : > { %2923 = vmatpush1.bf16.msra.mxu0 %v4437_v61  ;;  %3838 = vmatprep.subr.bf16.mxu1 %v4442_v13 }
 0x12d   : > { %2924 = vmatprep.subr.bf16.mxu0 %v4442_v13 }
 0x12f   : > { %3854 = vmatpush1.bf16.msra.mxu1 %v4440_v53 }
 0x130   : > { %2925 = vmatpush1.bf16.msra.mxu0 %v4440_v53  ;;  %3839 = vmatprep.subr.bf16.mxu1 %v4445_v29 }
 0x131   : > { %2926 = vmatprep.subr.bf16.mxu0 %v4445_v29 }
 0x133   : > { %3855 = vmatpush1.bf16.msra.mxu1 %v4443_v51 }
 0x134   : > { %2927 = vmatpush1.bf16.msra.mxu0 %v4443_v51  ;;  %3840 = vmatprep.subr.bf16.mxu1 %v4448_v32 }
 0x135   : > { %2928 = vmatprep.subr.bf16.mxu0 %v4448_v32 }
 0x137   : > { %3856 = vmatpush1.bf16.msra.mxu1 %v4446_v12 }
 0x138   : > { %2929 = vmatpush1.bf16.msra.mxu0 %v4446_v12  ;;  %3841 = vmatprep.subr.bf16.mxu1 %v4451_v46 }
 0x139   : > { %2930 = vmatprep.subr.bf16.mxu0 %v4451_v46 }
 0x13b   : > { %3857 = vmatpush1.bf16.msra.mxu1 %v4449_v25 }
 0x13c   : > { %2931 = vmatpush1.bf16.msra.mxu0 %v4449_v25  ;;  %3842 = vmatprep.subr.bf16.mxu1 %v4454_v2 }
 0x13d   : > { %2932 = vmatprep.subr.bf16.mxu0 %v4454_v2 }
 0x13f   : > { %3858 = vmatpush1.bf16.msra.mxu1 %v4452_v18 }
 0x140   : > { %2933 = vmatpush1.bf16.msra.mxu0 %v4452_v18  ;;  %3843 = vmatprep.subr.bf16.mxu1 %v4457_v20 }
 0x141   : > { %2934 = vmatprep.subr.bf16.mxu0 %v4457_v20 }
 0x143   : > { %3859 = vmatpush1.bf16.msra.mxu1 %v4455_v56 }
 0x144   : > { %2935 = vmatpush1.bf16.msra.mxu0 %v4455_v56  ;;  %3844 = vmatprep.subr.bf16.mxu1 %v4460_v21 }
 0x145   : > { %2936 = vmatprep.subr.bf16.mxu0 %v4460_v21 }
 0x147   : > { %3860 = vmatpush1.bf16.msra.mxu1 %v4458_v16 }
 0x148   : > { %2937 = vmatpush1.bf16.msra.mxu0 %v4458_v16  ;;  %3845 = vmatprep.subr.bf16.mxu1 %v4463_v34 }
 0x149   : > { %2938 = vmatprep.subr.bf16.mxu0 %v4463_v34 }
 0x14b   : > { %3861 = vmatpush1.bf16.msra.mxu1 %v4461_v6 }
 0x14c   : > { %2939 = vmatpush1.bf16.msra.mxu0 %v4461_v6 }
 0x14e   : > { %2961 = vmatmul.mubr.bf16.vlgmr.msra.gmra.mrb[16].mxu1 %v5310_v24 }
 0x14f   : > { %2941 = vmatmul.mubr.bf16.vlgmr.msra.gmra.mrb[0].mxu0 %v5210_v55  ;;  %2970 = vmatprep.mubr.bf16.mxu1 %v2714_v3 }
 0x150   : > { %2950 = vmatprep.mubr.bf16.mxu0 %v5254_v27 }
 0x156   : > { %2971 = vmatmul.mubr.bf16.gmra.mrb[20].mxu1 %v2713_v57 }
 0x157   : > { %2951 = vmatmul.mubr.bf16.gmra.mrb[4].mxu0 %v5258_v59 }
 0x1e1   : > { %v1470_v33 = vpop.f32.mrb[0].mxu1 }
 0x1e2   : > { %v1472_v22 = vpop.f32.mrb[1].mxu1 }
 0x1e3   : > { %v1474_v30 = vpop.f32.mrb[2].mxu1 }
 0x1e4   : > { %v1476_v36 = vpop.f32.mrb[3].mxu1 }
 0x1e9   : > { %v1480_v48 = vpop.f32.mrb[4].mxu1 }
 0x1ea   : > { %v1482_v1 = vpop.f32.mrb[5].mxu1 }
 0x1eb   : > { %v1484_v19 = vpop.f32.mrb[6].mxu1 }
 0x1ec   : > { %v1486_v55 = vpop.f32.mrb[7].mxu1 }
 0x1f1   : > { %v1490_v38 = vpop.f32.mrb[8].mxu1 }
 0x1f2   : > { %v2670_v24 = vpop.f32.mrb[8].mxu0  ;;  %v1492_v27 = vpop.f32.mrb[9].mxu1 }
 0x1f3   : > { %v3870_v63 = vadd.f32 %v2670_v24, %v1490_v38  ;;  %v2672_v40 = vpop.f32.mrb[9].mxu0  ;;  %v1494_v15 = vpop.f32.mrb[10].mxu1 }
 0x1f4   : > { %v3872_v45 = vadd.f32 %v2672_v40, %v1492_v27  ;;  %v2674_v31 = vpop.f32.mrb[10].mxu0  ;;  %v1496_v62 = vpop.f32.mrb[11].mxu1 }
 0x1f5   : > { %v3874_v9 = vadd.f32 %v2674_v31, %v1494_v15  ;;  %v2676_v59 = vpop.f32.mrb[11].mxu0 }
 0x1f6   : > { %v3876_v5 = vadd.f32 %v2676_v59, %v1496_v62 }
 0x1f9   : > { %v1500_v0 = vpop.f32.mrb[12].mxu1 }
 0x1fa   : > { %v2680_v60 = vpop.f32.mrb[12].mxu0  ;;  %v1502_v23 = vpop.f32.mrb[13].mxu1 }
 0x1fb   : > { %v3878_v17 = vadd.f32 %v2680_v60, %v1500_v0  ;;  %v2682_v26 = vpop.f32.mrb[13].mxu0  ;;  %v1504_v39 = vpop.f32.mrb[14].mxu1 }
 0x1fc   : > { %v3880_v37 = vadd.f32 %v2682_v26, %v1502_v23  ;;  %v2684_v43 = vpop.f32.mrb[14].mxu0  ;;  %v1506_v7 = vpop.f32.mrb[15].mxu1 }
 0x1fd   : > { %v3882_v54 = vadd.f32 %v2684_v43, %v1504_v39  ;;  %v2686_v42 = vpop.f32.mrb[15].mxu0 }
 0x1fe   : > { %v3884_v52 = vadd.f32 %v2686_v42, %v1506_v7 }
 0x221   : > { %v2962_v11 = vpop.f32.mrb[16].mxu1 }
 0x222   : > { %v2942_v50 = vpop.f32.mrb[0].mxu0  ;;  %v3871_v8 = vadd.f32 %v3870_v63, %v2962_v11  ;;  %v2964_v44 = vpop.f32.mrb[17].mxu1 }
 0x223   : > { %v3862_v4 = vadd.f32 %v2942_v50, %v1470_v33  ;;  %v2944_v49 = vpop.f32.mrb[1].mxu0  ;;  %v3873_v61 = vadd.f32 %v3872_v45, %v2964_v44  ;;  %v2966_v53 = vpop.f32.mrb[18].mxu1 }
 0x224   : > { %v3863_v14 = vadd.f32 %v2944_v49, %v1472_v22  ;;  %v2946_v13 = vpop.f32.mrb[2].mxu0  ;;  %v3875_v51 = vadd.f32 %v3874_v9, %v2966_v53  ;;  %v2968_v12 = vpop.f32.mrb[19].mxu1 }
 0x225   : > { %v3864_v29 = vadd.f32 %v2946_v13, %v1474_v30  ;;  %v2948_v32 = vpop.f32.mrb[3].mxu0  ;;  %v3877_v25 = vadd.f32 %v3876_v5, %v2968_v12  ;;  %v3011_v21 = vadd.f32 %v3873_v61, %v3871_v8 }
 0x226   : > { %v3865_v46 = vadd.f32 %v2948_v32, %v1476_v36  ;;  %v2999_v2 = vadd.f32 %v3863_v14, %v3862_v4 }
 0x227   : > { %v3014_v18 = vadd.f32 %v3877_v25, %v3875_v51 }
 0x228   : > { %3000 = vadd.xlane.f32.xlu0 %v2999_v2  ;;  %v3002_v36 = vadd.f32 %v3865_v46, %v3864_v29 }
 0x229   : > { %3015 = vadd.xlane.f32.xlu1 %v3014_v18  ;;  %v2972_v56 = vpop.f32.mrb[20].mxu1 }
 0x22a   : > { %v2952_v20 = vpop.f32.mrb[4].mxu0  ;;  %v3879_v58 = vadd.f32 %v3878_v17, %v2972_v56  ;;  %v2974_v35 = vpop.f32.mrb[21].mxu1 }
 0x22b   : > { %v3866_v16 = vadd.f32 %v2952_v20, %v1480_v48  ;;  %v2954_v34 = vpop.f32.mrb[5].mxu0  ;;  %v3881_v10 = vadd.f32 %v3880_v37, %v2974_v35  ;;  %v2976_v3 = vpop.f32.mrb[22].mxu1 }
 0x22c   : > { %v3867_v6 = vadd.f32 %v2954_v34, %v1482_v1  ;;  %v2956_v41 = vpop.f32.mrb[6].mxu0  ;;  %3012 = vadd.xlane.f32.xlu0 %v3011_v21  ;;  %v5950_v47 = vadd.f32 %v3882_v54, %v2976_v3  ;;  %v2978_v33 = vpop.f32.mrb[23].mxu1 }
 0x22d   : > { %v3868_v28 = vadd.f32 %v2956_v41, %v1484_v19  ;;  %v2958_v57 = vpop.f32.mrb[7].mxu0  ;;  %v5952_v30 = vadd.f32 %v3884_v52, %v2978_v33  ;;  %v3017_v24 = vadd.f32 %v3881_v10, %v3879_v58 }
 0x22e   : > { %v3869_v22 = vadd.f32 %v2958_v57, %v1486_v55  ;;  %v3005_v38 = vadd.f32 %v3867_v6, %v3866_v16 }
 0x22f   : > { %v3020_v1 = vadd.f32 %v5952_v30, %v5950_v47 }
 0x230   : > { %3003 = vadd.xlane.f32.xlu0 %v3002_v36  ;;  %3006 = vadd.xlane.f32.xlu1 %v3005_v38  ;;  %v3008_v48 = vadd.f32 %v3869_v22, %v3868_v28 }
 0x234   : > { %3009 = vadd.xlane.f32.xlu1 %v3008_v48  ;;  %3018 = vadd.xlane.f32.xlu0 %v3017_v24 }
 0x238   : > { %3021 = vadd.xlane.f32.xlu1 %v3020_v1 }
 0x2b5   : > { %v3001_v19 = vpop.xlane.xlu0 %3000 }
 0x2b6   : > { %v3024_v63 = vmul.f32 0.00390625, %v3001_v19  ;;  %v3016_v55 = vpop.xlane.xlu1 %3015 }
 0x2b7   : > { %v3029_v9 = vmul.f32 0.00390625, %v3016_v55 }
 0x2b8   : > { %v5956_v27 = vsub.f32 %v3862_v4, %v3024_v63  ;;  %v5958_v40 = vsub.f32 %v3863_v14, %v3024_v63 }
 0x2b9   : > { %v3013_v45 = vpop.xlane.xlu0 %3012  ;;  %v5972_v43 = vsub.f32 %v3875_v51, %v3029_v9  ;;  %v5974_v54 = vsub.f32 %v3877_v25, %v3029_v9  ;;  %v2997_v9 = vld [vmem:[%s6159_s2] sm:$0x3] }
 0x2ba   : > { %v3028_v15 = vmul.f32 0.00390625, %v3013_v45  ;;  %v3048_v31 = vmul.f32 %v5956_v27, %v5956_v27  ;;  %v3049_v62 = vmul.f32 %v5958_v40, %v5958_v40 }
 0x2bb   : > { %v3058_v32 = vmul.f32 %v5972_v43, %v5972_v43  ;;  %v3059_v12 = vmul.f32 %v5974_v54, %v5974_v54 }
 0x2bc   : > { %v5964_v59 = vsub.f32 %v3871_v8, %v3028_v15  ;;  %v5966_v5 = vsub.f32 %v3873_v61, %v3028_v15  ;;  %v3064_v17 = vadd.f32 %v3049_v62, %v3048_v31 }
 0x2bd   : > { %v3004_v0 = vpop.xlane.xlu0 %3003  ;;  %v3007_v60 = vpop.xlane.xlu1 %3006  ;;  %v3079_v34 = vadd.f32 %v3059_v12, %v3058_v32 }
 0x2be   : > { %v3025_v23 = vmul.f32 0.00390625, %v3004_v0  ;;  %v3026_v26 = vmul.f32 0.00390625, %v3007_v60  ;;  %v3056_v37 = vmul.f32 %v5964_v59, %v5964_v59  ;;  %v3057_v39 = vmul.f32 %v5966_v5, %v5966_v5  ;;  %3065 = vadd.xlane.f32.xlu0 %v3064_v17 }
 0x2c0   : > { %v5976_v7 = vsub.f32 %v3864_v29, %v3025_v23  ;;  %v5978_v42 = vsub.f32 %v3865_v46, %v3025_v23  ;;  %v5980_v52 = vsub.f32 %v3866_v16, %v3026_v26  ;;  %v5982_v50 = vsub.f32 %v3867_v6, %v3026_v26  ;;  %v2998_v23 = vld [vmem:[%s6160_s3] sm:$0x3] }
 0x2c1   : > { %v3010_v11 = vpop.xlane.xlu1 %3009  ;;  %v3019_v4 = vpop.xlane.xlu0 %3018  ;;  %v3076_v8 = vadd.f32 %v3057_v39, %v3056_v37 }
 0x2c2   : > { %v3027_v49 = vmul.f32 0.00390625, %v3010_v11  ;;  %v3030_v44 = vmul.f32 0.00390625, %v3019_v4  ;;  %v3052_v14 = vmul.f32 %v5980_v52, %v5980_v52  ;;  %v3053_v61 = vmul.f32 %v5982_v50, %v5982_v50 }
 0x2c3   : > { %3077 = vadd.xlane.f32.xlu0 %v3076_v8  ;;  %v3050_v13 = vmul.f32 %v5976_v7, %v5976_v7  ;;  %v3051_v53 = vmul.f32 %v5978_v42, %v5978_v42 }
 0x2c4   : > { %v5992_v29 = vsub.f32 %v3879_v58, %v3030_v44  ;;  %v5994_v51 = vsub.f32 %v3881_v10, %v3030_v44  ;;  %v6000_v46 = vsub.f32 %v3868_v28, %v3027_v49  ;;  %v6002_v25 = vsub.f32 %v3869_v22, %v3027_v49 }
 0x2c5   : > { %v3022_v2 = vpop.xlane.xlu1 %3021  ;;  %v3070_v18 = vadd.f32 %v3053_v61, %v3052_v14  ;;  %v3067_v20 = vadd.f32 %v3051_v53, %v3050_v13 }
 0x2c6   : > { %v3031_v56 = vmul.f32 0.00390625, %v3022_v2  ;;  %v3060_v21 = vmul.f32 %v5992_v29, %v5992_v29  ;;  %v3061_v16 = vmul.f32 %v5994_v51, %v5994_v51  ;;  %v3054_v10 = vmul.f32 %v6000_v46, %v6000_v46 }
 0x2c7   : > { %3071 = vadd.xlane.f32.xlu0 %v3070_v18  ;;  %3068 = vadd.xlane.f32.xlu1 %v3067_v20  ;;  %v3055_v41 = vmul.f32 %v6002_v25, %v6002_v25 }
 0x2c8   : > { %v3082_v58 = vadd.f32 %v3061_v16, %v3060_v21  ;;  %v6009_v35 = vsub.f32 %v5950_v47, %v3031_v56  ;;  %v6012_v6 = vsub.f32 %v5952_v30, %v3031_v56  ;;  %v3129_v30 = vlaneseq }
 0x2c9   : > { %v3073_v3 = vadd.f32 %v3055_v41, %v3054_v10 }
 0x2ca   : > { %v3062_v28 = vmul.f32 %v6009_v35, %v6009_v35  ;;  %v3063_v57 = vmul.f32 %v6012_v6, %v6012_v6  ;;  %v3130_v24 = vshrl.u32 %v3129_v30, 7 }
 0x2cb   : > { %3083 = vadd.xlane.f32.xlu0 %v3082_v58  ;;  %3080 = vadd.xlane.f32.xlu1 %v3079_v34 }
 0x2cc   : > { %v3085_v47 = vadd.f32 %v3063_v57, %v3062_v28  ;;  %v3131_v15 = vsub.s32 0, %v3130_v24  ;;  %v3135_v31 = vsub.s32 1, %v3130_v24 }
 0x2ce   : > { %v6029_v39 = vrot.slane %v2997_v9, %v3131_v15  ;;  %v6031_v11 = vrot.slane %v2997_v9, %v3135_v31  ;;  %v6033_v44 = vrot.slane %v2998_v23, %v3131_v15  ;;  %v6035_v14 = vrot.slane %v2998_v23, %v3135_v31 }
 0x2cf   : > { %3074 = vadd.xlane.f32.xlu1 %v3073_v3 }
 0x2d3   : > { %3086 = vadd.xlane.f32.xlu1 %v3085_v47 }
 0x34b   : > { %v3066_v33 = vpop.xlane.xlu0 %3065 }
 0x34c   : > { %v3088_v22 = vmul.f32 0.00390625, %v3066_v33 }
 0x34e   : > { %v3096_v36 = vadd.f32 1e-06, %v3088_v22 }
 0x350   : > { %v3078_v38 = vpop.xlane.xlu0 %3077  ;;  %4464 = vrsqrt.f32 %v3096_v36 }
 0x351   : > { %v3092_v48 = vmul.f32 0.00390625, %v3078_v38 }
 0x353   : > { %v3100_v1 = vadd.f32 1e-06, %v3092_v48 }
 0x354   : > { %v3072_v19 = vpop.xlane.xlu0 %3071  ;;  %v3069_v63 = vpop.xlane.xlu1 %3068 }
 0x355   : > { %4466 = vrsqrt.f32 %v3100_v1  ;;  %v3090_v55 = vmul.f32 0.00390625, %v3072_v19  ;;  %v3089_v45 = vmul.f32 0.00390625, %v3069_v63 }
 0x357   : > { %v3098_v62 = vadd.f32 1e-06, %v3090_v55  ;;  %v3097_v0 = vadd.f32 1e-06, %v3089_v45 }
 0x358   : > { %v3084_v60 = vpop.xlane.xlu0 %3083  ;;  %v3081_v17 = vpop.xlane.xlu1 %3080 }
 0x359   : > { %4468 = vrsqrt.f32 %v3098_v62  ;;  %v3094_v26 = vmul.f32 0.00390625, %v3084_v60  ;;  %v3093_v37 = vmul.f32 0.00390625, %v3081_v17 }
 0x35a   : > { %4470 = vrsqrt.f32 %v3097_v0  ;;  %v4465_v4 = vpop.eup %4464 }
 0x35b   : > { %v3102_v8 = vadd.f32 1e-06, %v3094_v26  ;;  %v3101_v49 = vadd.f32 1e-06, %v3093_v37  ;;  %v3112_v61 = vmul.f32 %v4465_v4, %v5956_v27  ;;  %v3113_v13 = vmul.f32 %v4465_v4, %v5958_v40 }
 0x35c   : > { %v3075_v53 = vpop.xlane.xlu1 %3074 }
 0x35d   : > { %4472 = vrsqrt.f32 %v3102_v8  ;;  %v3091_v32 = vmul.f32 0.00390625, %v3075_v53  ;;  %v3139_v12 = vmul.f32 %v6029_v39, %v3112_v61  ;;  %v3140_v2 = vmul.f32 %v6031_v11, %v3113_v13 }
 0x35e   : > { %4474 = vrsqrt.f32 %v3101_v49 }
 0x35f   : > { %v4467_v18 = vpop.eup %4466  ;;  %v3099_v20 = vadd.f32 1e-06, %v3091_v32  ;;  %v3166_v56 = vadd.f32 %v6033_v44, %v3139_v12  ;;  %v3167_v21 = vadd.f32 %v6035_v14, %v3140_v2 }
 0x360   : > { %v3120_v16 = vmul.f32 %v4467_v18, %v5964_v59  ;;  %v3121_v27 = vmul.f32 %v4467_v18, %v5966_v5  ;;  %v3087_v58 = vpop.xlane.xlu1 %3086 }
 0x361   : > { %4476 = vrsqrt.f32 %v3099_v20  ;;  %v3095_v40 = vmul.f32 0.00390625, %v3087_v58  ;;  %3182 = vst [vmem:[%s6047_s29] sm:$0xff] %v3166_v56  ;;  %3183 = vst [vmem:[%s6047_s29 + $0x8] sm:$0xff] %v3167_v21 }
 0x362   : > { %v3147_v34 = vmul.f32 %v6029_v39, %v3120_v16  ;;  %v3148_v10 = vmul.f32 %v6031_v11, %v3121_v27 }
 0x363   : > { %v4469_v41 = vpop.eup %4468  ;;  %v3103_v3 = vadd.f32 1e-06, %v3095_v40 }
 0x364   : > { %v4471_v59 = vpop.eup %4470  ;;  %v3174_v5 = vadd.f32 %v6033_v44, %v3147_v34  ;;  %v3175_v28 = vadd.f32 %v6035_v14, %v3148_v10  ;;  %v3116_v57 = vmul.f32 %v4469_v41, %v5980_v52  ;;  %v3117_v47 = vmul.f32 %v4469_v41, %v5982_v50 }
 0x365   : > { %v3114_v33 = vmul.f32 %v4471_v59, %v5976_v7  ;;  %v3115_v22 = vmul.f32 %v4471_v59, %v5978_v42  ;;  %4478 = vrsqrt.f32 %v3103_v3 }
 0x366   : > { %3190 = vst [vmem:[%s6047_s29 + $0x40] sm:$0xff] %v3174_v5  ;;  %3191 = vst [vmem:[%s6047_s29 + $0x48] sm:$0xff] %v3175_v28  ;;  %v3143_v30 = vmul.f32 %v6029_v39, %v3116_v57  ;;  %v3144_v36 = vmul.f32 %v6031_v11, %v3117_v47 }
 0x367   : > { %v4473_v38 = vpop.eup %4472  ;;  %v3141_v48 = vmul.f32 %v6029_v39, %v3114_v33  ;;  %v3142_v52 = vmul.f32 %v6031_v11, %v3115_v22 }
 0x368   : > { %v4475_v50 = vpop.eup %4474  ;;  %v3170_v7 = vadd.f32 %v6033_v44, %v3143_v30  ;;  %v3171_v42 = vadd.f32 %v6035_v14, %v3144_v36  ;;  %v3124_v24 = vmul.f32 %v4473_v38, %v5992_v29  ;;  %v3125_v1 = vmul.f32 %v4473_v38, %v5994_v51 }
 0x369   : > { %v3168_v19 = vadd.f32 %v6033_v44, %v3141_v48  ;;  %v3169_v63 = vadd.f32 %v6035_v14, %v3142_v52  ;;  %v3122_v55 = vmul.f32 %v4475_v50, %v5972_v43  ;;  %v3123_v45 = vmul.f32 %v4475_v50, %v5974_v54 }
 0x36a   : > { %3186 = vst [vmem:[%s6047_s29 + $0x20] sm:$0xff] %v3170_v7  ;;  %3187 = vst [vmem:[%s6047_s29 + $0x28] sm:$0xff] %v3171_v42  ;;  %v3151_v15 = vmul.f32 %v6029_v39, %v3124_v24  ;;  %v3152_v31 = vmul.f32 %v6031_v11, %v3125_v1 }
 0x36b   : > { %v4477_v9 = vpop.eup %4476  ;;  %3184 = vst [vmem:[%s6047_s29 + $0x10] sm:$0xff] %v3168_v19  ;;  %3185 = vst [vmem:[%s6047_s29 + $0x18] sm:$0xff] %v3169_v63  ;;  %v3149_v29 = vmul.f32 %v6029_v39, %v3122_v55  ;;  %v3150_v51 = vmul.f32 %v6031_v11, %v3123_v45 }
 0x36c   : > { %v3178_v43 = vadd.f32 %v6033_v44, %v3151_v15  ;;  %v3179_v54 = vadd.f32 %v6035_v14, %v3152_v31  ;;  %v3118_v62 = vmul.f32 %v4477_v9, %v6000_v46  ;;  %v3119_v0 = vmul.f32 %v4477_v9, %v6002_v25 }
 0x36d   : > { %v3176_v60 = vadd.f32 %v6033_v44, %v3149_v29  ;;  %v3177_v17 = vadd.f32 %v6035_v14, %v3150_v51 }
 0x36e   : > { %3194 = vst [vmem:[%s6047_s29 + $0x60] sm:$0xff] %v3178_v43  ;;  %3195 = vst [vmem:[%s6047_s29 + $0x68] sm:$0xff] %v3179_v54  ;;  %v3145_v23 = vmul.f32 %v6029_v39, %v3118_v62  ;;  %v3146_v26 = vmul.f32 %v6031_v11, %v3119_v0 }
 0x36f   : > { %v4479_v37 = vpop.eup %4478  ;;  %3192 = vst [vmem:[%s6047_s29 + $0x50] sm:$0xff] %v3176_v60  ;;  %3193 = vst [vmem:[%s6047_s29 + $0x58] sm:$0xff] %v3177_v17 }
 0x370   : > { %v3172_v46 = vadd.f32 %v6033_v44, %v3145_v23  ;;  %v3173_v25 = vadd.f32 %v6035_v14, %v3146_v26  ;;  %v3126_v4 = vmul.f32 %v4479_v37, %v6009_v35  ;;  %v3127_v8 = vmul.f32 %v4479_v37, %v6012_v6 }
 0x372   : > { %3188 = vst [vmem:[%s6047_s29 + $0x30] sm:$0xff] %v3172_v46  ;;  %3189 = vst [vmem:[%s6047_s29 + $0x38] sm:$0xff] %v3173_v25  ;;  %v3153_v49 = vmul.f32 %v6029_v39, %v3126_v4  ;;  %v3154_v61 = vmul.f32 %v6031_v11, %v3127_v8 }
 0x374   : > { %v3180_v35 = vadd.f32 %v6033_v44, %v3153_v49  ;;  %v3181_v6 = vadd.f32 %v6035_v14, %v3154_v61 }
 0x376   : > { %3196 = vst [vmem:[%s6047_s29 + $0x70] sm:$0xff] %v3180_v35  ;;  %3197 = vst [vmem:[%s6047_s29 + $0x78] sm:$0xff] %v3181_v6 }
 0x377   : > { %4503 = shalt.err (!%p4500_p3)
}
 0x378   : > { %s4504_s20 = scalar_lea.hbm %s6106_s9, 2048  ;;  %s4508_s22 = scalar_lea.hbm %s6161_s4, 4096 }
 0x379   : > { %p4505_p4 = scmp.ne.s32.totalorder %s6106_s9, %s4504_s20  ;;  %p4509_p9 = scmp.lt.u32.totalorder %s6106_s9, %s6161_s4 }
 0x37a   : > { %p4510_p10 = scmp.lt.u32.totalorder %s4508_s22, %s4504_s20  ;;  %p4512_p12 = scmp.lt.u32.totalorder %s4504_s20, %s6106_s9 }
 0x37b   : > { %p4506_p7 = pnand %p4505_p4, %p4620_p5 }
 0x37c   : > { %p4511_p11 = por %p4510_p10, %p4509_p9 }
 0x37d   : > { %p4507_p8 = pneg %p4506_p7 }
 0x37e   : > { %p4513_p13 = por %p4512_p12, %p4511_p11 }
 0x380   : > { %p4514_p0 = pnand %p4513_p13, %p4507_p8 }
 0x382   : > { %4517 = shalt.err (!%p4514_p0)
}
 0x383   : > { %s4555_s28 = smov 256   ;;  %s4556_s29 = smov 16  }
 0x384   : > { %3991 = dma.vmem_to_hbm [thread:$0]  (%p4620_p5), %s6108_s5, 2048, %s6106_s9, %s6116_s19, %s4555_s28, %s4555_s28, %s4556_s29  }
 0x385 PF: > { %p3997_p1 = scmp.ge.s32.totalorder %s4552_s18, 2  ;;  %s3227_s30 = sand.u32 1, %s4540_s15  }
 0x386   : > { %s3228_s6 = scalar_lea.sflag [#allocation3], %s3227_s30 }
 0x387   : > { %p3994_p2 = pnand %p3997_p1, %p4624_p6 }
 0x389   : > { %4535 = dma.done.wait (!%p3994_p2), %s3228_s6, 2048  }
 0x38a   : > { %4537 = vsyncadd (!%p3994_p2), %s3228_s6, 4294965248  ;;  %p14_p3 = scmp.ge.s32.totalorder %s4607_s21, 4   ;;  %s6164_s15 = smov %s4544_s16 }
 0x38b   : > { %s6165_s16 = smov %s4548_s17  ;;  %s6166_s17 = smov %s4618_s24 }
 0x38c   : > { %s6167_s18 = smov %s4607_s21  ;;  %16 = sbr.rel (!%p14_p3) target bundleno = 3 (0x3), region = 79 }
 0x393   :  { %3233 = vsyncpa [#allocation3], 1 }
 0x394   :  { %3235 = vsyncpa [#allocation3 + $0x1], 1 }

</bundles_post_ra>
